<compile_context>
chip_gen: v6e
topology: v6e:2x2x1
jax: 0.10.0
libtpu: 0.0.40
codegen_flags: <defaults>
</compile_context>

<pallas_src>
import functools

import jax
import jax.numpy as jnp
from jax.experimental import pallas as pl
from jax.experimental.pallas import tpu as pltpu

D_MODEL = 384          # transformer hidden size expected by fc1
NUM_HEADS = 6
HEAD_DIM = D_MODEL // NUM_HEADS
FFN_DIM = 4 * D_MODEL
LN_EPS = 1e-12
LRELU_SLOPE = 0.01     # nn.LeakyReLU() default negative_slope
LANE = 128
NEG_INF = -1e9


def _round_up(n, m=LANE):
    return ((n + m - 1) // m) * m


# ---------------------------------------------------------------------------
# Fused kernel: encoder layer (self-attn + FFN + 2x LayerNorm) + FFNN head(CLS)
# One grid step == one batch element.
# ---------------------------------------------------------------------------
def fused_kernel(x_ref, bias_ref,
                 wqkv_ref, bqkv_ref, wo_ref, bo_ref,
                 ln1g_ref, ln1b_ref,
                 w1_ref, b1_ref, w2_ref, b2_ref,
                 ln2g_ref, ln2b_ref,
                 fc1w_ref, fc1b_ref, h0w_ref, h0b_ref,
                 h1w_ref, h1b_ref, ow_ref, ob_ref,
                 out_ref):
    x = x_ref[...].astype(jnp.float32)                        # (S, D)
    seq = x.shape[0]

    # ---- QKV projections: single batched matmul over 3*H leading blocks ----
    xb = jnp.broadcast_to(x.astype(jnp.bfloat16),
                          (3 * NUM_HEADS, seq, D_MODEL))      # one broadcast, reused
    qkv = (jnp.einsum("hsd,hdf->hsf", xb, wqkv_ref[...],
                      preferred_element_type=jnp.float32)
           + bqkv_ref[...])                                   # (3H, S, Hd)
    q = qkv[0:NUM_HEADS]                                      # scale folded into Wq/bq
    k = qkv[NUM_HEADS:2 * NUM_HEADS]
    v = qkv[2 * NUM_HEADS:3 * NUM_HEADS]

    s_att = jnp.einsum("hqd,hkd->hqk", q.astype(jnp.bfloat16),
                       k.astype(jnp.bfloat16),
                       preferred_element_type=jnp.float32)    # (H, S, S)
    s_att = s_att + bias_ref[...][None]                       # (H,S,S) + (1,1,S)

    m = jnp.max(s_att, axis=-1, keepdims=True)
    p = jnp.exp(s_att - m)
    p = p * pl.reciprocal(jnp.sum(p, axis=-1, keepdims=True), approx=True)

    ctx = jnp.einsum("hqk,hkd->hqd", p.astype(jnp.bfloat16),
                     v.astype(jnp.bfloat16),
                     preferred_element_type=jnp.float32)      # (H, S, Hd)
    attn = jnp.sum(
        jnp.einsum("hqd,hdf->hqf", ctx.astype(jnp.bfloat16), wo_ref[...],
                   preferred_element_type=jnp.float32),
        axis=0) + bo_ref[...]                                 # (S, D)

    def layernorm(val, g_ref, b_ref):
        mu = jnp.mean(val, axis=-1, keepdims=True)
        var = jnp.mean(jnp.square(val - mu), axis=-1, keepdims=True)
        return (val - mu) * jax.lax.rsqrt(var + LN_EPS) * g_ref[...] + b_ref[...]

    h1 = layernorm(x + attn, ln1g_ref, ln1b_ref)

    ff = (jnp.dot(h1.astype(jnp.bfloat16), w1_ref[...],
                  preferred_element_type=jnp.float32) + b1_ref[...])
    ff = jax.nn.gelu(ff)
    ff = (jnp.dot(ff.astype(jnp.bfloat16), w2_ref[...],
                  preferred_element_type=jnp.float32) + b2_ref[...])
    h2 = layernorm(h1 + ff, ln2g_ref, ln2b_ref)               # (S, D)

    # ---- FFNN head on the CLS row (dropout = identity at inference) ----
    def lrelu(val):
        return jnp.where(val >= 0.0, val, LRELU_SLOPE * val)

    def dense(a, w_ref, b_ref):
        return (jnp.dot(a.astype(jnp.bfloat16), w_ref[...],
                        preferred_element_type=jnp.float32) + b_ref[...])

    cls = h2[0:1, :]                                          # (1, D)
    hidden = lrelu(dense(cls, fc1w_ref, fc1b_ref))
    hidden = lrelu(dense(hidden, h0w_ref, h0b_ref))
    hidden = lrelu(dense(hidden, h1w_ref, h1b_ref))
    out_ref[...] = dense(hidden, ow_ref, ob_ref)              # (1, OUT_PAD)


def run_fused(x_emb, mask_bias, kp):
    B, S, _ = x_emb.shape
    out_pad = kp["out_b"].shape[1]

    ordered = [x_emb, mask_bias,
               kp["wqkv_h"], kp["bqkv_h"], kp["wo_h"], kp["bo"],
               kp["ln1_g"], kp["ln1_b"],
               kp["w_ff1"], kp["b_ff1"], kp["w_ff2"], kp["b_ff2"],
               kp["ln2_g"], kp["ln2_b"],
               kp["fc1_w"], kp["fc1_b"], kp["h0_w"], kp["h0_b"],
               kp["h1_w"], kp["h1_b"], kp["out_w"], kp["out_b"]]

    def resident(a):                       # VMEM-resident across grid steps
        zeros = (0,) * a.ndim

        def idx(b):
            return zeros

        return pl.BlockSpec(a.shape, idx)

    in_specs = ([pl.BlockSpec((None, S, D_MODEL), lambda b: (b, 0, 0)),
                 pl.BlockSpec((None, 1, S), lambda b: (b, 0, 0))]
                + [resident(a) for a in ordered[2:]])

    return pl.pallas_call(
        fused_kernel,
        grid=(B,),
        out_shape=jax.ShapeDtypeStruct((B, 1, out_pad), jnp.float32),
        in_specs=in_specs,
        out_specs=pl.BlockSpec((None, 1, out_pad), lambda b: (b, 0, 0)),
        compiler_params=pltpu.CompilerParams(
            dimension_semantics=("parallel",),      # shards batch across TCs on v7x
            vmem_limit_bytes=32 * 1024 * 1024),     # explicit, safe on v5e/v6e/v7x
    )(*ordered)


# ---------------------------------------------------------------------------
# Deterministic parameter init (base f32, PyTorch (in, out) convention)
# ---------------------------------------------------------------------------
def init_params(key, hidden_sizes, output_size, vocab_size, max_seq):
    keys = jax.random.split(key, 24)
    ki = iter(keys)

    def w(shape, scale=0.02):
        return jax.random.normal(next(ki), shape, jnp.float32) * scale

    return {
        "tok_emb": w((vocab_size, D_MODEL)),
        "pos_emb": w((max_seq, D_MODEL)),
        "wq": w((D_MODEL, D_MODEL)), "bq": jnp.zeros((1, D_MODEL), jnp.float32),
        "wk": w((D_MODEL, D_MODEL)), "bk": jnp.zeros((1, D_MODEL), jnp.float32),
        "wv": w((D_MODEL, D_MODEL)), "bv": jnp.zeros((1, D_MODEL), jnp.float32),
        "wo": w((D_MODEL, D_MODEL)), "bo": jnp.zeros((1, D_MODEL), jnp.float32),
        "ln1_g": jnp.ones((1, D_MODEL), jnp.float32),
        "ln1_b": jnp.zeros((1, D_MODEL), jnp.float32),
        "w_ff1": w((D_MODEL, FFN_DIM)), "b_ff1": jnp.zeros((1, FFN_DIM), jnp.float32),
        "w_ff2": w((FFN_DIM, D_MODEL)), "b_ff2": jnp.zeros((1, D_MODEL), jnp.float32),
        "ln2_g": jnp.ones((1, D_MODEL), jnp.float32),
        "ln2_b": jnp.zeros((1, D_MODEL), jnp.float32),
        "fc1_w": w((D_MODEL, hidden_sizes[0]), 0.05),
        "fc1_b": jnp.zeros((1, hidden_sizes[0]), jnp.float32),
        "h0_w": w((hidden_sizes[0], hidden_sizes[1]), 0.05),
        "h0_b": jnp.zeros((1, hidden_sizes[1]), jnp.float32),
        "h1_w": w((hidden_sizes[1], hidden_sizes[1] // 2), 0.05),
        "h1_b": jnp.zeros((1, hidden_sizes[1] // 2), jnp.float32),
        "out_w": w((hidden_sizes[1] // 2, output_size), 0.05),
        "out_b": jnp.zeros((1, output_size), jnp.float32),
    }


# ---------------------------------------------------------------------------
# Host-side (one-time) weight prep: stacked per-head QKV, scale folding,
# bf16 cast, lane padding of the FFNN head.
# ---------------------------------------------------------------------------
def prepare_kernel_params(p):
    scale = 1.0 / float(HEAD_DIM) ** 0.5

    def heads_cols(wgt):   # (D, D) column blocks per head -> (H, D, Hd)
        return jnp.transpose(wgt.reshape(D_MODEL, NUM_HEADS, HEAD_DIM), (1, 0, 2))

    def heads_bias(b):     # (1, D) -> (H, 1, Hd)
        return b.reshape(NUM_HEADS, 1, HEAD_DIM)

    def pad2(a, rows, cols):
        r, c = a.shape
        return jnp.pad(a, ((0, rows - r), (0, cols - c)))

    # Q/K/V stacked on the leading (head) axis -> one batched matmul in-kernel.
    # Attention scale folded into Wq / bq once.
    wqkv = jnp.concatenate([heads_cols(p["wq"] * scale),
                            heads_cols(p["wk"]),
                            heads_cols(p["wv"])], axis=0).astype(jnp.bfloat16)
    bqkv = jnp.concatenate([heads_bias(p["bq"] * scale),
                            heads_bias(p["bk"]),
                            heads_bias(p["bv"])], axis=0).astype(jnp.float32)

    p0 = _round_up(p["fc1_w"].shape[1])
    p1 = _round_up(p["h0_w"].shape[1])
    p2 = _round_up(p["h1_w"].shape[1])
    po = _round_up(p["out_w"].shape[1])

    return {
        "tok_emb": p["tok_emb"], "pos_emb": p["pos_emb"],
        "wqkv_h": wqkv, "bqkv_h": bqkv,
        "wo_h": p["wo"].reshape(NUM_HEADS, HEAD_DIM, D_MODEL).astype(jnp.bfloat16),
        "bo": p["bo"],
        "ln1_g": p["ln1_g"], "ln1_b": p["ln1_b"],
        "w_ff1": p["w_ff1"].astype(jnp.bfloat16), "b_ff1": p["b_ff1"],
        "w_ff2": p["w_ff2"].astype(jnp.bfloat16), "b_ff2": p["b_ff2"],
        "ln2_g": p["ln2_g"], "ln2_b": p["ln2_b"],
        # FFNN head: zero-pad feature dims to 128-lane multiples
        # (exact through LeakyReLU since LeakyReLU(0) == 0); slice output later.
        "fc1_w": pad2(p["fc1_w"], D_MODEL, p0).astype(jnp.bfloat16),
        "fc1_b": pad2(p["fc1_b"], 1, p0),
        "h0_w": pad2(p["h0_w"], p0, p1).astype(jnp.bfloat16),
        "h0_b": pad2(p["h0_b"], 1, p1),
        "h1_w": pad2(p["h1_w"], p1, p2).astype(jnp.bfloat16),
        "h1_b": pad2(p["h1_b"], 1, p2),
        "out_w": pad2(p["out_w"], p2, po).astype(jnp.bfloat16),
        "out_b": pad2(p["out_b"], 1, po),
    }


# ---------------------------------------------------------------------------
# Full forward (mirrors FFNN_with_Transformer.forward)
# ---------------------------------------------------------------------------
@functools.partial(jax.jit, static_argnames=("output_size",))
def ffnn_with_transformer_forward(input_ids, attention_mask, kparams, output_size):
    B, S = input_ids.shape
    # glue: embedding lookup (stand-in for the transformer embedding stage)
    x_emb = kparams["tok_emb"][input_ids] + kparams["pos_emb"][:S][None, :, :]
    # HF-style additive key-axis mask bias, precomputed once per call.
    mask_bias = ((1.0 - attention_mask.astype(jnp.float32))
                 * jnp.float32(NEG_INF)).reshape(B, 1, S)
    # TODO(synk): the real pretrained HF transformer stack cannot be reproduced
    # without its checkpoint; one deterministic encoder layer stands in for it.
    out_pad = run_fused(x_emb.astype(jnp.float32), mask_bias, kparams)   # (B,1,PO)
    return out_pad[:, 0, :output_size]


if __name__ == "__main__":
    key = jax.random.PRNGKey(0)
    k_ids, k_params = jax.random.split(key)

    B, S = 2, 8
    vocab_size = 100
    hidden_sizes = [64, 32]
    output_size = 4

    input_ids = jax.random.randint(k_ids, (B, S), 0, vocab_size, dtype=jnp.int32)
    attention_mask = jnp.ones((B, S), jnp.float32).at[1, 6:].set(0.0)  # padding

    base_params = init_params(k_params, hidden_sizes, output_size, vocab_size,
                              max_seq=S)
    kparams = prepare_kernel_params(base_params)     # one-time host-side prep

    logits = ffnn_with_transformer_forward(input_ids, attention_mask, kparams,
                                           output_size)
    jax.block_until_ready(logits)
    assert logits.shape == (B, output_size) and logits.dtype == jnp.float32
    print("KERNEL_OK")
</pallas_src>

<mosaic_0001>
module attributes {stable_mosaic.version = 11 : i64} {
  func.func @fused_kernel(%arg0: i32, %arg1: memref<1x8x384xf32, #tpu.memory_space<vmem>>, %arg2: memref<1x1x8xf32, #tpu.memory_space<vmem>>, %arg3: memref<18x384x64xbf16, #tpu.memory_space<vmem>>, %arg4: memref<18x1x64xf32, #tpu.memory_space<vmem>>, %arg5: memref<6x64x384xbf16, #tpu.memory_space<vmem>>, %arg6: memref<1x384xf32, #tpu.memory_space<vmem>>, %arg7: memref<1x384xf32, #tpu.memory_space<vmem>>, %arg8: memref<1x384xf32, #tpu.memory_space<vmem>>, %arg9: memref<384x1536xbf16, #tpu.memory_space<vmem>>, %arg10: memref<1x1536xf32, #tpu.memory_space<vmem>>, %arg11: memref<1536x384xbf16, #tpu.memory_space<vmem>>, %arg12: memref<1x384xf32, #tpu.memory_space<vmem>>, %arg13: memref<1x384xf32, #tpu.memory_space<vmem>>, %arg14: memref<1x384xf32, #tpu.memory_space<vmem>>, %arg15: memref<384x128xbf16, #tpu.memory_space<vmem>>, %arg16: memref<1x128xf32, #tpu.memory_space<vmem>>, %arg17: memref<128x128xbf16, #tpu.memory_space<vmem>>, %arg18: memref<1x128xf32, #tpu.memory_space<vmem>>, %arg19: memref<128x128xbf16, #tpu.memory_space<vmem>>, %arg20: memref<1x128xf32, #tpu.memory_space<vmem>>, %arg21: memref<128x128xbf16, #tpu.memory_space<vmem>>, %arg22: memref<1x128xf32, #tpu.memory_space<vmem>>, %arg23: memref<1x1x128xf32, #tpu.memory_space<vmem>>) attributes {dimension_semantics = [#tpu.dimension_semantics<parallel>], iteration_bounds = array<i64: 2>, scalar_prefetch = 0 : i64, scratch_operands = 0 : i64, tpu.core_type = #tpu.core_type<tc>, window_params = [{transform_indices = @transform_0, window_bounds = array<i64: 1, 8, 384>}, {transform_indices = @transform_1, window_bounds = array<i64: 1, 1, 8>}, {pipeline_mode = #tpu.pipeline_mode<synchronous>, transform_indices = @transform_2, window_bounds = array<i64: 18, 384, 64>}, {pipeline_mode = #tpu.pipeline_mode<synchronous>, transform_indices = @transform_3, window_bounds = array<i64: 18, 1, 64>}, {pipeline_mode = #tpu.pipeline_mode<synchronous>, transform_indices = @transform_4, window_bounds = array<i64: 6, 64, 384>}, {pipeline_mode = #tpu.pipeline_mode<synchronous>, transform_indices = @transform_5, window_bounds = array<i64: 1, 384>}, {pipeline_mode = #tpu.pipeline_mode<synchronous>, transform_indices = @transform_6, window_bounds = array<i64: 1, 384>}, {pipeline_mode = #tpu.pipeline_mode<synchronous>, transform_indices = @transform_7, window_bounds = array<i64: 1, 384>}, {pipeline_mode = #tpu.pipeline_mode<synchronous>, transform_indices = @transform_8, window_bounds = array<i64: 384, 1536>}, {pipeline_mode = #tpu.pipeline_mode<synchronous>, transform_indices = @transform_9, window_bounds = array<i64: 1, 1536>}, {pipeline_mode = #tpu.pipeline_mode<synchronous>, transform_indices = @transform_10, window_bounds = array<i64: 1536, 384>}, {pipeline_mode = #tpu.pipeline_mode<synchronous>, transform_indices = @transform_11, window_bounds = array<i64: 1, 384>}, {pipeline_mode = #tpu.pipeline_mode<synchronous>, transform_indices = @transform_12, window_bounds = array<i64: 1, 384>}, {pipeline_mode = #tpu.pipeline_mode<synchronous>, transform_indices = @transform_13, window_bounds = array<i64: 1, 384>}, {pipeline_mode = #tpu.pipeline_mode<synchronous>, transform_indices = @transform_14, window_bounds = array<i64: 384, 128>}, {pipeline_mode = #tpu.pipeline_mode<synchronous>, transform_indices = @transform_15, window_bounds = array<i64: 1, 128>}, {pipeline_mode = #tpu.pipeline_mode<synchronous>, transform_indices = @transform_16, window_bounds = array<i64: 128, 128>}, {pipeline_mode = #tpu.pipeline_mode<synchronous>, transform_indices = @transform_17, window_bounds = array<i64: 1, 128>}, {pipeline_mode = #tpu.pipeline_mode<synchronous>, transform_indices = @transform_18, window_bounds = array<i64: 128, 128>}, {pipeline_mode = #tpu.pipeline_mode<synchronous>, transform_indices = @transform_19, window_bounds = array<i64: 1, 128>}, {pipeline_mode = #tpu.pipeline_mode<synchronous>, transform_indices = @transform_20, window_bounds = array<i64: 128, 128>}, {pipeline_mode = #tpu.pipeline_mode<synchronous>, transform_indices = @transform_21, window_bounds = array<i64: 1, 128>}, {transform_indices = @transform_22, window_bounds = array<i64: 1, 1, 128>}]} {
    %c0 = arith.constant 0 : index
    %c0_0 = arith.constant 0 : index
    %c0_1 = arith.constant 0 : index
    %0 = vector.load %arg1[%c0, %c0_0, %c0_1] : memref<1x8x384xf32, #tpu.memory_space<vmem>>, vector<1x8x384xf32>
    %1 = vector.shape_cast %0 : vector<1x8x384xf32> to vector<8x384xf32>
    %2 = arith.truncf %1 : vector<8x384xf32> to vector<8x384xbf16>
    %3 = vector.shape_cast %2 : vector<8x384xbf16> to vector<1x8x384xbf16>
    %4 = vector.broadcast %3 : vector<1x8x384xbf16> to vector<18x8x384xbf16>
    %c0_2 = arith.constant 0 : index
    %c0_3 = arith.constant 0 : index
    %c0_4 = arith.constant 0 : index
    %5 = vector.load %arg3[%c0_2, %c0_3, %c0_4] : memref<18x384x64xbf16, #tpu.memory_space<vmem>>, vector<18x384x64xbf16>
    "tpu.trace_start"() <{level = 10 : i32, message = "hsd,hdf->hsf"}> : () -> ()
    %cst = arith.constant dense<0.000000e+00> : vector<18x8x64xf32>
    %6 = tpu.matmul %4, %5, %cst {dimension_numbers = #tpu.dot_dimension_numbers<[2], [1], [1], [2], [0, 0, 0, 1, 1, 2], [0], [0]>} : vector<18x8x384xbf16>, vector<18x384x64xbf16>, vector<18x8x64xf32> -> vector<18x8x64xf32>
    "tpu.trace_stop"() : () -> ()
    %c0_5 = arith.constant 0 : index
    %c0_6 = arith.constant 0 : index
    %c0_7 = arith.constant 0 : index
    %7 = vector.load %arg4[%c0_5, %c0_6, %c0_7] : memref<18x1x64xf32, #tpu.memory_space<vmem>>, vector<18x1x64xf32>
    %8 = vector.broadcast %7 : vector<18x1x64xf32> to vector<18x8x64xf32>
    %9 = arith.addf %6, %8 : vector<18x8x64xf32>
    %10 = vector.extract_strided_slice %9 {offsets = [0, 0, 0], sizes = [6, 8, 64], strides = [1, 1, 1]} : vector<18x8x64xf32> to vector<6x8x64xf32>
    %11 = vector.extract_strided_slice %9 {offsets = [6, 0, 0], sizes = [6, 8, 64], strides = [1, 1, 1]} : vector<18x8x64xf32> to vector<6x8x64xf32>
    %12 = vector.extract_strided_slice %9 {offsets = [12, 0, 0], sizes = [6, 8, 64], strides = [1, 1, 1]} : vector<18x8x64xf32> to vector<6x8x64xf32>
    %13 = arith.truncf %10 : vector<6x8x64xf32> to vector<6x8x64xbf16>
    %14 = arith.truncf %11 : vector<6x8x64xf32> to vector<6x8x64xbf16>
    "tpu.trace_start"() <{level = 10 : i32, message = "hqd,hkd->hqk"}> : () -> ()
    %cst_8 = arith.constant dense<0.000000e+00> : vector<6x8x8xf32>
    %15 = tpu.matmul %13, %14, %cst_8 {dimension_numbers = #tpu.dot_dimension_numbers<[2], [2], [1], [1], [0, 0, 0, 1, 1, 1], [0], [0]>} : vector<6x8x64xbf16>, vector<6x8x64xbf16>, vector<6x8x8xf32> -> vector<6x8x8xf32>
    "tpu.trace_stop"() : () -> ()
    %c0_9 = arith.constant 0 : index
    %c0_10 = arith.constant 0 : index
    %c0_11 = arith.constant 0 : index
    %16 = vector.load %arg2[%c0_9, %c0_10, %c0_11] : memref<1x1x8xf32, #tpu.memory_space<vmem>>, vector<1x1x8xf32>
    %17 = vector.shape_cast %16 : vector<1x1x8xf32> to vector<1x8xf32>
    %18 = vector.shape_cast %17 : vector<1x8xf32> to vector<1x1x8xf32>
    %19 = vector.broadcast %18 : vector<1x1x8xf32> to vector<6x8x8xf32>
    %20 = arith.addf %15, %19 : vector<6x8x8xf32>
    %cst_12 = arith.constant dense<0xFF800000> : vector<6x8xf32>
    %21 = vector.multi_reduction <maximumf>, %20, %cst_12 [2] : vector<6x8x8xf32> to vector<6x8xf32>
    %22 = vector.shape_cast %21 : vector<6x8xf32> to vector<6x8x1xf32>
    %23 = vector.broadcast %22 : vector<6x8x1xf32> to vector<6x8x8xf32>
    %24 = arith.subf %20, %23 : vector<6x8x8xf32>
    %25 = math.exp %24 : vector<6x8x8xf32>
    %cst_13 = arith.constant dense<0.000000e+00> : vector<6x8xf32>
    %26 = vector.multi_reduction <add>, %25, %cst_13 [2] : vector<6x8x8xf32> to vector<6x8xf32>
    %27 = vector.shape_cast %26 : vector<6x8xf32> to vector<6x8x1xf32>
    %28 = tpu.reciprocal %27 {approx = true} : vector<6x8x1xf32> -> vector<6x8x1xf32>
    %29 = vector.broadcast %28 : vector<6x8x1xf32> to vector<6x8x8xf32>
    %30 = arith.mulf %25, %29 : vector<6x8x8xf32>
    %31 = arith.truncf %30 : vector<6x8x8xf32> to vector<6x8x8xbf16>
    %32 = arith.truncf %12 : vector<6x8x64xf32> to vector<6x8x64xbf16>
    "tpu.trace_start"() <{level = 10 : i32, message = "hqk,hkd->hqd"}> : () -> ()
    %cst_14 = arith.constant dense<0.000000e+00> : vector<6x8x64xf32>
    %33 = tpu.matmul %31, %32, %cst_14 {dimension_numbers = #tpu.dot_dimension_numbers<[2], [1], [1], [2], [0, 0, 0, 1, 1, 2], [0], [0]>} : vector<6x8x8xbf16>, vector<6x8x64xbf16>, vector<6x8x64xf32> -> vector<6x8x64xf32>
    "tpu.trace_stop"() : () -> ()
    %34 = arith.truncf %33 : vector<6x8x64xf32> to vector<6x8x64xbf16>
    %c0_15 = arith.constant 0 : index
    %c0_16 = arith.constant 0 : index
    %c0_17 = arith.constant 0 : index
    %35 = vector.load %arg5[%c0_15, %c0_16, %c0_17] : memref<6x64x384xbf16, #tpu.memory_space<vmem>>, vector<6x64x384xbf16>
    "tpu.trace_start"() <{level = 10 : i32, message = "hqd,hdf->hqf"}> : () -> ()
    %cst_18 = arith.constant dense<0.000000e+00> : vector<6x8x384xf32>
    %36 = tpu.matmul %34, %35, %cst_18 {dimension_numbers = #tpu.dot_dimension_numbers<[2], [1], [1], [2], [0, 0, 0, 1, 1, 2], [0], [0]>} : vector<6x8x64xbf16>, vector<6x64x384xbf16>, vector<6x8x384xf32> -> vector<6x8x384xf32>
    "tpu.trace_stop"() : () -> ()
    %cst_19 = arith.constant dense<0.000000e+00> : vector<8x384xf32>
    %37 = vector.multi_reduction <add>, %36, %cst_19 [0] : vector<6x8x384xf32> to vector<8x384xf32>
    %c0_20 = arith.constant 0 : index
    %c0_21 = arith.constant 0 : index
    %38 = vector.load %arg6[%c0_20, %c0_21] : memref<1x384xf32, #tpu.memory_space<vmem>>, vector<1x384xf32>
    %39 = vector.broadcast %38 : vector<1x384xf32> to vector<8x384xf32>
    %40 = arith.addf %37, %39 : vector<8x384xf32>
    %41 = arith.addf %1, %40 : vector<8x384xf32>
    %cst_22 = arith.constant dense<0.000000e+00> : vector<8xf32>
    %42 = vector.multi_reduction <add>, %41, %cst_22 [1] : vector<8x384xf32> to vector<8xf32>
    %43 = vector.shape_cast %42 : vector<8xf32> to vector<8x1xf32>
    %cst_23 = arith.constant 3.840000e+02 : f32
    %44 = vector.broadcast %cst_23 : f32 to vector<8x1xf32>
    %45 = arith.divf %43, %44 : vector<8x1xf32>
    %46 = vector.broadcast %45 : vector<8x1xf32> to vector<8x384xf32>
    %47 = arith.subf %41, %46 : vector<8x384xf32>
    %48 = arith.mulf %47, %47 : vector<8x384xf32>
    %cst_24 = arith.constant dense<0.000000e+00> : vector<8xf32>
    %49 = vector.multi_reduction <add>, %48, %cst_24 [1] : vector<8x384xf32> to vector<8xf32>
    %50 = vector.shape_cast %49 : vector<8xf32> to vector<8x1xf32>
    %cst_25 = arith.constant 3.840000e+02 : f32
    %51 = vector.broadcast %cst_25 : f32 to vector<8x1xf32>
    %52 = arith.divf %50, %51 : vector<8x1xf32>
    %53 = vector.broadcast %45 : vector<8x1xf32> to vector<8x384xf32>
    %54 = arith.subf %41, %53 : vector<8x384xf32>
    %cst_26 = arith.constant 9.99999996E-13 : f32
    %55 = vector.broadcast %cst_26 : f32 to vector<8x1xf32>
    %56 = arith.addf %52, %55 : vector<8x1xf32>
    %57 = math.rsqrt %56 : vector<8x1xf32>
    %58 = vector.broadcast %57 : vector<8x1xf32> to vector<8x384xf32>
    %59 = arith.mulf %54, %58 : vector<8x384xf32>
    %c0_27 = arith.constant 0 : index
    %c0_28 = arith.constant 0 : index
    %60 = vector.load %arg7[%c0_27, %c0_28] : memref<1x384xf32, #tpu.memory_space<vmem>>, vector<1x384xf32>
    %61 = vector.broadcast %60 : vector<1x384xf32> to vector<8x384xf32>
    %62 = arith.mulf %59, %61 : vector<8x384xf32>
    %c0_29 = arith.constant 0 : index
    %c0_30 = arith.constant 0 : index
    %63 = vector.load %arg8[%c0_29, %c0_30] : memref<1x384xf32, #tpu.memory_space<vmem>>, vector<1x384xf32>
    %64 = vector.broadcast %63 : vector<1x384xf32> to vector<8x384xf32>
    %65 = arith.addf %62, %64 : vector<8x384xf32>
    %66 = arith.truncf %65 : vector<8x384xf32> to vector<8x384xbf16>
    %c0_31 = arith.constant 0 : index
    %c0_32 = arith.constant 0 : index
    %67 = vector.load %arg9[%c0_31, %c0_32] : memref<384x1536xbf16, #tpu.memory_space<vmem>>, vector<384x1536xbf16>
    %cst_33 = arith.constant dense<0.000000e+00> : vector<8x1536xf32>
    %68 = tpu.matmul %66, %67, %cst_33 {dimension_numbers = #tpu.dot_dimension_numbers<[1], [0], [0], [1], [0, 0, 1, 1], [], []>} : vector<8x384xbf16>, vector<384x1536xbf16>, vector<8x1536xf32> -> vector<8x1536xf32>
    %c0_34 = arith.constant 0 : index
    %c0_35 = arith.constant 0 : index
    %69 = vector.load %arg10[%c0_34, %c0_35] : memref<1x1536xf32, #tpu.memory_space<vmem>>, vector<1x1536xf32>
    %70 = vector.broadcast %69 : vector<1x1536xf32> to vector<8x1536xf32>
    %71 = arith.addf %68, %70 : vector<8x1536xf32>
    %72 = arith.mulf %71, %71 : vector<8x1536xf32>
    %73 = arith.mulf %71, %72 : vector<8x1536xf32>
    %cst_36 = arith.constant 4.471500e-02 : f32
    %74 = vector.broadcast %cst_36 : f32 to vector<8x1536xf32>
    %75 = arith.mulf %74, %73 : vector<8x1536xf32>
    %76 = arith.addf %71, %75 : vector<8x1536xf32>
    %cst_37 = arith.constant 0.797884583 : f32
    %77 = vector.broadcast %cst_37 : f32 to vector<8x1536xf32>
    %78 = arith.mulf %77, %76 : vector<8x1536xf32>
    %79 = math.tanh %78 : vector<8x1536xf32>
    %cst_38 = arith.constant 1.000000e+00 : f32
    %80 = vector.broadcast %cst_38 : f32 to vector<8x1536xf32>
    %81 = arith.addf %80, %79 : vector<8x1536xf32>
    %cst_39 = arith.constant 5.000000e-01 : f32
    %82 = vector.broadcast %cst_39 : f32 to vector<8x1536xf32>
    %83 = arith.mulf %82, %81 : vector<8x1536xf32>
    %84 = arith.mulf %71, %83 : vector<8x1536xf32>
    %85 = arith.truncf %84 : vector<8x1536xf32> to vector<8x1536xbf16>
    %c0_40 = arith.constant 0 : index
    %c0_41 = arith.constant 0 : index
    %86 = vector.load %arg11[%c0_40, %c0_41] : memref<1536x384xbf16, #tpu.memory_space<vmem>>, vector<1536x384xbf16>
    %cst_42 = arith.constant dense<0.000000e+00> : vector<8x384xf32>
    %87 = tpu.matmul %85, %86, %cst_42 {dimension_numbers = #tpu.dot_dimension_numbers<[1], [0], [0], [1], [0, 0, 1, 1], [], []>} : vector<8x1536xbf16>, vector<1536x384xbf16>, vector<8x384xf32> -> vector<8x384xf32>
    %c0_43 = arith.constant 0 : index
    %c0_44 = arith.constant 0 : index
    %88 = vector.load %arg12[%c0_43, %c0_44] : memref<1x384xf32, #tpu.memory_space<vmem>>, vector<1x384xf32>
    %89 = vector.broadcast %88 : vector<1x384xf32> to vector<8x384xf32>
    %90 = arith.addf %87, %89 : vector<8x384xf32>
    %91 = arith.addf %65, %90 : vector<8x384xf32>
    %cst_45 = arith.constant dense<0.000000e+00> : vector<8xf32>
    %92 = vector.multi_reduction <add>, %91, %cst_45 [1] : vector<8x384xf32> to vector<8xf32>
    %93 = vector.shape_cast %92 : vector<8xf32> to vector<8x1xf32>
    %cst_46 = arith.constant 3.840000e+02 : f32
    %94 = vector.broadcast %cst_46 : f32 to vector<8x1xf32>
    %95 = arith.divf %93, %94 : vector<8x1xf32>
    %96 = vector.broadcast %95 : vector<8x1xf32> to vector<8x384xf32>
    %97 = arith.subf %91, %96 : vector<8x384xf32>
    %98 = arith.mulf %97, %97 : vector<8x384xf32>
    %cst_47 = arith.constant dense<0.000000e+00> : vector<8xf32>
    %99 = vector.multi_reduction <add>, %98, %cst_47 [1] : vector<8x384xf32> to vector<8xf32>
    %100 = vector.shape_cast %99 : vector<8xf32> to vector<8x1xf32>
    %cst_48 = arith.constant 3.840000e+02 : f32
    %101 = vector.broadcast %cst_48 : f32 to vector<8x1xf32>
    %102 = arith.divf %100, %101 : vector<8x1xf32>
    %103 = vector.broadcast %95 : vector<8x1xf32> to vector<8x384xf32>
    %104 = arith.subf %91, %103 : vector<8x384xf32>
    %cst_49 = arith.constant 9.99999996E-13 : f32
    %105 = vector.broadcast %cst_49 : f32 to vector<8x1xf32>
    %106 = arith.addf %102, %105 : vector<8x1xf32>
    %107 = math.rsqrt %106 : vector<8x1xf32>
    %108 = vector.broadcast %107 : vector<8x1xf32> to vector<8x384xf32>
    %109 = arith.mulf %104, %108 : vector<8x384xf32>
    %c0_50 = arith.constant 0 : index
    %c0_51 = arith.constant 0 : index
    %110 = vector.load %arg13[%c0_50, %c0_51] : memref<1x384xf32, #tpu.memory_space<vmem>>, vector<1x384xf32>
    %111 = vector.broadcast %110 : vector<1x384xf32> to vector<8x384xf32>
    %112 = arith.mulf %109, %111 : vector<8x384xf32>
    %c0_52 = arith.constant 0 : index
    %c0_53 = arith.constant 0 : index
    %113 = vector.load %arg14[%c0_52, %c0_53] : memref<1x384xf32, #tpu.memory_space<vmem>>, vector<1x384xf32>
    %114 = vector.broadcast %113 : vector<1x384xf32> to vector<8x384xf32>
    %115 = arith.addf %112, %114 : vector<8x384xf32>
    %116 = vector.extract_strided_slice %115 {offsets = [0, 0], sizes = [1, 384], strides = [1, 1]} : vector<8x384xf32> to vector<1x384xf32>
    %117 = arith.truncf %116 : vector<1x384xf32> to vector<1x384xbf16>
    %c0_54 = arith.constant 0 : index
    %c0_55 = arith.constant 0 : index
    %118 = vector.load %arg15[%c0_54, %c0_55] : memref<384x128xbf16, #tpu.memory_space<vmem>>, vector<384x128xbf16>
    %cst_56 = arith.constant dense<0.000000e+00> : vector<1x128xf32>
    %119 = tpu.matmul %117, %118, %cst_56 {dimension_numbers = #tpu.dot_dimension_numbers<[1], [0], [0], [1], [0, 0, 1, 1], [], []>} : vector<1x384xbf16>, vector<384x128xbf16>, vector<1x128xf32> -> vector<1x128xf32>
    %c0_57 = arith.constant 0 : index
    %c0_58 = arith.constant 0 : index
    %120 = vector.load %arg16[%c0_57, %c0_58] : memref<1x128xf32, #tpu.memory_space<vmem>>, vector<1x128xf32>
    %121 = arith.addf %119, %120 : vector<1x128xf32>
    %cst_59 = arith.constant 0.000000e+00 : f32
    %122 = vector.broadcast %cst_59 : f32 to vector<1x128xf32>
    %123 = arith.cmpf oge, %121, %122 : vector<1x128xf32>
    %cst_60 = arith.constant 0.00999999977 : f32
    %124 = vector.broadcast %cst_60 : f32 to vector<1x128xf32>
    %125 = arith.mulf %124, %121 : vector<1x128xf32>
    %126 = arith.select %123, %121, %125 : vector<1x128xi1>, vector<1x128xf32>
    %127 = arith.truncf %126 : vector<1x128xf32> to vector<1x128xbf16>
    %c0_61 = arith.constant 0 : index
    %c0_62 = arith.constant 0 : index
    %128 = vector.load %arg17[%c0_61, %c0_62] : memref<128x128xbf16, #tpu.memory_space<vmem>>, vector<128x128xbf16>
    %cst_63 = arith.constant dense<0.000000e+00> : vector<1x128xf32>
    %129 = tpu.matmul %127, %128, %cst_63 {dimension_numbers = #tpu.dot_dimension_numbers<[1], [0], [0], [1], [0, 0, 1, 1], [], []>} : vector<1x128xbf16>, vector<128x128xbf16>, vector<1x128xf32> -> vector<1x128xf32>
    %c0_64 = arith.constant 0 : index
    %c0_65 = arith.constant 0 : index
    %130 = vector.load %arg18[%c0_64, %c0_65] : memref<1x128xf32, #tpu.memory_space<vmem>>, vector<1x128xf32>
    %131 = arith.addf %129, %130 : vector<1x128xf32>
    %cst_66 = arith.constant 0.000000e+00 : f32
    %132 = vector.broadcast %cst_66 : f32 to vector<1x128xf32>
    %133 = arith.cmpf oge, %131, %132 : vector<1x128xf32>
    %cst_67 = arith.constant 0.00999999977 : f32
    %134 = vector.broadcast %cst_67 : f32 to vector<1x128xf32>
    %135 = arith.mulf %134, %131 : vector<1x128xf32>
    %136 = arith.select %133, %131, %135 : vector<1x128xi1>, vector<1x128xf32>
    %137 = arith.truncf %136 : vector<1x128xf32> to vector<1x128xbf16>
    %c0_68 = arith.constant 0 : index
    %c0_69 = arith.constant 0 : index
    %138 = vector.load %arg19[%c0_68, %c0_69] : memref<128x128xbf16, #tpu.memory_space<vmem>>, vector<128x128xbf16>
    %cst_70 = arith.constant dense<0.000000e+00> : vector<1x128xf32>
    %139 = tpu.matmul %137, %138, %cst_70 {dimension_numbers = #tpu.dot_dimension_numbers<[1], [0], [0], [1], [0, 0, 1, 1], [], []>} : vector<1x128xbf16>, vector<128x128xbf16>, vector<1x128xf32> -> vector<1x128xf32>
    %c0_71 = arith.constant 0 : index
    %c0_72 = arith.constant 0 : index
    %140 = vector.load %arg20[%c0_71, %c0_72] : memref<1x128xf32, #tpu.memory_space<vmem>>, vector<1x128xf32>
    %141 = arith.addf %139, %140 : vector<1x128xf32>
    %cst_73 = arith.constant 0.000000e+00 : f32
    %142 = vector.broadcast %cst_73 : f32 to vector<1x128xf32>
    %143 = arith.cmpf oge, %141, %142 : vector<1x128xf32>
    %cst_74 = arith.constant 0.00999999977 : f32
    %144 = vector.broadcast %cst_74 : f32 to vector<1x128xf32>
    %145 = arith.mulf %144, %141 : vector<1x128xf32>
    %146 = arith.select %143, %141, %145 : vector<1x128xi1>, vector<1x128xf32>
    %147 = arith.truncf %146 : vector<1x128xf32> to vector<1x128xbf16>
    %c0_75 = arith.constant 0 : index
    %c0_76 = arith.constant 0 : index
    %148 = vector.load %arg21[%c0_75, %c0_76] : memref<128x128xbf16, #tpu.memory_space<vmem>>, vector<128x128xbf16>
    %cst_77 = arith.constant dense<0.000000e+00> : vector<1x128xf32>
    %149 = tpu.matmul %147, %148, %cst_77 {dimension_numbers = #tpu.dot_dimension_numbers<[1], [0], [0], [1], [0, 0, 1, 1], [], []>} : vector<1x128xbf16>, vector<128x128xbf16>, vector<1x128xf32> -> vector<1x128xf32>
    %c0_78 = arith.constant 0 : index
    %c0_79 = arith.constant 0 : index
    %150 = vector.load %arg22[%c0_78, %c0_79] : memref<1x128xf32, #tpu.memory_space<vmem>>, vector<1x128xf32>
    %151 = arith.addf %149, %150 : vector<1x128xf32>
    %c0_80 = arith.constant 0 : index
    %c0_81 = arith.constant 0 : index
    %c0_82 = arith.constant 0 : index
    %152 = vector.load %arg23[%c0_80, %c0_81, %c0_82] : memref<1x1x128xf32, #tpu.memory_space<vmem>>, vector<1x1x128xf32>
    %153 = vector.shape_cast %152 : vector<1x1x128xf32> to vector<1x128xf32>
    %154 = vector.shape_cast %151 : vector<1x128xf32> to vector<1x1x128xf32>
    tpu.vector_store %arg23[%c0_80, %c0_81, %c0_82], %154 {strides = array<i32>} : memref<1x1x128xf32, #tpu.memory_space<vmem>>, vector<1x1x128xf32>,
    return
  }
  func.func @transform_0(%arg0: i32) -> (i32, i32, i32) {
    %c0_i32 = arith.constant 0 : i32
    %c0_i32_0 = arith.constant 0 : i32
    %c0_i32_1 = arith.constant 0 : i32
    return %arg0, %c0_i32, %c0_i32_0 : i32, i32, i32
  }
  func.func @transform_1(%arg0: i32) -> (i32, i32, i32) {
    %c0_i32 = arith.constant 0 : i32
    %c0_i32_0 = arith.constant 0 : i32
    %c0_i32_1 = arith.constant 0 : i32
    return %arg0, %c0_i32, %c0_i32_0 : i32, i32, i32
  }
  func.func @transform_2(%arg0: i32) -> (i32, i32, i32) {
    %c0_i32 = arith.constant 0 : i32
    %c0_i32_0 = arith.constant 0 : i32
    %c0_i32_1 = arith.constant 0 : i32
    %c0_i32_2 = arith.constant 0 : i32
    return %c0_i32, %c0_i32_0, %c0_i32_1 : i32, i32, i32
  }
  func.func @transform_3(%arg0: i32) -> (i32, i32, i32) {
    %c0_i32 = arith.constant 0 : i32
    %c0_i32_0 = arith.constant 0 : i32
    %c0_i32_1 = arith.constant 0 : i32
    %c0_i32_2 = arith.constant 0 : i32
    return %c0_i32, %c0_i32_0, %c0_i32_1 : i32, i32, i32
  }
  func.func @transform_4(%arg0: i32) -> (i32, i32, i32) {
    %c0_i32 = arith.constant 0 : i32
    %c0_i32_0 = arith.constant 0 : i32
    %c0_i32_1 = arith.constant 0 : i32
    %c0_i32_2 = arith.constant 0 : i32
    return %c0_i32, %c0_i32_0, %c0_i32_1 : i32, i32, i32
  }
  func.func @transform_5(%arg0: i32) -> (i32, i32) {
    %c0_i32 = arith.constant 0 : i32
    %c0_i32_0 = arith.constant 0 : i32
    %c0_i32_1 = arith.constant 0 : i32
    return %c0_i32, %c0_i32_0 : i32, i32
  }
  func.func @transform_6(%arg0: i32) -> (i32, i32) {
    %c0_i32 = arith.constant 0 : i32
    %c0_i32_0 = arith.constant 0 : i32
    %c0_i32_1 = arith.constant 0 : i32
    return %c0_i32, %c0_i32_0 : i32, i32
  }
  func.func @transform_7(%arg0: i32) -> (i32, i32) {
    %c0_i32 = arith.constant 0 : i32
    %c0_i32_0 = arith.constant 0 : i32
    %c0_i32_1 = arith.constant 0 : i32
    return %c0_i32, %c0_i32_0 : i32, i32
  }
  func.func @transform_8(%arg0: i32) -> (i32, i32) {
    %c0_i32 = arith.constant 0 : i32
    %c0_i32_0 = arith.constant 0 : i32
    %c0_i32_1 = arith.constant 0 : i32
    return %c0_i32, %c0_i32_0 : i32, i32
  }
  func.func @transform_9(%arg0: i32) -> (i32, i32) {
    %c0_i32 = arith.constant 0 : i32
    %c0_i32_0 = arith.constant 0 : i32
    %c0_i32_1 = arith.constant 0 : i32
    return %c0_i32, %c0_i32_0 : i32, i32
  }
  func.func @transform_10(%arg0: i32) -> (i32, i32) {
    %c0_i32 = arith.constant 0 : i32
    %c0_i32_0 = arith.constant 0 : i32
    %c0_i32_1 = arith.constant 0 : i32
    return %c0_i32, %c0_i32_0 : i32, i32
  }
  func.func @transform_11(%arg0: i32) -> (i32, i32) {
    %c0_i32 = arith.constant 0 : i32
    %c0_i32_0 = arith.constant 0 : i32
    %c0_i32_1 = arith.constant 0 : i32
    return %c0_i32, %c0_i32_0 : i32, i32
  }
  func.func @transform_12(%arg0: i32) -> (i32, i32) {
    %c0_i32 = arith.constant 0 : i32
    %c0_i32_0 = arith.constant 0 : i32
    %c0_i32_1 = arith.constant 0 : i32
    return %c0_i32, %c0_i32_0 : i32, i32
  }
  func.func @transform_13(%arg0: i32) -> (i32, i32) {
    %c0_i32 = arith.constant 0 : i32
    %c0_i32_0 = arith.constant 0 : i32
    %c0_i32_1 = arith.constant 0 : i32
    return %c0_i32, %c0_i32_0 : i32, i32
  }
  func.func @transform_14(%arg0: i32) -> (i32, i32) {
    %c0_i32 = arith.constant 0 : i32
    %c0_i32_0 = arith.constant 0 : i32
    %c0_i32_1 = arith.constant 0 : i32
    return %c0_i32, %c0_i32_0 : i32, i32
  }
  func.func @transform_15(%arg0: i32) -> (i32, i32) {
    %c0_i32 = arith.constant 0 : i32
    %c0_i32_0 = arith.constant 0 : i32
    %c0_i32_1 = arith.constant 0 : i32
    return %c0_i32, %c0_i32_0 : i32, i32
  }
  func.func @transform_16(%arg0: i32) -> (i32, i32) {
    %c0_i32 = arith.constant 0 : i32
    %c0_i32_0 = arith.constant 0 : i32
    %c0_i32_1 = arith.constant 0 : i32
    return %c0_i32, %c0_i32_0 : i32, i32
  }
  func.func @transform_17(%arg0: i32) -> (i32, i32) {
    %c0_i32 = arith.constant 0 : i32
    %c0_i32_0 = arith.constant 0 : i32
    %c0_i32_1 = arith.constant 0 : i32
    return %c0_i32, %c0_i32_0 : i32, i32
  }
  func.func @transform_18(%arg0: i32) -> (i32, i32) {
    %c0_i32 = arith.constant 0 : i32
    %c0_i32_0 = arith.constant 0 : i32
    %c0_i32_1 = arith.constant 0 : i32
    return %c0_i32, %c0_i32_0 : i32, i32
  }
  func.func @transform_19(%arg0: i32) -> (i32, i32) {
    %c0_i32 = arith.constant 0 : i32
    %c0_i32_0 = arith.constant 0 : i32
    %c0_i32_1 = arith.constant 0 : i32
    return %c0_i32, %c0_i32_0 : i32, i32
  }
  func.func @transform_20(%arg0: i32) -> (i32, i32) {
    %c0_i32 = arith.constant 0 : i32
    %c0_i32_0 = arith.constant 0 : i32
    %c0_i32_1 = arith.constant 0 : i32
    return %c0_i32, %c0_i32_0 : i32, i32
  }
  func.func @transform_21(%arg0: i32) -> (i32, i32) {
    %c0_i32 = arith.constant 0 : i32
    %c0_i32_0 = arith.constant 0 : i32
    %c0_i32_1 = arith.constant 0 : i32
    return %c0_i32, %c0_i32_0 : i32, i32
  }
  func.func @transform_22(%arg0: i32) -> (i32, i32, i32) {
    %c0_i32 = arith.constant 0 : i32
    %c0_i32_0 = arith.constant 0 : i32
    %c0_i32_1 = arith.constant 0 : i32
    return %arg0, %c0_i32, %c0_i32_0 : i32, i32, i32
  }
}

</mosaic_0001>

<bundles_post_ra>
// kernel: ffnn_with_transformer_forward.1
= control target key start
LH: loop header
LB: loop body
LE: loop exit
PB: predicated region body
PF: predicated region fallthrough
CT: control target
= control target key end

     0   :  { %s21649_s0 = inlined_call_operand.vmem [shape: f32[2,8,384], index: 0, kind: input, shape index: {}]   ;;  %s21650_s1 = inlined_call_operand.vmem [shape: f32[2,1,8], index: 1, kind: input, shape index: {}]   ;;  %s21651_s2 = inlined_call_operand.vmem [shape: bf16[18,384,64], index: 2, kind: input, shape index: {}]   ;;  %s21652_s3 = inlined_call_operand.vmem [shape: f32[18,1,64], index: 3, kind: input, shape index: {}]   ;;  %s21653_s4 = inlined_call_operand.vmem [shape: bf16[6,64,384], index: 4, kind: input, shape index: {}]   ;;  %s21654_s5 = inlined_call_operand.vmem [shape: f32[1,384], index: 5, kind: input, shape index: {}]   ;;  %s21655_s6 = inlined_call_operand.vmem [shape: f32[1,384], index: 6, kind: input, shape index: {}]   ;;  %s21656_s7 = inlined_call_operand.vmem [shape: f32[1,384], index: 7, kind: input, shape index: {}]   ;;  %s21657_s8 = inlined_call_operand.vmem [shape: bf16[384,1536], index: 8, kind: input, shape index: {}]   ;;  %s21658_s9 = inlined_call_operand.vmem [shape: f32[1,1536], index: 9, kind: input, shape index: {}]   ;;  %s21659_s10 = inlined_call_operand.vmem [shape: bf16[1536,384], index: 10, kind: input, shape index: {}]   ;;  %s21660_s11 = inlined_call_operand.vmem [shape: f32[1,384], index: 11, kind: input, shape index: {}]   ;;  %s21661_s12 = inlined_call_operand.vmem [shape: f32[1,384], index: 12, kind: input, shape index: {}]   ;;  %s21662_s13 = inlined_call_operand.vmem [shape: f32[1,384], index: 13, kind: input, shape index: {}]   ;;  %s21663_s14 = inlined_call_operand.vmem [shape: bf16[384,128], index: 14, kind: input, shape index: {}]   ;;  %s21664_s15 = inlined_call_operand.vmem [shape: f32[1,128], index: 15, kind: input, shape index: {}]   ;;  %s21665_s16 = inlined_call_operand.vmem [shape: bf16[128,128], index: 16, kind: input, shape index: {}]   ;;  %s21666_s17 = inlined_call_operand.vmem [shape: f32[1,128], index: 17, kind: input, shape index: {}]   ;;  %s21667_s18 = inlined_call_operand.vmem [shape: bf16[128,128], index: 18, kind: input, shape index: {}]   ;;  %s21668_s19 = inlined_call_operand.vmem [shape: f32[1,128], index: 19, kind: input, shape index: {}]   ;;  %s21669_s20 = inlined_call_operand.vmem [shape: bf16[128,128], index: 20, kind: input, shape index: {}]   ;;  %s21670_s21 = inlined_call_operand.vmem [shape: f32[1,128], index: 21, kind: input, shape index: {}]   ;;  %s21671_s22 = inlined_call_operand.hbm [shape: f32[2,1,128], index: 22, kind: output, shape index: {}]  }
   0x1   :  { %21683 = sst [smem:[#allocation11_spill]] %s21649_s0 }
   0x2   :  { %21684 = sst [smem:[#allocation12_spill]] %s21650_s1 }
   0x3   :  { %21685 = sst [smem:[#allocation13_spill]] %s21651_s2 }
   0x4   :  { %21686 = sst [smem:[#allocation14_spill]] %s21652_s3 }
   0x5   :  { %21687 = sst [smem:[#allocation15_spill]] %s21653_s4 }
   0x6   :  { %21688 = sst [smem:[#allocation16_spill]] %s21654_s5 }
   0x7   :  { %21689 = sst [smem:[#allocation17_spill]] %s21655_s6 }
   0x8   :  { %21690 = sst [smem:[#allocation18_spill]] %s21656_s7 }
   0x9   :  { %21691 = sst [smem:[#allocation19_spill]] %s21671_s22 }
   0xa   :  { %27 = vsyncpa [#allocation3], 0 }
   0xb   :  { %29 = vsyncpa [#allocation3 + $0x1], 0  ;;  %s17277_s3 = smov 0   ;;  %s17279_s28 = smov 0  }
   0xc   :  { %s17281_s29 = smov 0   ;;  %s17283_s30 = smov 0  }
   0xd LB: > { %21692 = sst [smem:[#allocation5_spill]] %s17144_s3  ;;  %s17298_s4 = sadd.s32 4294967295, %s17156_s30   ;;  %s17156_s30 = sphi %s17283_s30, %s21712_s30   ;;  %s17152_s29 = sphi %s17281_s29, %s21714_s29   ;;  %s17148_s28 = sphi %s17279_s28, %s21716_s28   ;;  %s17144_s3 = sphi %s17277_s3, %s21715_s3  }
   0xe   : > { %21693 = sst [smem:[#allocation6_spill]] %s17152_s29  ;;  %s13041_s0 = sadd.s32 4294967294, %s17156_s30  }
   0xf   : > { %21694 = sst [smem:[#allocation7_spill]] %s17156_s30  ;;  %s17302_s23 = sadd.s32 1, %s17156_s30  }
  0x10   : > { %21695 = sst [smem:[#allocation8_spill]] %s17302_s23  ;;  %s514_s1 = sadd.s32 1, %s17152_s29 }
  0x11   : > { %s511_s5 = ssub.s32 %s17156_s30, %s17302_s23  ;;  %p524_p0 = scmp.ne.s32.totalorder %s17152_s29, %s17148_s28 }
  0x12   : > { %p512_p1 = scmp.eq.s32.totalorder %s511_s5, 0  ;;  %p525_p2 = scmp.eq.s32.totalorder %s17298_s4, 1 }
  0x13   : > { %p530_p3 = scmp.ne.s32.totalorder %s17148_s28, %s17144_s3  ;;  %p531_p4 = scmp.eq.s32.totalorder %s13041_s0, 1 }
  0x14   : > { %s17313_s24 = scalar_select %p512_p1, %s17152_s29, %s514_s1  }
  0x15   : > { %p17315_p5 = por %p525_p2, %p524_p0  ;;  %p17319_p6 = por %p531_p4, %p530_p3 }
  0x16   : > { %21696 = sst [smem:[#allocation9_spill]] %s17313_s24  ;;  %p13044_p7 = scmp.ge.s32.totalorder %s17156_s30, 1 }
  0x17   : > { %s21698_s25 = scalar_select %p17319_p6, 1, 0 }
  0x18   : > { %p623_p8 = scmp.lt.s32.totalorder %s17156_s30, 3 }
  0x19   : > { %21699 = sst [smem:[#allocation10_spill]] %s21698_s25 }
  0x1a   : > { %p624_p9 = pnand %p13044_p7, %p623_p8 }
  0x1b   : > { %s21700_s27 = sld [smem:[#allocation13_spill]] (!%p624_p9)  ;;  %p687_p10 = scmp.lt.s32.totalorder (!%p624_p9), %s17298_s4, 1 }
  0x1c   : > { %627 = sbr.rel (%p624_p9) target bundleno = 3847 (0xf07), region = 108  ;;  %s21701_s30 = sld [smem:[#allocation11_spill]] (!%p624_p9) }
  0x1d   : > { %s21702_s25 = sld [smem:[#allocation14_spill]] (!%p624_p9) }
  0x1e   : > { %s21704_s5 = sld [smem:[#allocation15_spill]] (!%p624_p9) }
  0x1f   : > { %s21705_s3 = sld [smem:[#allocation16_spill]] (!%p624_p9) }
  0x20   : > { %s21706_s1 = sld [smem:[#allocation17_spill]] (!%p624_p9) }
  0x21   : > { %v15649_v0 = vld [vmem:[%s21700_s27 + $0x78] sm:$0xff]   ;;  %v17158_v1 = vmov 0.0   ;;  %v15652_v4 = vld [vmem:[%s21700_s27 + $0x70] sm:$0xff]   ;;  %vm17159_vm0 = vmmov 0   ;;  %v15655_v7 = vld [vmem:[%s21700_s27 + $0x68] sm:$0xff]   ;;  %s17372_s24 = scalar_select %p687_p10, %s17298_s4, 1 }
  0x22   : > { %15022 = vmatprep.subr.bf16.mxu1 %v17158_v1  ;;  %v15650_v2 = vld [vmem:[%s21700_s27 + $0xb8] sm:$0xff]   ;;  %14220 = vmatprep.subr.bf16.mxu0 %v15649_v0  ;;  %v15653_v5 = vld [vmem:[%s21700_s27 + $0xb0] sm:$0xff]   ;;  %v15656_v8 = vld [vmem:[%s21700_s27 + $0xa8] sm:$0xff]   ;;  %vm5743_vm1 = vcmask 523264   ;;  %vm6102_vm2 = vcmask 1043456   ;;  %vm6020_vm3 = vcmask 64512  }
  0x23   : > { %v15651_v3 = vld [vmem:[%s21700_s27 + $0x38] sm:$0xff]   ;;  %15023 = vmatpush3.bf16.msra.mxu1 %v15650_v2  ;;  %15038 = vmatprep.mubr.msk.bf16.mxu1 %vm17159_vm0, %v17158_v1  ;;  %v15654_v6 = vld [vmem:[%s21700_s27 + $0x30] sm:$0xff]   ;;  %v15657_v9 = vld [vmem:[%s21700_s27 + $0x28] sm:$0xff]   ;;  %s15606_s26 = smul.u32 24, %s17372_s24  ;;  %s21707_s7 = sld [smem:[#allocation18_spill]] }
  0x24   : > { %14221 = vmatpush3.bf16.msra.mxu0 %v15651_v3  ;;  %15024 = vmatprep.subr.bf16.mxu1 %v17158_v1  ;;  %v15658_v10 = vld [vmem:[%s21700_s27 + $0x60] sm:$0xff]   ;;  %v15661_v13 = vld [vmem:[%s21700_s27 + $0x58] sm:$0xff]   ;;  %v15664_v16 = vld [vmem:[%s21700_s27 + $0x50] sm:$0xff]  }
  0x25   : > { %14222 = vmatprep.subr.bf16.mxu0 %v15652_v4  ;;  %v15659_v11 = vld [vmem:[%s21700_s27 + $0xa0] sm:$0xff]   ;;  %v15662_v14 = vld [vmem:[%s21700_s27 + $0x98] sm:$0xff]   ;;  %v15665_v17 = vld [vmem:[%s21700_s27 + $0x90] sm:$0xff]   ;;  %s17398_s22 = scalar_lea.vmem %s21701_s30, %s15606_s26  ;;  %s21703_s30 = sld [smem:[#allocation12_spill]] }
  0x26   : > { %v15660_v12 = vld [vmem:[%s21700_s27 + $0x20] sm:$0xff]   ;;  %v15663_v15 = vld [vmem:[%s21700_s27 + $0x18] sm:$0xff]   ;;  %v15666_v18 = vld [vmem:[%s21700_s27 + $0x10] sm:$0xff]  }
  0x27   : > { %15025 = vmatpush3.bf16.msra.mxu1 %v15653_v5  ;;  %v15667_v19 = vld [vmem:[%s21700_s27 + $0x48] sm:$0xff]   ;;  %v15670_v22 = vld [vmem:[%s21700_s27 + $0x40] sm:$0xff]   ;;  %v698_v27 = vld [vmem:[%s17398_s22 + $0x10] sm:$0xff] }
  0x28   : > { %14223 = vmatpush3.bf16.msra.mxu0 %v15654_v6  ;;  %15026 = vmatprep.subr.bf16.mxu1 %v17158_v1  ;;  %v15668_v20 = vld [vmem:[%s21700_s27 + $0x88] sm:$0xff]   ;;  %v15671_v24 = vld [vmem:[%s21700_s27 + $0x80] sm:$0xff]   ;;  %v15673_v29 = vld [vmem:[%s21700_s27 + $0x138] sm:$0xff]   ;;  %v17426_v30 = vpack.c.bf16 %v698_v27, %v698_v27 }
  0x29   : > { %14224 = vmatprep.subr.bf16.mxu0 %v15655_v7  ;;  %v15669_v21 = vld [vmem:[%s21700_s27 + $0x8] sm:$0xff]   ;;  %v15672_v26 = vld [vmem:[%s21700_s27] sm:$0xff]   ;;  %v15674_v32 = vld [vmem:[%s21700_s27 + $0x178] sm:$0xff]  }
  0x2a   : > { %v697_v23 = vld [vmem:[%s17398_s22 + $0x8] sm:$0xff]  ;;  %v696_v28 = vld [vmem:[%s17398_s22] sm:$0xff]  ;;  %v15675_v33 = vld [vmem:[%s21700_s27 + $0xf8] sm:$0xff]  }
  0x2b   : > { %15027 = vmatpush3.bf16.msra.mxu1 %v15656_v8  ;;  %v17414_v25 = vpack.c.bf16 %v697_v23, %v697_v23  ;;  %v17428_v31 = vpack.c.bf16 %v696_v28, %v696_v28  ;;  %v15676_v34 = vld [vmem:[%s21700_s27 + $0x130] sm:$0xff]   ;;  %v15679_v37 = vld [vmem:[%s21700_s27 + $0x128] sm:$0xff]   ;;  %v15682_v40 = vld [vmem:[%s21700_s27 + $0x120] sm:$0xff]   ;;  %s694_s26 = scalar_lea.vmem %s21703_s30, %s17372_s24  ;;  %s21708_s24 = sld [smem:[#allocation19_spill]] }
  0x2c   : > { %14225 = vmatpush3.bf16.msra.mxu0 %v15657_v9  ;;  %15028 = vmatprep.subr.bf16.mxu1 %v17158_v1  ;;  %v15677_v35 = vld [vmem:[%s21700_s27 + $0x170] sm:$0xff]   ;;  %v15680_v38 = vld [vmem:[%s21700_s27 + $0x168] sm:$0xff]   ;;  %v15683_v41 = vld [vmem:[%s21700_s27 + $0x160] sm:$0xff]  }
  0x2d   : > { %14226 = vmatprep.subr.bf16.mxu0 %v15658_v10  ;;  %1868 = vmatprep.mubr.bf16.mxu0 %v17414_v25  ;;  %v15678_v36 = vld [vmem:[%s21700_s27 + $0xf0] sm:$0xff]   ;;  %v15681_v39 = vld [vmem:[%s21700_s27 + $0xe8] sm:$0xff]   ;;  %v15684_v42 = vld [vmem:[%s21700_s27 + $0xe0] sm:$0xff]  }
  0x2e   : > { %v15685_v43 = vld [vmem:[%s21700_s27 + $0x118] sm:$0xff]   ;;  %v15688_v46 = vld [vmem:[%s21700_s27 + $0x110] sm:$0xff]   ;;  %v15691_v49 = vld [vmem:[%s21700_s27 + $0x108] sm:$0xff]  }
  0x2f   : > { %15029 = vmatpush3.bf16.msra.mxu1 %v15659_v11  ;;  %v15686_v44 = vld [vmem:[%s21700_s27 + $0x158] sm:$0xff]   ;;  %v15689_v47 = vld [vmem:[%s21700_s27 + $0x150] sm:$0xff]   ;;  %v15692_v50 = vld [vmem:[%s21700_s27 + $0x148] sm:$0xff]  }
  0x30   : > { %14227 = vmatpush3.bf16.msra.mxu0 %v15660_v12  ;;  %15030 = vmatprep.subr.bf16.mxu1 %v17158_v1  ;;  %v15687_v45 = vld [vmem:[%s21700_s27 + $0xd8] sm:$0xff]   ;;  %v15690_v48 = vld [vmem:[%s21700_s27 + $0xd0] sm:$0xff]   ;;  %v15693_v51 = vld [vmem:[%s21700_s27 + $0xc8] sm:$0xff]  }
  0x31   : > { %14228 = vmatprep.subr.bf16.mxu0 %v15661_v13  ;;  %v15694_v52 = vld [vmem:[%s21700_s27 + $0x100] sm:$0xff]   ;;  %v15697_v55 = vld [vmem:[%s21700_s27 + $0x1f8] sm:$0xff]   ;;  %v15700_v58 = vld [vmem:[%s21700_s27 + $0x1f0] sm:$0xff]  }
  0x32   : > { %v15695_v53 = vld [vmem:[%s21700_s27 + $0x140] sm:$0xff]   ;;  %v15698_v56 = vld [vmem:[%s21700_s27 + $0x238] sm:$0xff]   ;;  %v15701_v59 = vld [vmem:[%s21700_s27 + $0x230] sm:$0xff]  }
  0x33   : > { %15031 = vmatpush3.bf16.msra.mxu1 %v15662_v14  ;;  %v15696_v54 = vld [vmem:[%s21700_s27 + $0xc0] sm:$0xff]   ;;  %v15699_v57 = vld [vmem:[%s21700_s27 + $0x1b8] sm:$0xff]   ;;  %v15702_v60 = vld [vmem:[%s21700_s27 + $0x1b0] sm:$0xff]  }
  0x34   : > { %14229 = vmatpush3.bf16.msra.mxu0 %v15663_v15  ;;  %15032 = vmatprep.subr.bf16.mxu1 %v17158_v1  ;;  %v15703_v61 = vld [vmem:[%s21700_s27 + $0x1e8] sm:$0xff]   ;;  %v15706_v0 = vld [vmem:[%s21700_s27 + $0x1e0] sm:$0xff]   ;;  %v15709_v4 = vld [vmem:[%s21700_s27 + $0x1d8] sm:$0xff]  }
  0x35   : > { %14230 = vmatprep.subr.bf16.mxu0 %v15664_v16  ;;  %v15704_v62 = vld [vmem:[%s21700_s27 + $0x228] sm:$0xff]   ;;  %v15707_v2 = vld [vmem:[%s21700_s27 + $0x220] sm:$0xff]   ;;  %v15710_v5 = vld [vmem:[%s21700_s27 + $0x218] sm:$0xff]  }
  0x36   : > { %v15705_v63 = vld [vmem:[%s21700_s27 + $0x1a8] sm:$0xff]   ;;  %v15708_v3 = vld [vmem:[%s21700_s27 + $0x1a0] sm:$0xff]   ;;  %v15711_v6 = vld [vmem:[%s21700_s27 + $0x198] sm:$0xff]  }
  0x37   : > { %15033 = vmatpush3.bf16.msra.mxu1 %v15665_v17  ;;  %v15712_v7 = vld [vmem:[%s21700_s27 + $0x1d0] sm:$0xff]   ;;  %v15715_v10 = vld [vmem:[%s21700_s27 + $0x1c8] sm:$0xff]   ;;  %v15718_v13 = vld [vmem:[%s21700_s27 + $0x1c0] sm:$0xff]  }
  0x38   : > { %14231 = vmatpush3.bf16.msra.mxu0 %v15666_v18  ;;  %15034 = vmatprep.subr.bf16.mxu1 %v17158_v1  ;;  %v15713_v8 = vld [vmem:[%s21700_s27 + $0x210] sm:$0xff]   ;;  %v15716_v11 = vld [vmem:[%s21700_s27 + $0x208] sm:$0xff]   ;;  %v15719_v14 = vld [vmem:[%s21700_s27 + $0x200] sm:$0xff]  }
  0x39   : > { %14232 = vmatprep.subr.bf16.mxu0 %v15667_v19  ;;  %v15714_v9 = vld [vmem:[%s21700_s27 + $0x190] sm:$0xff]   ;;  %v15717_v12 = vld [vmem:[%s21700_s27 + $0x188] sm:$0xff]   ;;  %v15720_v15 = vld [vmem:[%s21700_s27 + $0x180] sm:$0xff]  }
  0x3a   : > { %v15721_v16 = vld [vmem:[%s21700_s27 + $0x2b8] sm:$0xff]   ;;  %v15724_v19 = vld [vmem:[%s21700_s27 + $0x2b0] sm:$0xff]   ;;  %v15728_v23 = vld [vmem:[%s21700_s27 + $0x2e8] sm:$0xff]  }
  0x3b   : > { %15035 = vmatpush3.bf16.msra.mxu1 %v15668_v20  ;;  %v15722_v17 = vld [vmem:[%s21700_s27 + $0x2f8] sm:$0xff]   ;;  %v15725_v20 = vld [vmem:[%s21700_s27 + $0x2f0] sm:$0xff]   ;;  %v15731_v27 = vld [vmem:[%s21700_s27 + $0x2e0] sm:$0xff]  }
  0x3c   : > { %14233 = vmatpush3.bf16.msra.mxu0 %v15669_v21  ;;  %15036 = vmatprep.subr.bf16.mxu1 %v17158_v1  ;;  %v15723_v18 = vld [vmem:[%s21700_s27 + $0x278] sm:$0xff]   ;;  %v15726_v21 = vld [vmem:[%s21700_s27 + $0x270] sm:$0xff]   ;;  %v15732_v28 = vld [vmem:[%s21700_s27 + $0x260] sm:$0xff]  }
  0x3d   : > { %14234 = vmatprep.subr.bf16.mxu0 %v15670_v22  ;;  %v15727_v22 = vld [vmem:[%s21700_s27 + $0x2a8] sm:$0xff]  }
  0x3f   : > { %15037 = vmatpush3.bf16.msra.mxu1 %v15671_v24  ;;  %v15729_v24 = vld [vmem:[%s21700_s27 + $0x268] sm:$0xff]  }
  0x40   : > { %14235 = vmatpush3.bf16.msra.mxu0 %v15672_v26  ;;  %15042 = vmatprep.subr.bf16.mxu1 %v17158_v1  ;;  %v15730_v26 = vld [vmem:[%s21700_s27 + $0x2a0] sm:$0xff]  }
  0x41   : > { %14251 = vmatprep.subr.bf16.mxu0 %v15673_v29  ;;  %v15733_v29 = vld [vmem:[%s21700_s27 + $0x298] sm:$0xff]  }
  0x42   : > { %15039 = vmatmul.mubr.bf16.vlgmr.msra.gmra.mxu1 %v17426_v30 }
  0x43   : > { %1869 = vmatmul.mubr.bf16.vlgmr.msra.gmra.mxu0 %v17428_v31  ;;  %15043 = vmatpush3.bf16.msra.mxu1 %v15674_v32  ;;  %v15734_v32 = vld [vmem:[%s21700_s27 + $0x2d8] sm:$0xff]  }
  0x44   : > { %14252 = vmatpush3.bf16.msra.mxu0 %v15675_v33  ;;  %15044 = vmatprep.subr.bf16.mxu1 %v17158_v1  ;;  %v15735_v33 = vld [vmem:[%s21700_s27 + $0x258] sm:$0xff]  }
  0x45   : > { %14253 = vmatprep.subr.bf16.mxu0 %v15676_v34  ;;  %2092 = vmatprep.mubr.bf16.mxu0 %v17414_v25  ;;  %v15736_v34 = vld [vmem:[%s21700_s27 + $0x290] sm:$0xff]  }
  0x46   : > { %15058 = vmatprep.mubr.msk.bf16.mxu1 %vm17159_vm0, %v17158_v1 }
  0x47   : > { %15045 = vmatpush3.bf16.msra.mxu1 %v15677_v35  ;;  %v15737_v35 = vld [vmem:[%s21700_s27 + $0x2d0] sm:$0xff]  }
  0x48   : > { %14254 = vmatpush3.bf16.msra.mxu0 %v15678_v36  ;;  %15046 = vmatprep.subr.bf16.mxu1 %v17158_v1  ;;  %v15738_v36 = vld [vmem:[%s21700_s27 + $0x250] sm:$0xff]  }
  0x49   : > { %14255 = vmatprep.subr.bf16.mxu0 %v15679_v37  ;;  %v15739_v37 = vld [vmem:[%s21700_s27 + $0x288] sm:$0xff]  }
  0x4b   : > { %15047 = vmatpush3.bf16.msra.mxu1 %v15680_v38  ;;  %v15740_v38 = vld [vmem:[%s21700_s27 + $0x2c8] sm:$0xff]  }
  0x4c   : > { %14256 = vmatpush3.bf16.msra.mxu0 %v15681_v39  ;;  %15048 = vmatprep.subr.bf16.mxu1 %v17158_v1  ;;  %v15741_v39 = vld [vmem:[%s21700_s27 + $0x248] sm:$0xff]  }
  0x4d   : > { %14257 = vmatprep.subr.bf16.mxu0 %v15682_v40  ;;  %v15742_v40 = vld [vmem:[%s21700_s27 + $0x280] sm:$0xff]  }
  0x4f   : > { %15049 = vmatpush3.bf16.msra.mxu1 %v15683_v41  ;;  %v15743_v41 = vld [vmem:[%s21700_s27 + $0x2c0] sm:$0xff]  }
  0x50   : > { %14258 = vmatpush3.bf16.msra.mxu0 %v15684_v42  ;;  %15050 = vmatprep.subr.bf16.mxu1 %v17158_v1  ;;  %v15744_v42 = vld [vmem:[%s21700_s27 + $0x240] sm:$0xff]  }
  0x51   : > { %14259 = vmatprep.subr.bf16.mxu0 %v15685_v43  ;;  %v15745_v43 = vld [vmem:[%s21700_s27 + $0x378] sm:$0xff]  }
  0x53   : > { %15051 = vmatpush3.bf16.msra.mxu1 %v15686_v44  ;;  %v15746_v44 = vld [vmem:[%s21700_s27 + $0x3b8] sm:$0xff]  }
  0x54   : > { %14260 = vmatpush3.bf16.msra.mxu0 %v15687_v45  ;;  %15052 = vmatprep.subr.bf16.mxu1 %v17158_v1  ;;  %v15747_v45 = vld [vmem:[%s21700_s27 + $0x338] sm:$0xff]  }
  0x55   : > { %14261 = vmatprep.subr.bf16.mxu0 %v15688_v46  ;;  %v15748_v46 = vld [vmem:[%s21700_s27 + $0x370] sm:$0xff]  }
  0x57   : > { %15053 = vmatpush3.bf16.msra.mxu1 %v15689_v47  ;;  %v15749_v47 = vld [vmem:[%s21700_s27 + $0x3b0] sm:$0xff]  }
  0x58   : > { %14262 = vmatpush3.bf16.msra.mxu0 %v15690_v48  ;;  %15054 = vmatprep.subr.bf16.mxu1 %v17158_v1  ;;  %v15750_v48 = vld [vmem:[%s21700_s27 + $0x330] sm:$0xff]  }
  0x59   : > { %14263 = vmatprep.subr.bf16.mxu0 %v15691_v49  ;;  %v15751_v49 = vld [vmem:[%s21700_s27 + $0x368] sm:$0xff]  }
  0x5b   : > { %15055 = vmatpush3.bf16.msra.mxu1 %v15692_v50  ;;  %v15752_v50 = vld [vmem:[%s21700_s27 + $0x3a8] sm:$0xff]  }
  0x5c   : > { %14264 = vmatpush3.bf16.msra.mxu0 %v15693_v51  ;;  %15056 = vmatprep.subr.bf16.mxu1 %v17158_v1  ;;  %v15753_v51 = vld [vmem:[%s21700_s27 + $0x328] sm:$0xff]  }
  0x5d   : > { %14265 = vmatprep.subr.bf16.mxu0 %v15694_v52  ;;  %v15754_v52 = vld [vmem:[%s21700_s27 + $0x360] sm:$0xff]  }
  0x5f   : > { %15057 = vmatpush3.bf16.msra.mxu1 %v15695_v53  ;;  %v15755_v53 = vld [vmem:[%s21700_s27 + $0x3a0] sm:$0xff]  }
  0x60   : > { %14266 = vmatpush3.bf16.msra.mxu0 %v15696_v54  ;;  %15062 = vmatprep.subr.bf16.mxu1 %v17158_v1  ;;  %v15756_v54 = vld [vmem:[%s21700_s27 + $0x320] sm:$0xff]  }
  0x61   : > { %14282 = vmatprep.subr.bf16.mxu0 %v15697_v55  ;;  %v15757_v55 = vld [vmem:[%s21700_s27 + $0x358] sm:$0xff]  }
  0x62   : > { %15059 = vmatmul.mubr.bf16.vlgmr.msra.gmra.mxu1 %v17426_v30 }
  0x63   : > { %2093 = vmatmul.mubr.bf16.vlgmr.msra.gmra.mxu0 %v17428_v31  ;;  %15063 = vmatpush3.bf16.msra.mxu1 %v15698_v56  ;;  %v15758_v56 = vld [vmem:[%s21700_s27 + $0x398] sm:$0xff]  }
  0x64   : > { %14283 = vmatpush3.bf16.msra.mxu0 %v15699_v57  ;;  %15064 = vmatprep.subr.bf16.mxu1 %v17158_v1  ;;  %v15759_v57 = vld [vmem:[%s21700_s27 + $0x318] sm:$0xff]  }
  0x65   : > { %14284 = vmatprep.subr.bf16.mxu0 %v15700_v58  ;;  %2316 = vmatprep.mubr.bf16.mxu0 %v17414_v25  ;;  %v15760_v58 = vld [vmem:[%s21700_s27 + $0x350] sm:$0xff]  }
  0x66   : > { %15078 = vmatprep.mubr.msk.bf16.mxu1 %vm17159_vm0, %v17158_v1 }
  0x67   : > { %15065 = vmatpush3.bf16.msra.mxu1 %v15701_v59  ;;  %v15761_v59 = vld [vmem:[%s21700_s27 + $0x390] sm:$0xff]  }
  0x68   : > { %14285 = vmatpush3.bf16.msra.mxu0 %v15702_v60  ;;  %15066 = vmatprep.subr.bf16.mxu1 %v17158_v1  ;;  %v15762_v60 = vld [vmem:[%s21700_s27 + $0x310] sm:$0xff]  }
  0x69   : > { %14286 = vmatprep.subr.bf16.mxu0 %v15703_v61  ;;  %v15763_v61 = vld [vmem:[%s21700_s27 + $0x348] sm:$0xff]  }
  0x6b   : > { %15067 = vmatpush3.bf16.msra.mxu1 %v15704_v62  ;;  %v15764_v62 = vld [vmem:[%s21700_s27 + $0x388] sm:$0xff]  }
  0x6c   : > { %14287 = vmatpush3.bf16.msra.mxu0 %v15705_v63  ;;  %15068 = vmatprep.subr.bf16.mxu1 %v17158_v1  ;;  %v15765_v63 = vld [vmem:[%s21700_s27 + $0x308] sm:$0xff]  }
  0x6d   : > { %14288 = vmatprep.subr.bf16.mxu0 %v15706_v0  ;;  %v15766_v0 = vld [vmem:[%s21700_s27 + $0x340] sm:$0xff]  }
  0x6f   : > { %15069 = vmatpush3.bf16.msra.mxu1 %v15707_v2  ;;  %v15767_v2 = vld [vmem:[%s21700_s27 + $0x380] sm:$0xff]  }
  0x70   : > { %14289 = vmatpush3.bf16.msra.mxu0 %v15708_v3  ;;  %15070 = vmatprep.subr.bf16.mxu1 %v17158_v1  ;;  %v15768_v3 = vld [vmem:[%s21700_s27 + $0x300] sm:$0xff]  }
  0x71   : > { %14290 = vmatprep.subr.bf16.mxu0 %v15709_v4  ;;  %v15769_v4 = vld [vmem:[%s21700_s27 + $0x438] sm:$0xff]  }
  0x73   : > { %15071 = vmatpush3.bf16.msra.mxu1 %v15710_v5  ;;  %v15770_v5 = vld [vmem:[%s21700_s27 + $0x478] sm:$0xff]  }
  0x74   : > { %14291 = vmatpush3.bf16.msra.mxu0 %v15711_v6  ;;  %15072 = vmatprep.subr.bf16.mxu1 %v17158_v1  ;;  %v15771_v6 = vld [vmem:[%s21700_s27 + $0x3f8] sm:$0xff]  }
  0x75   : > { %14292 = vmatprep.subr.bf16.mxu0 %v15712_v7  ;;  %v15772_v7 = vld [vmem:[%s21700_s27 + $0x430] sm:$0xff]  }
  0x77   : > { %15073 = vmatpush3.bf16.msra.mxu1 %v15713_v8  ;;  %v15773_v8 = vld [vmem:[%s21700_s27 + $0x470] sm:$0xff]  }
  0x78   : > { %14293 = vmatpush3.bf16.msra.mxu0 %v15714_v9  ;;  %15074 = vmatprep.subr.bf16.mxu1 %v17158_v1  ;;  %v15774_v9 = vld [vmem:[%s21700_s27 + $0x3f0] sm:$0xff]  }
  0x79   : > { %14294 = vmatprep.subr.bf16.mxu0 %v15715_v10  ;;  %v15775_v10 = vld [vmem:[%s21700_s27 + $0x428] sm:$0xff]  }
  0x7b   : > { %15075 = vmatpush3.bf16.msra.mxu1 %v15716_v11  ;;  %v15776_v11 = vld [vmem:[%s21700_s27 + $0x468] sm:$0xff]  }
  0x7c   : > { %14295 = vmatpush3.bf16.msra.mxu0 %v15717_v12  ;;  %15076 = vmatprep.subr.bf16.mxu1 %v17158_v1  ;;  %v15777_v12 = vld [vmem:[%s21700_s27 + $0x3e8] sm:$0xff]  }
  0x7d   : > { %14296 = vmatprep.subr.bf16.mxu0 %v15718_v13  ;;  %v15778_v13 = vld [vmem:[%s21700_s27 + $0x420] sm:$0xff]  }
  0x7f   : > { %15077 = vmatpush3.bf16.msra.mxu1 %v15719_v14  ;;  %v15779_v14 = vld [vmem:[%s21700_s27 + $0x460] sm:$0xff]  }
  0x80   : > { %14297 = vmatpush3.bf16.msra.mxu0 %v15720_v15  ;;  %15082 = vmatprep.subr.bf16.mxu1 %v17158_v1  ;;  %v15780_v15 = vld [vmem:[%s21700_s27 + $0x3e0] sm:$0xff]  }
  0x81   : > { %14313 = vmatprep.subr.bf16.mxu0 %v15721_v16  ;;  %v15781_v16 = vld [vmem:[%s21700_s27 + $0x418] sm:$0xff]  }
  0x82   : > { %15079 = vmatmul.mubr.bf16.vlgmr.msra.gmra.mxu1 %v17426_v30 }
  0x83   : > { %2317 = vmatmul.mubr.bf16.vlgmr.msra.gmra.mxu0 %v17428_v31  ;;  %15083 = vmatpush3.bf16.msra.mxu1 %v15722_v17  ;;  %v15782_v17 = vld [vmem:[%s21700_s27 + $0x458] sm:$0xff]  }
  0x84   : > { %14314 = vmatpush3.bf16.msra.mxu0 %v15723_v18  ;;  %15084 = vmatprep.subr.bf16.mxu1 %v17158_v1  ;;  %v15783_v18 = vld [vmem:[%s21700_s27 + $0x3d8] sm:$0xff]  }
  0x85   : > { %14315 = vmatprep.subr.bf16.mxu0 %v15724_v19  ;;  %2540 = vmatprep.mubr.bf16.mxu0 %v17414_v25  ;;  %v15784_v19 = vld [vmem:[%s21700_s27 + $0x410] sm:$0xff]  }
  0x86   : > { %15098 = vmatprep.mubr.msk.bf16.mxu1 %vm17159_vm0, %v17158_v1 }
  0x87   : > { %15085 = vmatpush3.bf16.msra.mxu1 %v15725_v20  ;;  %v15785_v20 = vld [vmem:[%s21700_s27 + $0x450] sm:$0xff]  }
  0x88   : > { %14316 = vmatpush3.bf16.msra.mxu0 %v15726_v21  ;;  %15086 = vmatprep.subr.bf16.mxu1 %v17158_v1  ;;  %v15786_v21 = vld [vmem:[%s21700_s27 + $0x3d0] sm:$0xff]  }
  0x89   : > { %14317 = vmatprep.subr.bf16.mxu0 %v15727_v22  ;;  %v15787_v22 = vld [vmem:[%s21700_s27 + $0x408] sm:$0xff]  }
  0x8b   : > { %15087 = vmatpush3.bf16.msra.mxu1 %v15728_v23  ;;  %v15788_v23 = vld [vmem:[%s21700_s27 + $0x448] sm:$0xff]  }
  0x8c   : > { %14318 = vmatpush3.bf16.msra.mxu0 %v15729_v24  ;;  %15088 = vmatprep.subr.bf16.mxu1 %v17158_v1  ;;  %v15789_v24 = vld [vmem:[%s21700_s27 + $0x3c8] sm:$0xff]  }
  0x8d   : > { %14319 = vmatprep.subr.bf16.mxu0 %v15730_v26  ;;  %v15790_v26 = vld [vmem:[%s21700_s27 + $0x400] sm:$0xff]  }
  0x8f   : > { %15089 = vmatpush3.bf16.msra.mxu1 %v15731_v27  ;;  %v15791_v27 = vld [vmem:[%s21700_s27 + $0x440] sm:$0xff]  }
  0x90   : > { %14320 = vmatpush3.bf16.msra.mxu0 %v15732_v28  ;;  %15090 = vmatprep.subr.bf16.mxu1 %v17158_v1  ;;  %v15792_v28 = vld [vmem:[%s21700_s27 + $0x3c0] sm:$0xff]  }
  0x91   : > { %14321 = vmatprep.subr.bf16.mxu0 %v15733_v29  ;;  %v15793_v29 = vld [vmem:[%s21700_s27 + $0x4f8] sm:$0xff]  }
  0x93   : > { %15091 = vmatpush3.bf16.msra.mxu1 %v15734_v32  ;;  %v15794_v32 = vld [vmem:[%s21700_s27 + $0x538] sm:$0xff]  }
  0x94   : > { %14322 = vmatpush3.bf16.msra.mxu0 %v15735_v33  ;;  %15092 = vmatprep.subr.bf16.mxu1 %v17158_v1  ;;  %v15795_v33 = vld [vmem:[%s21700_s27 + $0x4b8] sm:$0xff]  }
  0x95   : > { %14323 = vmatprep.subr.bf16.mxu0 %v15736_v34  ;;  %v15796_v34 = vld [vmem:[%s21700_s27 + $0x4f0] sm:$0xff]  }
  0x97   : > { %15093 = vmatpush3.bf16.msra.mxu1 %v15737_v35  ;;  %v15797_v35 = vld [vmem:[%s21700_s27 + $0x530] sm:$0xff]  }
  0x98   : > { %14324 = vmatpush3.bf16.msra.mxu0 %v15738_v36  ;;  %15094 = vmatprep.subr.bf16.mxu1 %v17158_v1  ;;  %v15798_v36 = vld [vmem:[%s21700_s27 + $0x4b0] sm:$0xff]  }
  0x99   : > { %14325 = vmatprep.subr.bf16.mxu0 %v15739_v37  ;;  %v15799_v37 = vld [vmem:[%s21700_s27 + $0x4e8] sm:$0xff]  }
  0x9b   : > { %15095 = vmatpush3.bf16.msra.mxu1 %v15740_v38  ;;  %v15800_v38 = vld [vmem:[%s21700_s27 + $0x528] sm:$0xff]  }
  0x9c   : > { %14326 = vmatpush3.bf16.msra.mxu0 %v15741_v39  ;;  %15096 = vmatprep.subr.bf16.mxu1 %v17158_v1  ;;  %v15801_v39 = vld [vmem:[%s21700_s27 + $0x4a8] sm:$0xff]  }
  0x9d   : > { %14327 = vmatprep.subr.bf16.mxu0 %v15742_v40  ;;  %v15802_v40 = vld [vmem:[%s21700_s27 + $0x4e0] sm:$0xff]  }
  0x9f   : > { %15097 = vmatpush3.bf16.msra.mxu1 %v15743_v41  ;;  %v15803_v41 = vld [vmem:[%s21700_s27 + $0x520] sm:$0xff]  }
  0xa0   : > { %14328 = vmatpush3.bf16.msra.mxu0 %v15744_v42  ;;  %15102 = vmatprep.subr.bf16.mxu1 %v17158_v1  ;;  %v15804_v42 = vld [vmem:[%s21700_s27 + $0x4a0] sm:$0xff]  }
  0xa1   : > { %14344 = vmatprep.subr.bf16.mxu0 %v15745_v43  ;;  %v15805_v43 = vld [vmem:[%s21700_s27 + $0x4d8] sm:$0xff]  }
  0xa2   : > { %15099 = vmatmul.mubr.bf16.vlgmr.msra.gmra.mxu1 %v17426_v30 }
  0xa3   : > { %2541 = vmatmul.mubr.bf16.vlgmr.msra.gmra.mxu0 %v17428_v31  ;;  %15103 = vmatpush3.bf16.msra.mxu1 %v15746_v44  ;;  %v15806_v44 = vld [vmem:[%s21700_s27 + $0x518] sm:$0xff]  }
  0xa4   : > { %14345 = vmatpush3.bf16.msra.mxu0 %v15747_v45  ;;  %15104 = vmatprep.subr.bf16.mxu1 %v17158_v1  ;;  %v15807_v45 = vld [vmem:[%s21700_s27 + $0x498] sm:$0xff]  }
  0xa5   : > { %14346 = vmatprep.subr.bf16.mxu0 %v15748_v46  ;;  %2764 = vmatprep.mubr.bf16.mxu0 %v17414_v25  ;;  %v15808_v46 = vld [vmem:[%s21700_s27 + $0x4d0] sm:$0xff]  }
  0xa6   : > { %15118 = vmatprep.mubr.msk.bf16.mxu1 %vm17159_vm0, %v17158_v1 }
  0xa7   : > { %15105 = vmatpush3.bf16.msra.mxu1 %v15749_v47  ;;  %v15809_v47 = vld [vmem:[%s21700_s27 + $0x510] sm:$0xff]  }
  0xa8   : > { %14347 = vmatpush3.bf16.msra.mxu0 %v15750_v48  ;;  %15106 = vmatprep.subr.bf16.mxu1 %v17158_v1  ;;  %v15810_v48 = vld [vmem:[%s21700_s27 + $0x490] sm:$0xff]  }
  0xa9   : > { %14348 = vmatprep.subr.bf16.mxu0 %v15751_v49  ;;  %v15811_v49 = vld [vmem:[%s21700_s27 + $0x4c8] sm:$0xff]  }
  0xab   : > { %15107 = vmatpush3.bf16.msra.mxu1 %v15752_v50  ;;  %v15812_v50 = vld [vmem:[%s21700_s27 + $0x508] sm:$0xff]  }
  0xac   : > { %14349 = vmatpush3.bf16.msra.mxu0 %v15753_v51  ;;  %15108 = vmatprep.subr.bf16.mxu1 %v17158_v1  ;;  %v15813_v51 = vld [vmem:[%s21700_s27 + $0x488] sm:$0xff]  }
  0xad   : > { %14350 = vmatprep.subr.bf16.mxu0 %v15754_v52  ;;  %v15814_v52 = vld [vmem:[%s21700_s27 + $0x4c0] sm:$0xff]  }
  0xaf   : > { %15109 = vmatpush3.bf16.msra.mxu1 %v15755_v53  ;;  %v15815_v53 = vld [vmem:[%s21700_s27 + $0x500] sm:$0xff]  }
  0xb0   : > { %14351 = vmatpush3.bf16.msra.mxu0 %v15756_v54  ;;  %15110 = vmatprep.subr.bf16.mxu1 %v17158_v1  ;;  %v15816_v54 = vld [vmem:[%s21700_s27 + $0x480] sm:$0xff]  }
  0xb1   : > { %14352 = vmatprep.subr.bf16.mxu0 %v15757_v55  ;;  %v15817_v55 = vld [vmem:[%s21700_s27 + $0x5b8] sm:$0xff]  }
  0xb3   : > { %15111 = vmatpush3.bf16.msra.mxu1 %v15758_v56  ;;  %v15818_v56 = vld [vmem:[%s21700_s27 + $0x5f8] sm:$0xff]  }
  0xb4   : > { %14353 = vmatpush3.bf16.msra.mxu0 %v15759_v57  ;;  %15112 = vmatprep.subr.bf16.mxu1 %v17158_v1  ;;  %v15819_v57 = vld [vmem:[%s21700_s27 + $0x578] sm:$0xff]  }
  0xb5   : > { %14354 = vmatprep.subr.bf16.mxu0 %v15760_v58  ;;  %v15820_v58 = vld [vmem:[%s21700_s27 + $0x5b0] sm:$0xff]  }
  0xb7   : > { %15113 = vmatpush3.bf16.msra.mxu1 %v15761_v59  ;;  %v15821_v59 = vld [vmem:[%s21700_s27 + $0x5f0] sm:$0xff]  }
  0xb8   : > { %14355 = vmatpush3.bf16.msra.mxu0 %v15762_v60  ;;  %15114 = vmatprep.subr.bf16.mxu1 %v17158_v1 }
  0xb9   : > { %14356 = vmatprep.subr.bf16.mxu0 %v15763_v61 }
  0xbb   : > { %15115 = vmatpush3.bf16.msra.mxu1 %v15764_v62  ;;  %v15822_v62 = vld [vmem:[%s21700_s27 + $0x570] sm:$0xff]  }
  0xbc   : > { %14357 = vmatpush3.bf16.msra.mxu0 %v15765_v63  ;;  %15116 = vmatprep.subr.bf16.mxu1 %v17158_v1  ;;  %v13046_v63 = vld [vmem:[%s21702_s25] ss:$0 sm:$0xff] }
  0xbd   : > { %14358 = vmatprep.subr.bf16.mxu0 %v15766_v0 }
  0xbf   : > { %15117 = vmatpush3.bf16.msra.mxu1 %v15767_v2 }
  0xc0   : > { %14359 = vmatpush3.bf16.msra.mxu0 %v15768_v3  ;;  %15122 = vmatprep.subr.bf16.mxu1 %v17158_v1  ;;  %v15823_v3 = vld [vmem:[%s21700_s27 + $0x5a8] sm:$0xff]  }
  0xc1   : > { %14375 = vmatprep.subr.bf16.mxu0 %v15769_v4 }
  0xc2   : > { %15119 = vmatmul.mubr.bf16.vlgmr.msra.gmra.mxu1 %v17426_v30 }
  0xc3   : > { %2765 = vmatmul.mubr.bf16.vlgmr.msra.gmra.mxu0 %v17428_v31  ;;  %15123 = vmatpush3.bf16.msra.mxu1 %v15770_v5 }
  0xc4   : > { %14376 = vmatpush3.bf16.msra.mxu0 %v15771_v6  ;;  %15124 = vmatprep.subr.bf16.mxu1 %v17158_v1 }
  0xc5   : > { %14377 = vmatprep.subr.bf16.mxu0 %v15772_v7  ;;  %2988 = vmatprep.mubr.bf16.mxu0 %v17414_v25  ;;  %v15824_v7 = vld [vmem:[%s21700_s27 + $0x5e8] sm:$0xff]  }
  0xc6   : > { %15138 = vmatprep.mubr.msk.bf16.mxu1 %vm17159_vm0, %v17158_v1 }
  0xc7   : > { %15125 = vmatpush3.bf16.msra.mxu1 %v15773_v8 }
  0xc8   : > { %14378 = vmatpush3.bf16.msra.mxu0 %v15774_v9  ;;  %15126 = vmatprep.subr.bf16.mxu1 %v17158_v1  ;;  %v15825_v9 = vld [vmem:[%s21700_s27 + $0x568] sm:$0xff]  }
  0xc9   : > { %14379 = vmatprep.subr.bf16.mxu0 %v15775_v10 }
  0xcb   : > { %15127 = vmatpush3.bf16.msra.mxu1 %v15776_v11 }
  0xcc   : > { %14380 = vmatpush3.bf16.msra.mxu0 %v15777_v12  ;;  %15128 = vmatprep.subr.bf16.mxu1 %v17158_v1  ;;  %v15826_v12 = vld [vmem:[%s21700_s27 + $0x5a0] sm:$0xff]  }
  0xcd   : > { %14381 = vmatprep.subr.bf16.mxu0 %v15778_v13 }
  0xcf   : > { %15129 = vmatpush3.bf16.msra.mxu1 %v15779_v14  ;;  %v15827_v14 = vld [vmem:[%s21700_s27 + $0x5e0] sm:$0xff]  }
  0xd0   : > { %14382 = vmatpush3.bf16.msra.mxu0 %v15780_v15  ;;  %15130 = vmatprep.subr.bf16.mxu1 %v17158_v1  ;;  %v15828_v15 = vld [vmem:[%s21700_s27 + $0x560] sm:$0xff]  }
  0xd1   : > { %14383 = vmatprep.subr.bf16.mxu0 %v15781_v16  ;;  %v15829_v16 = vld [vmem:[%s21700_s27 + $0x598] sm:$0xff]  }
  0xd3   : > { %15131 = vmatpush3.bf16.msra.mxu1 %v15782_v17  ;;  %v15830_v17 = vld [vmem:[%s21700_s27 + $0x5d8] sm:$0xff]  }
  0xd4   : > { %14384 = vmatpush3.bf16.msra.mxu0 %v15783_v18  ;;  %15132 = vmatprep.subr.bf16.mxu1 %v17158_v1  ;;  %v15831_v18 = vld [vmem:[%s21700_s27 + $0x558] sm:$0xff]  }
  0xd5   : > { %14385 = vmatprep.subr.bf16.mxu0 %v15784_v19  ;;  %v15832_v19 = vld [vmem:[%s21700_s27 + $0x590] sm:$0xff]  }
  0xd7   : > { %15133 = vmatpush3.bf16.msra.mxu1 %v15785_v20  ;;  %v15833_v20 = vld [vmem:[%s21700_s27 + $0x5d0] sm:$0xff]  }
  0xd8   : > { %14386 = vmatpush3.bf16.msra.mxu0 %v15786_v21  ;;  %15134 = vmatprep.subr.bf16.mxu1 %v17158_v1  ;;  %v15834_v21 = vld [vmem:[%s21700_s27 + $0x550] sm:$0xff]  }
  0xd9   : > { %14387 = vmatprep.subr.bf16.mxu0 %v15787_v22  ;;  %v15835_v22 = vld [vmem:[%s21700_s27 + $0x588] sm:$0xff]  }
  0xdb   : > { %15135 = vmatpush3.bf16.msra.mxu1 %v15788_v23  ;;  %v15836_v23 = vld [vmem:[%s21700_s27 + $0x5c8] sm:$0xff]  }
  0xdc   : > { %14388 = vmatpush3.bf16.msra.mxu0 %v15789_v24  ;;  %15136 = vmatprep.subr.bf16.mxu1 %v17158_v1  ;;  %v15837_v24 = vld [vmem:[%s21700_s27 + $0x548] sm:$0xff]  }
  0xdd   : > { %14389 = vmatprep.subr.bf16.mxu0 %v15790_v26  ;;  %v15838_v26 = vld [vmem:[%s21700_s27 + $0x580] sm:$0xff]  }
  0xdf   : > { %15137 = vmatpush3.bf16.msra.mxu1 %v15791_v27  ;;  %v15839_v27 = vld [vmem:[%s21700_s27 + $0x5c0] sm:$0xff]  }
  0xe0   : > { %14390 = vmatpush3.bf16.msra.mxu0 %v15792_v28  ;;  %15142 = vmatprep.subr.bf16.mxu1 %v17158_v1  ;;  %v15840_v28 = vld [vmem:[%s21700_s27 + $0x540] sm:$0xff]  }
  0xe1   : > { %14406 = vmatprep.subr.bf16.mxu0 %v15793_v29  ;;  %v15841_v29 = vld [vmem:[%s21700_s27 + $0x678] sm:$0xff]  }
  0xe2   : > { %15139 = vmatmul.mubr.bf16.vlgmr.msra.gmra.mxu1 %v17426_v30 }
  0xe3   : > { %2989 = vmatmul.mubr.bf16.vlgmr.msra.gmra.mxu0 %v17428_v31  ;;  %15143 = vmatpush3.bf16.msra.mxu1 %v15794_v32  ;;  %v15842_v32 = vld [vmem:[%s21700_s27 + $0x6b8] sm:$0xff]  }
  0xe4   : > { %14407 = vmatpush3.bf16.msra.mxu0 %v15795_v33  ;;  %15144 = vmatprep.subr.bf16.mxu1 %v17158_v1  ;;  %v15843_v33 = vld [vmem:[%s21700_s27 + $0x638] sm:$0xff]  }
  0xe5   : > { %14408 = vmatprep.subr.bf16.mxu0 %v15796_v34  ;;  %3212 = vmatprep.mubr.bf16.mxu0 %v17414_v25  ;;  %v15844_v34 = vld [vmem:[%s21700_s27 + $0x670] sm:$0xff]  }
  0xe6   : > { %15158 = vmatprep.mubr.msk.bf16.mxu1 %vm17159_vm0, %v17158_v1 }
  0xe7   : > { %15145 = vmatpush3.bf16.msra.mxu1 %v15797_v35  ;;  %v15845_v35 = vld [vmem:[%s21700_s27 + $0x6b0] sm:$0xff]  }
  0xe8   : > { %14409 = vmatpush3.bf16.msra.mxu0 %v15798_v36  ;;  %15146 = vmatprep.subr.bf16.mxu1 %v17158_v1 }
  0xe9   : > { %14410 = vmatprep.subr.bf16.mxu0 %v15799_v37 }
  0xeb   : > { %15147 = vmatpush3.bf16.msra.mxu1 %v15800_v38  ;;  %v15846_v38 = vld [vmem:[%s21700_s27 + $0x630] sm:$0xff]  }
  0xec   : > { %14411 = vmatpush3.bf16.msra.mxu0 %v15801_v39  ;;  %15148 = vmatprep.subr.bf16.mxu1 %v17158_v1  ;;  %v13047_v39 = vld [vmem:[%s21702_s25 + $0x1] ss:$0 sm:$0xff] }
  0xed   : > { %14412 = vmatprep.subr.bf16.mxu0 %v15802_v40 }
  0xef   : > { %15149 = vmatpush3.bf16.msra.mxu1 %v15803_v41 }
  0xf0   : > { %14413 = vmatpush3.bf16.msra.mxu0 %v15804_v42  ;;  %15150 = vmatprep.subr.bf16.mxu1 %v17158_v1  ;;  %v15847_v42 = vld [vmem:[%s21700_s27 + $0x668] sm:$0xff]  }
  0xf1   : > { %14414 = vmatprep.subr.bf16.mxu0 %v15805_v43 }
  0xf3   : > { %15151 = vmatpush3.bf16.msra.mxu1 %v15806_v44 }
  0xf4   : > { %14415 = vmatpush3.bf16.msra.mxu0 %v15807_v45  ;;  %15152 = vmatprep.subr.bf16.mxu1 %v17158_v1 }
  0xf5   : > { %14416 = vmatprep.subr.bf16.mxu0 %v15808_v46  ;;  %v15848_v46 = vld [vmem:[%s21700_s27 + $0x6a8] sm:$0xff]  }
  0xf7   : > { %15153 = vmatpush3.bf16.msra.mxu1 %v15809_v47 }
  0xf8   : > { %14417 = vmatpush3.bf16.msra.mxu0 %v15810_v48  ;;  %15154 = vmatprep.subr.bf16.mxu1 %v17158_v1  ;;  %v15849_v48 = vld [vmem:[%s21700_s27 + $0x628] sm:$0xff]  }
  0xf9   : > { %14418 = vmatprep.subr.bf16.mxu0 %v15811_v49 }
  0xfb   : > { %15155 = vmatpush3.bf16.msra.mxu1 %v15812_v50 }
  0xfc   : > { %14419 = vmatpush3.bf16.msra.mxu0 %v15813_v51  ;;  %15156 = vmatprep.subr.bf16.mxu1 %v17158_v1  ;;  %v15850_v51 = vld [vmem:[%s21700_s27 + $0x660] sm:$0xff]  }
  0xfd   : > { %14420 = vmatprep.subr.bf16.mxu0 %v15814_v52 }
  0xff   : > { %15157 = vmatpush3.bf16.msra.mxu1 %v15815_v53  ;;  %v15851_v53 = vld [vmem:[%s21700_s27 + $0x6a0] sm:$0xff]  }
 0x100   : > { %14421 = vmatpush3.bf16.msra.mxu0 %v15816_v54  ;;  %15162 = vmatprep.subr.bf16.mxu1 %v17158_v1  ;;  %v15852_v54 = vld [vmem:[%s21700_s27 + $0x620] sm:$0xff]  }
 0x101   : > { %14437 = vmatprep.subr.bf16.mxu0 %v15817_v55  ;;  %v15853_v55 = vld [vmem:[%s21700_s27 + $0x658] sm:$0xff]  }
 0x102   : > { %15159 = vmatmul.mubr.bf16.vlgmr.msra.gmra.mxu1 %v17426_v30  ;;  %v1910_v60 = vpop.f32.mrf.mxu1 }
 0x103   : > { %v14236_v61 = vpop.f32.mrf.mxu0  ;;  %3213 = vmatmul.mubr.bf16.vlgmr.msra.gmra.mxu0 %v17428_v31  ;;  %15163 = vmatpush3.bf16.msra.mxu1 %v15818_v56  ;;  %v15854_v56 = vld [vmem:[%s21700_s27 + $0x698] sm:$0xff]  }
 0x104   : > { %14438 = vmatpush3.bf16.msra.mxu0 %v15819_v57  ;;  %15164 = vmatprep.subr.bf16.mxu1 %v17158_v1  ;;  %v15040_v0 = vpop.f32.mrf.mxu1  ;;  %v15855_v57 = vld [vmem:[%s21700_s27 + $0x618] sm:$0xff]  }
 0x105   : > { %v14237_v2 = vpop.f32.mrf.mxu0  ;;  %14439 = vmatprep.subr.bf16.mxu0 %v15820_v58  ;;  %3436 = vmatprep.mubr.bf16.mxu0 %v17414_v25  ;;  %v15856_v58 = vld [vmem:[%s21700_s27 + $0x650] sm:$0xff]   ;;  %v15862_v0 = vld [vmem:[%s21700_s27 + $0x640] sm:$0xff]  }
 0x106   : > { %v14238_v4 = vadd.f32 %v14237_v2, %v14236_v61  ;;  %v1913_v5 = vpop.f32.mrf.mxu1  ;;  %15178 = vmatprep.mubr.msk.bf16.mxu1 %vm17159_vm0, %v17158_v1  ;;  %v15859_v61 = vld [vmem:[%s21700_s27 + $0x648] sm:$0xff]   ;;  %v15863_v2 = vld [vmem:[%s21700_s27 + $0x680] sm:$0xff]  }
 0x107   : > { %v14239_v6 = vpop.f32.mrf.mxu0  ;;  %15165 = vmatpush3.bf16.msra.mxu1 %v15821_v59  ;;  %v15857_v59 = vld [vmem:[%s21700_s27 + $0x690] sm:$0xff]   ;;  %v15866_v5 = vld [vmem:[%s21700_s27 + $0x778] sm:$0xff]  }
 0x108   : > { %14440 = vmatpush3.bf16.msra.mxu0 %v15822_v62  ;;  %v1871_v8 = vadd.f32 %v14238_v4, %v13046_v63  ;;  %15166 = vmatprep.subr.bf16.mxu1 %v17158_v1  ;;  %v15041_v10 = vpop.f32.mrf.mxu1  ;;  %v15860_v62 = vld [vmem:[%s21700_s27 + $0x688] sm:$0xff]   ;;  %v15865_v4 = vld [vmem:[%s21700_s27 + $0x738] sm:$0xff]  }
 0x109   : > { %v14240_v11 = vpop.f32.mrf.mxu0  ;;  %14441 = vmatprep.subr.bf16.mxu0 %v15823_v3  ;;  %v15861_v63 = vld [vmem:[%s21700_s27 + $0x608] sm:$0xff]   ;;  %v15864_v3 = vld [vmem:[%s21700_s27 + $0x600] sm:$0xff]   ;;  %v15867_v6 = vld [vmem:[%s21700_s27 + $0x6f8] sm:$0xff]  }
 0x10a   : > { %v17978_v13 = vadd.f32 %v1910_v60, %v1871_v8  ;;  %v15858_v60 = vld [vmem:[%s21700_s27 + $0x610] sm:$0xff]  }
 0x10b   : > { %15167 = vmatpush3.bf16.msra.mxu1 %v15824_v7  ;;  %v15868_v7 = vld [vmem:[%s21700_s27 + $0x730] sm:$0xff]  }
 0x10c   : > { %14442 = vmatpush3.bf16.msra.mxu0 %v15825_v9  ;;  %15168 = vmatprep.subr.bf16.mxu1 %v17158_v1  ;;  %v15869_v8 = vld [vmem:[%s21700_s27 + $0x770] sm:$0xff]  }
 0x10d   : > { %14443 = vmatprep.subr.bf16.mxu0 %v15826_v12  ;;  %v15870_v11 = vld [vmem:[%s21700_s27 + $0x6f0] sm:$0xff]   ;;  %v13048_v12 = vld [vmem:[%s21702_s25 + $0x2] ss:$0 sm:$0xff] }
 0x10f   : > { %15169 = vmatpush3.bf16.msra.mxu1 %v15827_v14 }
 0x110   : > { %14444 = vmatpush3.bf16.msra.mxu0 %v15828_v15  ;;  %15170 = vmatprep.subr.bf16.mxu1 %v17158_v1 }
 0x111   : > { %14445 = vmatprep.subr.bf16.mxu0 %v15829_v16  ;;  %v15871_v16 = vld [vmem:[%s21700_s27 + $0x728] sm:$0xff]  }
 0x113   : > { %15171 = vmatpush3.bf16.msra.mxu1 %v15830_v17 }
 0x114   : > { %14446 = vmatpush3.bf16.msra.mxu0 %v15831_v18  ;;  %15172 = vmatprep.subr.bf16.mxu1 %v17158_v1 }
 0x115   : > { %14447 = vmatprep.subr.bf16.mxu0 %v15832_v19 }
 0x117   : > { %15173 = vmatpush3.bf16.msra.mxu1 %v15833_v20  ;;  %v15872_v20 = vld [vmem:[%s21700_s27 + $0x768] sm:$0xff]  }
 0x118   : > { %14448 = vmatpush3.bf16.msra.mxu0 %v15834_v21  ;;  %15174 = vmatprep.subr.bf16.mxu1 %v17158_v1 }
 0x119   : > { %14449 = vmatprep.subr.bf16.mxu0 %v15835_v22  ;;  %v15873_v22 = vld [vmem:[%s21700_s27 + $0x6e8] sm:$0xff]  }
 0x11b   : > { %15175 = vmatpush3.bf16.msra.mxu1 %v15836_v23 }
 0x11c   : > { %14450 = vmatpush3.bf16.msra.mxu0 %v15837_v24  ;;  %15176 = vmatprep.subr.bf16.mxu1 %v17158_v1 }
 0x11d   : > { %14451 = vmatprep.subr.bf16.mxu0 %v15838_v26  ;;  %v15874_v26 = vld [vmem:[%s21700_s27 + $0x720] sm:$0xff]  }
 0x11f   : > { %15177 = vmatpush3.bf16.msra.mxu1 %v15839_v27 }
 0x120   : > { %14452 = vmatpush3.bf16.msra.mxu0 %v15840_v28  ;;  %15182 = vmatprep.subr.bf16.mxu1 %v17158_v1  ;;  %v15875_v28 = vld [vmem:[%s21700_s27 + $0x760] sm:$0xff]  }
 0x121   : > { %14468 = vmatprep.subr.bf16.mxu0 %v15841_v29  ;;  %v15876_v29 = vld [vmem:[%s21700_s27 + $0x6e0] sm:$0xff]  }
 0x122   : > { %15179 = vmatmul.mubr.bf16.vlgmr.msra.gmra.mxu1 %v17426_v30  ;;  %v2134_v36 = vpop.f32.mrf.mxu1 }
 0x123   : > { %v14267_v37 = vpop.f32.mrf.mxu0  ;;  %3437 = vmatmul.mubr.bf16.vlgmr.msra.gmra.mxu0 %v17428_v31  ;;  %15183 = vmatpush3.bf16.msra.mxu1 %v15842_v32  ;;  %v15877_v32 = vld [vmem:[%s21700_s27 + $0x718] sm:$0xff]  }
 0x124   : > { %14469 = vmatpush3.bf16.msra.mxu0 %v15843_v33  ;;  %15184 = vmatprep.subr.bf16.mxu1 %v17158_v1  ;;  %v15060_v40 = vpop.f32.mrf.mxu1  ;;  %v15878_v33 = vld [vmem:[%s21700_s27 + $0x758] sm:$0xff]  }
 0x125   : > { %v14268_v41 = vpop.f32.mrf.mxu0  ;;  %14470 = vmatprep.subr.bf16.mxu0 %v15844_v34  ;;  %3660 = vmatprep.mubr.bf16.mxu0 %v17414_v25  ;;  %v15879_v34 = vld [vmem:[%s21700_s27 + $0x6d8] sm:$0xff]   ;;  %v15885_v40 = vld [vmem:[%s21700_s27 + $0x6c8] sm:$0xff]  }
 0x126   : > { %v14269_v43 = vadd.f32 %v14268_v41, %v14267_v37  ;;  %v2137_v44 = vpop.f32.mrf.mxu1  ;;  %15198 = vmatprep.mubr.msk.bf16.mxu1 %vm17159_vm0, %v17158_v1  ;;  %v15882_v37 = vld [vmem:[%s21700_s27 + $0x6d0] sm:$0xff]   ;;  %v15886_v41 = vld [vmem:[%s21700_s27 + $0x700] sm:$0xff]  }
 0x127   : > { %v14270_v45 = vpop.f32.mrf.mxu0  ;;  %15185 = vmatpush3.bf16.msra.mxu1 %v15845_v35  ;;  %v15880_v35 = vld [vmem:[%s21700_s27 + $0x710] sm:$0xff]   ;;  %v15889_v44 = vld [vmem:[%s21700_s27 + $0x7f8] sm:$0xff]  }
 0x128   : > { %14471 = vmatpush3.bf16.msra.mxu0 %v15846_v38  ;;  %v2095_v47 = vadd.f32 %v14269_v43, %v13047_v39  ;;  %15186 = vmatprep.subr.bf16.mxu1 %v17158_v1  ;;  %v15061_v49 = vpop.f32.mrf.mxu1  ;;  %v15883_v38 = vld [vmem:[%s21700_s27 + $0x708] sm:$0xff]   ;;  %v15888_v43 = vld [vmem:[%s21700_s27 + $0x6c0] sm:$0xff]   ;;  %v15890_v45 = vld [vmem:[%s21700_s27 + $0x838] sm:$0xff]  }
 0x129   : > { %v14271_v50 = vpop.f32.mrf.mxu0  ;;  %14472 = vmatprep.subr.bf16.mxu0 %v15847_v42  ;;  %v15884_v39 = vld [vmem:[%s21700_s27 + $0x748] sm:$0xff]   ;;  %v15887_v42 = vld [vmem:[%s21700_s27 + $0x740] sm:$0xff]  }
 0x12a   : > { %v18068_v52 = vadd.f32 %v2134_v36, %v2095_v47  ;;  %v15881_v36 = vld [vmem:[%s21700_s27 + $0x750] sm:$0xff]  }
 0x12b   : > { %15187 = vmatpush3.bf16.msra.mxu1 %v15848_v46  ;;  %v15891_v46 = vld [vmem:[%s21700_s27 + $0x7b8] sm:$0xff]   ;;  %v15892_v47 = vld [vmem:[%s21700_s27 + $0x7f0] sm:$0xff]  }
 0x12c   : > { %14473 = vmatpush3.bf16.msra.mxu0 %v15849_v48  ;;  %15188 = vmatprep.subr.bf16.mxu1 %v17158_v1  ;;  %v15893_v48 = vld [vmem:[%s21700_s27 + $0x830] sm:$0xff]  }
 0x12d   : > { %14474 = vmatprep.subr.bf16.mxu0 %v15850_v51  ;;  %v15894_v51 = vld [vmem:[%s21700_s27 + $0x7b0] sm:$0xff]  }
 0x12f   : > { %15189 = vmatpush3.bf16.msra.mxu1 %v15851_v53  ;;  %v13049_v53 = vld [vmem:[%s21702_s25 + $0x3] ss:$0 sm:$0xff] }
 0x130   : > { %14475 = vmatpush3.bf16.msra.mxu0 %v15852_v54  ;;  %15190 = vmatprep.subr.bf16.mxu1 %v17158_v1 }
 0x131   : > { %14476 = vmatprep.subr.bf16.mxu0 %v15853_v55 }
 0x133   : > { %15191 = vmatpush3.bf16.msra.mxu1 %v15854_v56  ;;  %v15895_v56 = vld [vmem:[%s21700_s27 + $0x7e8] sm:$0xff]  }
 0x134   : > { %14477 = vmatpush3.bf16.msra.mxu0 %v15855_v57  ;;  %15192 = vmatprep.subr.bf16.mxu1 %v17158_v1 }
 0x135   : > { %14478 = vmatprep.subr.bf16.mxu0 %v15856_v58 }
 0x137   : > { %15193 = vmatpush3.bf16.msra.mxu1 %v15857_v59 }
 0x138   : > { %14479 = vmatpush3.bf16.msra.mxu0 %v15858_v60  ;;  %15194 = vmatprep.subr.bf16.mxu1 %v17158_v1  ;;  %v15896_v60 = vld [vmem:[%s21700_s27 + $0x828] sm:$0xff]  }
 0x139   : > { %14480 = vmatprep.subr.bf16.mxu0 %v15859_v61 }
 0x13b   : > { %15195 = vmatpush3.bf16.msra.mxu1 %v15860_v62  ;;  %v15897_v62 = vld [vmem:[%s21700_s27 + $0x7a8] sm:$0xff]  }
 0x13c   : > { %14481 = vmatpush3.bf16.msra.mxu0 %v15861_v63  ;;  %15196 = vmatprep.subr.bf16.mxu1 %v17158_v1 }
 0x13d   : > { %14482 = vmatprep.subr.bf16.mxu0 %v15862_v0 }
 0x13f   : > { %15197 = vmatpush3.bf16.msra.mxu1 %v15863_v2  ;;  %v15898_v2 = vld [vmem:[%s21700_s27 + $0x7e0] sm:$0xff]  }
 0x140   : > { %14483 = vmatpush3.bf16.msra.mxu0 %v15864_v3  ;;  %15202 = vmatprep.subr.bf16.mxu1 %v17158_v1 }
 0x141   : > { %14499 = vmatprep.subr.bf16.mxu0 %v15865_v4  ;;  %v15899_v4 = vld [vmem:[%s21700_s27 + $0x820] sm:$0xff]  }
 0x142   : > { %15199 = vmatmul.mubr.bf16.vlgmr.msra.gmra.mxu1 %v17426_v30  ;;  %v2358_v9 = vpop.f32.mrf.mxu1 }
 0x143   : > { %v14298_v10 = vpop.f32.mrf.mxu0  ;;  %3661 = vmatmul.mubr.bf16.vlgmr.msra.gmra.mxu0 %v17428_v31  ;;  %15203 = vmatpush3.bf16.msra.mxu1 %v15866_v5  ;;  %v15900_v5 = vld [vmem:[%s21700_s27 + $0x7a0] sm:$0xff]  }
 0x144   : > { %14500 = vmatpush3.bf16.msra.mxu0 %v15867_v6  ;;  %15204 = vmatprep.subr.bf16.mxu1 %v17158_v1  ;;  %v15080_v14 = vpop.f32.mrf.mxu1  ;;  %v15901_v6 = vld [vmem:[%s21700_s27 + $0x7d8] sm:$0xff]  }
 0x145   : > { %v14299_v15 = vpop.f32.mrf.mxu0  ;;  %14501 = vmatprep.subr.bf16.mxu0 %v15868_v7  ;;  %3884 = vmatprep.mubr.bf16.mxu0 %v17414_v25  ;;  %v15902_v7 = vld [vmem:[%s21700_s27 + $0x818] sm:$0xff]   ;;  %v15908_v14 = vld [vmem:[%s21700_s27 + $0x808] sm:$0xff]  }
 0x146   : > { %v14300_v17 = vadd.f32 %v14299_v15, %v14298_v10  ;;  %v2361_v18 = vpop.f32.mrf.mxu1  ;;  %15218 = vmatprep.mubr.msk.bf16.mxu1 %vm17159_vm0, %v17158_v1  ;;  %v15905_v10 = vld [vmem:[%s21700_s27 + $0x810] sm:$0xff]   ;;  %v15909_v15 = vld [vmem:[%s21700_s27 + $0x788] sm:$0xff]  }
 0x147   : > { %v14301_v19 = vpop.f32.mrf.mxu0  ;;  %15205 = vmatpush3.bf16.msra.mxu1 %v15869_v8  ;;  %v15903_v8 = vld [vmem:[%s21700_s27 + $0x798] sm:$0xff]   ;;  %v15912_v18 = vld [vmem:[%s21700_s27 + $0x780] sm:$0xff]  }
 0x148   : > { %14502 = vmatpush3.bf16.msra.mxu0 %v15870_v11  ;;  %v2319_v21 = vadd.f32 %v14300_v17, %v13048_v12  ;;  %15206 = vmatprep.subr.bf16.mxu1 %v17158_v1  ;;  %v15081_v23 = vpop.f32.mrf.mxu1  ;;  %v15906_v11 = vld [vmem:[%s21700_s27 + $0x790] sm:$0xff]   ;;  %v15907_v12 = vld [vmem:[%s21700_s27 + $0x7c8] sm:$0xff]   ;;  %v15911_v17 = vld [vmem:[%s21700_s27 + $0x800] sm:$0xff]  }
 0x149   : > { %v14302_v24 = vpop.f32.mrf.mxu0  ;;  %14503 = vmatprep.subr.bf16.mxu0 %v15871_v16  ;;  %v15910_v16 = vld [vmem:[%s21700_s27 + $0x7c0] sm:$0xff]   ;;  %v15913_v19 = vld [vmem:[%s21700_s27 + $0x8b8] sm:$0xff]   ;;  %v15917_v23 = vld [vmem:[%s21700_s27 + $0x8f0] sm:$0xff]  }
 0x14a   : > { %v18158_v27 = vadd.f32 %v2358_v9, %v2319_v21  ;;  %v15904_v9 = vld [vmem:[%s21700_s27 + $0x7d0] sm:$0xff]   ;;  %v15915_v21 = vld [vmem:[%s21700_s27 + $0x878] sm:$0xff]  }
 0x14b   : > { %15207 = vmatpush3.bf16.msra.mxu1 %v15872_v20  ;;  %v15914_v20 = vld [vmem:[%s21700_s27 + $0x8f8] sm:$0xff]  }
 0x14c   : > { %14504 = vmatpush3.bf16.msra.mxu0 %v15873_v22  ;;  %15208 = vmatprep.subr.bf16.mxu1 %v17158_v1  ;;  %v15916_v22 = vld [vmem:[%s21700_s27 + $0x8b0] sm:$0xff]  }
 0x14d   : > { %14505 = vmatprep.subr.bf16.mxu0 %v15874_v26 }
 0x14f   : > { %15209 = vmatpush3.bf16.msra.mxu1 %v15875_v28  ;;  %v15918_v28 = vld [vmem:[%s21700_s27 + $0x870] sm:$0xff]  }
 0x150   : > { %14506 = vmatpush3.bf16.msra.mxu0 %v15876_v29  ;;  %15210 = vmatprep.subr.bf16.mxu1 %v17158_v1  ;;  %v13050_v29 = vld [vmem:[%s21702_s25 + $0x4] ss:$0 sm:$0xff] }
 0x151   : > { %14507 = vmatprep.subr.bf16.mxu0 %v15877_v32 }
 0x153   : > { %15211 = vmatpush3.bf16.msra.mxu1 %v15878_v33 }
 0x154   : > { %14508 = vmatpush3.bf16.msra.mxu0 %v15879_v34  ;;  %15212 = vmatprep.subr.bf16.mxu1 %v17158_v1  ;;  %v15919_v34 = vld [vmem:[%s21700_s27 + $0x8a8] sm:$0xff]  }
 0x155   : > { %14509 = vmatprep.subr.bf16.mxu0 %v15880_v35 }
 0x157   : > { %15213 = vmatpush3.bf16.msra.mxu1 %v15881_v36 }
 0x158   : > { %14510 = vmatpush3.bf16.msra.mxu0 %v15882_v37  ;;  %15214 = vmatprep.subr.bf16.mxu1 %v17158_v1 }
 0x159   : > { %14511 = vmatprep.subr.bf16.mxu0 %v15883_v38  ;;  %v15920_v38 = vld [vmem:[%s21700_s27 + $0x8e8] sm:$0xff]  }
 0x15b   : > { %15215 = vmatpush3.bf16.msra.mxu1 %v15884_v39 }
 0x15c   : > { %14512 = vmatpush3.bf16.msra.mxu0 %v15885_v40  ;;  %15216 = vmatprep.subr.bf16.mxu1 %v17158_v1  ;;  %v15921_v40 = vld [vmem:[%s21700_s27 + $0x868] sm:$0xff]  }
 0x15d   : > { %14513 = vmatprep.subr.bf16.mxu0 %v15886_v41 }
 0x15f   : > { %15217 = vmatpush3.bf16.msra.mxu1 %v15887_v42 }
 0x160   : > { %14514 = vmatpush3.bf16.msra.mxu0 %v15888_v43  ;;  %15222 = vmatprep.subr.bf16.mxu1 %v17158_v1  ;;  %v15922_v43 = vld [vmem:[%s21700_s27 + $0x8a0] sm:$0xff]  }
 0x161   : > { %14530 = vmatprep.subr.bf16.mxu0 %v15889_v44 }
 0x162   : > { %15219 = vmatmul.mubr.bf16.vlgmr.msra.gmra.mxu1 %v17426_v30  ;;  %v2582_v49 = vpop.f32.mrf.mxu1 }
 0x163   : > { %v14329_v50 = vpop.f32.mrf.mxu0  ;;  %3885 = vmatmul.mubr.bf16.vlgmr.msra.gmra.mxu0 %v17428_v31  ;;  %15223 = vmatpush3.bf16.msra.mxu1 %v15890_v45  ;;  %v15923_v45 = vld [vmem:[%s21700_s27 + $0x8e0] sm:$0xff]  }
 0x164   : > { %14531 = vmatpush3.bf16.msra.mxu0 %v15891_v46  ;;  %15224 = vmatprep.subr.bf16.mxu1 %v17158_v1  ;;  %v15100_v54 = vpop.f32.mrf.mxu1  ;;  %v15924_v46 = vld [vmem:[%s21700_s27 + $0x860] sm:$0xff]  }
 0x165   : > { %v14330_v55 = vpop.f32.mrf.mxu0  ;;  %14532 = vmatprep.subr.bf16.mxu0 %v15892_v47  ;;  %4108 = vmatprep.mubr.bf16.mxu0 %v17414_v25  ;;  %v15925_v47 = vld [vmem:[%s21700_s27 + $0x898] sm:$0xff]   ;;  %v15931_v54 = vld [vmem:[%s21700_s27 + $0x888] sm:$0xff]  }
 0x166   : > { %v14331_v57 = vadd.f32 %v14330_v55, %v14329_v50  ;;  %v2585_v58 = vpop.f32.mrf.mxu1  ;;  %15238 = vmatprep.mubr.msk.bf16.mxu1 %vm17159_vm0, %v17158_v1  ;;  %v15928_v50 = vld [vmem:[%s21700_s27 + $0x890] sm:$0xff]   ;;  %v15932_v55 = vld [vmem:[%s21700_s27 + $0x8c8] sm:$0xff]  }
 0x167   : > { %v14332_v59 = vpop.f32.mrf.mxu0  ;;  %15225 = vmatpush3.bf16.msra.mxu1 %v15893_v48  ;;  %v15926_v48 = vld [vmem:[%s21700_s27 + $0x8d8] sm:$0xff]   ;;  %v15935_v58 = vld [vmem:[%s21700_s27 + $0x8c0] sm:$0xff]  }
 0x168   : > { %14533 = vmatpush3.bf16.msra.mxu0 %v15894_v51  ;;  %v2543_v61 = vadd.f32 %v14331_v57, %v13049_v53  ;;  %15226 = vmatprep.subr.bf16.mxu1 %v17158_v1  ;;  %v15101_v63 = vpop.f32.mrf.mxu1  ;;  %v15929_v51 = vld [vmem:[%s21700_s27 + $0x8d0] sm:$0xff]   ;;  %v15934_v57 = vld [vmem:[%s21700_s27 + $0x880] sm:$0xff]  }
 0x169   : > { %v14333_v0 = vpop.f32.mrf.mxu0  ;;  %14534 = vmatprep.subr.bf16.mxu0 %v15895_v56  ;;  %v15930_v53 = vld [vmem:[%s21700_s27 + $0x850] sm:$0xff]   ;;  %v15933_v56 = vld [vmem:[%s21700_s27 + $0x848] sm:$0xff]   ;;  %v15936_v59 = vld [vmem:[%s21700_s27 + $0x840] sm:$0xff]  }
 0x16a   : > { %v18248_v3 = vadd.f32 %v2582_v49, %v2543_v61  ;;  %v15927_v49 = vld [vmem:[%s21700_s27 + $0x858] sm:$0xff]   ;;  %v15940_v63 = vld [vmem:[%s21700_s27 + $0x970] sm:$0xff]  }
 0x16b   : > { %15227 = vmatpush3.bf16.msra.mxu1 %v15896_v60  ;;  %v15937_v60 = vld [vmem:[%s21700_s27 + $0x978] sm:$0xff]   ;;  %v15941_v0 = vld [vmem:[%s21700_s27 + $0x9b0] sm:$0xff]  }
 0x16c   : > { %14535 = vmatpush3.bf16.msra.mxu0 %v15897_v62  ;;  %15228 = vmatprep.subr.bf16.mxu1 %v17158_v1  ;;  %v15938_v61 = vld [vmem:[%s21700_s27 + $0x9b8] sm:$0xff]  }
 0x16d   : > { %14536 = vmatprep.subr.bf16.mxu0 %v15898_v2  ;;  %v15939_v62 = vld [vmem:[%s21700_s27 + $0x938] sm:$0xff]  }
 0x16f   : > { %15229 = vmatpush3.bf16.msra.mxu1 %v15899_v4 }
 0x170   : > { %14537 = vmatpush3.bf16.msra.mxu0 %v15900_v5  ;;  %15230 = vmatprep.subr.bf16.mxu1 %v17158_v1  ;;  %v15942_v5 = vld [vmem:[%s21700_s27 + $0x930] sm:$0xff]  }
 0x171   : > { %14538 = vmatprep.subr.bf16.mxu0 %v15901_v6  ;;  %v13051_v6 = vld [vmem:[%s21702_s25 + $0x5] ss:$0 sm:$0xff] }
 0x173   : > { %15231 = vmatpush3.bf16.msra.mxu1 %v15902_v7 }
 0x174   : > { %14539 = vmatpush3.bf16.msra.mxu0 %v15903_v8  ;;  %15232 = vmatprep.subr.bf16.mxu1 %v17158_v1 }
 0x175   : > { %14540 = vmatprep.subr.bf16.mxu0 %v15904_v9  ;;  %v15943_v9 = vld [vmem:[%s21700_s27 + $0x968] sm:$0xff]  }
 0x177   : > { %15233 = vmatpush3.bf16.msra.mxu1 %v15905_v10 }
 0x178   : > { %14541 = vmatpush3.bf16.msra.mxu0 %v15906_v11  ;;  %15234 = vmatprep.subr.bf16.mxu1 %v17158_v1 }
 0x179   : > { %14542 = vmatprep.subr.bf16.mxu0 %v15907_v12 }
 0x17b   : > { %15235 = vmatpush3.bf16.msra.mxu1 %v15908_v14  ;;  %v15944_v14 = vld [vmem:[%s21700_s27 + $0x9a8] sm:$0xff]  }
 0x17c   : > { %14543 = vmatpush3.bf16.msra.mxu0 %v15909_v15  ;;  %15236 = vmatprep.subr.bf16.mxu1 %v17158_v1 }
 0x17d   : > { %14544 = vmatprep.subr.bf16.mxu0 %v15910_v16  ;;  %v15945_v16 = vld [vmem:[%s21700_s27 + $0x928] sm:$0xff]  }
 0x17f   : > { %15237 = vmatpush3.bf16.msra.mxu1 %v15911_v17 }
 0x180   : > { %14545 = vmatpush3.bf16.msra.mxu0 %v15912_v18  ;;  %15242 = vmatprep.subr.bf16.mxu1 %v17158_v1 }
 0x181   : > { %14561 = vmatprep.subr.bf16.mxu0 %v15913_v19  ;;  %v15946_v19 = vld [vmem:[%s21700_s27 + $0x960] sm:$0xff]  }
 0x182   : > { %15239 = vmatmul.mubr.bf16.vlgmr.msra.gmra.mxu1 %v17426_v30  ;;  %v2806_v24 = vpop.f32.mrf.mxu1 }
 0x183   : > { %v14360_v26 = vpop.f32.mrf.mxu0  ;;  %4109 = vmatmul.mubr.bf16.vlgmr.msra.gmra.mxu0 %v17428_v31  ;;  %15243 = vmatpush3.bf16.msra.mxu1 %v15914_v20 }
 0x184   : > { %14562 = vmatpush3.bf16.msra.mxu0 %v15915_v21  ;;  %15244 = vmatprep.subr.bf16.mxu1 %v17158_v1  ;;  %v15120_v32 = vpop.f32.mrf.mxu1  ;;  %v15947_v21 = vld [vmem:[%s21700_s27 + $0x9a0] sm:$0xff]  }
 0x185   : > { %v14361_v33 = vpop.f32.mrf.mxu0  ;;  %14563 = vmatprep.subr.bf16.mxu0 %v15916_v22  ;;  %4332 = vmatprep.mubr.bf16.mxu0 %v17414_v25  ;;  %v15948_v22 = vld [vmem:[%s21700_s27 + $0x920] sm:$0xff]   ;;  %v15954_v32 = vld [vmem:[%s21700_s27 + $0x910] sm:$0xff]  }
 0x186   : > { %v14362_v35 = vadd.f32 %v14361_v33, %v14360_v26  ;;  %v2809_v36 = vpop.f32.mrf.mxu1  ;;  %15258 = vmatprep.mubr.msk.bf16.mxu1 %vm17159_vm0, %v17158_v1  ;;  %v15951_v26 = vld [vmem:[%s21700_s27 + $0x918] sm:$0xff]   ;;  %v15955_v33 = vld [vmem:[%s21700_s27 + $0x948] sm:$0xff]  }
 0x187   : > { %v14363_v37 = vpop.f32.mrf.mxu0  ;;  %15245 = vmatpush3.bf16.msra.mxu1 %v15917_v23  ;;  %v15949_v23 = vld [vmem:[%s21700_s27 + $0x958] sm:$0xff]   ;;  %v15958_v36 = vld [vmem:[%s21700_s27 + $0x940] sm:$0xff]  }
 0x188   : > { %14564 = vmatpush3.bf16.msra.mxu0 %v15918_v28  ;;  %v2767_v39 = vadd.f32 %v14362_v35, %v13050_v29  ;;  %15246 = vmatprep.subr.bf16.mxu1 %v17158_v1  ;;  %v15121_v41 = vpop.f32.mrf.mxu1  ;;  %v15952_v28 = vld [vmem:[%s21700_s27 + $0x950] sm:$0xff]   ;;  %v15957_v35 = vld [vmem:[%s21700_s27 + $0x908] sm:$0xff]   ;;  %v15959_v37 = vld [vmem:[%s21700_s27 + $0x980] sm:$0xff]  }
 0x189   : > { %v14364_v42 = vpop.f32.mrf.mxu0  ;;  %14565 = vmatprep.subr.bf16.mxu0 %v15919_v34  ;;  %v15953_v29 = vld [vmem:[%s21700_s27 + $0x990] sm:$0xff]   ;;  %v15956_v34 = vld [vmem:[%s21700_s27 + $0x988] sm:$0xff]   ;;  %v15963_v41 = vld [vmem:[%s21700_s27 + $0x9f8] sm:$0xff]  }
 0x18a   : > { %v18338_v44 = vadd.f32 %v2806_v24, %v2767_v39  ;;  %v15950_v24 = vld [vmem:[%s21700_s27 + $0x998] sm:$0xff]   ;;  %v15964_v42 = vld [vmem:[%s21700_s27 + $0xa30] sm:$0xff]  }
 0x18b   : > { %15247 = vmatpush3.bf16.msra.mxu1 %v15920_v38  ;;  %v15960_v38 = vld [vmem:[%s21700_s27 + $0x900] sm:$0xff]   ;;  %v15961_v39 = vld [vmem:[%s21700_s27 + $0xa38] sm:$0xff]  }
 0x18c   : > { %14566 = vmatpush3.bf16.msra.mxu0 %v15921_v40  ;;  %15248 = vmatprep.subr.bf16.mxu1 %v17158_v1  ;;  %v15962_v40 = vld [vmem:[%s21700_s27 + $0xa78] sm:$0xff]  }
 0x18d   : > { %14567 = vmatprep.subr.bf16.mxu0 %v15922_v43  ;;  %v15965_v43 = vld [vmem:[%s21700_s27 + $0xa70] sm:$0xff]  }
 0x18f   : > { %15249 = vmatpush3.bf16.msra.mxu1 %v15923_v45  ;;  %v15966_v45 = vld [vmem:[%s21700_s27 + $0x9f0] sm:$0xff]  }
 0x190   : > { %14568 = vmatpush3.bf16.msra.mxu0 %v15924_v46  ;;  %15250 = vmatprep.subr.bf16.mxu1 %v17158_v1 }
 0x191   : > { %14569 = vmatprep.subr.bf16.mxu0 %v15925_v47 }
 0x193   : > { %15251 = vmatpush3.bf16.msra.mxu1 %v15926_v48 }
 0x194   : > { %14570 = vmatpush3.bf16.msra.mxu0 %v15927_v49  ;;  %15252 = vmatprep.subr.bf16.mxu1 %v17158_v1 }
 0x195   : > { %14571 = vmatprep.subr.bf16.mxu0 %v15928_v50  ;;  %v13052_v50 = vld [vmem:[%s21702_s25 + $0x6] ss:$0 sm:$0xff] }
 0x197   : > { %15253 = vmatpush3.bf16.msra.mxu1 %v15929_v51  ;;  %v15967_v51 = vld [vmem:[%s21700_s27 + $0xa28] sm:$0xff]  }
 0x198   : > { %14572 = vmatpush3.bf16.msra.mxu0 %v15930_v53  ;;  %15254 = vmatprep.subr.bf16.mxu1 %v17158_v1 }
 0x199   : > { %14573 = vmatprep.subr.bf16.mxu0 %v15931_v54  ;;  %v15968_v54 = vld [vmem:[%s21700_s27 + $0xa68] sm:$0xff]  }
 0x19b   : > { %15255 = vmatpush3.bf16.msra.mxu1 %v15932_v55 }
 0x19c   : > { %14574 = vmatpush3.bf16.msra.mxu0 %v15933_v56  ;;  %15256 = vmatprep.subr.bf16.mxu1 %v17158_v1 }
 0x19d   : > { %14575 = vmatprep.subr.bf16.mxu0 %v15934_v57  ;;  %v15969_v57 = vld [vmem:[%s21700_s27 + $0x9e8] sm:$0xff]  }
 0x19f   : > { %15257 = vmatpush3.bf16.msra.mxu1 %v15935_v58 }
 0x1a0   : > { %14576 = vmatpush3.bf16.msra.mxu0 %v15936_v59  ;;  %15262 = vmatprep.subr.bf16.mxu1 %v17158_v1 }
 0x1a1   : > { %14592 = vmatprep.subr.bf16.mxu0 %v15937_v60 }
 0x1a2   : > { %15259 = vmatmul.mubr.bf16.vlgmr.msra.gmra.mxu1 %v17426_v30  ;;  %v3030_v2 = vpop.f32.mrf.mxu1 }
 0x1a3   : > { %v14391_v4 = vpop.f32.mrf.mxu0  ;;  %4333 = vmatmul.mubr.bf16.vlgmr.msra.gmra.mxu0 %v17428_v31  ;;  %15263 = vmatpush3.bf16.msra.mxu1 %v15938_v61  ;;  %v15970_v61 = vld [vmem:[%s21700_s27 + $0xa20] sm:$0xff]  }
 0x1a4   : > { %14593 = vmatpush3.bf16.msra.mxu0 %v15939_v62  ;;  %15264 = vmatprep.subr.bf16.mxu1 %v17158_v1  ;;  %v15140_v7 = vpop.f32.mrf.mxu1  ;;  %v15971_v62 = vld [vmem:[%s21700_s27 + $0xa60] sm:$0xff]  }
 0x1a5   : > { %v14392_v8 = vpop.f32.mrf.mxu0  ;;  %14594 = vmatprep.subr.bf16.mxu0 %v15940_v63  ;;  %4556 = vmatprep.mubr.bf16.mxu0 %v17414_v25  ;;  %v15977_v7 = vld [vmem:[%s21700_s27 + $0xa50] sm:$0xff]  }
 0x1a6   : > { %v14393_v10 = vadd.f32 %v14392_v8, %v14391_v4  ;;  %v3033_v11 = vpop.f32.mrf.mxu1  ;;  %15278 = vmatprep.mubr.msk.bf16.mxu1 %vm17159_vm0, %v17158_v1  ;;  %v15974_v4 = vld [vmem:[%s21700_s27 + $0xa58] sm:$0xff]   ;;  %v15978_v8 = vld [vmem:[%s21700_s27 + $0x9d0] sm:$0xff]  }
 0x1a7   : > { %v14394_v12 = vpop.f32.mrf.mxu0  ;;  %15265 = vmatpush3.bf16.msra.mxu1 %v15941_v0  ;;  %v15972_v0 = vld [vmem:[%s21700_s27 + $0x9e0] sm:$0xff]   ;;  %v15981_v11 = vld [vmem:[%s21700_s27 + $0x9c8] sm:$0xff]  }
 0x1a8   : > { %14595 = vmatpush3.bf16.msra.mxu0 %v15942_v5  ;;  %v2991_v15 = vadd.f32 %v14393_v10, %v13051_v6  ;;  %15266 = vmatprep.subr.bf16.mxu1 %v17158_v1  ;;  %v15141_v17 = vpop.f32.mrf.mxu1  ;;  %v15975_v5 = vld [vmem:[%s21700_s27 + $0x9d8] sm:$0xff]   ;;  %v15976_v6 = vld [vmem:[%s21700_s27 + $0xa10] sm:$0xff]   ;;  %v15980_v10 = vld [vmem:[%s21700_s27 + $0xa48] sm:$0xff]  }
 0x1a9   : > { %v14395_v18 = vpop.f32.mrf.mxu0  ;;  %14596 = vmatprep.subr.bf16.mxu0 %v15943_v9  ;;  %v15979_v9 = vld [vmem:[%s21700_s27 + $0xa08] sm:$0xff]   ;;  %v15982_v12 = vld [vmem:[%s21700_s27 + $0xa00] sm:$0xff]   ;;  %v15986_v17 = vld [vmem:[%s21700_s27 + $0xb38] sm:$0xff]  }
 0x1aa   : > { %v18428_v20 = vadd.f32 %v3030_v2, %v2991_v15  ;;  %v15973_v2 = vld [vmem:[%s21700_s27 + $0xa18] sm:$0xff]   ;;  %v15984_v15 = vld [vmem:[%s21700_s27 + $0x9c0] sm:$0xff]  }
 0x1ab   : > { %15267 = vmatpush3.bf16.msra.mxu1 %v15944_v14  ;;  %v15983_v14 = vld [vmem:[%s21700_s27 + $0xa40] sm:$0xff]   ;;  %v15987_v18 = vld [vmem:[%s21700_s27 + $0xab8] sm:$0xff]  }
 0x1ac   : > { %14597 = vmatpush3.bf16.msra.mxu0 %v15945_v16  ;;  %15268 = vmatprep.subr.bf16.mxu1 %v17158_v1  ;;  %v15985_v16 = vld [vmem:[%s21700_s27 + $0xaf8] sm:$0xff]  }
 0x1ad   : > { %14598 = vmatprep.subr.bf16.mxu0 %v15946_v19  ;;  %v15988_v19 = vld [vmem:[%s21700_s27 + $0xaf0] sm:$0xff]  }
 0x1af   : > { %15269 = vmatpush3.bf16.msra.mxu1 %v15947_v21  ;;  %v15989_v21 = vld [vmem:[%s21700_s27 + $0xb30] sm:$0xff]  }
 0x1b0   : > { %14599 = vmatpush3.bf16.msra.mxu0 %v15948_v22  ;;  %15270 = vmatprep.subr.bf16.mxu1 %v17158_v1  ;;  %v15990_v22 = vld [vmem:[%s21700_s27 + $0xab0] sm:$0xff]  }
 0x1b1   : > { %14600 = vmatprep.subr.bf16.mxu0 %v15949_v23 }
 0x1b3   : > { %15271 = vmatpush3.bf16.msra.mxu1 %v15950_v24 }
 0x1b4   : > { %14601 = vmatpush3.bf16.msra.mxu0 %v15951_v26  ;;  %15272 = vmatprep.subr.bf16.mxu1 %v17158_v1  ;;  %v13053_v26 = vld [vmem:[%s21702_s25 + $0x7] ss:$0 sm:$0xff] }
 0x1b5   : > { %14602 = vmatprep.subr.bf16.mxu0 %v15952_v28  ;;  %v15991_v28 = vld [vmem:[%s21700_s27 + $0xae8] sm:$0xff]  }
 0x1b7   : > { %15273 = vmatpush3.bf16.msra.mxu1 %v15953_v29 }
 0x1b8   : > { %14603 = vmatpush3.bf16.msra.mxu0 %v15954_v32  ;;  %15274 = vmatprep.subr.bf16.mxu1 %v17158_v1 }
 0x1b9   : > { %14604 = vmatprep.subr.bf16.mxu0 %v15955_v33  ;;  %v15992_v33 = vld [vmem:[%s21700_s27 + $0xb28] sm:$0xff]  }
 0x1bb   : > { %15275 = vmatpush3.bf16.msra.mxu1 %v15956_v34 }
 0x1bc   : > { %14605 = vmatpush3.bf16.msra.mxu0 %v15957_v35  ;;  %15276 = vmatprep.subr.bf16.mxu1 %v17158_v1  ;;  %v15993_v35 = vld [vmem:[%s21700_s27 + $0xaa8] sm:$0xff]  }
 0x1bd   : > { %14606 = vmatprep.subr.bf16.mxu0 %v15958_v36 }
 0x1bf   : > { %15277 = vmatpush3.bf16.msra.mxu1 %v15959_v37 }
 0x1c0   : > { %14607 = vmatpush3.bf16.msra.mxu0 %v15960_v38  ;;  %15282 = vmatprep.subr.bf16.mxu1 %v17158_v1  ;;  %v15994_v38 = vld [vmem:[%s21700_s27 + $0xae0] sm:$0xff]  }
 0x1c1   : > { %14623 = vmatprep.subr.bf16.mxu0 %v15961_v39 }
 0x1c2   : > { %15279 = vmatmul.mubr.bf16.vlgmr.msra.gmra.mxu1 %v17426_v30  ;;  %v3254_v46 = vpop.f32.mrf.mxu1 }
 0x1c3   : > { %v14422_v47 = vpop.f32.mrf.mxu0  ;;  %4557 = vmatmul.mubr.bf16.vlgmr.msra.gmra.mxu0 %v17428_v31  ;;  %15283 = vmatpush3.bf16.msra.mxu1 %v15962_v40 }
 0x1c4   : > { %14624 = vmatpush3.bf16.msra.mxu0 %v15963_v41  ;;  %15284 = vmatprep.subr.bf16.mxu1 %v17158_v1  ;;  %v15160_v48 = vpop.f32.mrf.mxu1 }
 0x1c5   : > { %v14423_v49 = vpop.f32.mrf.mxu0  ;;  %14625 = vmatprep.subr.bf16.mxu0 %v15964_v42  ;;  %4780 = vmatprep.mubr.bf16.mxu0 %v17414_v25  ;;  %v15995_v42 = vld [vmem:[%s21700_s27 + $0xb20] sm:$0xff]   ;;  %v15999_v48 = vld [vmem:[%s21700_s27 + $0xa98] sm:$0xff]  }
 0x1c6   : > { %v14424_v53 = vadd.f32 %v14423_v49, %v14422_v47  ;;  %v3257_v55 = vpop.f32.mrf.mxu1  ;;  %15298 = vmatprep.mubr.msk.bf16.mxu1 %vm17159_vm0, %v17158_v1  ;;  %v15998_v47 = vld [vmem:[%s21700_s27 + $0xb18] sm:$0xff]   ;;  %v16000_v49 = vld [vmem:[%s21700_s27 + $0xad0] sm:$0xff]  }
 0x1c7   : > { %v14425_v56 = vpop.f32.mrf.mxu0  ;;  %15285 = vmatpush3.bf16.msra.mxu1 %v15965_v43  ;;  %v16005_v55 = vld [vmem:[%s21700_s27 + $0xa88] sm:$0xff]  }
 0x1c8   : > { %14626 = vmatpush3.bf16.msra.mxu0 %v15966_v45  ;;  %v3215_v58 = vadd.f32 %v14424_v53, %v13052_v50  ;;  %15286 = vmatprep.subr.bf16.mxu1 %v17158_v1  ;;  %v15161_v59 = vpop.f32.mrf.mxu1  ;;  %v15996_v45 = vld [vmem:[%s21700_s27 + $0xaa0] sm:$0xff]   ;;  %v16001_v50 = vld [vmem:[%s21700_s27 + $0xb10] sm:$0xff]   ;;  %v16003_v53 = vld [vmem:[%s21700_s27 + $0xac8] sm:$0xff]  }
 0x1c9   : > { %v14426_v60 = vpop.f32.mrf.mxu0  ;;  %14627 = vmatprep.subr.bf16.mxu0 %v15967_v51  ;;  %v16002_v51 = vld [vmem:[%s21700_s27 + $0xa90] sm:$0xff]   ;;  %v16006_v56 = vld [vmem:[%s21700_s27 + $0xac0] sm:$0xff]   ;;  %v16009_v59 = vld [vmem:[%s21700_s27 + $0xbb8] sm:$0xff]  }
 0x1ca   : > { %v18521_v63 = vadd.f32 %v3254_v46, %v3215_v58  ;;  %v15997_v46 = vld [vmem:[%s21700_s27 + $0xad8] sm:$0xff]   ;;  %v16008_v58 = vld [vmem:[%s21700_s27 + $0xa80] sm:$0xff]  }
 0x1cb   : > { %15287 = vmatpush3.bf16.msra.mxu1 %v15968_v54  ;;  %v16004_v54 = vld [vmem:[%s21700_s27 + $0xb08] sm:$0xff]   ;;  %v16010_v60 = vld [vmem:[%s21700_s27 + $0xbf8] sm:$0xff]  }
 0x1cc   : > { %14628 = vmatpush3.bf16.msra.mxu0 %v15969_v57  ;;  %15288 = vmatprep.subr.bf16.mxu1 %v17158_v1  ;;  %v16007_v57 = vld [vmem:[%s21700_s27 + $0xb00] sm:$0xff]  }
 0x1cd   : > { %14629 = vmatprep.subr.bf16.mxu0 %v15970_v61  ;;  %v16011_v61 = vld [vmem:[%s21700_s27 + $0xb78] sm:$0xff]  }
 0x1cf   : > { %15289 = vmatpush3.bf16.msra.mxu1 %v15971_v62  ;;  %v16012_v62 = vld [vmem:[%s21700_s27 + $0xbb0] sm:$0xff]  }
 0x1d0   : > { %14630 = vmatpush3.bf16.msra.mxu0 %v15972_v0  ;;  %15290 = vmatprep.subr.bf16.mxu1 %v17158_v1  ;;  %v16013_v0 = vld [vmem:[%s21700_s27 + $0xbf0] sm:$0xff]  }
 0x1d1   : > { %14631 = vmatprep.subr.bf16.mxu0 %v15973_v2  ;;  %v16014_v2 = vld [vmem:[%s21700_s27 + $0xb70] sm:$0xff]  }
 0x1d3   : > { %15291 = vmatpush3.bf16.msra.mxu1 %v15974_v4 }
 0x1d4   : > { %14632 = vmatpush3.bf16.msra.mxu0 %v15975_v5  ;;  %15292 = vmatprep.subr.bf16.mxu1 %v17158_v1 }
 0x1d5   : > { %14633 = vmatprep.subr.bf16.mxu0 %v15976_v6  ;;  %v13054_v6 = vld [vmem:[%s21702_s25 + $0x8] ss:$0 sm:$0xff] }
 0x1d7   : > { %15293 = vmatpush3.bf16.msra.mxu1 %v15977_v7  ;;  %v16015_v7 = vld [vmem:[%s21700_s27 + $0xba8] sm:$0xff]  }
 0x1d8   : > { %14634 = vmatpush3.bf16.msra.mxu0 %v15978_v8  ;;  %15294 = vmatprep.subr.bf16.mxu1 %v17158_v1 }
 0x1d9   : > { %14635 = vmatprep.subr.bf16.mxu0 %v15979_v9 }
 0x1db   : > { %15295 = vmatpush3.bf16.msra.mxu1 %v15980_v10  ;;  %v16016_v10 = vld [vmem:[%s21700_s27 + $0xbe8] sm:$0xff]  }
 0x1dc   : > { %14636 = vmatpush3.bf16.msra.mxu0 %v15981_v11  ;;  %15296 = vmatprep.subr.bf16.mxu1 %v17158_v1 }
 0x1dd   : > { %14637 = vmatprep.subr.bf16.mxu0 %v15982_v12  ;;  %v16017_v12 = vld [vmem:[%s21700_s27 + $0xb68] sm:$0xff]  }
 0x1df   : > { %15297 = vmatpush3.bf16.msra.mxu1 %v15983_v14 }
 0x1e0   : > { %14638 = vmatpush3.bf16.msra.mxu0 %v15984_v15  ;;  %15302 = vmatprep.subr.bf16.mxu1 %v17158_v1 }
 0x1e1   : > { %14654 = vmatprep.subr.bf16.mxu0 %v15985_v16  ;;  %v16018_v16 = vld [vmem:[%s21700_s27 + $0xba0] sm:$0xff]  }
 0x1e2   : > { %15299 = vmatmul.mubr.bf16.vlgmr.msra.gmra.mxu1 %v17426_v30  ;;  %v3478_v23 = vpop.f32.mrf.mxu1 }
 0x1e3   : > { %v14453_v24 = vpop.f32.mrf.mxu0  ;;  %4781 = vmatmul.mubr.bf16.vlgmr.msra.gmra.mxu0 %v17428_v31  ;;  %15303 = vmatpush3.bf16.msra.mxu1 %v15986_v17 }
 0x1e4   : > { %14655 = vmatpush3.bf16.msra.mxu0 %v15987_v18  ;;  %15304 = vmatprep.subr.bf16.mxu1 %v17158_v1  ;;  %v15180_v29 = vpop.f32.mrf.mxu1 }
 0x1e5   : > { %v14454_v32 = vpop.f32.mrf.mxu0  ;;  %14656 = vmatprep.subr.bf16.mxu0 %v15988_v19  ;;  %5004 = vmatprep.mubr.bf16.mxu0 %v17414_v25  ;;  %v16024_v29 = vld [vmem:[%s21700_s27 + $0xb90] sm:$0xff]  }
 0x1e6   : > { %v14455_v34 = vadd.f32 %v14454_v32, %v14453_v24  ;;  %v3481_v36 = vpop.f32.mrf.mxu1  ;;  %15318 = vmatprep.mubr.msk.bf16.mxu1 %vm17159_vm0, %v17158_v1  ;;  %v16021_v24 = vld [vmem:[%s21700_s27 + $0xb98] sm:$0xff]   ;;  %v16025_v32 = vld [vmem:[%s21700_s27 + $0xbd0] sm:$0xff]  }
 0x1e7   : > { %v14456_v37 = vpop.f32.mrf.mxu0  ;;  %15305 = vmatpush3.bf16.msra.mxu1 %v15989_v21  ;;  %v16019_v21 = vld [vmem:[%s21700_s27 + $0xbe0] sm:$0xff]   ;;  %v16029_v36 = vld [vmem:[%s21700_s27 + $0xb48] sm:$0xff]  }
 0x1e8   : > { %14657 = vmatpush3.bf16.msra.mxu0 %v15990_v22  ;;  %v3439_v39 = vadd.f32 %v14455_v34, %v13053_v26  ;;  %15306 = vmatprep.subr.bf16.mxu1 %v17158_v1  ;;  %v15181_v40 = vpop.f32.mrf.mxu1  ;;  %v16022_v26 = vld [vmem:[%s21700_s27 + $0xbd8] sm:$0xff]   ;;  %v16027_v34 = vld [vmem:[%s21700_s27 + $0xb88] sm:$0xff]   ;;  %v16030_v37 = vld [vmem:[%s21700_s27 + $0xb80] sm:$0xff]  }
 0x1e9   : > { %v14457_v41 = vpop.f32.mrf.mxu0  ;;  %14658 = vmatprep.subr.bf16.mxu0 %v15991_v28  ;;  %v16023_v28 = vld [vmem:[%s21700_s27 + $0xb58] sm:$0xff]  }
 0x1ea   : > { %v18611_v43 = vadd.f32 %v3478_v23, %v3439_v39  ;;  %v16020_v23 = vld [vmem:[%s21700_s27 + $0xb60] sm:$0xff]   ;;  %v16033_v40 = vld [vmem:[%s21700_s27 + $0xc78] sm:$0xff]  }
 0x1eb   : > { %15307 = vmatpush3.bf16.msra.mxu1 %v15992_v33  ;;  %v16026_v33 = vld [vmem:[%s21700_s27 + $0xb50] sm:$0xff]   ;;  %v16032_v39 = vld [vmem:[%s21700_s27 + $0xb40] sm:$0xff]   ;;  %v16034_v41 = vld [vmem:[%s21700_s27 + $0xcb8] sm:$0xff]  }
 0x1ec   : > { %14659 = vmatpush3.bf16.msra.mxu0 %v15993_v35  ;;  %15308 = vmatprep.subr.bf16.mxu1 %v17158_v1  ;;  %v16028_v35 = vld [vmem:[%s21700_s27 + $0xbc8] sm:$0xff]  }
 0x1ed   : > { %14660 = vmatprep.subr.bf16.mxu0 %v15994_v38  ;;  %v16031_v38 = vld [vmem:[%s21700_s27 + $0xbc0] sm:$0xff]  }
 0x1ef   : > { %15309 = vmatpush3.bf16.msra.mxu1 %v15995_v42  ;;  %v16035_v42 = vld [vmem:[%s21700_s27 + $0xc38] sm:$0xff]  }
 0x1f0   : > { %14661 = vmatpush3.bf16.msra.mxu0 %v15996_v45  ;;  %15310 = vmatprep.subr.bf16.mxu1 %v17158_v1  ;;  %v16036_v45 = vld [vmem:[%s21700_s27 + $0xc70] sm:$0xff]  }
 0x1f1   : > { %14662 = vmatprep.subr.bf16.mxu0 %v15997_v46  ;;  %v16037_v46 = vld [vmem:[%s21700_s27 + $0xcb0] sm:$0xff]  }
 0x1f3   : > { %15311 = vmatpush3.bf16.msra.mxu1 %v15998_v47  ;;  %v16038_v47 = vld [vmem:[%s21700_s27 + $0xc30] sm:$0xff]  }
 0x1f4   : > { %14663 = vmatpush3.bf16.msra.mxu0 %v15999_v48  ;;  %15312 = vmatprep.subr.bf16.mxu1 %v17158_v1 }
 0x1f5   : > { %14664 = vmatprep.subr.bf16.mxu0 %v16000_v49 }
 0x1f7   : > { %15313 = vmatpush3.bf16.msra.mxu1 %v16001_v50  ;;  %v16039_v50 = vld [vmem:[%s21700_s27 + $0xc68] sm:$0xff]  }
 0x1f8   : > { %14665 = vmatpush3.bf16.msra.mxu0 %v16002_v51  ;;  %15314 = vmatprep.subr.bf16.mxu1 %v17158_v1 }
 0x1f9   : > { %14666 = vmatprep.subr.bf16.mxu0 %v16003_v53 }
 0x1fb   : > { %15315 = vmatpush3.bf16.msra.mxu1 %v16004_v54  ;;  %v16040_v54 = vld [vmem:[%s21700_s27 + $0xca8] sm:$0xff]  }
 0x1fc   : > { %14667 = vmatpush3.bf16.msra.mxu0 %v16005_v55  ;;  %15316 = vmatprep.subr.bf16.mxu1 %v17158_v1  ;;  %v16041_v55 = vld [vmem:[%s21700_s27 + $0xc28] sm:$0xff]  }
 0x1fd   : > { %14668 = vmatprep.subr.bf16.mxu0 %v16006_v56 }
 0x1ff   : > { %15317 = vmatpush3.bf16.msra.mxu1 %v16007_v57 }
 0x200   : > { %14669 = vmatpush3.bf16.msra.mxu0 %v16008_v58  ;;  %15322 = vmatprep.subr.bf16.mxu1 %v17158_v1  ;;  %v16042_v58 = vld [vmem:[%s21700_s27 + $0xc60] sm:$0xff]  }
 0x201   : > { %14685 = vmatprep.subr.bf16.mxu0 %v16009_v59 }
 0x202   : > { %15319 = vmatmul.mubr.bf16.vlgmr.msra.gmra.mxu1 %v17426_v30  ;;  %v3702_v4 = vpop.f32.mrf.mxu1 }
 0x203   : > { %v14484_v5 = vpop.f32.mrf.mxu0  ;;  %5005 = vmatmul.mubr.bf16.vlgmr.msra.gmra.mxu0 %v17428_v31  ;;  %15323 = vmatpush3.bf16.msra.mxu1 %v16010_v60 }
 0x204   : > { %14686 = vmatpush3.bf16.msra.mxu0 %v16011_v61  ;;  %15324 = vmatprep.subr.bf16.mxu1 %v17158_v1  ;;  %v15200_v8 = vpop.f32.mrf.mxu1  ;;  %v16043_v61 = vld [vmem:[%s21700_s27 + $0xca0] sm:$0xff]  }
 0x205   : > { %v14485_v9 = vpop.f32.mrf.mxu0  ;;  %14687 = vmatprep.subr.bf16.mxu0 %v16012_v62  ;;  %5228 = vmatprep.mubr.bf16.mxu0 %v17414_v25  ;;  %v16044_v62 = vld [vmem:[%s21700_s27 + $0xc20] sm:$0xff]   ;;  %v16051_v8 = vld [vmem:[%s21700_s27 + $0xc48] sm:$0xff]  }
 0x206   : > { %v14486_v11 = vadd.f32 %v14485_v9, %v14484_v5  ;;  %v3705_v14 = vpop.f32.mrf.mxu1  ;;  %15338 = vmatprep.mubr.msk.bf16.mxu1 %vm17159_vm0, %v17158_v1  ;;  %v16048_v5 = vld [vmem:[%s21700_s27 + $0xc50] sm:$0xff]   ;;  %v16052_v9 = vld [vmem:[%s21700_s27 + $0xc88] sm:$0xff]  }
 0x207   : > { %v14487_v15 = vpop.f32.mrf.mxu0  ;;  %15325 = vmatpush3.bf16.msra.mxu1 %v16013_v0  ;;  %v16045_v0 = vld [vmem:[%s21700_s27 + $0xc58] sm:$0xff]   ;;  %v16056_v14 = vld [vmem:[%s21700_s27 + $0xc00] sm:$0xff]  }
 0x208   : > { %14688 = vmatpush3.bf16.msra.mxu0 %v16014_v2  ;;  %v3663_v17 = vadd.f32 %v14486_v11, %v13054_v6  ;;  %15326 = vmatprep.subr.bf16.mxu1 %v17158_v1  ;;  %v15201_v18 = vpop.f32.mrf.mxu1  ;;  %v16046_v2 = vld [vmem:[%s21700_s27 + $0xc98] sm:$0xff]   ;;  %v16049_v6 = vld [vmem:[%s21700_s27 + $0xc90] sm:$0xff]   ;;  %v16054_v11 = vld [vmem:[%s21700_s27 + $0xc40] sm:$0xff]  }
 0x209   : > { %v14488_v19 = vpop.f32.mrf.mxu0  ;;  %14689 = vmatprep.subr.bf16.mxu0 %v16015_v7  ;;  %v16050_v7 = vld [vmem:[%s21700_s27 + $0xc10] sm:$0xff]   ;;  %v16057_v15 = vld [vmem:[%s21700_s27 + $0xd38] sm:$0xff]  }
 0x20a   : > { %v18701_v22 = vadd.f32 %v3702_v4, %v3663_v17  ;;  %v16047_v4 = vld [vmem:[%s21700_s27 + $0xc18] sm:$0xff]   ;;  %v16060_v18 = vld [vmem:[%s21700_s27 + $0xd30] sm:$0xff]  }
 0x20b   : > { %15327 = vmatpush3.bf16.msra.mxu1 %v16016_v10  ;;  %v16053_v10 = vld [vmem:[%s21700_s27 + $0xc08] sm:$0xff]   ;;  %v16059_v17 = vld [vmem:[%s21700_s27 + $0xcf8] sm:$0xff]   ;;  %v16061_v19 = vld [vmem:[%s21700_s27 + $0xd70] sm:$0xff]  }
 0x20c   : > { %14690 = vmatpush3.bf16.msra.mxu0 %v16017_v12  ;;  %15328 = vmatprep.subr.bf16.mxu1 %v17158_v1  ;;  %v16055_v12 = vld [vmem:[%s21700_s27 + $0xc80] sm:$0xff]  }
 0x20d   : > { %14691 = vmatprep.subr.bf16.mxu0 %v16018_v16  ;;  %v16058_v16 = vld [vmem:[%s21700_s27 + $0xd78] sm:$0xff]  }
 0x20f   : > { %15329 = vmatpush3.bf16.msra.mxu1 %v16019_v21  ;;  %v16062_v21 = vld [vmem:[%s21700_s27 + $0xcf0] sm:$0xff]  }
 0x210   : > { %14692 = vmatpush3.bf16.msra.mxu0 %v16020_v23  ;;  %15330 = vmatprep.subr.bf16.mxu1 %v17158_v1 }
 0x211   : > { %14693 = vmatprep.subr.bf16.mxu0 %v16021_v24 }
 0x213   : > { %15331 = vmatpush3.bf16.msra.mxu1 %v16022_v26  ;;  %v16063_v26 = vld [vmem:[%s21700_s27 + $0xd28] sm:$0xff]  }
 0x214   : > { %14694 = vmatpush3.bf16.msra.mxu0 %v16023_v28  ;;  %15332 = vmatprep.subr.bf16.mxu1 %v17158_v1 }
 0x215   : > { %14695 = vmatprep.subr.bf16.mxu0 %v16024_v29 }
 0x217   : > { %15333 = vmatpush3.bf16.msra.mxu1 %v16025_v32  ;;  %v16064_v32 = vld [vmem:[%s21700_s27 + $0xd68] sm:$0xff]  }
 0x218   : > { %14696 = vmatpush3.bf16.msra.mxu0 %v16026_v33  ;;  %15334 = vmatprep.subr.bf16.mxu1 %v17158_v1  ;;  %v16065_v33 = vld [vmem:[%s21700_s27 + $0xce8] sm:$0xff]  }
 0x219   : > { %14697 = vmatprep.subr.bf16.mxu0 %v16027_v34 }
 0x21b   : > { %15335 = vmatpush3.bf16.msra.mxu1 %v16028_v35 }
 0x21c   : > { %14698 = vmatpush3.bf16.msra.mxu0 %v16029_v36  ;;  %15336 = vmatprep.subr.bf16.mxu1 %v17158_v1  ;;  %v16066_v36 = vld [vmem:[%s21700_s27 + $0xd20] sm:$0xff]  }
 0x21d   : > { %14699 = vmatprep.subr.bf16.mxu0 %v16030_v37 }
 0x21f   : > { %15337 = vmatpush3.bf16.msra.mxu1 %v16031_v38 }
 0x220   : > { %14700 = vmatpush3.bf16.msra.mxu0 %v16032_v39  ;;  %15342 = vmatprep.subr.bf16.mxu1 %v17158_v1  ;;  %v16067_v39 = vld [vmem:[%s21700_s27 + $0xd60] sm:$0xff]  }
 0x221   : > { %14716 = vmatprep.subr.bf16.mxu0 %v16033_v40  ;;  %v16069_v40 = vld [vmem:[%s21700_s27 + $0xd18] sm:$0xff]  }
 0x222   : > { %15339 = vmatmul.mubr.bf16.vlgmr.msra.gmra.mxu1 %v17426_v30  ;;  %v18767_v48 = vpop.f32.mrf.mxu1 }
 0x223   : > { %v18769_v49 = vpop.f32.mrf.mxu0  ;;  %5229 = vmatmul.mubr.bf16.vlgmr.msra.gmra.mxu0 %v17428_v31  ;;  %15343 = vmatpush3.bf16.msra.mxu1 %v16034_v41  ;;  %v16070_v41 = vld [vmem:[%s21700_s27 + $0xd58] sm:$0xff]  }
 0x224   : > { %14717 = vmatpush3.bf16.msra.mxu0 %v16035_v42  ;;  %15344 = vmatprep.subr.bf16.mxu1 %v17158_v1  ;;  %v15220_v51 = vpop.f32.mrf.mxu1  ;;  %v16071_v42 = vld [vmem:[%s21700_s27 + $0xcd8] sm:$0xff]  }
 0x225   : > { %v18776_v53 = vpop.f32.mrf.mxu0  ;;  %14718 = vmatprep.subr.bf16.mxu0 %v16036_v45  ;;  %5452 = vmatprep.mubr.bf16.mxu0 %v17414_v25  ;;  %v16072_v45 = vld [vmem:[%s21700_s27 + $0xd10] sm:$0xff]   ;;  %v16076_v51 = vld [vmem:[%s21700_s27 + $0xd48] sm:$0xff]  }
 0x226   : > { %v3929_v56 = vpop.f32.mrf.mxu1  ;;  %15358 = vmatprep.mubr.msk.bf16.mxu1 %vm17159_vm0, %v17158_v1 }
 0x227   : > { %v14518_v57 = vpop.f32.mrf.mxu0  ;;  %15345 = vmatpush3.bf16.msra.mxu1 %v16037_v46  ;;  %v16073_v46 = vld [vmem:[%s21700_s27 + $0xd50] sm:$0xff]   ;;  %v13055_v56 = vld [vmem:[%s21702_s25 + $0x9] ss:$0 sm:$0xff] }
 0x228   : > { %14719 = vmatpush3.bf16.msra.mxu0 %v16038_v47  ;;  %15346 = vmatprep.subr.bf16.mxu1 %v17158_v1  ;;  %v15221_v59 = vpop.f32.mrf.mxu1  ;;  %v16074_v47 = vld [vmem:[%s21700_s27 + $0xcd0] sm:$0xff]   ;;  %v16079_v57 = vld [vmem:[%s21700_s27 + $0xd40] sm:$0xff]  }
 0x229   : > { %v14519_v60 = vpop.f32.mrf.mxu0  ;;  %14720 = vmatprep.subr.bf16.mxu0 %v16039_v50  ;;  %v16075_v50 = vld [vmem:[%s21700_s27 + $0xd08] sm:$0xff]   ;;  %v16080_v59 = vld [vmem:[%s21700_s27 + $0xcc0] sm:$0xff]  }
 0x22a   : > { %v5731_v60 = vpack.c.bf16 %v18611_v43, %v18611_v43 }
 0x22b   : > { %15347 = vmatpush3.bf16.msra.mxu1 %v16040_v54  ;;  %v16077_v54 = vld [vmem:[%s21700_s27 + $0xcc8] sm:$0xff]  }
 0x22c   : > { %14721 = vmatpush3.bf16.msra.mxu0 %v16041_v55  ;;  %15348 = vmatprep.subr.bf16.mxu1 %v17158_v1  ;;  %v16078_v55 = vld [vmem:[%s21700_s27 + $0xd00] sm:$0xff]  }
 0x22d   : > { %14722 = vmatprep.subr.bf16.mxu0 %v16042_v58  ;;  %v14517_v58 = vadd.f32 %v18776_v53, %v18769_v49  ;;  %v5794_v49 = vsel %vm5743_vm1, %v5731_v60, 0 }
 0x22f   : > { %15349 = vmatpush3.bf16.msra.mxu1 %v16043_v61  ;;  %v3887_v61 = vadd.f32 %v14517_v58, %v13055_v56 }
 0x230   : > { %14723 = vmatpush3.bf16.msra.mxu0 %v16044_v62  ;;  %15350 = vmatprep.subr.bf16.mxu1 %v17158_v1  ;;  %v5730_v62 = vpack.c.bf16 %v18521_v63, %v18521_v63 }
 0x231   : > { %14724 = vmatprep.subr.bf16.mxu0 %v16045_v0  ;;  %v3927_v53 = vadd.f32 %v18767_v48, %v3887_v61  ;;  %v13056_v0 = vld [vmem:[%s21702_s25 + $0xa] ss:$0 sm:$0xff]  ;;  %v13057_v48 = vld [vmem:[%s21702_s25 + $0xb] ss:$0 sm:$0xff] }
 0x232   : > { %v5748_v63 = vsel %vm5743_vm1, %v5730_v62, 0 }
 0x233   : > { %15351 = vmatpush3.bf16.msra.mxu1 %v16046_v2 }
 0x234   : > { %14725 = vmatpush3.bf16.msra.mxu0 %v16047_v4  ;;  %15352 = vmatprep.subr.bf16.mxu1 %v17158_v1 }
 0x235   : > { %14726 = vmatprep.subr.bf16.mxu0 %v16048_v5 }
 0x237   : > { %15353 = vmatpush3.bf16.msra.mxu1 %v16049_v6  ;;  %v5733_v6 = vpack.c.bf16 %v3927_v53, %v3927_v53 }
 0x238   : > { %14727 = vmatpush3.bf16.msra.mxu0 %v16050_v7  ;;  %15354 = vmatprep.subr.bf16.mxu1 %v17158_v1 }
 0x239   : > { %14728 = vmatprep.subr.bf16.mxu0 %v16051_v8  ;;  %v5732_v8 = vpack.c.bf16 %v18701_v22, %v18701_v22 }
 0x23b   : > { %15355 = vmatpush3.bf16.msra.mxu1 %v16052_v9 }
 0x23c   : > { %14729 = vmatpush3.bf16.msra.mxu0 %v16053_v10  ;;  %15356 = vmatprep.subr.bf16.mxu1 %v17158_v1 }
 0x23d   : > { %14730 = vmatprep.subr.bf16.mxu0 %v16054_v11  ;;  %v5725_v11 = vpack.c.bf16 %v18068_v52, %v18068_v52 }
 0x23f   : > { %15357 = vmatpush3.bf16.msra.mxu1 %v16055_v12 }
 0x240   : > { %14731 = vmatpush3.bf16.msra.mxu0 %v16056_v14  ;;  %15362 = vmatprep.subr.bf16.mxu1 %v17158_v1 }
 0x241   : > { %14747 = vmatprep.subr.bf16.mxu0 %v16057_v15  ;;  %v5724_v15 = vpack.c.bf16 %v17978_v13, %v17978_v13 }
 0x242   : > { %15359 = vmatmul.mubr.bf16.vlgmr.msra.gmra.mxu1 %v17426_v30  ;;  %v18858_v23 = vpop.f32.mrf.mxu1 }
 0x243   : > { %v18860_v24 = vpop.f32.mrf.mxu0  ;;  %5453 = vmatmul.mubr.bf16.vlgmr.msra.gmra.mxu0 %v17428_v31  ;;  %15363 = vmatpush3.bf16.msra.mxu1 %v16058_v16 }
 0x244   : > { %14748 = vmatpush3.bf16.msra.mxu0 %v16059_v17  ;;  %15364 = vmatprep.subr.bf16.mxu1 %v17158_v1  ;;  %v15240_v28 = vpop.f32.mrf.mxu1  ;;  %v5886_v17 = vsel %vm5743_vm1, %v5733_v6, 0 }
 0x245   : > { %v18867_v29 = vpop.f32.mrf.mxu0  ;;  %14749 = vmatprep.subr.bf16.mxu0 %v16060_v18  ;;  %15378 = vmatprep.mubr.msk.bf16.mxu1 %vm17159_vm0, %v17158_v1 }
 0x246   : > { %v4153_v34 = vpop.f32.mrf.mxu1  ;;  %5676 = vmatprep.mubr.bf16.mxu0 %v17414_v25  ;;  %v16068_v25 = vld [vmem:[%s21700_s27 + $0xce0] sm:$0xff]   ;;  %v14548_v2 = vadd.f32 %v18867_v29, %v18860_v24 }
 0x247   : > { %v14549_v35 = vpop.f32.mrf.mxu0  ;;  %15365 = vmatpush3.bf16.msra.mxu1 %v16061_v19  ;;  %v5840_v19 = vsel %vm5743_vm1, %v5732_v8, 0 }
 0x248   : > { %14750 = vmatpush3.bf16.msra.mxu0 %v16062_v21  ;;  %15366 = vmatprep.subr.bf16.mxu1 %v17158_v1  ;;  %v15241_v37 = vpop.f32.mrf.mxu1  ;;  %v4111_v9 = vadd.f32 %v14548_v2, %v13056_v0  ;;  %v5727_v21 = vpack.c.bf16 %v18248_v3, %v18248_v3  ;;  %v5728_v3 = vpack.c.bf16 %v18338_v44, %v18338_v44 }
 0x249   : > { %v14550_v38 = vpop.f32.mrf.mxu0  ;;  %14751 = vmatprep.subr.bf16.mxu0 %v16063_v26 }
 0x24a   : > { %v4151_v22 = vadd.f32 %v18858_v23, %v4111_v9  ;;  %v5726_v23 = vpack.c.bf16 %v18158_v27, %v18158_v27  ;;  %v5729_v27 = vpack.c.bf16 %v18428_v20, %v18428_v20 }
 0x24b   : > { %15367 = vmatpush3.bf16.msra.mxu1 %v16064_v32  ;;  %v13058_v32 = vld [vmem:[%s21702_s25 + $0xc] ss:$0 sm:$0xff] }
 0x24c   : > { %14752 = vmatpush3.bf16.msra.mxu0 %v16065_v33  ;;  %15368 = vmatprep.subr.bf16.mxu1 %v17158_v1  ;;  %v5734_v52 = vpack.c.bf16 %v4151_v22, %v4151_v22 }
 0x24d   : > { %14753 = vmatprep.subr.bf16.mxu0 %v16066_v36 }
 0x24e   : > { %v5932_v26 = vsel %vm5743_vm1, %v5734_v52, 0  ;;  %v13062_v52 = vld [vmem:[%s21702_s25 + $0x10] ss:$0 sm:$0xff] }
 0x24f   : > { %15369 = vmatpush3.bf16.msra.mxu1 %v16067_v39 }
 0x250   : > { %14754 = vmatpush3.bf16.msra.mxu0 %v16068_v25  ;;  %15370 = vmatprep.subr.bf16.mxu1 %v17158_v1 }
 0x251   : > { %14755 = vmatprep.subr.bf16.mxu0 %v16069_v40 }
 0x253   : > { %15371 = vmatpush3.bf16.msra.mxu1 %v16070_v41 }
 0x254   : > { %14756 = vmatpush3.bf16.msra.mxu0 %v16071_v42  ;;  %15372 = vmatprep.subr.bf16.mxu1 %v17158_v1 }
 0x255   : > { %14757 = vmatprep.subr.bf16.mxu0 %v16072_v45  ;;  %v13059_v45 = vld [vmem:[%s21702_s25 + $0xd] ss:$0 sm:$0xff] }
 0x257   : > { %15373 = vmatpush3.bf16.msra.mxu1 %v16073_v46 }
 0x258   : > { %14758 = vmatpush3.bf16.msra.mxu0 %v16074_v47  ;;  %15374 = vmatprep.subr.bf16.mxu1 %v17158_v1 }
 0x259   : > { %14759 = vmatprep.subr.bf16.mxu0 %v16075_v50 }
 0x25b   : > { %15375 = vmatpush3.bf16.msra.mxu1 %v16076_v51 }
 0x25c   : > { %14760 = vmatpush3.bf16.msra.mxu0 %v16077_v54  ;;  %15376 = vmatprep.subr.bf16.mxu1 %v17158_v1 }
 0x25d   : > { %14761 = vmatprep.subr.bf16.mxu0 %v16078_v55 }
 0x25f   : > { %15377 = vmatpush3.bf16.msra.mxu1 %v16079_v57 }
 0x260   : > { %14762 = vmatpush3.bf16.msra.mxu0 %v16080_v59  ;;  %15388 = vmatprep.subr.bf16.mxu1 %v17158_v1 }
 0x261   : > { %15382 = vmatprep.subr.bf16.mxu0 %v17158_v1 }
 0x262   : > { %15379 = vmatmul.mubr.bf16.vlgmr.msra.gmra.mxu1 %v17426_v30  ;;  %v4374_v43 = vpop.f32.mrf.mxu1 }
 0x263   : > { %v14577_v4 = vpop.f32.mrf.mxu0  ;;  %5677 = vmatmul.mubr.bf16.vlgmr.msra.gmra.mxu0 %v17428_v31  ;;  %15389 = vmatpush3.bf16.xpose.msra.mxu1 %v5794_v49  ;;  %v13060_v49 = vld [vmem:[%s21702_s25 + $0xe] ss:$0 sm:$0xff] }
 0x264   : > { %15383 = vmatpush3.bf16.xpose.msra.mxu0 %v5748_v63  ;;  %15390 = vmatprep.mubr.msk.bf16.mxu1 %vm17159_vm0, %v17158_v1  ;;  %v15260_v5 = vpop.f32.mrf.mxu1 }
 0x265   : > { %v14578_v30 = vpop.f32.mrf.mxu0  ;;  %15384 = vmatprep.mubr.msk.bf16.mxu0 %vm17159_vm0, %v17158_v1  ;;  %15400 = vmatprep.subr.bf16.mxu1 %v17158_v1 }
 0x266   : > { %v14579_v7 = vadd.f32 %v14578_v30, %v14577_v4  ;;  %15394 = vmatprep.subr.bf16.mxu0 %v17158_v1  ;;  %v4377_v31 = vpop.f32.mrf.mxu1 }
 0x267   : > { %v14580_v10 = vpop.f32.mrf.mxu0  ;;  %v13061_v31 = vld [vmem:[%s21702_s25 + $0xf] ss:$0 sm:$0xff] }
 0x268   : > { %v4335_v12 = vadd.f32 %v14579_v7, %v13057_v48  ;;  %v15261_v14 = vpop.f32.mrf.mxu1 }
 0x269   : > { %v14581_v16 = vpop.f32.mrf.mxu0 }
 0x26a   : > { %v4375_v18 = vadd.f32 %v4374_v43, %v4335_v12  ;;  %15391 = vmatmul.mubr.msk.bf16.vlgmr.msra.gmra.mxu1 %vm5743_vm1, %v5725_v11 }
 0x26b   : > { %15385 = vmatmul.mubr.msk.bf16.vlgmr.msra.gmra.mxu0 %vm5743_vm1, %v5724_v15  ;;  %15401 = vmatpush3.bf16.xpose.msra.mxu1 %v5886_v17 }
 0x26c   : > { %15395 = vmatpush3.bf16.xpose.msra.mxu0 %v5840_v19  ;;  %15402 = vmatprep.mubr.msk.bf16.mxu1 %vm17159_vm0, %v17158_v1  ;;  %v5735_v13 = vpack.c.bf16 %v4375_v18, %v4375_v18 }
 0x26d   : > { %15396 = vmatprep.mubr.msk.bf16.mxu0 %vm17159_vm0, %v17158_v1  ;;  %15412 = vmatprep.subr.bf16.mxu1 %v17158_v1 }
 0x26e   : > { %15406 = vmatprep.subr.bf16.mxu0 %v17158_v1  ;;  %v5978_v24 = vsel %vm5743_vm1, %v5735_v13, 0 }
 0x272   : > { %15403 = vmatmul.mubr.msk.bf16.vlgmr.msra.gmra.mxu1 %vm5743_vm1, %v5727_v21 }
 0x273   : > { %15397 = vmatmul.mubr.msk.bf16.vlgmr.msra.gmra.mxu0 %vm5743_vm1, %v5726_v23  ;;  %15413 = vmatpush3.bf16.xpose.msra.mxu1 %v5978_v24 }
 0x274   : > { %15407 = vmatpush3.bf16.xpose.msra.mxu0 %v5932_v26  ;;  %15414 = vmatprep.mubr.msk.bf16.mxu1 %vm17159_vm0, %v17158_v1 }
 0x275   : > { %15408 = vmatprep.mubr.msk.bf16.mxu0 %vm17159_vm0, %v17158_v1  ;;  %15418 = vmatprep.subr.bf16.mxu0 %v17158_v1 }
 0x276   : > { %15424 = vmatprep.subr.bf16.mxu1 %v17158_v1 }
 0x27a   : > { %15415 = vmatmul.mubr.msk.bf16.vlgmr.msra.gmra.mxu1 %vm5743_vm1, %v5729_v27 }
 0x27b   : > { %15409 = vmatmul.mubr.msk.bf16.vlgmr.msra.gmra.mxu0 %vm5743_vm1, %v5728_v3  ;;  %15426 = vmatprep.mubr.msk.bf16.mxu1 %vm17159_vm0, %v17158_v1 }
 0x27c   : > { %15420 = vmatprep.mubr.msk.bf16.mxu0 %vm17159_vm0, %v17158_v1 }
 0x282   : > { %v4598_v28 = vpop.f32.mrf.mxu1 }
 0x283   : > { %v14608_v29 = vpop.f32.mrf.mxu0 }
 0x284   : > { %v15280_v20 = vpop.f32.mrf.mxu1 }
 0x285   : > { %v14609_v33 = vpop.f32.mrf.mxu0 }
 0x286   : > { %v14610_v34 = vadd.f32 %v14609_v33, %v14608_v29  ;;  %v4601_v44 = vpop.f32.mrf.mxu1  ;;  %v13063_v33 = vld [vmem:[%s21702_s25 + $0x11] ss:$0 sm:$0xff] }
 0x287   : > { %v14611_v35 = vpop.f32.mrf.mxu0 }
 0x288   : > { %v4559_v36 = vadd.f32 %v14610_v34, %v13058_v32  ;;  %v15281_v37 = vpop.f32.mrf.mxu1 }
 0x289   : > { %v14612_v38 = vpop.f32.mrf.mxu0 }
 0x28a   : > { %v4599_v39 = vadd.f32 %v4598_v28, %v4559_v36 }
 0x28c   : > { %v6093_v25 = vpack.c.bf16 %v4599_v39, %v4599_v39 }
 0x28e   : > { %v6104_v40 = vsel %vm6102_vm2, %v6093_v25, 0  ;;  %v13496_v25 = vld [vmem:[%s694_s26] ss:$0 sm:$0xff] }
 0x28f   : > { %15419 = vmatpush3.bf16.msra.mxu0 %v6104_v40 }
 0x290   : > { %15430 = vmatprep.subr.bf16.mxu0 %v17158_v1 }
 0x2a2   : > { %v4822_v41 = vpop.f32.mrf.mxu1 }
 0x2a3   : > { %v14639_v42 = vpop.f32.mrf.mxu0 }
 0x2a4   : > { %v15300_v46 = vpop.f32.mrf.mxu1 }
 0x2a5   : > { %v14640_v47 = vpop.f32.mrf.mxu0 }
 0x2a6   : > { %v14641_v50 = vadd.f32 %v14640_v47, %v14639_v42  ;;  %v4825_v51 = vpop.f32.mrf.mxu1 }
 0x2a7   : > { %v14642_v54 = vpop.f32.mrf.mxu0 }
 0x2a8   : > { %v4783_v55 = vadd.f32 %v14641_v50, %v13059_v45  ;;  %v15301_v56 = vpop.f32.mrf.mxu1 }
 0x2a9   : > { %v14643_v57 = vpop.f32.mrf.mxu0 }
 0x2aa   : > { %v4823_v58 = vadd.f32 %v4822_v41, %v4783_v55 }
 0x2ac   : > { %v6094_v59 = vpack.c.bf16 %v4823_v58, %v4823_v58 }
 0x2ae   : > { %v6150_v60 = vsel %vm6102_vm2, %v6094_v59, 0 }
 0x2af   : > { %15425 = vmatpush3.bf16.msra.mxu1 %v6150_v60 }
 0x2b0   : > { %15436 = vmatprep.subr.bf16.mxu1 %v17158_v1 }
 0x2c2   : > { %v5046_v61 = vpop.f32.mrf.mxu1 }
 0x2c3   : > { %v14670_v62 = vpop.f32.mrf.mxu0 }
 0x2c4   : > { %v15320_v53 = vpop.f32.mrf.mxu1 }
 0x2c5   : > { %v14671_v0 = vpop.f32.mrf.mxu0 }
 0x2c6   : > { %v14672_v43 = vadd.f32 %v14671_v0, %v14670_v62  ;;  %v5049_v63 = vpop.f32.mrf.mxu1 }
 0x2c7   : > { %v14673_v2 = vpop.f32.mrf.mxu0 }
 0x2c8   : > { %v5007_v4 = vadd.f32 %v14672_v43, %v13060_v49  ;;  %v15321_v48 = vpop.f32.mrf.mxu1 }
 0x2c9   : > { %v14674_v5 = vpop.f32.mrf.mxu0 }
 0x2ca   : > { %v19013_v30 = vadd.f32 %v5046_v61, %v5007_v4 }
 0x2e2   : > { %v5270_v6 = vpop.f32.mrf.mxu1 }
 0x2e3   : > { %v14701_v7 = vpop.f32.mrf.mxu0 }
 0x2e4   : > { %v15340_v8 = vpop.f32.mrf.mxu1 }
 0x2e5   : > { %v14702_v9 = vpop.f32.mrf.mxu0 }
 0x2e6   : > { %v14703_v10 = vadd.f32 %v14702_v9, %v14701_v7  ;;  %v5273_v11 = vpop.f32.mrf.mxu1 }
 0x2e7   : > { %v14704_v12 = vpop.f32.mrf.mxu0 }
 0x2e8   : > { %v5231_v14 = vadd.f32 %v14703_v10, %v13061_v31  ;;  %v15341_v15 = vpop.f32.mrf.mxu1 }
 0x2e9   : > { %v14705_v16 = vpop.f32.mrf.mxu0 }
 0x2ea   : > { %v19018_v17 = vadd.f32 %v5270_v6, %v5231_v14 }
 0x302   : > { %v5494_v18 = vpop.f32.mrf.mxu1 }
 0x303   : > { %v14732_v19 = vpop.f32.mrf.mxu0 }
 0x304   : > { %v15360_v22 = vpop.f32.mrf.mxu1 }
 0x305   : > { %v14733_v13 = vpop.f32.mrf.mxu0 }
 0x306   : > { %v14734_v21 = vadd.f32 %v14733_v13, %v14732_v19  ;;  %v5497_v23 = vpop.f32.mrf.mxu1 }
 0x307   : > { %v14735_v24 = vpop.f32.mrf.mxu0 }
 0x308   : > { %v5455_v26 = vadd.f32 %v14734_v21, %v13062_v52  ;;  %v15361_v27 = vpop.f32.mrf.mxu1 }
 0x309   : > { %v14736_v3 = vpop.f32.mrf.mxu0 }
 0x30a   : > { %v19023_v28 = vadd.f32 %v5494_v18, %v5455_v26 }
 0x322   : > { %v5718_v29 = vpop.f32.mrf.mxu1 }
 0x323   : > { %v14763_v32 = vpop.f32.mrf.mxu0 }
 0x324   : > { %v15380_v20 = vpop.f32.mrf.mxu1 }
 0x325   : > { %v14764_v34 = vpop.f32.mrf.mxu0 }
 0x326   : > { %v14765_v44 = vadd.f32 %v14764_v34, %v14763_v32  ;;  %v5721_v35 = vpop.f32.mrf.mxu1 }
 0x327   : > { %v14766_v36 = vpop.f32.mrf.mxu0 }
 0x328   : > { %v5679_v37 = vadd.f32 %v14765_v44, %v13063_v33  ;;  %v15381_v38 = vpop.f32.mrf.mxu1 }
 0x329   : > { %v14767_v39 = vpop.f32.mrf.mxu0 }
 0x32a   : > { %v19032_v40 = vadd.f32 %v5718_v29, %v5679_v37  ;;  %v5830_v41 = vpop.f32.mrf.mxu1 }
 0x32b   : > { %v5784_v42 = vpop.f32.mrf.mxu0  ;;  %v5831_v50 = vadd.f32 %v13496_v25, %v5830_v41 }
 0x32c   : > { %v5785_v45 = vadd.f32 %v13496_v25, %v5784_v42  ;;  %v15392_v46 = vpop.f32.mrf.mxu1 }
 0x32d   : > { %v15386_v47 = vpop.f32.mrf.mxu0  ;;  %v6024_v59 = vsel %vm6020_vm3, %v5831_v50, -inf }
 0x32e   : > { %v5833_v51 = vpop.f32.mrf.mxu1  ;;  %v6021_v54 = vsel %vm6020_vm3, %v5785_v45, -inf }
 0x32f   : > { %6022 = vmax.xlane.f32.xlu0 %v6021_v54  ;;  %v5787_v55 = vpop.f32.mrf.mxu0 }
 0x330   : > { %v15393_v56 = vpop.f32.mrf.mxu1 }
 0x331   : > { %v15387_v57 = vpop.f32.mrf.mxu0 }
 0x332   : > { %v5922_v58 = vpop.f32.mrf.mxu1 }
 0x333   : > { %6025 = vmax.xlane.f32.xlu0 %v6024_v59  ;;  %v5876_v60 = vpop.f32.mrf.mxu0  ;;  %v5923_v53 = vadd.f32 %v13496_v25, %v5922_v58  ;;  %v6095_v59 = vpack.c.bf16 %v19013_v30, %v19013_v30 }
 0x334   : > { %v5877_v61 = vadd.f32 %v13496_v25, %v5876_v60  ;;  %v15404_v62 = vpop.f32.mrf.mxu1 }
 0x335   : > { %v15398_v49 = vpop.f32.mrf.mxu0  ;;  %v6030_v5 = vsel %vm6020_vm3, %v5923_v53, -inf }
 0x336   : > { %v5925_v0 = vpop.f32.mrf.mxu1  ;;  %v6027_v43 = vsel %vm6020_vm3, %v5877_v61, -inf }
 0x337   : > { %6028 = vmax.xlane.f32.xlu1 %v6027_v43  ;;  %v5879_v63 = vpop.f32.mrf.mxu0  ;;  %v6096_v0 = vpack.c.bf16 %v19018_v17, %v19018_v17 }
 0x338   : > { %v15405_v2 = vpop.f32.mrf.mxu1 }
 0x339   : > { %v15399_v4 = vpop.f32.mrf.mxu0 }
 0x33a   : > { %v6014_v48 = vpop.f32.mrf.mxu1  ;;  %v6242_v4 = vsel %vm6102_vm2, %v6096_v0, 0 }
 0x33b   : > { %6031 = vmax.xlane.f32.xlu1 %v6030_v5  ;;  %v5968_v6 = vpop.f32.mrf.mxu0  ;;  %v6015_v9 = vadd.f32 %v13496_v25, %v6014_v48  ;;  %v6097_v48 = vpack.c.bf16 %v19023_v28, %v19023_v28  ;;  %v6098_v28 = vpack.c.bf16 %v19032_v40, %v19032_v40  ;;  %v16087_v40 = vld [vmem:[%s21704_s5 + $0xa8] ss:$12 sps:$4 sm:$0xff]  }
 0x33c   : > { %v5969_v7 = vadd.f32 %v13496_v25, %v5968_v6  ;;  %v15416_v31 = vpop.f32.mrf.mxu1  ;;  %v16089_v6 = vld [vmem:[%s21704_s5 + $0xac] ss:$12 sps:$4 sm:$0xff]  }
 0x33d   : > { %v15410_v8 = vpop.f32.mrf.mxu0  ;;  %v6036_v16 = vsel %vm6020_vm3, %v6015_v9, -inf  ;;  %v6288_v31 = vsel %vm6102_vm2, %v6097_v48, 0  ;;  %v16124_v48 = vld [vmem:[%s21704_s5 + $0x16c] ss:$12 sps:$4 sm:$0xff]  }
 0x33e   : > { %v6017_v10 = vpop.f32.mrf.mxu1  ;;  %v6033_v11 = vsel %vm6020_vm3, %v5969_v7, -inf }
 0x33f   : > { %6034 = vmax.xlane.f32.xlu0 %v6033_v11  ;;  %v5971_v12 = vpop.f32.mrf.mxu0  ;;  %v16083_v10 = vld [vmem:[%s21704_s5 + $0x4c] ss:$12 sps:$4 sm:$0xff]  }
 0x340   : > { %v15417_v14 = vpop.f32.mrf.mxu1  ;;  %v6334_v12 = vsel %vm6102_vm2, %v6098_v28, 0  ;;  %v16125_v28 = vld [vmem:[%s21704_s5 + $0x98] ss:$12 sps:$4 sm:$0xff]  }
 0x341   : > { %v15411_v15 = vpop.f32.mrf.mxu0 }
 0x343   : > { %6037 = vmax.xlane.f32.xlu0 %v6036_v16  ;;  %v16095_v16 = vld [vmem:[%s21704_s5 + $0x94] ss:$12 sps:$4 sm:$0xff]  }
 0x3b8   : > { %v6023_v18 = vpop.xlane.xlu0 %6022 }
 0x3b9   : > { %v6039_v19 = vsub.f32 %v5785_v45, %v6023_v18 }
 0x3bb   : > { %v6045_v22 = vmul.f32 1.442695, %v6039_v19 }
 0x3bc   : > { %v6026_v13 = vpop.xlane.xlu0 %6025 }
 0x3bd   : > { %17041 = vpow2.f32 %v6045_v22  ;;  %v6040_v52 = vsub.f32 %v5831_v50, %v6026_v13  ;;  %v16081_v22 = vld [vmem:[%s21704_s5 + $0x48] ss:$12 sps:$4 sm:$0xff]   ;;  %v16093_v13 = vld [vmem:[%s21704_s5 + $0x90] ss:$12 sps:$4 sm:$0xff]  }
 0x3bf   : > { %v6047_v21 = vmul.f32 1.442695, %v6040_v52 }
 0x3c0   : > { %v6029_v23 = vpop.xlane.xlu1 %6028 }
 0x3c1   : > { %17043 = vpow2.f32 %v6047_v21  ;;  %v6041_v24 = vsub.f32 %v5877_v61, %v6029_v23  ;;  %v16086_v21 = vld [vmem:[%s21704_s5 + $0x34] ss:$12 sps:$4 sm:$0xff]   ;;  %v16101_v23 = vld [vmem:[%s21704_s5 + $0x7c] ss:$12 sps:$4 sm:$0xff]  }
 0x3c3   : > { %v6049_v26 = vmul.f32 1.442695, %v6041_v24  ;;  %v16084_v24 = vld [vmem:[%s21704_s5 + $0x30] ss:$12 sps:$4 sm:$0xff]  }
 0x3c4   : > { %v6032_v27 = vpop.xlane.xlu1 %6031 }
 0x3c5   : > { %17045 = vpow2.f32 %v6049_v26  ;;  %v6042_v3 = vsub.f32 %v5923_v53, %v6032_v27  ;;  %v6196_v53 = vsel %vm6102_vm2, %v6095_v59, 0  ;;  %v16099_v26 = vld [vmem:[%s21704_s5 + $0x78] ss:$12 sps:$4 sm:$0xff]   ;;  %v16092_v27 = vld [vmem:[%s21704_s5 + $0x1c] ss:$12 sps:$4 sm:$0xff]  }
 0x3c7   : > { %v6051_v29 = vmul.f32 1.442695, %v6042_v3  ;;  %v16090_v3 = vld [vmem:[%s21704_s5 + $0x18] ss:$12 sps:$4 sm:$0xff]  }
 0x3c8   : > { %v6035_v32 = vpop.xlane.xlu0 %6034 }
 0x3c9   : > { %17047 = vpow2.f32 %v6051_v29  ;;  %v6043_v20 = vsub.f32 %v5969_v7, %v6035_v32  ;;  %v16098_v29 = vld [vmem:[%s21704_s5 + $0x4] ss:$12 sps:$4 sm:$0xff]   ;;  %v16096_v32 = vld [vmem:[%s21704_s5] ss:$12 sps:$4 sm:$0xff]  }
 0x3ca   : > { %v17042_v33 = vpop.eup %17041 }
 0x3cb   : > { %v6053_v34 = vmul.f32 1.442695, %v6043_v20  ;;  %v6057_v44 = vsel %vm6020_vm3, %v17042_v33, 0.0  ;;  %v16104_v20 = vld [vmem:[%s21704_s5 + $0x64] ss:$12 sps:$4 sm:$0xff]  }
 0x3cc   : > { %6058 = vadd.xlane.f32.xlu1 %v6057_v44  ;;  %v6038_v35 = vpop.xlane.xlu0 %6037  ;;  %v16108_v44 = vld [vmem:[%s21704_s5 + $0x10c] ss:$12 sps:$4 sm:$0xff]  }
 0x3cd   : > { %17049 = vpow2.f32 %v6053_v34  ;;  %v6044_v36 = vsub.f32 %v6015_v9, %v6038_v35  ;;  %v17160_v34 = vmov 0  }
 0x3ce   : > { %v17044_v37 = vpop.eup %17043 }
 0x3cf   : > { %v6055_v38 = vmul.f32 1.442695, %v6044_v36  ;;  %v6060_v39 = vsel %vm6020_vm3, %v17044_v37, 0.0  ;;  %v16105_v36 = vld [vmem:[%s21704_s5 + $0x50] ss:$12 sps:$4 sm:$0xff]  }
 0x3d0   : > { %6061 = vadd.xlane.f32.xlu1 %v6060_v39 }
 0x3d1   : > { %17051 = vpow2.f32 %v6055_v38 }
 0x3d2   : > { %v17046_v25 = vpop.eup %17045 }
 0x3d3   : > { %v6063_v41 = vsel %vm6020_vm3, %v17046_v25, 0.0 }
 0x3d4   : > { %6064 = vadd.xlane.f32.xlu0 %v6063_v41  ;;  %v16106_v41 = vld [vmem:[%s21704_s5 + $0x108] ss:$12 sps:$4 sm:$0xff]  }
 0x3d6   : > { %v17048_v42 = vpop.eup %17047 }
 0x3d7   : > { %v6066_v45 = vsel %vm6020_vm3, %v17048_v42, 0.0 }
 0x3d8   : > { %6067 = vadd.xlane.f32.xlu1 %v6066_v45 }
 0x3da   : > { %v17050_v46 = vpop.eup %17049 }
 0x3db   : > { %v6069_v47 = vsel %vm6020_vm3, %v17050_v46, 0.0 }
 0x3dc   : > { %6070 = vadd.xlane.f32.xlu0 %v6069_v47 }
 0x3de   : > { %v17052_v50 = vpop.eup %17051 }
 0x3df   : > { %v6072_v51 = vsel %vm6020_vm3, %v17052_v50, 0.0 }
 0x3e0   : > { %6073 = vadd.xlane.f32.xlu1 %v6072_v51 }
 0x455   : > { %v6059_v54 = vpop.xlane.xlu1 %6058 }
 0x456   : > { %17053 = vrcp.f32 %v6059_v54 }
 0x459   : > { %v6062_v55 = vpop.xlane.xlu1 %6061 }
 0x45a   : > { %17055 = vrcp.f32 %v6062_v55  ;;  %v16110_v55 = vld [vmem:[%s21704_s5 + $0xf0] ss:$12 sps:$4 sm:$0xff]  }
 0x45d   : > { %v6065_v56 = vpop.xlane.xlu0 %6064 }
 0x45e   : > { %17057 = vrcp.f32 %v6065_v56  ;;  %v16113_v56 = vld [vmem:[%s21704_s5 + $0x20] ss:$12 sps:$4 sm:$0xff]  }
 0x461   : > { %v6068_v57 = vpop.xlane.xlu1 %6067 }
 0x462   : > { %17059 = vrcp.f32 %v6068_v57  ;;  %v16116_v57 = vld [vmem:[%s21704_s5 + $0xdc] ss:$12 sps:$4 sm:$0xff]  }
 0x463   : > { %v17054_v58 = vpop.eup %17053 }
 0x464   : > { %v6081_v60 = vmul.f32 %v17054_v58, %v17042_v33  ;;  %v16102_v33 = vld [vmem:[%s21704_s5 + $0x60] ss:$12 sps:$4 sm:$0xff]  }
 0x465   : > { %v6071_v61 = vpop.xlane.xlu0 %6070 }
 0x466   : > { %17061 = vrcp.f32 %v6071_v61  ;;  %v6087_v62 = vpack.c.bf16 %v6081_v60, %v6081_v60 }
 0x467   : > { %v17056_v49 = vpop.eup %17055 }
 0x468   : > { %15421 = vmatmul.mubr.msk.bf16.vlgmr.msra.gmra.mxu0 %vm6020_vm3, %v6087_v62  ;;  %v6082_v43 = vmul.f32 %v17056_v49, %v17044_v37  ;;  %v16114_v62 = vld [vmem:[%s21704_s5 + $0xd8] ss:$12 sps:$4 sm:$0xff]   ;;  %v16117_v49 = vld [vmem:[%s21704_s5 + $0x8] ss:$12 sps:$4 sm:$0xff]  }
 0x469   : > { %15431 = vmatpush3.bf16.msra.mxu0 %v6196_v53  ;;  %v6074_v63 = vpop.xlane.xlu1 %6073  ;;  %15432 = vmatprep.mubr.msk.bf16.mxu0 %vm17159_vm0, %v17158_v1  ;;  %v16120_v53 = vld [vmem:[%s21704_s5 + $0xc4] ss:$12 sps:$4 sm:$0xff]  }
 0x46a   : > { %17063 = vrcp.f32 %v6074_v63  ;;  %v6088_v30 = vpack.c.bf16 %v6082_v43, %v6082_v43  ;;  %15442 = vmatprep.subr.bf16.mxu0 %v17158_v1 }
 0x46b   : > { %v17058_v2 = vpop.eup %17057 }
 0x46c   : > { %15427 = vmatmul.mubr.msk.bf16.vlgmr.msra.gmra.mxu1 %vm6020_vm3, %v6088_v30  ;;  %v6083_v17 = vmul.f32 %v17058_v2, %v17046_v25  ;;  %v16118_v2 = vld [vmem:[%s21704_s5 + $0xc0] ss:$12 sps:$4 sm:$0xff]  }
 0x46d   : > { %15437 = vmatpush3.bf16.msra.mxu1 %v6242_v4  ;;  %15438 = vmatprep.mubr.msk.bf16.mxu1 %vm17159_vm0, %v17158_v1  ;;  %v16121_v4 = vld [vmem:[%s21704_s5 + $0xb0] ss:$12 sps:$4 sm:$0xff]  }
 0x46e   : > { %v6089_v5 = vpack.c.bf16 %v6083_v17, %v6083_v17  ;;  %15448 = vmatprep.subr.bf16.mxu1 %v17158_v1 }
 0x46f   : > { %v17060_v7 = vpop.eup %17059 }
 0x470   : > { %15433 = vmatmul.mubr.msk.bf16.vlgmr.msra.gmra.mxu0 %vm6020_vm3, %v6089_v5  ;;  %v6084_v8 = vmul.f32 %v17060_v7, %v17048_v42  ;;  %v16109_v42 = vld [vmem:[%s21704_s5 + $0x38] ss:$12 sps:$4 sm:$0xff]  }
 0x471   : > { %15443 = vmatpush3.bf16.msra.mxu0 %v6288_v31  ;;  %15444 = vmatprep.mubr.msk.bf16.mxu0 %vm17159_vm0, %v17158_v1  ;;  %v16122_v31 = vld [vmem:[%s21704_s5 + $0x168] ss:$12 sps:$4 sm:$0xff]  }
 0x472   : > { %v6090_v9 = vpack.c.bf16 %v6084_v8, %v6084_v8  ;;  %6701 = vmatprep.subr.bf16.mxu0 %v16089_v6 }
 0x473   : > { %v17062_v11 = vpop.eup %17061 }
 0x474   : > { %15439 = vmatmul.mubr.msk.bf16.vlgmr.msra.gmra.mxu1 %vm6020_vm3, %v6090_v9  ;;  %v6085_v14 = vmul.f32 %v17062_v11, %v17050_v46  ;;  %v16112_v46 = vld [vmem:[%s21704_s5 + $0xf4] ss:$12 sps:$4 sm:$0xff]  }
 0x475   : > { %15449 = vmatpush3.bf16.msra.mxu1 %v6334_v12  ;;  %15450 = vmatprep.mubr.msk.bf16.mxu1 %vm17159_vm0, %v17158_v1  ;;  %v16128_v9 = vld [vmem:[%s21704_s5 + $0x154] ss:$12 sps:$4 sm:$0xff]  }
 0x476   : > { %v6091_v15 = vpack.c.bf16 %v6085_v14, %v6085_v14  ;;  %6553 = vmatprep.subr.bf16.mxu1 %v16083_v10  ;;  %v16126_v14 = vld [vmem:[%s21704_s5 + $0x150] ss:$12 sps:$4 sm:$0xff]  }
 0x477   : > { %v17064_v18 = vpop.eup %17063 }
 0x478   : > { %15445 = vmatmul.mubr.msk.bf16.vlgmr.msra.gmra.mxu0 %vm6020_vm3, %v6091_v15  ;;  %v6086_v19 = vmul.f32 %v17064_v18, %v17052_v50  ;;  %v16132_v15 = vld [vmem:[%s21704_s5 + $0x13c] ss:$12 sps:$4 sm:$0xff]   ;;  %v16130_v18 = vld [vmem:[%s21704_s5 + $0x138] ss:$12 sps:$4 sm:$0xff]  }
 0x479   : > { %6702 = vmatpush1.bf16.msra.mxu0 %v16087_v40  ;;  %6725 = vmatprep.mubr.bf16.mxu0 %v17160_v34  ;;  %v16129_v40 = vld [vmem:[%s21704_s5 + $0x80] ss:$12 sps:$4 sm:$0xff]  }
 0x47a   : > { %v6092_v52 = vpack.c.bf16 %v6086_v19, %v6086_v19  ;;  %6703 = vmatprep.subr.bf16.mxu0 %v16095_v16  ;;  %v16133_v19 = vld [vmem:[%s21704_s5 + $0x68] ss:$12 sps:$4 sm:$0xff]  }
 0x47c   : > { %15451 = vmatmul.mubr.msk.bf16.vlgmr.msra.gmra.mxu1 %vm6020_vm3, %v6092_v52  ;;  %v16137_v52 = vld [vmem:[%s21704_s5 + $0x110] ss:$12 sps:$4 sm:$0xff]  }
 0x47d   : > { %6554 = vmatpush1.bf16.msra.mxu1 %v16081_v22  ;;  %6704 = vmatpush1.bf16.msra.mxu0 %v16093_v13  ;;  %v16136_v22 = vld [vmem:[%s21704_s5 + $0x124] ss:$12 sps:$4 sm:$0xff]   ;;  %v16134_v13 = vld [vmem:[%s21704_s5 + $0x120] ss:$12 sps:$4 sm:$0xff]  }
 0x47e   : > { %6555 = vmatprep.subr.bf16.mxu1 %v16086_v21  ;;  %6705 = vmatprep.subr.bf16.mxu0 %v16101_v23  ;;  %v16140_v21 = vld [vmem:[%s21704_s5 + $0x1cc] ss:$12 sps:$4 sm:$0xff]   ;;  %v16138_v23 = vld [vmem:[%s21704_s5 + $0x1c8] ss:$12 sps:$4 sm:$0xff]  }
 0x47f   : > { %6577 = vmatprep.mubr.bf16.mxu1 %v17160_v34 }
 0x481   : > { %6556 = vmatpush1.bf16.msra.mxu1 %v16084_v24  ;;  %6706 = vmatpush1.bf16.msra.mxu0 %v16099_v26  ;;  %v16141_v24 = vld [vmem:[%s21704_s5 + $0xf8] ss:$12 sps:$4 sm:$0xff]  }
 0x482   : > { %6557 = vmatprep.subr.bf16.mxu1 %v16092_v27  ;;  %6707 = vmatprep.subr.bf16.mxu0 %v16104_v20  ;;  %v16144_v27 = vld [vmem:[%s21704_s5 + $0x1b4] ss:$12 sps:$4 sm:$0xff]   ;;  %v16146_v20 = vld [vmem:[%s21704_s5 + $0x198] ss:$12 sps:$4 sm:$0xff]  }
 0x485   : > { %6558 = vmatpush1.bf16.msra.mxu1 %v16090_v3  ;;  %6708 = vmatpush1.bf16.msra.mxu0 %v16102_v33  ;;  %v16142_v3 = vld [vmem:[%s21704_s5 + $0x1b0] ss:$12 sps:$4 sm:$0xff]   ;;  %v16149_v33 = vld [vmem:[%s21704_s5 + $0xc8] ss:$12 sps:$4 sm:$0xff]  }
 0x486   : > { %6559 = vmatprep.subr.bf16.mxu1 %v16098_v29  ;;  %6849 = vmatprep.subr.bf16.mxu0 %v16108_v44  ;;  %v16145_v29 = vld [vmem:[%s21704_s5 + $0xe0] ss:$12 sps:$4 sm:$0xff]   ;;  %v16152_v44 = vld [vmem:[%s21704_s5 + $0x184] ss:$12 sps:$4 sm:$0xff]  }
 0x489   : > { %6560 = vmatpush1.bf16.msra.mxu1 %v16096_v32  ;;  %v16148_v32 = vld [vmem:[%s21704_s5 + $0x19c] ss:$12 sps:$4 sm:$0xff]  }
 0x48a   : > { %15454 = vmatprep.subr.bf16.mxu1 %v17158_v1 }
 0x528   : > { %v6140_v35 = vpop.f32.mrf.mxu0 }
 0x529   : > { %v6376_v37 = vpack.c.bf16 %v6140_v35, %v6140_v35  ;;  %v16150_v35 = vld [vmem:[%s21704_s5 + $0x180] ss:$12 sps:$4 sm:$0xff]  }
 0x52a   : > { %v15422_v38 = vpop.f32.mrf.mxu0 }
 0x52b   : > { %13521 = vmatmul.mubr.msk.bf16.vlgmr.msra.gmra.mxu1 %vm5743_vm1, %v6376_v37  ;;  %v16154_v38 = vld [vmem:[%s21704_s5 + $0x228] ss:$12 sps:$4 sm:$0xff]  }
 0x52c   : > { %15455 = vmatpush3.bf16.msra.mxu1 %v16105_v36  ;;  %v6143_v39 = vpop.f32.mrf.mxu0  ;;  %v6186_v25 = vpop.f32.mrf.mxu1  ;;  %15462 = vmatprep.mubr.msk.bf16.mxu1 %vm17159_vm0, %v17158_v1  ;;  %v16153_v36 = vld [vmem:[%s21704_s5 + $0x170] ss:$12 sps:$4 sm:$0xff]  }
 0x52d   : > { %v19140_v45 = vpack.c.bf16 %v6186_v25, %v6186_v25  ;;  %15456 = vmatprep.subr.bf16.mxu1 %v17158_v1  ;;  %v16157_v39 = vld [vmem:[%s21704_s5 + $0x158] ss:$12 sps:$4 sm:$0xff]  }
 0x52e   : > { %v15423_v47 = vpop.f32.mrf.mxu0  ;;  %v15428_v50 = vpop.f32.mrf.mxu1 }
 0x52f   : > { %13535 = vmatmul.mubr.msk.bf16.vlgmr.msra.gmra.mxu0 %vm5743_vm1, %v19140_v45  ;;  %v16162_v47 = vld [vmem:[%s21704_s5 + $0x1f8] ss:$12 sps:$4 sm:$0xff]   ;;  %v16165_v50 = vld [vmem:[%s21704_s5 + $0x128] ss:$12 sps:$4 sm:$0xff]  }
 0x530   : > { %15457 = vmatpush3.bf16.msra.mxu1 %v16109_v42  ;;  %6850 = vmatpush1.bf16.msra.mxu0 %v16106_v41  ;;  %v6189_v51 = vpop.f32.mrf.mxu1  ;;  %v6232_v54 = vpop.f32.mrf.mxu0  ;;  %v16160_v41 = vld [vmem:[%s21704_s5 + $0x214] ss:$12 sps:$4 sm:$0xff]   ;;  %v16158_v42 = vld [vmem:[%s21704_s5 + $0x210] ss:$12 sps:$4 sm:$0xff]  }
 0x531   : > { %15458 = vmatprep.subr.bf16.mxu1 %v17158_v1  ;;  %6851 = vmatprep.subr.bf16.mxu0 %v16112_v46  ;;  %v19190_v8 = vpack.c.bf16 %v6232_v54, %v6232_v54  ;;  %v16164_v46 = vld [vmem:[%s21704_s5 + $0x1fc] ss:$12 sps:$4 sm:$0xff]   ;;  %v16168_v51 = vld [vmem:[%s21704_s5 + $0x1e4] ss:$12 sps:$4 sm:$0xff]   ;;  %v16166_v54 = vld [vmem:[%s21704_s5 + $0x1e0] ss:$12 sps:$4 sm:$0xff]  }
 0x532   : > { %v15429_v58 = vpop.f32.mrf.mxu1  ;;  %v15434_v59 = vpop.f32.mrf.mxu0  ;;  %6873 = vmatprep.mubr.bf16.mxu0 %v17160_v34 }
 0x533   : > { %v16171_v58 = vld [vmem:[%s21704_s5 + $0x1a0] ss:$12 sps:$4 sm:$0xff]   ;;  %v16172_v59 = vld [vmem:[%s21704_s5 + $0x188] ss:$12 sps:$4 sm:$0xff]  }
 0x534   : > { %15459 = vmatpush3.bf16.msra.mxu1 %v16113_v56  ;;  %6852 = vmatpush1.bf16.msra.mxu0 %v16110_v55  ;;  %v6235_v60 = vpop.f32.mrf.mxu0  ;;  %v6278_v61 = vpop.f32.mrf.mxu1  ;;  %v16169_v55 = vld [vmem:[%s21704_s5 + $0x1d0] ss:$12 sps:$4 sm:$0xff]   ;;  %v16170_v56 = vld [vmem:[%s21704_s5 + $0x1b8] ss:$12 sps:$4 sm:$0xff]  }
 0x535   : > { %15460 = vmatprep.subr.bf16.mxu1 %v17158_v1  ;;  %6853 = vmatprep.subr.bf16.mxu0 %v16116_v57  ;;  %v6379_v26 = vpack.c.bf16 %v6278_v61, %v6278_v61  ;;  %v16173_v60 = vld [vmem:[%s21704_s5 + $0x230] ss:$12 sps:$4 sm:$0xff]   ;;  %v16174_v61 = vld [vmem:[%s21704_s5 + $0x218] ss:$12 sps:$4 sm:$0xff]  }
 0x536   : > { %v15435_v0 = vpop.f32.mrf.mxu0  ;;  %v15440_v43 = vpop.f32.mrf.mxu1 }
 0x538   : > { %15461 = vmatpush3.bf16.msra.mxu1 %v16117_v49  ;;  %6854 = vmatpush1.bf16.msra.mxu0 %v16114_v62  ;;  %v6281_v63 = vpop.f32.mrf.mxu1  ;;  %v19169_v30 = vpop.f32.mrf.mxu0  ;;  %v16175_v62 = vld [vmem:[%s21704_s5 + $0x200] ss:$12 sps:$4 sm:$0xff]   ;;  %v16176_v49 = vld [vmem:[%s21704_s5 + $0x1e8] ss:$12 sps:$4 sm:$0xff]  }
 0x539   : > { %15466 = vmatprep.subr.bf16.mxu1 %v17158_v1  ;;  %6855 = vmatprep.subr.bf16.mxu0 %v16120_v53  ;;  %v6380_v25 = vpack.c.bf16 %v19169_v30, %v19169_v30 }
 0x53a   : > { %v15441_v17 = vpop.f32.mrf.mxu1  ;;  %v15446_v5 = vpop.f32.mrf.mxu0 }
 0x53b   : > { %15463 = vmatmul.mubr.msk.bf16.vlgmr.msra.gmra.mxu1 %vm5743_vm1, %v6376_v37  ;;  %v16156_v37 = vld [vmem:[%s21704_s5 + $0x22c] ss:$12 sps:$4 sm:$0xff]  }
 0x53c   : > { %15467 = vmatpush3.bf16.msra.mxu1 %v16121_v4  ;;  %6856 = vmatpush1.bf16.msra.mxu0 %v16118_v2  ;;  %v6327_v6 = vpop.f32.mrf.mxu0  ;;  %v19182_v7 = vpop.f32.mrf.mxu1 }
 0x53d   : > { %15468 = vmatprep.subr.bf16.mxu1 %v17158_v1  ;;  %6997 = vmatprep.subr.bf16.mxu0 %v16124_v48  ;;  %v6381_v57 = vpack.c.bf16 %v19182_v7, %v19182_v7 }
 0x53e   : > { %v15447_v10 = vpop.f32.mrf.mxu0  ;;  %v15452_v11 = vpop.f32.mrf.mxu1  ;;  %15474 = vmatprep.mubr.msk.bf16.mxu1 %vm17159_vm0, %v17158_v1 }
 0x53f   : > { %13549 = vmatmul.mubr.msk.bf16.vlgmr.msra.gmra.mxu0 %vm5743_vm1, %v19190_v8 }
 0x540   : > { %15469 = vmatpush3.bf16.msra.mxu1 %v16125_v28  ;;  %6998 = vmatpush1.bf16.msra.mxu0 %v16122_v31  ;;  %v6373_v12 = vpop.f32.mrf.mxu1 }
 0x541   : > { %15470 = vmatprep.subr.bf16.mxu1 %v17158_v1  ;;  %6999 = vmatprep.subr.bf16.mxu0 %v16128_v9 }
 0x542   : > { %v15453_v16 = vpop.f32.mrf.mxu1  ;;  %7021 = vmatprep.mubr.bf16.mxu0 %v17160_v34 }
 0x544   : > { %15471 = vmatpush3.bf16.msra.mxu1 %v16129_v40  ;;  %7000 = vmatpush1.bf16.msra.mxu0 %v16126_v14 }
 0x545   : > { %15472 = vmatprep.subr.bf16.mxu1 %v17158_v1  ;;  %7001 = vmatprep.subr.bf16.mxu0 %v16132_v15 }
 0x548   : > { %15473 = vmatpush3.bf16.msra.mxu1 %v16133_v19  ;;  %7002 = vmatpush1.bf16.msra.mxu0 %v16130_v18 }
 0x549   : > { %15478 = vmatprep.subr.bf16.mxu1 %v17158_v1  ;;  %7003 = vmatprep.subr.bf16.mxu0 %v16136_v22 }
 0x54b   : > { %15475 = vmatmul.mubr.msk.bf16.vlgmr.msra.gmra.mxu1 %vm5743_vm1, %v19140_v45  ;;  %v16161_v45 = vld [vmem:[%s21704_s5 + $0x140] ss:$12 sps:$4 sm:$0xff]  }
 0x54c   : > { %15479 = vmatpush3.bf16.msra.mxu1 %v16137_v52  ;;  %7004 = vmatpush1.bf16.msra.mxu0 %v16134_v13 }
 0x54d   : > { %15480 = vmatprep.subr.bf16.mxu1 %v17158_v1  ;;  %7145 = vmatprep.subr.bf16.mxu0 %v16140_v21 }
 0x54e   : > { %15486 = vmatprep.mubr.msk.bf16.mxu1 %vm17159_vm0, %v17158_v1 }
 0x54f   : > { %13563 = vmatmul.mubr.msk.bf16.vlgmr.msra.gmra.mxu0 %vm5743_vm1, %v6379_v26 }
 0x550   : > { %15481 = vmatpush3.bf16.msra.mxu1 %v16141_v24  ;;  %7146 = vmatpush1.bf16.msra.mxu0 %v16138_v23 }
 0x551   : > { %15482 = vmatprep.subr.bf16.mxu1 %v17158_v1  ;;  %7147 = vmatprep.subr.bf16.mxu0 %v16144_v27 }
 0x552   : > { %7169 = vmatprep.mubr.bf16.mxu0 %v17160_v34 }
 0x554   : > { %15483 = vmatpush3.bf16.msra.mxu1 %v16145_v29  ;;  %7148 = vmatpush1.bf16.msra.mxu0 %v16142_v3 }
 0x555   : > { %15484 = vmatprep.subr.bf16.mxu1 %v17158_v1  ;;  %7149 = vmatprep.subr.bf16.mxu0 %v16148_v32 }
 0x558   : > { %15485 = vmatpush3.bf16.msra.mxu1 %v16149_v33  ;;  %7150 = vmatpush1.bf16.msra.mxu0 %v16146_v20 }
 0x559   : > { %15490 = vmatprep.subr.bf16.mxu1 %v17158_v1  ;;  %7151 = vmatprep.subr.bf16.mxu0 %v16152_v44 }
 0x55b   : > { %15487 = vmatmul.mubr.msk.bf16.vlgmr.msra.gmra.mxu1 %vm5743_vm1, %v19190_v8 }
 0x55c   : > { %15491 = vmatpush3.bf16.msra.mxu1 %v16153_v36  ;;  %7152 = vmatpush1.bf16.msra.mxu0 %v16150_v35 }
 0x55d   : > { %15492 = vmatprep.subr.bf16.mxu1 %v17158_v1  ;;  %7293 = vmatprep.subr.bf16.mxu0 %v16156_v37 }
 0x55e   : > { %15498 = vmatprep.mubr.msk.bf16.mxu1 %vm17159_vm0, %v17158_v1 }
 0x55f   : > { %13577 = vmatmul.mubr.msk.bf16.vlgmr.msra.gmra.mxu0 %vm5743_vm1, %v6380_v25 }
 0x560   : > { %15493 = vmatpush3.bf16.msra.mxu1 %v16157_v39  ;;  %7294 = vmatpush1.bf16.msra.mxu0 %v16154_v38 }
 0x561   : > { %15494 = vmatprep.subr.bf16.mxu1 %v17158_v1  ;;  %7295 = vmatprep.subr.bf16.mxu0 %v16160_v41 }
 0x562   : > { %7317 = vmatprep.mubr.bf16.mxu0 %v17160_v34 }
 0x564   : > { %15495 = vmatpush3.bf16.msra.mxu1 %v16161_v45  ;;  %7296 = vmatpush1.bf16.msra.mxu0 %v16158_v42 }
 0x565   : > { %15496 = vmatprep.subr.bf16.mxu1 %v17158_v1  ;;  %7297 = vmatprep.subr.bf16.mxu0 %v16164_v46 }
 0x568   : > { %15497 = vmatpush3.bf16.msra.mxu1 %v16165_v50  ;;  %7298 = vmatpush1.bf16.msra.mxu0 %v16162_v47 }
 0x569   : > { %15502 = vmatprep.subr.bf16.mxu1 %v17158_v1  ;;  %7299 = vmatprep.subr.bf16.mxu0 %v16168_v51 }
 0x56b   : > { %15499 = vmatmul.mubr.msk.bf16.vlgmr.msra.gmra.mxu1 %vm5743_vm1, %v6379_v26 }
 0x56c   : > { %15503 = vmatpush3.bf16.msra.mxu1 %v16169_v55  ;;  %7300 = vmatpush1.bf16.msra.mxu0 %v16166_v54 }
 0x56d   : > { %15504 = vmatprep.subr.bf16.mxu1 %v17158_v1  ;;  %15510 = vmatprep.mubr.msk.bf16.mxu1 %vm17159_vm0, %v17158_v1 }
 0x56f   : > { %13591 = vmatmul.mubr.msk.bf16.vlgmr.msra.gmra.mxu0 %vm5743_vm1, %v6381_v57 }
 0x570   : > { %15505 = vmatpush3.bf16.msra.mxu1 %v16170_v56 }
 0x571   : > { %15506 = vmatprep.subr.bf16.mxu1 %v17158_v1 }
 0x574   : > { %15507 = vmatpush3.bf16.msra.mxu1 %v16171_v58 }
 0x575   : > { %15508 = vmatprep.subr.bf16.mxu1 %v17158_v1 }
 0x578   : > { %15509 = vmatpush3.bf16.msra.mxu1 %v16172_v59 }
 0x579   : > { %15514 = vmatprep.subr.bf16.mxu1 %v17158_v1 }
 0x57b   : > { %15511 = vmatmul.mubr.msk.bf16.vlgmr.msra.gmra.mxu1 %vm5743_vm1, %v6380_v25  ;;  %v7383_v25 = vlaneseq }
 0x57c   : > { %15515 = vmatpush3.bf16.msra.mxu1 %v16173_v60  ;;  %15522 = vmatprep.mubr.msk.bf16.mxu1 %vm17159_vm0, %v17158_v1 }
 0x57d   : > { %15516 = vmatprep.subr.bf16.mxu1 %v17158_v1  ;;  %v19361_v45 = vshrl.u32 %v7383_v25, 7  ;;  %v16210_v25 = vld [vmem:[%s21657_s8 + $0x540] ss:$48 sps:$4 sm:$0xff]  }
 0x57f   : > { %v19364_v50 = vsub.s32 1, %v19361_v45  ;;  %v19367_v56 = vsub.s32 0, %v19361_v45 }
 0x580   : > { %15517 = vmatpush3.bf16.msra.mxu1 %v16174_v61 }
 0x581   : > { %15518 = vmatprep.subr.bf16.mxu1 %v17158_v1 }
 0x584   : > { %15519 = vmatpush3.bf16.msra.mxu1 %v16175_v62 }
 0x585   : > { %15520 = vmatprep.subr.bf16.mxu1 %v17158_v1 }
 0x588   : > { %15521 = vmatpush3.bf16.msra.mxu1 %v16176_v49 }
 0x58b   : > { %15523 = vmatmul.mubr.msk.bf16.vlgmr.msra.gmra.mxu1 %vm5743_vm1, %v6381_v57  ;;  %v7381_v57 = vld [vmem:[%s21705_s3] sm:$0x7]  ;;  %s685_s3 = sand.u32 1, %s17148_s28  }
 0x58c   : > { %9334 = vmatprep.mubr.bf16.mxu1 %v17160_v34  ;;  %v7390_v61 = vrot.slane %v7381_v57, %v19364_v50  ;;  %s686_s29 = scalar_lea.vmem [#allocation2], %s685_s3  ;;  %s12965_s2 = scalar_lea.sflag [#allocation3], %s685_s3 }
 0x58d   : > { %s12977_s30 = sshll.u32 %s686_s29, 4  ;;  %s21610_s30 = int_to_ptr.vmem [resolvable:$true] %s12977_s30 }
 0x58e   : > { %s17096_s0 = scalar_lea.vmem %s21610_s30, 16 }
 0x58f   : > { %p17097_p11 = scmp.ne.s32.totalorder %s21610_s30, %s17096_s0 }
 0x591   : > { %p17098_p12 = pnand %p17097_p11, %p17315_p5 }
 0x593   : > { %p17099_p13 = pneg %p17098_p12 }
 0x5eb   : > { %v6579_v53 = vpop.f32.mrf.mxu1 }
 0x5ed   : > { %v6581_v0 = vpop.f32.mrf.mxu1 }
 0x5ef   : > { %v6583_v43 = vpop.f32.mrf.mxu1  ;;  %v6727_v63 = vpop.f32.mrf.mxu0 }
 0x5f0   : > { %v7366_v30 = vadd.f32 %v6727_v63, %v6579_v53  ;;  %v7386_v53 = vrot.slane %v7381_v57, %v19367_v56 }
 0x5f1   : > { %v6584_v2 = vpop.f32.mrf.mxu1  ;;  %v6729_v4 = vpop.f32.mrf.mxu0 }
 0x5f2   : > { %v7371_v48 = vadd.f32 %v6729_v4, %v6581_v0  ;;  %v19375_v0 = vsub.s32 2, %v19361_v45 }
 0x5f3   : > { %v6731_v17 = vpop.f32.mrf.mxu0 }
 0x5f4   : > { %v7394_v4 = vrot.slane %v7381_v57, %v19375_v0  ;;  %v17093_v17 = vld [vmem:[%s17398_s22 + $0x8] sm:$0xff] }
 0x5f5   : > { %v6732_v5 = vpop.f32.mrf.mxu0 }
 0x5fb   : > { %v6620_v6 = vpop.f32.mrf.mxu1 }
 0x5fd   : > { %v15464_v7 = vpop.f32.mrf.mxu1 }
 0x5ff   : > { %v6623_v31 = vpop.f32.mrf.mxu1  ;;  %v6875_v28 = vpop.f32.mrf.mxu0 }
 0x600   : > { %v7367_v8 = vadd.f32 %v7366_v30, %v6875_v28  ;;  %v17094_v31 = vld [vmem:[%s17398_s22] sm:$0xff] }
 0x601   : > { %v15465_v9 = vpop.f32.mrf.mxu1  ;;  %v6877_v10 = vpop.f32.mrf.mxu0 }
 0x602   : > { %v7372_v11 = vadd.f32 %v7371_v48, %v6877_v10  ;;  %v17095_v10 = vld [vmem:[%s17398_s22 + $0x10] sm:$0xff] }
 0x603   : > { %v6879_v12 = vpop.f32.mrf.mxu0 }
 0x605   : > { %v6880_v14 = vpop.f32.mrf.mxu0 }
 0x60b   : > { %v6768_v40 = vpop.f32.mrf.mxu1 }
 0x60c   : > { %v7376_v58 = vadd.f32 %v6768_v40, %v6620_v6 }
 0x60d   : > { %v15476_v15 = vpop.f32.mrf.mxu1 }
 0x60e   : > { %v16177_v15 = vld [vmem:[%s21657_s8 + $0x2a0] ss:$48 sps:$4 sm:$0xff]  }
 0x60f   : > { %v6771_v16 = vpop.f32.mrf.mxu1  ;;  %v7023_v18 = vpop.f32.mrf.mxu0 }
 0x610   : > { %v7368_v54 = vadd.f32 %v7367_v8, %v7023_v18  ;;  %v16179_v16 = vld [vmem:[%s21657_s8 + $0x2a4] ss:$48 sps:$4 sm:$0xff]  }
 0x611   : > { %v15477_v19 = vpop.f32.mrf.mxu1  ;;  %v7025_v22 = vpop.f32.mrf.mxu0  ;;  %v16182_v18 = vld [vmem:[%s21657_s8 + $0x244] ss:$48 sps:$4 sm:$0xff]   ;;  %9261 = vmatprep.subr.bf16.mxu0 %v16179_v16  ;;  %v16254_v16 = vld [vmem:[%s21657_s8 + $0x8ac] ss:$48 sps:$4 sm:$0xff]  }
 0x612   : > { %v7373_v47 = vadd.f32 %v7372_v11, %v7025_v22  ;;  %9262 = vmatpush1.bf16.msra.mxu0 %v16177_v15  ;;  %v16180_v19 = vld [vmem:[%s21657_s8 + $0x240] ss:$48 sps:$4 sm:$0xff]   ;;  %v16185_v22 = vld [vmem:[%s21657_s8 + $0x1e4] ss:$48 sps:$4 sm:$0xff]   ;;  %v16251_v15 = vld [vmem:[%s21657_s8 + $0x2ac] ss:$48 sps:$4 sm:$0xff]  }
 0x613   : > { %v7027_v13 = vpop.f32.mrf.mxu0  ;;  %9263 = vmatprep.subr.bf16.mxu0 %v16182_v18 }
 0x614   : > { %v16201_v13 = vld [vmem:[%s21657_s8 + $0x8a0] ss:$48 sps:$4 sm:$0xff]  }
 0x615   : > { %v7028_v52 = vpop.f32.mrf.mxu0 }
 0x616   : > { %v16203_v52 = vld [vmem:[%s21657_s8 + $0x8a4] ss:$48 sps:$4 sm:$0xff]   ;;  %9264 = vmatpush1.bf16.msra.mxu0 %v16180_v19 }
 0x617   : > { %9302 = vmatprep.subr.bf16.mxu1 %v16203_v52  ;;  %9265 = vmatprep.subr.bf16.mxu0 %v16185_v22  ;;  %v7446_v52 = vld [vmem:[%s21707_s7] sm:$0x7] }
 0x618   : > { %9303 = vmatpush1.bf16.msra.mxu1 %v16201_v13  ;;  %v7426_v13 = vld [vmem:[%s21706_s1] sm:$0x7]  ;;  %s14217_s1 = sshll.u32 %s17298_s4, 4  ;;  %s17161_s4 = smov [#allocation2]  }
 0x619   : > { %s21608_s23 = scalar_lea.hbm %s21708_s24, %s14217_s1  ;;  %s17100_s5 = sshll.u32 %s17161_s4, 4  ;;  %s17101_s5 = int_to_ptr.vmem [resolvable:$false] %s17100_s5 }
 0x61a   : > { %s17102_s26 = scalar_lea.vmem %s17101_s5, 32  ;;  %p17103_p0 = scmp.lt.s32.totalorder %s21610_s30, %s17101_s5 }
 0x61b   : > { %v6916_v21 = vpop.f32.mrf.mxu1  ;;  %p17104_p1 = scmp.lt.s32.totalorder %s17102_s26, %s17096_s0 }
 0x61c   : > { %v7377_v62 = vadd.f32 %v7376_v58, %v6916_v21  ;;  %v16183_v21 = vld [vmem:[%s21657_s8 + $0x1e0] ss:$48 sps:$4 sm:$0xff]  }
 0x61d   : > { %v15488_v23 = vpop.f32.mrf.mxu1  ;;  %9266 = vmatpush1.bf16.msra.mxu0 %v16183_v21  ;;  %v7435_v21 = vrot.slane %v7426_v13, %v19364_v50  ;;  %p17105_p2 = por %p17104_p1, %p17103_p0 }
 0x61e   : > { %v16209_v23 = vld [vmem:[%s21657_s8 + $0x844] ss:$48 sps:$4 sm:$0xff]  }
 0x61f   : > { %v6919_v24 = vpop.f32.mrf.mxu1  ;;  %v7171_v26 = vpop.f32.mrf.mxu0  ;;  %9304 = vmatprep.subr.bf16.mxu1 %v16209_v23  ;;  %v7439_v23 = vrot.slane %v7426_v13, %v19375_v0  ;;  %p17106_p3 = pnand %p17105_p2, %p17099_p13 }
 0x620   : > { %v7369_v59 = vadd.f32 %v7368_v54, %v7171_v26  ;;  %v16188_v24 = vld [vmem:[%s21657_s8 + $0x184] ss:$48 sps:$4 sm:$0xff]   ;;  %v16207_v26 = vld [vmem:[%s21657_s8 + $0x840] ss:$48 sps:$4 sm:$0xff]  }
 0x621   : > { %v15489_v27 = vpop.f32.mrf.mxu1  ;;  %v7173_v3 = vpop.f32.mrf.mxu0  ;;  %9267 = vmatprep.subr.bf16.mxu0 %v16188_v24  ;;  %9305 = vmatpush1.bf16.msra.mxu1 %v16207_v26  ;;  %v7431_v24 = vrot.slane %v7426_v13, %v19367_v56  ;;  %v16306_v13 = vld [vmem:[%s21657_s8 + $0x250] ss:$48 sps:$4 sm:$0xff]  }
 0x622   : > { %v7374_v55 = vadd.f32 %v7373_v47, %v7173_v3  ;;  %v16186_v27 = vld [vmem:[%s21657_s8 + $0x180] ss:$48 sps:$4 sm:$0xff]   ;;  %v16191_v3 = vld [vmem:[%s21657_s8 + $0x124] ss:$48 sps:$4 sm:$0xff]  }
 0x623   : > { %v7175_v29 = vpop.f32.mrf.mxu0  ;;  %9268 = vmatpush1.bf16.msra.mxu0 %v16186_v27  ;;  %v7455_v27 = vrot.slane %v7446_v52, %v19364_v50 }
 0x624   : > { %v16189_v29 = vld [vmem:[%s21657_s8 + $0x120] ss:$48 sps:$4 sm:$0xff]   ;;  %9269 = vmatprep.subr.bf16.mxu0 %v16191_v3  ;;  %v7459_v3 = vrot.slane %v7446_v52, %v19375_v0 }
 0x625   : > { %v7176_v32 = vpop.f32.mrf.mxu0 }
 0x626   : > { %v16194_v32 = vld [vmem:[%s21657_s8 + $0xc4] ss:$48 sps:$4 sm:$0xff]  }
 0x627   : > { %9270 = vmatpush1.bf16.msra.mxu0 %v16189_v29 }
 0x628   : > { %9271 = vmatprep.subr.bf16.mxu0 %v16194_v32 }
 0x62b   : > { %v7064_v20 = vpop.f32.mrf.mxu1 }
 0x62c   : > { %v7378_v43 = vadd.f32 %v7377_v62, %v7064_v20  ;;  %v16192_v20 = vld [vmem:[%s21657_s8 + $0xc0] ss:$48 sps:$4 sm:$0xff]   ;;  %v16218_v62 = vld [vmem:[%s21657_s8 + $0x4e4] ss:$48 sps:$4 sm:$0xff]  }
 0x62d   : > { %v15500_v33 = vpop.f32.mrf.mxu1  ;;  %9272 = vmatpush1.bf16.msra.mxu0 %v16192_v20 }
 0x62e   : > { %v16197_v33 = vld [vmem:[%s21657_s8 + $0x64] ss:$48 sps:$4 sm:$0xff]  }
 0x62f   : > { %v7067_v44 = vpop.f32.mrf.mxu1  ;;  %v7319_v35 = vpop.f32.mrf.mxu0  ;;  %9273 = vmatprep.subr.bf16.mxu0 %v16197_v33  ;;  %v7451_v33 = vrot.slane %v7446_v52, %v19367_v56  ;;  %v16311_v52 = vld [vmem:[%s21657_s8 + $0x4ec] ss:$48 sps:$4 sm:$0xff]  }
 0x630   : > { %v7370_v49 = vadd.f32 %v7369_v59, %v7319_v35  ;;  %v16195_v44 = vld [vmem:[%s21657_s8 + $0x60] ss:$48 sps:$4 sm:$0xff]   ;;  %v16200_v35 = vld [vmem:[%s21657_s8 + $0x4] ss:$48 sps:$4 sm:$0xff]  }
 0x631   : > { %v15501_v36 = vpop.f32.mrf.mxu1  ;;  %v7321_v37 = vpop.f32.mrf.mxu0  ;;  %9274 = vmatpush1.bf16.msra.mxu0 %v16195_v44 }
 0x632   : > { %v7375_v60 = vadd.f32 %v7374_v55, %v7321_v37  ;;  %v7398_v30 = vadd.f32 %v7386_v53, %v7370_v49  ;;  %v16198_v36 = vld [vmem:[%s21657_s8] ss:$48 sps:$4 sm:$0xff]   ;;  %9275 = vmatprep.subr.bf16.mxu0 %v16200_v35  ;;  %v16206_v37 = vld [vmem:[%s21657_s8 + $0x5a4] ss:$48 sps:$4 sm:$0xff]  }
 0x633   : > { %v7323_v38 = vpop.f32.mrf.mxu0  ;;  %v16216_v49 = vld [vmem:[%s21657_s8 + $0x4e0] ss:$48 sps:$4 sm:$0xff]   ;;  %v16221_v53 = vld [vmem:[%s21657_s8 + $0x784] ss:$48 sps:$4 sm:$0xff]  }
 0x634   : > { %v7399_v63 = vadd.f32 %v7390_v61, %v7375_v60  ;;  %v7401_v28 = vadd.f32 %v17094_v31, %v7398_v30  ;;  %v16204_v38 = vld [vmem:[%s21657_s8 + $0x5a0] ss:$48 sps:$4 sm:$0xff]   ;;  %v16215_v60 = vld [vmem:[%s21657_s8 + $0x7e4] ss:$48 sps:$4 sm:$0xff]  }
 0x635   : > { %v7324_v39 = vpop.f32.mrf.mxu0  ;;  %9276 = vmatpush1.bf16.msra.mxu0 %v16198_v36  ;;  %v16213_v61 = vld [vmem:[%s21657_s8 + $0x7e0] ss:$48 sps:$4 sm:$0xff]   ;;  %9306 = vmatprep.subr.bf16.mxu1 %v16215_v60  ;;  %v16224_v30 = vld [vmem:[%s21657_s8 + $0x484] ss:$48 sps:$4 sm:$0xff]   ;;  %v16261_v60 = vld [vmem:[%s21657_s8 + $0x1e8] ss:$48 sps:$4 sm:$0xff]  }
 0x636   : > { %v19379_v5 = vadd.f32 %v17093_v17, %v7399_v63  ;;  %9277 = vmatprep.subr.bf16.mxu0 %v16206_v37  ;;  %v16212_v39 = vld [vmem:[%s21657_s8 + $0x544] ss:$48 sps:$4 sm:$0xff]   ;;  %9307 = vmatpush1.bf16.msra.mxu1 %v16213_v61  ;;  %v16222_v63 = vld [vmem:[%s21657_s8 + $0x480] ss:$48 sps:$4 sm:$0xff]   ;;  %v16264_v61 = vld [vmem:[%s21657_s8 + $0x7e8] ss:$48 sps:$4 sm:$0xff]  }
 0x637   : > { %9308 = vmatprep.subr.bf16.mxu1 %v16221_v53  ;;  %v16228_v17 = vld [vmem:[%s21657_s8 + $0x420] ss:$48 sps:$4 sm:$0xff]   ;;  %v16267_v53 = vld [vmem:[%s21657_s8 + $0x188] ss:$48 sps:$4 sm:$0xff]  }
 0x638   : > { %v7404_v12 = vadd.f32 %v19379_v5, %v7401_v28  ;;  %v16234_v31 = vld [vmem:[%s21657_s8 + $0x3c0] ss:$48 sps:$4 sm:$0xff]  }
 0x639   : > { %9278 = vmatpush2.bf16.msra.mxu0 %v16204_v38 }
 0x63a   : > { %9279 = vmatprep.subr.bf16.mxu0 %v16212_v39 }
 0x63b   : > { %v7212_v41 = vpop.f32.mrf.mxu1 }
 0x63c   : > { %v7379_v2 = vadd.f32 %v7378_v43, %v7212_v41  ;;  %v16219_v43 = vld [vmem:[%s21657_s8 + $0x780] ss:$48 sps:$4 sm:$0xff]  }
 0x63d   : > { %v15512_v42 = vpop.f32.mrf.mxu1  ;;  %9280 = vmatpush2.bf16.msra.mxu0 %v16210_v25  ;;  %9309 = vmatpush1.bf16.msra.mxu1 %v16219_v43  ;;  %v16249_v25 = vld [vmem:[%s21657_s8 + $0x2a8] ss:$48 sps:$4 sm:$0xff]  }
 0x63e   : > { %9281 = vmatprep.subr.bf16.mxu0 %v16218_v62  ;;  %v16269_v62 = vld [vmem:[%s21657_s8 + $0x18c] ss:$48 sps:$4 sm:$0xff]   ;;  %v16270_v43 = vld [vmem:[%s21657_s8 + $0x788] ss:$48 sps:$4 sm:$0xff]  }
 0x63f   : > { %v7215_v46 = vpop.f32.mrf.mxu1 }
 0x641   : > { %v15513_v51 = vpop.f32.mrf.mxu1  ;;  %9282 = vmatpush2.bf16.msra.mxu0 %v16216_v49  ;;  %v16272_v49 = vld [vmem:[%s21657_s8 + $0x78c] ss:$48 sps:$4 sm:$0xff]  }
 0x642   : > { %9283 = vmatprep.subr.bf16.mxu0 %v16224_v30  ;;  %v16278_v30 = vld [vmem:[%s21657_s8 + $0x72c] ss:$48 sps:$4 sm:$0xff]  }
 0x645   : > { %9284 = vmatpush2.bf16.msra.mxu0 %v16222_v63  ;;  %v16275_v63 = vld [vmem:[%s21657_s8 + $0x12c] ss:$48 sps:$4 sm:$0xff]  }
 0x64b   : > { %v7360_v48 = vpop.f32.mrf.mxu1 }
 0x64c   : > { %v7380_v6 = vadd.f32 %v7379_v2, %v7360_v48  ;;  %v16227_v2 = vld [vmem:[%s21657_s8 + $0x724] ss:$48 sps:$4 sm:$0xff]  }
 0x64d   : > { %v15524_v7 = vpop.f32.mrf.mxu1  ;;  %v16230_v48 = vld [vmem:[%s21657_s8 + $0x424] ss:$48 sps:$4 sm:$0xff]   ;;  %9310 = vmatprep.subr.bf16.mxu1 %v16227_v2  ;;  %v16273_v2 = vld [vmem:[%s21657_s8 + $0x128] ss:$48 sps:$4 sm:$0xff]  }
 0x64e   : > { %v7400_v8 = vadd.f32 %v7394_v4, %v7380_v6  ;;  %v16225_v4 = vld [vmem:[%s21657_s8 + $0x720] ss:$48 sps:$4 sm:$0xff]   ;;  %9285 = vmatprep.subr.bf16.mxu0 %v16230_v48  ;;  %v16236_v6 = vld [vmem:[%s21657_s8 + $0x3c4] ss:$48 sps:$4 sm:$0xff]   ;;  %v16281_v48 = vld [vmem:[%s21657_s8 + $0xcc] ss:$48 sps:$4 sm:$0xff]  }
 0x64f   : > { %v7363_v9 = vpop.f32.mrf.mxu1  ;;  %9311 = vmatpush1.bf16.msra.mxu1 %v16225_v4  ;;  %v16231_v7 = vld [vmem:[%s21657_s8 + $0x6c0] ss:$48 sps:$4 sm:$0xff]   ;;  %9286 = vmatpush2.bf16.msra.mxu0 %v16228_v17  ;;  %v16276_v4 = vld [vmem:[%s21657_s8 + $0x728] ss:$48 sps:$4 sm:$0xff]   ;;  %v16284_v17 = vld [vmem:[%s21657_s8 + $0x6cc] ss:$48 sps:$4 sm:$0xff]  }
 0x650   : > { %v7403_v11 = vadd.f32 %v17095_v10, %v7400_v8  ;;  %9287 = vmatprep.subr.bf16.mxu0 %v16236_v6  ;;  %v16242_v8 = vld [vmem:[%s21657_s8 + $0x364] ss:$48 sps:$4 sm:$0xff]   ;;  %v16237_v9 = vld [vmem:[%s21657_s8 + $0x660] ss:$48 sps:$4 sm:$0xff]   ;;  %v16282_v6 = vld [vmem:[%s21657_s8 + $0x6c8] ss:$48 sps:$4 sm:$0xff]  }
 0x651   : > { %v15525_v14 = vpop.f32.mrf.mxu1  ;;  %v16240_v10 = vld [vmem:[%s21657_s8 + $0x360] ss:$48 sps:$4 sm:$0xff]  }
 0x652   : > { %v7405_v40 = vadd.f32 %v7404_v12, %v7403_v11  ;;  %v16248_v12 = vld [vmem:[%s21657_s8 + $0x304] ss:$48 sps:$4 sm:$0xff]   ;;  %v16243_v14 = vld [vmem:[%s21657_s8 + $0x600] ss:$48 sps:$4 sm:$0xff]  }
 0x653   : > { %9288 = vmatpush2.bf16.msra.mxu0 %v16234_v31  ;;  %v16290_v31 = vld [vmem:[%s21657_s8 + $0x66c] ss:$48 sps:$4 sm:$0xff]  }
 0x654   : > { %7406 = vadd.xlane.f32.xlu0 %v7405_v40  ;;  %9289 = vmatprep.subr.bf16.mxu0 %v16242_v8  ;;  %v16246_v40 = vld [vmem:[%s21657_s8 + $0x300] ss:$48 sps:$4 sm:$0xff]   ;;  %v16288_v8 = vld [vmem:[%s21657_s8 + $0x668] ss:$48 sps:$4 sm:$0xff]  }
 0x657   : > { %9290 = vmatpush2.bf16.msra.mxu0 %v16240_v10  ;;  %v16296_v10 = vld [vmem:[%s21657_s8 + $0x60c] ss:$48 sps:$4 sm:$0xff]  }
 0x658   : > { %9291 = vmatprep.subr.bf16.mxu0 %v16248_v12  ;;  %v16294_v12 = vld [vmem:[%s21657_s8 + $0x608] ss:$48 sps:$4 sm:$0xff]  }
 0x65b   : > { %9292 = vmatpush2.bf16.msra.mxu0 %v16246_v40  ;;  %v16302_v40 = vld [vmem:[%s21657_s8 + $0x2b4] ss:$48 sps:$4 sm:$0xff]  }
 0x65c   : > { %9384 = vmatprep.subr.bf16.mxu0 %v16254_v16  ;;  %v16300_v16 = vld [vmem:[%s21657_s8 + $0x2b0] ss:$48 sps:$4 sm:$0xff]  }
 0x6dd   : > { %v7407_v41 = vpop.xlane.xlu0 %7406 }
 0x6de   : > { %v7409_v42 = vmul.f32 0.0026041667, %v7407_v41 }
 0x6e0   : > { %v19456_v46 = vsub.f32 %v7401_v28, %v7409_v42  ;;  %v19459_v47 = vsub.f32 %v19379_v5, %v7409_v42  ;;  %v19461_v51 = vsub.f32 %v7403_v11, %v7409_v42  ;;  %v16233_v5 = vld [vmem:[%s21657_s8 + $0x6c4] ss:$48 sps:$4 sm:$0xff]  }
 0x6e1   : > { %9312 = vmatprep.subr.bf16.mxu1 %v16233_v5  ;;  %v16239_v28 = vld [vmem:[%s21657_s8 + $0x664] ss:$48 sps:$4 sm:$0xff]   ;;  %v16279_v5 = vld [vmem:[%s21657_s8 + $0xc8] ss:$48 sps:$4 sm:$0xff]  }
 0x6e2   : > { %v7413_v54 = vmul.f32 %v19456_v46, %v19456_v46  ;;  %v7414_v55 = vmul.f32 %v19459_v47, %v19459_v47  ;;  %v7415_v57 = vmul.f32 %v19461_v51, %v19461_v51  ;;  %9313 = vmatpush1.bf16.msra.mxu1 %v16231_v7  ;;  %v16245_v11 = vld [vmem:[%s21657_s8 + $0x604] ss:$48 sps:$4 sm:$0xff]   ;;  %v16287_v7 = vld [vmem:[%s21657_s8 + $0x6c] ss:$48 sps:$4 sm:$0xff]  }
 0x6e3   : > { %9314 = vmatprep.subr.bf16.mxu1 %v16239_v28  ;;  %v16285_v28 = vld [vmem:[%s21657_s8 + $0x68] ss:$48 sps:$4 sm:$0xff]  }
 0x6e4   : > { %v7416_v58 = vadd.f32 %v7414_v55, %v7413_v54  ;;  %v16260_v54 = vld [vmem:[%s21657_s8 + $0x84c] ss:$48 sps:$4 sm:$0xff]   ;;  %v16255_v55 = vld [vmem:[%s21657_s8 + $0x248] ss:$48 sps:$4 sm:$0xff]  }
 0x6e6   : > { %v7417_v59 = vadd.f32 %v7416_v58, %v7415_v57  ;;  %9315 = vmatpush1.bf16.msra.mxu1 %v16237_v9  ;;  %v16258_v57 = vld [vmem:[%s21657_s8 + $0x848] ss:$48 sps:$4 sm:$0xff]   ;;  %v16263_v58 = vld [vmem:[%s21657_s8 + $0x1ec] ss:$48 sps:$4 sm:$0xff]  }
 0x6e7   : > { %9316 = vmatprep.subr.bf16.mxu1 %v16245_v11  ;;  %v16293_v9 = vld [vmem:[%s21657_s8 + $0xc] ss:$48 sps:$4 sm:$0xff]   ;;  %v16291_v11 = vld [vmem:[%s21657_s8 + $0x8] ss:$48 sps:$4 sm:$0xff]  }
 0x6e8   : > { %7418 = vadd.xlane.f32.xlu1 %v7417_v59  ;;  %v16266_v59 = vld [vmem:[%s21657_s8 + $0x7ec] ss:$48 sps:$4 sm:$0xff]  }
 0x6ea   : > { %9317 = vmatpush1.bf16.msra.mxu1 %v16243_v14  ;;  %v16299_v14 = vld [vmem:[%s21657_s8 + $0x5ac] ss:$48 sps:$4 sm:$0xff]  }
 0x6eb   : > { %9343 = vmatprep.subr.bf16.mxu1 %v16251_v15  ;;  %v16297_v15 = vld [vmem:[%s21657_s8 + $0x5a8] ss:$48 sps:$4 sm:$0xff]  }
 0x771   : > { %v7419_v18 = vpop.xlane.xlu1 %7418 }
 0x772   : > { %v7420_v19 = vmul.f32 0.0026041667, %v7419_v18  ;;  %v16305_v18 = vld [vmem:[%s21657_s8 + $0x54c] ss:$48 sps:$4 sm:$0xff]  }
 0x774   : > { %v7421_v22 = vadd.f32 1e-12, %v7420_v19  ;;  %v16308_v19 = vld [vmem:[%s21657_s8 + $0x254] ss:$48 sps:$4 sm:$0xff]  }
 0x776   : > { %17065 = vrsqrt.f32 %v7421_v22  ;;  %v16303_v22 = vld [vmem:[%s21657_s8 + $0x548] ss:$48 sps:$4 sm:$0xff]  }
 0x783   : > { %v17066_v26 = vpop.eup %17065 }
 0x784   : > { %v7424_v29 = vmul.f32 %v17066_v26, %v19459_v47  ;;  %v7425_v32 = vmul.f32 %v17066_v26, %v19461_v51  ;;  %v7423_v20 = vmul.f32 %v17066_v26, %v19456_v46  ;;  %v16252_v46 = vld [vmem:[%s21657_s8 + $0x8a8] ss:$48 sps:$4 sm:$0xff]   ;;  %v16257_v51 = vld [vmem:[%s21657_s8 + $0x24c] ss:$48 sps:$4 sm:$0xff]  }
 0x785   : > { %v16317_v26 = vld [vmem:[%s21657_s8 + $0x48c] ss:$48 sps:$4 sm:$0xff]  }
 0x786   : > { %v7444_v44 = vmul.f32 %v7435_v21, %v7424_v29  ;;  %v7445_v35 = vmul.f32 %v7439_v23, %v7425_v32  ;;  %v7443_v36 = vmul.f32 %v7431_v24, %v7423_v20  ;;  %v16314_v21 = vld [vmem:[%s21657_s8 + $0x1f4] ss:$48 sps:$4 sm:$0xff]   ;;  %v16309_v23 = vld [vmem:[%s21657_s8 + $0x4e8] ss:$48 sps:$4 sm:$0xff]   ;;  %v16312_v24 = vld [vmem:[%s21657_s8 + $0x1f0] ss:$48 sps:$4 sm:$0xff]  }
 0x787   : > { %v16318_v29 = vld [vmem:[%s21657_s8 + $0x190] ss:$48 sps:$4 sm:$0xff]   ;;  %v16323_v32 = vld [vmem:[%s21657_s8 + $0x42c] ss:$48 sps:$4 sm:$0xff]   ;;  %v16326_v20 = vld [vmem:[%s21657_s8 + $0x134] ss:$48 sps:$4 sm:$0xff]  }
 0x788   : > { %v19562_v37 = vadd.f32 %v7455_v27, %v7444_v44  ;;  %v19564_v38 = vadd.f32 %v7459_v3, %v7445_v35  ;;  %v19566_v39 = vadd.f32 %v7451_v33, %v7443_v36  ;;  %v16320_v27 = vld [vmem:[%s21657_s8 + $0x194] ss:$48 sps:$4 sm:$0xff]   ;;  %v16315_v3 = vld [vmem:[%s21657_s8 + $0x488] ss:$48 sps:$4 sm:$0xff]   ;;  %v16324_v44 = vld [vmem:[%s21657_s8 + $0x130] ss:$48 sps:$4 sm:$0xff]  }
 0x789   : > { %v16321_v33 = vld [vmem:[%s21657_s8 + $0x428] ss:$48 sps:$4 sm:$0xff]   ;;  %v16329_v35 = vld [vmem:[%s21657_s8 + $0x3cc] ss:$48 sps:$4 sm:$0xff]   ;;  %v16332_v36 = vld [vmem:[%s21657_s8 + $0xd4] ss:$48 sps:$4 sm:$0xff]  }
 0x78a   : > { %v19573_v41 = vpack.c.bf16 %v19562_v37, %v19562_v37  ;;  %v19577_v42 = vpack.c.bf16 %v19564_v38, %v19564_v38  ;;  %v19584_v47 = vpack.c.bf16 %v19566_v39, %v19566_v39 }
 0x78c   : > { %9293 = vmatprep.mubr.bf16.mxu0 %v19573_v41  ;;  %9335 = vmatmul.mubr.bf16.vlgmr.msra.gmra.mxu1 %v19577_v42 }
 0x78d   : > { %9344 = vmatpush1.bf16.msra.mxu1 %v16249_v25  ;;  %9294 = vmatmul.mubr.bf16.vlgmr.msra.gmra.mxu0 %v19584_v47  ;;  %v16327_v25 = vld [vmem:[%s21657_s8 + $0x3c8] ss:$48 sps:$4 sm:$0xff]  }
 0x78e   : > { %9375 = vmatprep.mubr.bf16.mxu1 %v19573_v41  ;;  %9385 = vmatpush1.bf16.msra.mxu0 %v16252_v46  ;;  %v16330_v46 = vld [vmem:[%s21657_s8 + $0xd0] ss:$48 sps:$4 sm:$0xff]  }
 0x78f   : > { %9345 = vmatprep.subr.bf16.mxu1 %v16257_v51  ;;  %9386 = vmatprep.subr.bf16.mxu0 %v16260_v54  ;;  %v16335_v51 = vld [vmem:[%s21657_s8 + $0x36c] ss:$48 sps:$4 sm:$0xff]   ;;  %v16338_v54 = vld [vmem:[%s21657_s8 + $0x74] ss:$48 sps:$4 sm:$0xff]  }
 0x790   : > { %9416 = vmatprep.mubr.bf16.mxu0 %v17160_v34 }
 0x791   : > { %9346 = vmatpush1.bf16.msra.mxu1 %v16255_v55  ;;  %v16333_v55 = vld [vmem:[%s21657_s8 + $0x368] ss:$48 sps:$4 sm:$0xff]  }
 0x792   : > { %9387 = vmatpush1.bf16.msra.mxu0 %v16258_v57  ;;  %9347 = vmatprep.subr.bf16.mxu1 %v16263_v58  ;;  %v16336_v57 = vld [vmem:[%s21657_s8 + $0x70] ss:$48 sps:$4 sm:$0xff]   ;;  %v16341_v58 = vld [vmem:[%s21657_s8 + $0x30c] ss:$48 sps:$4 sm:$0xff]  }
 0x793   : > { %9388 = vmatprep.subr.bf16.mxu0 %v16266_v59  ;;  %v16344_v59 = vld [vmem:[%s21657_s8 + $0x14] ss:$48 sps:$4 sm:$0xff]  }
 0x795   : > { %9348 = vmatpush1.bf16.msra.mxu1 %v16261_v60  ;;  %v16339_v60 = vld [vmem:[%s21657_s8 + $0x308] ss:$48 sps:$4 sm:$0xff]  }
 0x796   : > { %9389 = vmatpush1.bf16.msra.mxu0 %v16264_v61  ;;  %9349 = vmatprep.subr.bf16.mxu1 %v16269_v62  ;;  %v16342_v61 = vld [vmem:[%s21657_s8 + $0x10] ss:$48 sps:$4 sm:$0xff]   ;;  %v16347_v62 = vld [vmem:[%s21657_s8 + $0x8b4] ss:$48 sps:$4 sm:$0xff]  }
 0x797   : > { %9390 = vmatprep.subr.bf16.mxu0 %v16272_v49  ;;  %v16350_v49 = vld [vmem:[%s21657_s8 + $0x5b4] ss:$48 sps:$4 sm:$0xff]  }
 0x799   : > { %9350 = vmatpush1.bf16.msra.mxu1 %v16267_v53  ;;  %v16345_v53 = vld [vmem:[%s21657_s8 + $0x8b0] ss:$48 sps:$4 sm:$0xff]  }
 0x79a   : > { %9391 = vmatpush1.bf16.msra.mxu0 %v16270_v43  ;;  %9351 = vmatprep.subr.bf16.mxu1 %v16275_v63  ;;  %v16348_v43 = vld [vmem:[%s21657_s8 + $0x5b0] ss:$48 sps:$4 sm:$0xff]   ;;  %v16353_v63 = vld [vmem:[%s21657_s8 + $0x854] ss:$48 sps:$4 sm:$0xff]  }
 0x79b   : > { %9392 = vmatprep.subr.bf16.mxu0 %v16278_v30  ;;  %v16356_v30 = vld [vmem:[%s21657_s8 + $0x554] ss:$48 sps:$4 sm:$0xff]  }
 0x79d   : > { %9352 = vmatpush1.bf16.msra.mxu1 %v16273_v2  ;;  %v16351_v2 = vld [vmem:[%s21657_s8 + $0x850] ss:$48 sps:$4 sm:$0xff]  }
 0x79e   : > { %9393 = vmatpush1.bf16.msra.mxu0 %v16276_v4  ;;  %9353 = vmatprep.subr.bf16.mxu1 %v16281_v48  ;;  %v16354_v4 = vld [vmem:[%s21657_s8 + $0x550] ss:$48 sps:$4 sm:$0xff]   ;;  %v16359_v48 = vld [vmem:[%s21657_s8 + $0x7f4] ss:$48 sps:$4 sm:$0xff]  }
 0x79f   : > { %9394 = vmatprep.subr.bf16.mxu0 %v16284_v17  ;;  %v16362_v17 = vld [vmem:[%s21657_s8 + $0x4f4] ss:$48 sps:$4 sm:$0xff]  }
 0x7a1   : > { %9354 = vmatpush1.bf16.msra.mxu1 %v16279_v5  ;;  %v16357_v5 = vld [vmem:[%s21657_s8 + $0x7f0] ss:$48 sps:$4 sm:$0xff]  }
 0x7a2   : > { %9395 = vmatpush1.bf16.msra.mxu0 %v16282_v6  ;;  %9355 = vmatprep.subr.bf16.mxu1 %v16287_v7  ;;  %v16360_v6 = vld [vmem:[%s21657_s8 + $0x4f0] ss:$48 sps:$4 sm:$0xff]   ;;  %v16365_v7 = vld [vmem:[%s21657_s8 + $0x794] ss:$48 sps:$4 sm:$0xff]  }
 0x7a3   : > { %9396 = vmatprep.subr.bf16.mxu0 %v16290_v31  ;;  %v16368_v31 = vld [vmem:[%s21657_s8 + $0x494] ss:$48 sps:$4 sm:$0xff]  }
 0x7a5   : > { %9356 = vmatpush1.bf16.msra.mxu1 %v16285_v28  ;;  %v16363_v28 = vld [vmem:[%s21657_s8 + $0x790] ss:$48 sps:$4 sm:$0xff]  }
 0x7a6   : > { %9397 = vmatpush1.bf16.msra.mxu0 %v16288_v8  ;;  %9357 = vmatprep.subr.bf16.mxu1 %v16293_v9  ;;  %v16366_v8 = vld [vmem:[%s21657_s8 + $0x490] ss:$48 sps:$4 sm:$0xff]   ;;  %v16371_v9 = vld [vmem:[%s21657_s8 + $0x734] ss:$48 sps:$4 sm:$0xff]  }
 0x7a7   : > { %9398 = vmatprep.subr.bf16.mxu0 %v16296_v10  ;;  %v16374_v10 = vld [vmem:[%s21657_s8 + $0x434] ss:$48 sps:$4 sm:$0xff]  }
 0x7a9   : > { %9358 = vmatpush1.bf16.msra.mxu1 %v16291_v11  ;;  %v16369_v11 = vld [vmem:[%s21657_s8 + $0x730] ss:$48 sps:$4 sm:$0xff]  }
 0x7aa   : > { %9399 = vmatpush1.bf16.msra.mxu0 %v16294_v12  ;;  %9359 = vmatprep.subr.bf16.mxu1 %v16299_v14  ;;  %v16372_v12 = vld [vmem:[%s21657_s8 + $0x430] ss:$48 sps:$4 sm:$0xff]   ;;  %v16377_v14 = vld [vmem:[%s21657_s8 + $0x6d4] ss:$48 sps:$4 sm:$0xff]  }
 0x7ab   : > { %9425 = vmatprep.subr.bf16.mxu0 %v16302_v40  ;;  %v16380_v40 = vld [vmem:[%s21657_s8 + $0x3d4] ss:$48 sps:$4 sm:$0xff]  }
 0x7ad   : > { %9360 = vmatpush2.bf16.msra.mxu1 %v16297_v15  ;;  %9417 = vmatmul.mubr.bf16.vlgmr.msra.gmra.mxu0 %v19577_v42  ;;  %v16375_v15 = vld [vmem:[%s21657_s8 + $0x6d0] ss:$48 sps:$4 sm:$0xff]  }
 0x7ae   : > { %9426 = vmatpush1.bf16.msra.mxu0 %v16300_v16  ;;  %9457 = vmatprep.mubr.bf16.mxu0 %v19573_v41  ;;  %v16378_v16 = vld [vmem:[%s21657_s8 + $0x3d0] ss:$48 sps:$4 sm:$0xff]  }
 0x7af   : > { %9361 = vmatprep.subr.bf16.mxu1 %v16305_v18  ;;  %9427 = vmatprep.subr.bf16.mxu0 %v16308_v19  ;;  %v16383_v18 = vld [vmem:[%s21657_s8 + $0x674] ss:$48 sps:$4 sm:$0xff]  }
 0x7b0   : > { %v16386_v19 = vld [vmem:[%s21657_s8 + $0x374] ss:$48 sps:$4 sm:$0xff]  }
 0x7b1   : > { %9362 = vmatpush2.bf16.msra.mxu1 %v16303_v22  ;;  %v16381_v22 = vld [vmem:[%s21657_s8 + $0x670] ss:$48 sps:$4 sm:$0xff]  }
 0x7b2   : > { %9428 = vmatpush1.bf16.msra.mxu0 %v16306_v13  ;;  %9363 = vmatprep.subr.bf16.mxu1 %v16311_v52  ;;  %v16384_v13 = vld [vmem:[%s21657_s8 + $0x370] ss:$48 sps:$4 sm:$0xff]   ;;  %v16389_v52 = vld [vmem:[%s21657_s8 + $0x614] ss:$48 sps:$4 sm:$0xff]  }
 0x7b3   : > { %9429 = vmatprep.subr.bf16.mxu0 %v16314_v21  ;;  %v16392_v21 = vld [vmem:[%s21657_s8 + $0x314] ss:$48 sps:$4 sm:$0xff]  }
 0x7b5   : > { %9364 = vmatpush2.bf16.msra.mxu1 %v16309_v23  ;;  %v16387_v23 = vld [vmem:[%s21657_s8 + $0x610] ss:$48 sps:$4 sm:$0xff]  }
 0x7b6   : > { %9430 = vmatpush1.bf16.msra.mxu0 %v16312_v24  ;;  %9365 = vmatprep.subr.bf16.mxu1 %v16317_v26  ;;  %v16390_v24 = vld [vmem:[%s21657_s8 + $0x310] ss:$48 sps:$4 sm:$0xff]   ;;  %v16395_v26 = vld [vmem:[%s21657_s8 + $0x2bc] ss:$48 sps:$4 sm:$0xff]  }
 0x7b7   : > { %9431 = vmatprep.subr.bf16.mxu0 %v16320_v27  ;;  %v16398_v27 = vld [vmem:[%s21657_s8 + $0x8bc] ss:$48 sps:$4 sm:$0xff]  }
 0x7b9   : > { %9366 = vmatpush2.bf16.msra.mxu1 %v16315_v3  ;;  %v16393_v3 = vld [vmem:[%s21657_s8 + $0x2b8] ss:$48 sps:$4 sm:$0xff]  }
 0x7ba   : > { %9432 = vmatpush1.bf16.msra.mxu0 %v16318_v29  ;;  %9367 = vmatprep.subr.bf16.mxu1 %v16323_v32  ;;  %v16396_v29 = vld [vmem:[%s21657_s8 + $0x8b8] ss:$48 sps:$4 sm:$0xff]   ;;  %v16401_v32 = vld [vmem:[%s21657_s8 + $0x25c] ss:$48 sps:$4 sm:$0xff]  }
 0x7bb   : > { %9433 = vmatprep.subr.bf16.mxu0 %v16326_v20  ;;  %v16404_v20 = vld [vmem:[%s21657_s8 + $0x85c] ss:$48 sps:$4 sm:$0xff]  }
 0x7bd   : > { %9368 = vmatpush2.bf16.msra.mxu1 %v16321_v33  ;;  %v16399_v33 = vld [vmem:[%s21657_s8 + $0x258] ss:$48 sps:$4 sm:$0xff]  }
 0x7be   : > { %9434 = vmatpush1.bf16.msra.mxu0 %v16324_v44  ;;  %9369 = vmatprep.subr.bf16.mxu1 %v16329_v35  ;;  %v16402_v44 = vld [vmem:[%s21657_s8 + $0x858] ss:$48 sps:$4 sm:$0xff]   ;;  %v16407_v35 = vld [vmem:[%s21657_s8 + $0x1fc] ss:$48 sps:$4 sm:$0xff]  }
 0x7bf   : > { %9435 = vmatprep.subr.bf16.mxu0 %v16332_v36  ;;  %v16410_v36 = vld [vmem:[%s21657_s8 + $0x7fc] ss:$48 sps:$4 sm:$0xff]  }
 0x7c1   : > { %9370 = vmatpush2.bf16.msra.mxu1 %v16327_v25  ;;  %v16405_v25 = vld [vmem:[%s21657_s8 + $0x1f8] ss:$48 sps:$4 sm:$0xff]  }
 0x7c2   : > { %9436 = vmatpush1.bf16.msra.mxu0 %v16330_v46  ;;  %9371 = vmatprep.subr.bf16.mxu1 %v16335_v51  ;;  %v16408_v46 = vld [vmem:[%s21657_s8 + $0x7f8] ss:$48 sps:$4 sm:$0xff]   ;;  %v16413_v51 = vld [vmem:[%s21657_s8 + $0x19c] ss:$48 sps:$4 sm:$0xff]  }
 0x7c3   : > { %9437 = vmatprep.subr.bf16.mxu0 %v16338_v54  ;;  %v16416_v54 = vld [vmem:[%s21657_s8 + $0x79c] ss:$48 sps:$4 sm:$0xff]  }
 0x7c5   : > { %9372 = vmatpush2.bf16.msra.mxu1 %v16333_v55  ;;  %v16411_v55 = vld [vmem:[%s21657_s8 + $0x198] ss:$48 sps:$4 sm:$0xff]  }
 0x7c6   : > { %9438 = vmatpush1.bf16.msra.mxu0 %v16336_v57  ;;  %9373 = vmatprep.subr.bf16.mxu1 %v16341_v58  ;;  %v16414_v57 = vld [vmem:[%s21657_s8 + $0x798] ss:$48 sps:$4 sm:$0xff]   ;;  %v16419_v58 = vld [vmem:[%s21657_s8 + $0x13c] ss:$48 sps:$4 sm:$0xff]  }
 0x7c7   : > { %9439 = vmatprep.subr.bf16.mxu0 %v16344_v59  ;;  %v16422_v59 = vld [vmem:[%s21657_s8 + $0x73c] ss:$48 sps:$4 sm:$0xff]  }
 0x7c9   : > { %9374 = vmatpush2.bf16.msra.mxu1 %v16339_v60  ;;  %v16417_v60 = vld [vmem:[%s21657_s8 + $0x138] ss:$48 sps:$4 sm:$0xff]  }
 0x7ca   : > { %9440 = vmatpush1.bf16.msra.mxu0 %v16342_v61  ;;  %9466 = vmatprep.subr.bf16.mxu1 %v16347_v62  ;;  %v16420_v61 = vld [vmem:[%s21657_s8 + $0x738] ss:$48 sps:$4 sm:$0xff]   ;;  %v16425_v62 = vld [vmem:[%s21657_s8 + $0xdc] ss:$48 sps:$4 sm:$0xff]  }
 0x7cb   : > { %9441 = vmatprep.subr.bf16.mxu0 %v16350_v49  ;;  %v16428_v49 = vld [vmem:[%s21657_s8 + $0x6dc] ss:$48 sps:$4 sm:$0xff]  }
 0x7cc   : > { %9376 = vmatmul.mubr.bf16.vlgmr.msra.gmra.mxu1 %v19584_v47 }
 0x7cd   : > { %9467 = vmatpush1.bf16.msra.mxu1 %v16345_v53  ;;  %9498 = vmatprep.mubr.bf16.mxu1 %v17160_v34  ;;  %v16423_v53 = vld [vmem:[%s21657_s8 + $0xd8] ss:$48 sps:$4 sm:$0xff]  }
 0x7ce   : > { %9442 = vmatpush2.bf16.msra.mxu0 %v16348_v43  ;;  %9468 = vmatprep.subr.bf16.mxu1 %v16353_v63  ;;  %v16426_v43 = vld [vmem:[%s21657_s8 + $0x6d8] ss:$48 sps:$4 sm:$0xff]   ;;  %v16431_v63 = vld [vmem:[%s21657_s8 + $0x7c] ss:$48 sps:$4 sm:$0xff]  }
 0x7cf   : > { %9443 = vmatprep.subr.bf16.mxu0 %v16356_v30  ;;  %v16434_v30 = vld [vmem:[%s21657_s8 + $0x67c] ss:$48 sps:$4 sm:$0xff]  }
 0x7d1   : > { %9469 = vmatpush1.bf16.msra.mxu1 %v16351_v2  ;;  %v16429_v2 = vld [vmem:[%s21657_s8 + $0x78] ss:$48 sps:$4 sm:$0xff]  }
 0x7d2   : > { %9444 = vmatpush2.bf16.msra.mxu0 %v16354_v4  ;;  %9470 = vmatprep.subr.bf16.mxu1 %v16359_v48  ;;  %v16432_v4 = vld [vmem:[%s21657_s8 + $0x678] ss:$48 sps:$4 sm:$0xff]   ;;  %v16437_v48 = vld [vmem:[%s21657_s8 + $0x1c] ss:$48 sps:$4 sm:$0xff]  }
 0x7d3   : > { %9445 = vmatprep.subr.bf16.mxu0 %v16362_v17  ;;  %v16440_v17 = vld [vmem:[%s21657_s8 + $0x61c] ss:$48 sps:$4 sm:$0xff]  }
 0x7d5   : > { %9471 = vmatpush1.bf16.msra.mxu1 %v16357_v5  ;;  %v16435_v5 = vld [vmem:[%s21657_s8 + $0x18] ss:$48 sps:$4 sm:$0xff]  }
 0x7d6   : > { %9446 = vmatpush2.bf16.msra.mxu0 %v16360_v6  ;;  %9472 = vmatprep.subr.bf16.mxu1 %v16365_v7  ;;  %v16438_v6 = vld [vmem:[%s21657_s8 + $0x618] ss:$48 sps:$4 sm:$0xff]   ;;  %v16443_v7 = vld [vmem:[%s21657_s8 + $0x5bc] ss:$48 sps:$4 sm:$0xff]  }
 0x7d7   : > { %9447 = vmatprep.subr.bf16.mxu0 %v16368_v31  ;;  %v16446_v31 = vld [vmem:[%s21657_s8 + $0x2c4] ss:$48 sps:$4 sm:$0xff]  }
 0x7d9   : > { %9473 = vmatpush1.bf16.msra.mxu1 %v16363_v28  ;;  %v16441_v28 = vld [vmem:[%s21657_s8 + $0x5b8] ss:$48 sps:$4 sm:$0xff]  }
 0x7da   : > { %9448 = vmatpush2.bf16.msra.mxu0 %v16366_v8  ;;  %9474 = vmatprep.subr.bf16.mxu1 %v16371_v9  ;;  %v16444_v8 = vld [vmem:[%s21657_s8 + $0x2c0] ss:$48 sps:$4 sm:$0xff]   ;;  %v16449_v9 = vld [vmem:[%s21657_s8 + $0x55c] ss:$48 sps:$4 sm:$0xff]  }
 0x7db   : > { %9449 = vmatprep.subr.bf16.mxu0 %v16374_v10  ;;  %v16452_v10 = vld [vmem:[%s21657_s8 + $0x264] ss:$48 sps:$4 sm:$0xff]  }
 0x7dd   : > { %9475 = vmatpush1.bf16.msra.mxu1 %v16369_v11  ;;  %v16447_v11 = vld [vmem:[%s21657_s8 + $0x558] ss:$48 sps:$4 sm:$0xff]  }
 0x7de   : > { %9450 = vmatpush2.bf16.msra.mxu0 %v16372_v12  ;;  %9476 = vmatprep.subr.bf16.mxu1 %v16377_v14  ;;  %v16450_v12 = vld [vmem:[%s21657_s8 + $0x260] ss:$48 sps:$4 sm:$0xff]   ;;  %v16455_v14 = vld [vmem:[%s21657_s8 + $0x4fc] ss:$48 sps:$4 sm:$0xff]  }
 0x7df   : > { %9451 = vmatprep.subr.bf16.mxu0 %v16380_v40  ;;  %v16458_v40 = vld [vmem:[%s21657_s8 + $0x204] ss:$48 sps:$4 sm:$0xff]  }
 0x7e1   : > { %9477 = vmatpush1.bf16.msra.mxu1 %v16375_v15  ;;  %v16453_v15 = vld [vmem:[%s21657_s8 + $0x4f8] ss:$48 sps:$4 sm:$0xff]  }
 0x7e2   : > { %9452 = vmatpush2.bf16.msra.mxu0 %v16378_v16  ;;  %9478 = vmatprep.subr.bf16.mxu1 %v16383_v18  ;;  %v16456_v16 = vld [vmem:[%s21657_s8 + $0x200] ss:$48 sps:$4 sm:$0xff]   ;;  %v16461_v18 = vld [vmem:[%s21657_s8 + $0x49c] ss:$48 sps:$4 sm:$0xff]  }
 0x7e3   : > { %9453 = vmatprep.subr.bf16.mxu0 %v16386_v19  ;;  %v16464_v19 = vld [vmem:[%s21657_s8 + $0x1a4] ss:$48 sps:$4 sm:$0xff]  }
 0x7e5   : > { %9479 = vmatpush1.bf16.msra.mxu1 %v16381_v22  ;;  %v16459_v22 = vld [vmem:[%s21657_s8 + $0x498] ss:$48 sps:$4 sm:$0xff]  }
 0x7e6   : > { %9454 = vmatpush2.bf16.msra.mxu0 %v16384_v13  ;;  %9480 = vmatprep.subr.bf16.mxu1 %v16389_v52  ;;  %v16462_v13 = vld [vmem:[%s21657_s8 + $0x1a0] ss:$48 sps:$4 sm:$0xff]   ;;  %v16467_v52 = vld [vmem:[%s21657_s8 + $0x43c] ss:$48 sps:$4 sm:$0xff]  }
 0x7e7   : > { %9455 = vmatprep.subr.bf16.mxu0 %v16392_v21  ;;  %v16470_v21 = vld [vmem:[%s21657_s8 + $0x144] ss:$48 sps:$4 sm:$0xff]  }
 0x7e9   : > { %9481 = vmatpush1.bf16.msra.mxu1 %v16387_v23  ;;  %v16465_v23 = vld [vmem:[%s21657_s8 + $0x438] ss:$48 sps:$4 sm:$0xff]  }
 0x7ea   : > { %9456 = vmatpush2.bf16.msra.mxu0 %v16390_v24  ;;  %9507 = vmatprep.subr.bf16.mxu1 %v16395_v26  ;;  %v16468_v24 = vld [vmem:[%s21657_s8 + $0x140] ss:$48 sps:$4 sm:$0xff]   ;;  %v16473_v26 = vld [vmem:[%s21657_s8 + $0x3dc] ss:$48 sps:$4 sm:$0xff]  }
 0x7eb   : > { %9548 = vmatprep.subr.bf16.mxu0 %v16398_v27  ;;  %v16476_v27 = vld [vmem:[%s21657_s8 + $0xe4] ss:$48 sps:$4 sm:$0xff]  }
 0x7ec   : > { %9499 = vmatmul.mubr.bf16.vlgmr.msra.gmra.mxu1 %v19577_v42 }
 0x7ed   : > { %9458 = vmatmul.mubr.bf16.vlgmr.msra.gmra.mxu0 %v19584_v47  ;;  %9508 = vmatpush1.bf16.msra.mxu1 %v16393_v3  ;;  %v16471_v3 = vld [vmem:[%s21657_s8 + $0x3d8] ss:$48 sps:$4 sm:$0xff]  }
 0x7ee   : > { %9539 = vmatprep.mubr.bf16.mxu1 %v19573_v41  ;;  %9549 = vmatpush1.bf16.msra.mxu0 %v16396_v29  ;;  %v16474_v29 = vld [vmem:[%s21657_s8 + $0xe0] ss:$48 sps:$4 sm:$0xff]  }
 0x7ef   : > { %9509 = vmatprep.subr.bf16.mxu1 %v16401_v32  ;;  %9550 = vmatprep.subr.bf16.mxu0 %v16404_v20  ;;  %v16479_v32 = vld [vmem:[%s21657_s8 + $0x37c] ss:$48 sps:$4 sm:$0xff]   ;;  %v16482_v20 = vld [vmem:[%s21657_s8 + $0x84] ss:$48 sps:$4 sm:$0xff]  }
 0x7f0   : > { %9580 = vmatprep.mubr.bf16.mxu0 %v17160_v34 }
 0x7f1   : > { %9510 = vmatpush1.bf16.msra.mxu1 %v16399_v33  ;;  %v16477_v33 = vld [vmem:[%s21657_s8 + $0x378] ss:$48 sps:$4 sm:$0xff]  }
 0x7f2   : > { %9551 = vmatpush1.bf16.msra.mxu0 %v16402_v44  ;;  %9511 = vmatprep.subr.bf16.mxu1 %v16407_v35  ;;  %v16480_v44 = vld [vmem:[%s21657_s8 + $0x80] ss:$48 sps:$4 sm:$0xff]   ;;  %v16485_v35 = vld [vmem:[%s21657_s8 + $0x31c] ss:$48 sps:$4 sm:$0xff]  }
 0x7f3   : > { %9552 = vmatprep.subr.bf16.mxu0 %v16410_v36  ;;  %v16488_v36 = vld [vmem:[%s21657_s8 + $0x24] ss:$48 sps:$4 sm:$0xff]  }
 0x7f5   : > { %9512 = vmatpush1.bf16.msra.mxu1 %v16405_v25  ;;  %v16483_v25 = vld [vmem:[%s21657_s8 + $0x318] ss:$48 sps:$4 sm:$0xff]  }
 0x7f6   : > { %9553 = vmatpush1.bf16.msra.mxu0 %v16408_v46  ;;  %9513 = vmatprep.subr.bf16.mxu1 %v16413_v51  ;;  %v16486_v46 = vld [vmem:[%s21657_s8 + $0x20] ss:$48 sps:$4 sm:$0xff]   ;;  %v16491_v51 = vld [vmem:[%s21657_s8 + $0x8c4] ss:$48 sps:$4 sm:$0xff]  }
 0x7f7   : > { %9554 = vmatprep.subr.bf16.mxu0 %v16416_v54  ;;  %v16494_v54 = vld [vmem:[%s21657_s8 + $0x5c4] ss:$48 sps:$4 sm:$0xff]  }
 0x7f9   : > { %9514 = vmatpush1.bf16.msra.mxu1 %v16411_v55  ;;  %v16489_v55 = vld [vmem:[%s21657_s8 + $0x8c0] ss:$48 sps:$4 sm:$0xff]  }
 0x7fa   : > { %9555 = vmatpush1.bf16.msra.mxu0 %v16414_v57  ;;  %9515 = vmatprep.subr.bf16.mxu1 %v16419_v58  ;;  %v16492_v57 = vld [vmem:[%s21657_s8 + $0x5c0] ss:$48 sps:$4 sm:$0xff]   ;;  %v16497_v58 = vld [vmem:[%s21657_s8 + $0x864] ss:$48 sps:$4 sm:$0xff]  }
 0x7fb   : > { %9556 = vmatprep.subr.bf16.mxu0 %v16422_v59  ;;  %v16500_v59 = vld [vmem:[%s21657_s8 + $0x564] ss:$48 sps:$4 sm:$0xff]  }
 0x7fd   : > { %9516 = vmatpush1.bf16.msra.mxu1 %v16417_v60  ;;  %v16495_v60 = vld [vmem:[%s21657_s8 + $0x860] ss:$48 sps:$4 sm:$0xff]  }
 0x7fe   : > { %9557 = vmatpush1.bf16.msra.mxu0 %v16420_v61  ;;  %9517 = vmatprep.subr.bf16.mxu1 %v16425_v62  ;;  %v16498_v61 = vld [vmem:[%s21657_s8 + $0x560] ss:$48 sps:$4 sm:$0xff]   ;;  %v16503_v62 = vld [vmem:[%s21657_s8 + $0x804] ss:$48 sps:$4 sm:$0xff]  }
 0x7ff   : > { %9558 = vmatprep.subr.bf16.mxu0 %v16428_v49  ;;  %v16506_v49 = vld [vmem:[%s21657_s8 + $0x504] ss:$48 sps:$4 sm:$0xff]  }
 0x801   : > { %9518 = vmatpush1.bf16.msra.mxu1 %v16423_v53  ;;  %v16501_v53 = vld [vmem:[%s21657_s8 + $0x800] ss:$48 sps:$4 sm:$0xff]  }
 0x802   : > { %9559 = vmatpush1.bf16.msra.mxu0 %v16426_v43  ;;  %9519 = vmatprep.subr.bf16.mxu1 %v16431_v63  ;;  %v16504_v43 = vld [vmem:[%s21657_s8 + $0x500] ss:$48 sps:$4 sm:$0xff]   ;;  %v16509_v63 = vld [vmem:[%s21657_s8 + $0x7a4] ss:$48 sps:$4 sm:$0xff]  }
 0x803   : > { %9560 = vmatprep.subr.bf16.mxu0 %v16434_v30  ;;  %v16512_v30 = vld [vmem:[%s21657_s8 + $0x4a4] ss:$48 sps:$4 sm:$0xff]  }
 0x805   : > { %9520 = vmatpush1.bf16.msra.mxu1 %v16429_v2  ;;  %v16507_v2 = vld [vmem:[%s21657_s8 + $0x7a0] ss:$48 sps:$4 sm:$0xff]  }
 0x806   : > { %9561 = vmatpush1.bf16.msra.mxu0 %v16432_v4  ;;  %9521 = vmatprep.subr.bf16.mxu1 %v16437_v48  ;;  %v16510_v4 = vld [vmem:[%s21657_s8 + $0x4a0] ss:$48 sps:$4 sm:$0xff]   ;;  %v16515_v48 = vld [vmem:[%s21657_s8 + $0x744] ss:$48 sps:$4 sm:$0xff]  }
 0x807   : > { %9562 = vmatprep.subr.bf16.mxu0 %v16440_v17  ;;  %v16518_v17 = vld [vmem:[%s21657_s8 + $0x444] ss:$48 sps:$4 sm:$0xff]  }
 0x809   : > { %9522 = vmatpush1.bf16.msra.mxu1 %v16435_v5  ;;  %v16513_v5 = vld [vmem:[%s21657_s8 + $0x740] ss:$48 sps:$4 sm:$0xff]  }
 0x80a   : > { %9563 = vmatpush1.bf16.msra.mxu0 %v16438_v6  ;;  %9523 = vmatprep.subr.bf16.mxu1 %v16443_v7  ;;  %v16516_v6 = vld [vmem:[%s21657_s8 + $0x440] ss:$48 sps:$4 sm:$0xff]   ;;  %v16521_v7 = vld [vmem:[%s21657_s8 + $0x6e4] ss:$48 sps:$4 sm:$0xff]  }
 0x80b   : > { %9589 = vmatprep.subr.bf16.mxu0 %v16446_v31  ;;  %v16524_v31 = vld [vmem:[%s21657_s8 + $0x3e4] ss:$48 sps:$4 sm:$0xff]  }
 0x80d   : > { %9524 = vmatpush2.bf16.msra.mxu1 %v16441_v28  ;;  %9581 = vmatmul.mubr.bf16.vlgmr.msra.gmra.mxu0 %v19577_v42  ;;  %v16519_v28 = vld [vmem:[%s21657_s8 + $0x6e0] ss:$48 sps:$4 sm:$0xff]  }
 0x80e   : > { %9590 = vmatpush1.bf16.msra.mxu0 %v16444_v8  ;;  %9621 = vmatprep.mubr.bf16.mxu0 %v19573_v41  ;;  %v16522_v8 = vld [vmem:[%s21657_s8 + $0x3e0] ss:$48 sps:$4 sm:$0xff]  }
 0x80f   : > { %9525 = vmatprep.subr.bf16.mxu1 %v16449_v9  ;;  %9591 = vmatprep.subr.bf16.mxu0 %v16452_v10  ;;  %v16527_v9 = vld [vmem:[%s21657_s8 + $0x684] ss:$48 sps:$4 sm:$0xff]  }
 0x810   : > { %v16530_v10 = vld [vmem:[%s21657_s8 + $0x384] ss:$48 sps:$4 sm:$0xff]  }
 0x811   : > { %9526 = vmatpush2.bf16.msra.mxu1 %v16447_v11  ;;  %v16525_v11 = vld [vmem:[%s21657_s8 + $0x680] ss:$48 sps:$4 sm:$0xff]  }
 0x812   : > { %9592 = vmatpush1.bf16.msra.mxu0 %v16450_v12  ;;  %9527 = vmatprep.subr.bf16.mxu1 %v16455_v14  ;;  %v16528_v12 = vld [vmem:[%s21657_s8 + $0x380] ss:$48 sps:$4 sm:$0xff]   ;;  %v16533_v14 = vld [vmem:[%s21657_s8 + $0x624] ss:$48 sps:$4 sm:$0xff]  }
 0x813   : > { %9593 = vmatprep.subr.bf16.mxu0 %v16458_v40  ;;  %v16536_v40 = vld [vmem:[%s21657_s8 + $0x324] ss:$48 sps:$4 sm:$0xff]  }
 0x815   : > { %9528 = vmatpush2.bf16.msra.mxu1 %v16453_v15  ;;  %v16531_v15 = vld [vmem:[%s21657_s8 + $0x620] ss:$48 sps:$4 sm:$0xff]  }
 0x816   : > { %9594 = vmatpush1.bf16.msra.mxu0 %v16456_v16  ;;  %9529 = vmatprep.subr.bf16.mxu1 %v16461_v18  ;;  %v16534_v16 = vld [vmem:[%s21657_s8 + $0x320] ss:$48 sps:$4 sm:$0xff]   ;;  %v16539_v18 = vld [vmem:[%s21657_s8 + $0x2cc] ss:$48 sps:$4 sm:$0xff]  }
 0x817   : > { %9595 = vmatprep.subr.bf16.mxu0 %v16464_v19  ;;  %v16542_v19 = vld [vmem:[%s21657_s8 + $0x8cc] ss:$48 sps:$4 sm:$0xff]  }
 0x819   : > { %9530 = vmatpush2.bf16.msra.mxu1 %v16459_v22  ;;  %v16537_v22 = vld [vmem:[%s21657_s8 + $0x2c8] ss:$48 sps:$4 sm:$0xff]  }
 0x81a   : > { %9596 = vmatpush1.bf16.msra.mxu0 %v16462_v13  ;;  %9531 = vmatprep.subr.bf16.mxu1 %v16467_v52  ;;  %v16540_v13 = vld [vmem:[%s21657_s8 + $0x8c8] ss:$48 sps:$4 sm:$0xff]   ;;  %v20182_v52 = vld [vmem:[%s21658_s9] sm:$0xff] }
 0x81b   : > { %9597 = vmatprep.subr.bf16.mxu0 %v16470_v21  ;;  %v16545_v21 = vld [vmem:[%s21657_s8 + $0x26c] ss:$48 sps:$4 sm:$0xff]  }
 0x81d   : > { %9532 = vmatpush2.bf16.msra.mxu1 %v16465_v23  ;;  %v16548_v23 = vld [vmem:[%s21657_s8 + $0x86c] ss:$48 sps:$4 sm:$0xff]  }
 0x81e   : > { %9598 = vmatpush1.bf16.msra.mxu0 %v16468_v24  ;;  %9533 = vmatprep.subr.bf16.mxu1 %v16473_v26  ;;  %v7768_v26 = vrot.slane %v20182_v52, %v19364_v50 }
 0x81f   : > { %9599 = vmatprep.subr.bf16.mxu0 %v16476_v27 }
 0x821   : > { %9534 = vmatpush2.bf16.msra.mxu1 %v16471_v3  ;;  %v16543_v3 = vld [vmem:[%s21657_s8 + $0x268] ss:$48 sps:$4 sm:$0xff]  }
 0x822   : > { %9600 = vmatpush1.bf16.msra.mxu0 %v16474_v29  ;;  %9535 = vmatprep.subr.bf16.mxu1 %v16479_v32  ;;  %v16546_v32 = vld [vmem:[%s21657_s8 + $0x868] ss:$48 sps:$4 sm:$0xff]  }
 0x823   : > { %9601 = vmatprep.subr.bf16.mxu0 %v16482_v20  ;;  %v16551_v20 = vld [vmem:[%s21657_s8 + $0x20c] ss:$48 sps:$4 sm:$0xff]  }
 0x825   : > { %9536 = vmatpush2.bf16.msra.mxu1 %v16477_v33 }
 0x826   : > { %9602 = vmatpush1.bf16.msra.mxu0 %v16480_v44  ;;  %9537 = vmatprep.subr.bf16.mxu1 %v16485_v35  ;;  %v16554_v44 = vld [vmem:[%s21657_s8 + $0x80c] ss:$48 sps:$4 sm:$0xff]  }
 0x827   : > { %9603 = vmatprep.subr.bf16.mxu0 %v16488_v36 }
 0x829   : > { %9538 = vmatpush2.bf16.msra.mxu1 %v16483_v25  ;;  %v16549_v25 = vld [vmem:[%s21657_s8 + $0x208] ss:$48 sps:$4 sm:$0xff]  }
 0x82a   : > { %9604 = vmatpush1.bf16.msra.mxu0 %v16486_v46  ;;  %9630 = vmatprep.subr.bf16.mxu1 %v16491_v51 }
 0x82b   : > { %9605 = vmatprep.subr.bf16.mxu0 %v16494_v54  ;;  %v16552_v54 = vld [vmem:[%s21657_s8 + $0x808] ss:$48 sps:$4 sm:$0xff]  }
 0x82c   : > { %9540 = vmatmul.mubr.bf16.vlgmr.msra.gmra.mxu1 %v19584_v47 }
 0x82d   : > { %9631 = vmatpush1.bf16.msra.mxu1 %v16489_v55  ;;  %9662 = vmatprep.mubr.bf16.mxu1 %v17160_v34  ;;  %v16557_v55 = vld [vmem:[%s21657_s8 + $0x1ac] ss:$48 sps:$4 sm:$0xff]  }
 0x82e   : > { %9606 = vmatpush2.bf16.msra.mxu0 %v16492_v57  ;;  %9632 = vmatprep.subr.bf16.mxu1 %v16497_v58  ;;  %v16560_v57 = vld [vmem:[%s21657_s8 + $0x7ac] ss:$48 sps:$4 sm:$0xff]  }
 0x82f   : > { %9607 = vmatprep.subr.bf16.mxu0 %v16500_v59  ;;  %v16555_v59 = vld [vmem:[%s21657_s8 + $0x1a8] ss:$48 sps:$4 sm:$0xff]  }
 0x831   : > { %9633 = vmatpush1.bf16.msra.mxu1 %v16495_v60 }
 0x832   : > { %9608 = vmatpush2.bf16.msra.mxu0 %v16498_v61  ;;  %9634 = vmatprep.subr.bf16.mxu1 %v16503_v62  ;;  %v16558_v61 = vld [vmem:[%s21657_s8 + $0x7a8] ss:$48 sps:$4 sm:$0xff]   ;;  %v16563_v62 = vld [vmem:[%s21657_s8 + $0x14c] ss:$48 sps:$4 sm:$0xff]  }
 0x833   : > { %9609 = vmatprep.subr.bf16.mxu0 %v16506_v49  ;;  %v16566_v49 = vld [vmem:[%s21657_s8 + $0x74c] ss:$48 sps:$4 sm:$0xff]  }
 0x835   : > { %9635 = vmatpush1.bf16.msra.mxu1 %v16501_v53 }
 0x836   : > { %9610 = vmatpush2.bf16.msra.mxu0 %v16504_v43  ;;  %9636 = vmatprep.subr.bf16.mxu1 %v16509_v63  ;;  %v16561_v43 = vld [vmem:[%s21657_s8 + $0x148] ss:$48 sps:$4 sm:$0xff]  }
 0x837   : > { %9611 = vmatprep.subr.bf16.mxu0 %v16512_v30  ;;  %v16564_v30 = vld [vmem:[%s21657_s8 + $0x748] ss:$48 sps:$4 sm:$0xff]  }
 0x839   : > { %9637 = vmatpush1.bf16.msra.mxu1 %v16507_v2  ;;  %v16569_v2 = vld [vmem:[%s21657_s8 + $0xec] ss:$48 sps:$4 sm:$0xff]  }
 0x83a   : > { %9612 = vmatpush2.bf16.msra.mxu0 %v16510_v4  ;;  %9638 = vmatprep.subr.bf16.mxu1 %v16515_v48  ;;  %v16572_v4 = vld [vmem:[%s21657_s8 + $0x6ec] ss:$48 sps:$4 sm:$0xff]  }
 0x83b   : > { %9613 = vmatprep.subr.bf16.mxu0 %v16518_v17  ;;  %v16567_v17 = vld [vmem:[%s21657_s8 + $0xe8] ss:$48 sps:$4 sm:$0xff]  }
 0x83d   : > { %9639 = vmatpush1.bf16.msra.mxu1 %v16513_v5  ;;  %v16570_v5 = vld [vmem:[%s21657_s8 + $0x6e8] ss:$48 sps:$4 sm:$0xff]  }
 0x83e   : > { %9614 = vmatpush2.bf16.msra.mxu0 %v16516_v6  ;;  %9640 = vmatprep.subr.bf16.mxu1 %v16521_v7  ;;  %v16575_v6 = vld [vmem:[%s21657_s8 + $0x8c] ss:$48 sps:$4 sm:$0xff]  }
 0x83f   : > { %9615 = vmatprep.subr.bf16.mxu0 %v16524_v31  ;;  %v16578_v7 = vld [vmem:[%s21657_s8 + $0x68c] ss:$48 sps:$4 sm:$0xff]   ;;  %v16573_v31 = vld [vmem:[%s21657_s8 + $0x88] ss:$48 sps:$4 sm:$0xff]  }
 0x841   : > { %9641 = vmatpush1.bf16.msra.mxu1 %v16519_v28  ;;  %v16576_v28 = vld [vmem:[%s21657_s8 + $0x688] ss:$48 sps:$4 sm:$0xff]  }
 0x842   : > { %9616 = vmatpush2.bf16.msra.mxu0 %v16522_v8  ;;  %9642 = vmatprep.subr.bf16.mxu1 %v16527_v9  ;;  %v16581_v8 = vld [vmem:[%s21657_s8 + $0x2c] ss:$48 sps:$4 sm:$0xff]  }
 0x843   : > { %9617 = vmatprep.subr.bf16.mxu0 %v16530_v10  ;;  %v16584_v9 = vld [vmem:[%s21657_s8 + $0x62c] ss:$48 sps:$4 sm:$0xff]   ;;  %v16579_v10 = vld [vmem:[%s21657_s8 + $0x28] ss:$48 sps:$4 sm:$0xff]  }
 0x845   : > { %9643 = vmatpush1.bf16.msra.mxu1 %v16525_v11  ;;  %v16582_v11 = vld [vmem:[%s21657_s8 + $0x628] ss:$48 sps:$4 sm:$0xff]  }
 0x846   : > { %9618 = vmatpush2.bf16.msra.mxu0 %v16528_v12  ;;  %9644 = vmatprep.subr.bf16.mxu1 %v16533_v14  ;;  %v16587_v12 = vld [vmem:[%s21657_s8 + $0x5cc] ss:$48 sps:$4 sm:$0xff]  }
 0x847   : > { %9619 = vmatprep.subr.bf16.mxu0 %v16536_v40  ;;  %v16590_v14 = vld [vmem:[%s21659_s10 + $0xac] ss:$12 sps:$4 sm:$0xff]  }
 0x848   : > { %v16585_v40 = vld [vmem:[%s21657_s8 + $0x5c8] ss:$48 sps:$4 sm:$0xff]  }
 0x849   : > { %9645 = vmatpush1.bf16.msra.mxu1 %v16531_v15  ;;  %v16588_v15 = vld [vmem:[%s21659_s10 + $0xa8] ss:$12 sps:$4 sm:$0xff]  }
 0x84a   : > { %9620 = vmatpush2.bf16.msra.mxu0 %v16534_v16  ;;  %9671 = vmatprep.subr.bf16.mxu1 %v16539_v18  ;;  %v16593_v16 = vld [vmem:[%s21657_s8 + $0x56c] ss:$48 sps:$4 sm:$0xff]  }
 0x84b   : > { %9712 = vmatprep.subr.bf16.mxu0 %v16542_v19  ;;  %v16596_v19 = vld [vmem:[%s21659_s10 + $0x94] ss:$12 sps:$4 sm:$0xff]  }
 0x84c   : > { %9663 = vmatmul.mubr.bf16.vlgmr.msra.gmra.mxu1 %v19577_v42  ;;  %v20191_v24 = vpop.f32.mrf.mxu1 }
 0x84d   : > { %9622 = vmatmul.mubr.bf16.vlgmr.msra.gmra.mxu0 %v19584_v47  ;;  %9672 = vmatpush1.bf16.msra.mxu1 %v16537_v22  ;;  %v20196_v27 = vpop.f32.mrf.mxu0 }
 0x84e   : > { %9703 = vmatprep.mubr.bf16.mxu1 %v19573_v41  ;;  %9713 = vmatpush1.bf16.msra.mxu0 %v16540_v13  ;;  %v9338_v29 = vpop.f32.mrf.mxu1 }
 0x84f   : > { %v9297_v33 = vpop.f32.mrf.mxu0  ;;  %9673 = vmatprep.subr.bf16.mxu1 %v16545_v21  ;;  %9714 = vmatprep.subr.bf16.mxu0 %v16548_v23  ;;  %v16591_v21 = vld [vmem:[%s21657_s8 + $0x568] ss:$48 sps:$4 sm:$0xff]   ;;  %v16594_v23 = vld [vmem:[%s21659_s10 + $0x90] ss:$12 sps:$4 sm:$0xff]  }
 0x850   : > { %v9298_v35 = vadd.f32 %v9297_v33, %v7768_v26  ;;  %v9340_v36 = vpop.f32.mrf.mxu1  ;;  %9744 = vmatprep.mubr.bf16.mxu0 %v17160_v34  ;;  %v16599_v26 = vld [vmem:[%s21657_s8 + $0x50c] ss:$48 sps:$4 sm:$0xff]  }
 0x851   : > { %9674 = vmatpush1.bf16.msra.mxu1 %v16543_v3  ;;  %v9299_v41 = vpop.f32.mrf.mxu0 }
 0x852   : > { %v20215_v46 = vadd.f32 %v9338_v29, %v9298_v35  ;;  %9715 = vmatpush1.bf16.msra.mxu0 %v16546_v32  ;;  %v9341_v51 = vpop.f32.mrf.mxu1  ;;  %9675 = vmatprep.subr.bf16.mxu1 %v16551_v20  ;;  %v7764_v29 = vrot.slane %v20182_v52, %v19367_v56  ;;  %v16600_v35 = vld [vmem:[%s21659_s10 + $0x78] ss:$12 sps:$4 sm:$0xff]   ;;  %v16605_v41 = vld [vmem:[%s21657_s8 + $0x4ac] ss:$48 sps:$4 sm:$0xff]  }
 0x853   : > { %v9300_v34 = vpop.f32.mrf.mxu0  ;;  %9716 = vmatprep.subr.bf16.mxu0 %v16554_v44  ;;  %v16597_v44 = vld [vmem:[%s21657_s8 + $0x508] ss:$48 sps:$4 sm:$0xff]   ;;  %v16608_v51 = vld [vmem:[%s21659_s10 + $0x64] ss:$12 sps:$4 sm:$0xff]  }
 0x854   : > { %v9754_v58 = vmul.f32 %v20215_v46, %v20215_v46 }
 0x855   : > { %9676 = vmatpush1.bf16.msra.mxu1 %v16549_v25  ;;  %v9296_v25 = vadd.f32 %v20196_v27, %v7764_v29  ;;  %v16611_v27 = vld [vmem:[%s21657_s8 + $0x44c] ss:$48 sps:$4 sm:$0xff]   ;;  %v16645_v29 = vld [vmem:[%s21659_s10 + $0x1f8] ss:$12 sps:$4 sm:$0xff]  }
 0x856   : > { %v9766_v60 = vmul.f32 %v9754_v58, %v20215_v46  ;;  %9717 = vmatpush1.bf16.msra.mxu0 %v16552_v54  ;;  %9677 = vmatprep.subr.bf16.mxu1 %v16557_v55  ;;  %v16603_v54 = vld [vmem:[%s21657_s8 + $0x4a8] ss:$48 sps:$4 sm:$0xff]   ;;  %v16606_v55 = vld [vmem:[%s21659_s10 + $0x60] ss:$12 sps:$4 sm:$0xff]  }
 0x857   : > { %9718 = vmatprep.subr.bf16.mxu0 %v16560_v57  ;;  %v20348_v34 = vadd.f32 %v20191_v24, %v9296_v25  ;;  %v16614_v57 = vld [vmem:[%s21659_s10 + $0x4c] ss:$12 sps:$4 sm:$0xff]  }
 0x858   : > { %v9778_v53 = vmul.f32 0.044715, %v9766_v60  ;;  %v16609_v58 = vld [vmem:[%s21657_s8 + $0x448] ss:$48 sps:$4 sm:$0xff]   ;;  %v16617_v24 = vld [vmem:[%s21657_s8 + $0x3ec] ss:$48 sps:$4 sm:$0xff]  }
 0x859   : > { %9678 = vmatpush1.bf16.msra.mxu1 %v16555_v59  ;;  %v16612_v59 = vld [vmem:[%s21659_s10 + $0x48] ss:$12 sps:$4 sm:$0xff]   ;;  %v9753_v60 = vmul.f32 %v20348_v34, %v20348_v34  ;;  %v16651_v25 = vld [vmem:[%s21659_s10 + $0x1e0] ss:$12 sps:$4 sm:$0xff]  }
 0x85a   : > { %v9790_v63 = vadd.f32 %v9778_v53, %v20215_v46  ;;  %9719 = vmatpush1.bf16.msra.mxu0 %v16558_v61  ;;  %9679 = vmatprep.subr.bf16.mxu1 %v16563_v62  ;;  %v16620_v61 = vld [vmem:[%s21659_s10 + $0x34] ss:$12 sps:$4 sm:$0xff]   ;;  %v16615_v62 = vld [vmem:[%s21657_s8 + $0x3e8] ss:$48 sps:$4 sm:$0xff]   ;;  %v16623_v53 = vld [vmem:[%s21657_s8 + $0x38c] ss:$48 sps:$4 sm:$0xff]  }
 0x85b   : > { %9720 = vmatprep.subr.bf16.mxu0 %v16566_v49  ;;  %v16618_v49 = vld [vmem:[%s21659_s10 + $0x30] ss:$12 sps:$4 sm:$0xff]  }
 0x85c   : > { %v9802_v48 = vmul.f32 0.7978846, %v9790_v63  ;;  %v16626_v63 = vld [vmem:[%s21659_s10 + $0x1c] ss:$12 sps:$4 sm:$0xff]  }
 0x85d   : > { %9680 = vmatpush1.bf16.msra.mxu1 %v16561_v43  ;;  %v9765_v43 = vmul.f32 %v9753_v60, %v20348_v34  ;;  %v16668_v60 = vld [vmem:[%s21659_s10 + $0xf4] ss:$12 sps:$4 sm:$0xff]  }
 0x85e   : > { %9721 = vmatpush1.bf16.msra.mxu0 %v16564_v30  ;;  %9681 = vmatprep.subr.bf16.mxu1 %v16569_v2  ;;  %17067 = vtanh.f32 %v9802_v48  ;;  %v16621_v30 = vld [vmem:[%s21657_s8 + $0x388] ss:$48 sps:$4 sm:$0xff]  }
 0x85f   : > { %9722 = vmatprep.subr.bf16.mxu0 %v16572_v4  ;;  %v16624_v2 = vld [vmem:[%s21659_s10 + $0x18] ss:$12 sps:$4 sm:$0xff]   ;;  %v16629_v4 = vld [vmem:[%s21657_s8 + $0x32c] ss:$48 sps:$4 sm:$0xff]   ;;  %v9777_v48 = vmul.f32 0.044715, %v9765_v43 }
 0x860   : > { %v16666_v43 = vld [vmem:[%s21659_s10 + $0xf0] ss:$12 sps:$4 sm:$0xff]  }
 0x861   : > { %9682 = vmatpush1.bf16.msra.mxu1 %v16567_v17  ;;  %v16632_v17 = vld [vmem:[%s21659_s10 + $0x4] ss:$12 sps:$4 sm:$0xff]  }
 0x862   : > { %9723 = vmatpush1.bf16.msra.mxu0 %v16570_v5  ;;  %9683 = vmatprep.subr.bf16.mxu1 %v16575_v6  ;;  %v16627_v5 = vld [vmem:[%s21657_s8 + $0x328] ss:$48 sps:$4 sm:$0xff]   ;;  %v16630_v6 = vld [vmem:[%s21659_s10] ss:$12 sps:$4 sm:$0xff]  }
 0x863   : > { %9724 = vmatprep.subr.bf16.mxu0 %v16578_v7  ;;  %v16635_v7 = vld [vmem:[%s21659_s10 + $0x22c] ss:$12 sps:$4 sm:$0xff]  }
 0x865   : > { %9684 = vmatpush1.bf16.msra.mxu1 %v16573_v31  ;;  %v9789_v31 = vadd.f32 %v9777_v48, %v20348_v34 }
 0x866   : > { %9725 = vmatpush1.bf16.msra.mxu0 %v16576_v28  ;;  %9685 = vmatprep.subr.bf16.mxu1 %v16581_v8  ;;  %v16638_v28 = vld [vmem:[%s21659_s10 + $0x16c] ss:$12 sps:$4 sm:$0xff]   ;;  %v7775_v8 = vsub.s32 3, %v19361_v45 }
 0x867   : > { %9726 = vmatprep.subr.bf16.mxu0 %v16584_v9  ;;  %v16633_v9 = vld [vmem:[%s21659_s10 + $0x228] ss:$12 sps:$4 sm:$0xff]  }
 0x869   : > { %9686 = vmatpush1.bf16.msra.mxu1 %v16579_v10  ;;  %v16636_v10 = vld [vmem:[%s21659_s10 + $0x168] ss:$12 sps:$4 sm:$0xff]  }
 0x86a   : > { %9727 = vmatpush1.bf16.msra.mxu0 %v16582_v11  ;;  %9687 = vmatprep.subr.bf16.mxu1 %v16587_v12  ;;  %v16641_v11 = vld [vmem:[%s21659_s10 + $0x214] ss:$12 sps:$4 sm:$0xff]   ;;  %v9801_v12 = vmul.f32 0.7978846, %v9789_v31 }
 0x86b   : > { %v17068_v18 = vpop.eup %17067  ;;  %11810 = vmatprep.subr.bf16.mxu0 %v16590_v14  ;;  %v7776_v14 = vrot.slane %v20182_v52, %v7775_v8  ;;  %v16675_v31 = vld [vmem:[%s21659_s10 + $0x180] ss:$12 sps:$4 sm:$0xff]  }
 0x86c   : > { %v9826_v22 = vadd.f32 1.0, %v17068_v18  ;;  %v7772_v18 = vrot.slane %v20182_v52, %v19375_v0  ;;  %17069 = vtanh.f32 %v9801_v12  ;;  %v16686_v12 = vld [vmem:[%s21659_s10 + $0x3ac] ss:$12 sps:$4 sm:$0xff]  }
 0x86d   : > { %v20302_v13 = vpop.f32.mrf.mxu0  ;;  %9688 = vmatpush2.bf16.msra.mxu1 %v16585_v40  ;;  %9745 = vmatmul.mubr.bf16.vlgmr.msra.gmra.mxu0 %v19577_v42  ;;  %v16602_v42 = vld [vmem:[%s21659_s10 + $0x7c] ss:$12 sps:$4 sm:$0xff]   ;;  %v16644_v40 = vld [vmem:[%s21659_s10 + $0x154] ss:$12 sps:$4 sm:$0xff]  }
 0x86e   : > { %11811 = vmatpush1.bf16.msra.mxu0 %v16588_v15  ;;  %9689 = vmatprep.subr.bf16.mxu1 %v16593_v16  ;;  %v9838_v3 = vmul.f32 0.5, %v9826_v22  ;;  %v16639_v16 = vld [vmem:[%s21659_s10 + $0x210] ss:$12 sps:$4 sm:$0xff]  }
 0x86f   : > { %v20316_v32 = vpop.f32.mrf.mxu0  ;;  %11812 = vmatprep.subr.bf16.mxu0 %v16596_v19  ;;  %v16642_v22 = vld [vmem:[%s21659_s10 + $0x150] ss:$12 sps:$4 sm:$0xff]  }
 0x870   : > { %v9850_v20 = vmul.f32 %v9838_v3, %v20215_v46 }
 0x871   : > { %v9422_v33 = vpop.f32.mrf.mxu0  ;;  %9690 = vmatpush2.bf16.msra.mxu1 %v16591_v21  ;;  %v16647_v21 = vld [vmem:[%s21659_s10 + $0x1fc] ss:$12 sps:$4 sm:$0xff]  }
 0x872   : > { %11813 = vmatpush1.bf16.msra.mxu0 %v16594_v23  ;;  %9691 = vmatprep.subr.bf16.mxu1 %v16599_v26  ;;  %v20328_v36 = vpack.c.bf16 %v9850_v20, %v9850_v20  ;;  %v16650_v23 = vld [vmem:[%s21659_s10 + $0x13c] ss:$12 sps:$4 sm:$0xff]   ;;  %v16648_v33 = vld [vmem:[%s21659_s10 + $0x138] ss:$12 sps:$4 sm:$0xff]  }
 0x873   : > { %v9423_v46 = vpop.f32.mrf.mxu0  ;;  %11814 = vmatprep.subr.bf16.mxu0 %v16602_v42 }
 0x874   : > { %11842 = vmatprep.mubr.bf16.mxu0 %v20328_v36 }
 0x875   : > { %9692 = vmatpush2.bf16.msra.mxu1 %v16597_v44  ;;  %v16653_v44 = vld [vmem:[%s21659_s10 + $0x1e4] ss:$12 sps:$4 sm:$0xff]  }
 0x876   : > { %11815 = vmatpush1.bf16.msra.mxu0 %v16600_v35  ;;  %9693 = vmatprep.subr.bf16.mxu1 %v16605_v41  ;;  %v16656_v35 = vld [vmem:[%s21659_s10 + $0x124] ss:$12 sps:$4 sm:$0xff]  }
 0x877   : > { %11816 = vmatprep.subr.bf16.mxu0 %v16608_v51  ;;  %v16654_v51 = vld [vmem:[%s21659_s10 + $0x120] ss:$12 sps:$4 sm:$0xff]  }
 0x879   : > { %9694 = vmatpush2.bf16.msra.mxu1 %v16603_v54  ;;  %v16659_v54 = vld [vmem:[%s21659_s10 + $0x1cc] ss:$12 sps:$4 sm:$0xff]  }
 0x87a   : > { %11817 = vmatpush1.bf16.msra.mxu0 %v16606_v55  ;;  %9695 = vmatprep.subr.bf16.mxu1 %v16611_v27  ;;  %v16662_v27 = vld [vmem:[%s21659_s10 + $0x10c] ss:$12 sps:$4 sm:$0xff]  }
 0x87b   : > { %11818 = vmatprep.subr.bf16.mxu0 %v16614_v57 }
 0x87d   : > { %9696 = vmatpush2.bf16.msra.mxu1 %v16609_v58 }
 0x87e   : > { %11819 = vmatpush1.bf16.msra.mxu0 %v16612_v59  ;;  %9697 = vmatprep.subr.bf16.mxu1 %v16617_v24  ;;  %v16660_v59 = vld [vmem:[%s21659_s10 + $0x108] ss:$12 sps:$4 sm:$0xff]  }
 0x87f   : > { %11820 = vmatprep.subr.bf16.mxu0 %v16620_v61  ;;  %v16665_v24 = vld [vmem:[%s21659_s10 + $0x1b4] ss:$12 sps:$4 sm:$0xff]  }
 0x881   : > { %9698 = vmatpush2.bf16.msra.mxu1 %v16615_v62  ;;  %v17070_v62 = vpop.eup %17069 }
 0x882   : > { %11821 = vmatpush1.bf16.msra.mxu0 %v16618_v49  ;;  %9699 = vmatprep.subr.bf16.mxu1 %v16623_v53  ;;  %v16663_v49 = vld [vmem:[%s21659_s10 + $0x1b0] ss:$12 sps:$4 sm:$0xff]  }
 0x883   : > { %11822 = vmatprep.subr.bf16.mxu0 %v16626_v63  ;;  %v16671_v63 = vld [vmem:[%s21659_s10 + $0x19c] ss:$12 sps:$4 sm:$0xff]  }
 0x885   : > { %9700 = vmatpush2.bf16.msra.mxu1 %v16621_v30  ;;  %v9825_v30 = vadd.f32 1.0, %v17070_v62  ;;  %v16704_v62 = vld [vmem:[%s21659_s10 + $0x364] ss:$12 sps:$4 sm:$0xff]  }
 0x886   : > { %11823 = vmatpush1.bf16.msra.mxu0 %v16624_v2  ;;  %9701 = vmatprep.subr.bf16.mxu1 %v16629_v4  ;;  %v16674_v2 = vld [vmem:[%s21659_s10 + $0xdc] ss:$12 sps:$4 sm:$0xff]   ;;  %v16669_v4 = vld [vmem:[%s21659_s10 + $0x198] ss:$12 sps:$4 sm:$0xff]  }
 0x887   : > { %11824 = vmatprep.subr.bf16.mxu0 %v16632_v17  ;;  %v16672_v17 = vld [vmem:[%s21659_s10 + $0xd8] ss:$12 sps:$4 sm:$0xff]  }
 0x889   : > { %9702 = vmatpush2.bf16.msra.mxu1 %v16627_v5  ;;  %v16677_v5 = vld [vmem:[%s21659_s10 + $0x184] ss:$12 sps:$4 sm:$0xff]  }
 0x88a   : > { %11825 = vmatpush1.bf16.msra.mxu0 %v16630_v6  ;;  %11851 = vmatprep.subr.bf16.mxu1 %v16635_v7  ;;  %v9837_v6 = vmul.f32 0.5, %v9825_v30  ;;  %v16680_v7 = vld [vmem:[%s21659_s10 + $0xc4] ss:$12 sps:$4 sm:$0xff]   ;;  %v16707_v30 = vld [vmem:[%s21659_s10 + $0x28c] ss:$12 sps:$4 sm:$0xff]  }
 0x88b   : > { %11826 = vmatprep.subr.bf16.mxu0 %v16638_v28 }
 0x88c   : > { %v9377_v15 = vpop.f32.mrf.mxu1  ;;  %9704 = vmatmul.mubr.bf16.vlgmr.msra.gmra.mxu1 %v19584_v47 }
 0x88d   : > { %11852 = vmatpush1.bf16.msra.mxu1 %v16633_v9  ;;  %v9378_v42 = vadd.f32 %v9377_v15, %v7772_v18  ;;  %v16678_v9 = vld [vmem:[%s21659_s10 + $0xc0] ss:$12 sps:$4 sm:$0xff]  }
 0x88e   : > { %v9379_v19 = vpop.f32.mrf.mxu1  ;;  %11827 = vmatpush2.bf16.msra.mxu0 %v16636_v10  ;;  %11853 = vmatprep.subr.bf16.mxu1 %v16641_v11  ;;  %v16683_v10 = vld [vmem:[%s21659_s10 + $0x2ec] ss:$12 sps:$4 sm:$0xff]   ;;  %v9849_v11 = vmul.f32 %v9837_v6, %v20348_v34  ;;  %v16684_v34 = vld [vmem:[%s21659_s10 + $0x3a8] ss:$12 sps:$4 sm:$0xff]  }
 0x88f   : > { %v9380_v47 = vadd.f32 %v9379_v19, %v7776_v14  ;;  %11828 = vmatprep.subr.bf16.mxu0 %v16644_v40  ;;  %v20458_v46 = vadd.f32 %v20302_v13, %v9378_v42  ;;  %v16657_v13 = vld [vmem:[%s21659_s10 + $0x1c8] ss:$12 sps:$4 sm:$0xff]   ;;  %v7783_v14 = vsub.s32 5, %v19361_v45  ;;  %v16687_v42 = vld [vmem:[%s21659_s10 + $0x2d0] ss:$12 sps:$4 sm:$0xff]  }
 0x890   : > { %v9381_v26 = vpop.f32.mrf.mxu1  ;;  %v16681_v40 = vld [vmem:[%s21659_s10 + $0x2e8] ss:$12 sps:$4 sm:$0xff]   ;;  %v20533_v19 = vpack.c.bf16 %v9849_v11, %v9849_v11  ;;  %v16711_v11 = vld [vmem:[%s21659_s10 + $0x270] ss:$12 sps:$4 sm:$0xff]  }
 0x891   : > { %v20437_v3 = vadd.f32 %v20316_v32, %v9380_v47  ;;  %11854 = vmatpush1.bf16.msra.mxu1 %v16639_v16  ;;  %v9755_v58 = vmul.f32 %v20458_v46, %v20458_v46  ;;  %v16689_v18 = vld [vmem:[%s21659_s10 + $0x2d4] ss:$12 sps:$4 sm:$0xff]   ;;  %v7784_v26 = vrot.slane %v20182_v52, %v7783_v14  ;;  %v16714_v14 = vld [vmem:[%s21659_s10 + $0x330] ss:$12 sps:$4 sm:$0xff]  }
 0x892   : > { %v9382_v20 = vpop.f32.mrf.mxu1  ;;  %11829 = vmatpush2.bf16.msra.mxu0 %v16642_v22  ;;  %11855 = vmatprep.subr.bf16.mxu1 %v16647_v21  ;;  %v7779_v22 = vsub.s32 4, %v19361_v45  ;;  %v16692_v21 = vld [vmem:[%s21659_s10 + $0x394] ss:$12 sps:$4 sm:$0xff]  }
 0x893   : > { %v9756_v32 = vmul.f32 %v20437_v3, %v20437_v3  ;;  %11830 = vmatprep.subr.bf16.mxu0 %v16650_v23  ;;  %v9767_v53 = vmul.f32 %v9755_v58, %v20458_v46  ;;  %v16708_v6 = vld [vmem:[%s21659_s10 + $0x348] ss:$12 sps:$4 sm:$0xff]  }
 0x895   : > { %v9768_v41 = vmul.f32 %v9756_v32, %v20437_v3  ;;  %11856 = vmatpush1.bf16.msra.mxu1 %v16645_v29  ;;  %v9779_v48 = vmul.f32 0.044715, %v9767_v53  ;;  %v16695_v32 = vld [vmem:[%s21659_s10 + $0x2bc] ss:$12 sps:$4 sm:$0xff]   ;;  %v16699_v53 = vld [vmem:[%s21659_s10 + $0x2a0] ss:$12 sps:$4 sm:$0xff]  }
 0x896   : > { %11831 = vmatpush2.bf16.msra.mxu0 %v16648_v33  ;;  %11857 = vmatprep.subr.bf16.mxu1 %v16653_v44  ;;  %v16690_v44 = vld [vmem:[%s21659_s10 + $0x390] ss:$12 sps:$4 sm:$0xff]  }
 0x897   : > { %v9780_v55 = vmul.f32 0.044715, %v9768_v41  ;;  %11832 = vmatprep.subr.bf16.mxu0 %v16656_v35  ;;  %v9791_v28 = vadd.f32 %v9779_v48, %v20458_v46  ;;  %v7780_v35 = vrot.slane %v20182_v52, %v7779_v22  ;;  %v16720_v22 = vld [vmem:[%s21659_s10 + $0x318] ss:$12 sps:$4 sm:$0xff]  }
 0x899   : > { %v9792_v57 = vadd.f32 %v9780_v55, %v20437_v3  ;;  %11858 = vmatpush1.bf16.msra.mxu1 %v16651_v25  ;;  %v9803_v16 = vmul.f32 0.7978846, %v9791_v28 }
 0x89a   : > { %11833 = vmatpush2.bf16.msra.mxu0 %v16654_v51  ;;  %11859 = vmatprep.subr.bf16.mxu1 %v16659_v54  ;;  %v16698_v51 = vld [vmem:[%s21659_s10 + $0x37c] ss:$12 sps:$4 sm:$0xff]  }
 0x89b   : > { %11834 = vmatprep.subr.bf16.mxu0 %v16662_v27  ;;  %v9804_v61 = vmul.f32 0.7978846, %v9792_v57 }
 0x89d   : > { %11860 = vmatpush1.bf16.msra.mxu1 %v16657_v13  ;;  %17071 = vtanh.f32 %v9804_v61  ;;  %v16693_v13 = vld [vmem:[%s21659_s10 + $0x2b8] ss:$12 sps:$4 sm:$0xff]  }
 0x89e   : > { %11835 = vmatpush2.bf16.msra.mxu0 %v16660_v59  ;;  %11861 = vmatprep.subr.bf16.mxu1 %v16665_v24  ;;  %17073 = vtanh.f32 %v9803_v16  ;;  %v16701_v24 = vld [vmem:[%s21659_s10 + $0x2a4] ss:$12 sps:$4 sm:$0xff]   ;;  %v16722_v16 = vld [vmem:[%s21659_s10 + $0x31c] ss:$12 sps:$4 sm:$0xff]  }
 0x89f   : > { %11836 = vmatprep.subr.bf16.mxu0 %v16668_v60 }
 0x8a1   : > { %11862 = vmatpush1.bf16.msra.mxu1 %v16663_v49 }
 0x8a2   : > { %11837 = vmatpush2.bf16.msra.mxu0 %v16666_v43  ;;  %11863 = vmatprep.subr.bf16.mxu1 %v16671_v63  ;;  %v16702_v63 = vld [vmem:[%s21659_s10 + $0x360] ss:$12 sps:$4 sm:$0xff]  }
 0x8a3   : > { %11838 = vmatprep.subr.bf16.mxu0 %v16674_v2 }
 0x8a5   : > { %11864 = vmatpush1.bf16.msra.mxu1 %v16669_v4  ;;  %v16710_v4 = vld [vmem:[%s21659_s10 + $0x34c] ss:$12 sps:$4 sm:$0xff]  }
 0x8a6   : > { %11839 = vmatpush2.bf16.msra.mxu0 %v16672_v17  ;;  %11865 = vmatprep.subr.bf16.mxu1 %v16677_v5  ;;  %v16705_v17 = vld [vmem:[%s21659_s10 + $0x288] ss:$12 sps:$4 sm:$0xff]  }
 0x8a7   : > { %11840 = vmatprep.subr.bf16.mxu0 %v16680_v7  ;;  %v16713_v7 = vld [vmem:[%s21659_s10 + $0x274] ss:$12 sps:$4 sm:$0xff]  }
 0x8a9   : > { %11866 = vmatpush1.bf16.msra.mxu1 %v16675_v31 }
 0x8aa   : > { %v17072_v15 = vpop.eup %17071  ;;  %11841 = vmatpush2.bf16.msra.mxu0 %v16678_v9  ;;  %11867 = vmatprep.subr.bf16.mxu1 %v16683_v10  ;;  %v16716_v9 = vld [vmem:[%s21659_s10 + $0x334] ss:$12 sps:$4 sm:$0xff]  }
 0x8ab   : > { %11892 = vmatprep.subr.bf16.mxu0 %v16686_v12  ;;  %v9828_v47 = vadd.f32 1.0, %v17072_v15  ;;  %v17074_v31 = vpop.eup %17073 }
 0x8ac   : > { %v9500_v23 = vpop.f32.mrf.mxu1  ;;  %v9827_v12 = vadd.f32 1.0, %v17074_v31  ;;  %v16750_v31 = vld [vmem:[%s21659_s10 + $0x408] ss:$12 sps:$4 sm:$0xff]  }
 0x8ad   : > { %v9459_v29 = vpop.f32.mrf.mxu0  ;;  %11843 = vmatmul.mubr.bf16.vlgmr.msra.gmra.mxu0 %v20533_v19  ;;  %11868 = vmatpush2.bf16.msra.mxu1 %v16681_v40  ;;  %v9840_v20 = vmul.f32 0.5, %v9828_v47  ;;  %v16719_v40 = vld [vmem:[%s21659_s10 + $0x25c] ss:$12 sps:$4 sm:$0xff]  }
 0x8ae   : > { %v9502_v33 = vpop.f32.mrf.mxu1  ;;  %11893 = vmatpush1.bf16.msra.mxu0 %v16684_v34  ;;  %11869 = vmatprep.subr.bf16.mxu1 %v16689_v18  ;;  %v9460_v60 = vadd.f32 %v9459_v29, %v7780_v35  ;;  %v16717_v34 = vld [vmem:[%s21659_s10 + $0x258] ss:$12 sps:$4 sm:$0xff]   ;;  %v9839_v18 = vmul.f32 0.5, %v9827_v12  ;;  %v16729_v35 = vld [vmem:[%s21659_s10 + $0x468] ss:$12 sps:$4 sm:$0xff]  }
 0x8af   : > { %v9461_v41 = vpop.f32.mrf.mxu0  ;;  %11894 = vmatprep.subr.bf16.mxu0 %v16692_v21  ;;  %v9852_v25 = vmul.f32 %v9840_v20, %v20437_v3  ;;  %v16696_v3 = vld [vmem:[%s21659_s10 + $0x378] ss:$12 sps:$4 sm:$0xff]   ;;  %v16756_v12 = vld [vmem:[%s21659_s10 + $0x3f0] ss:$12 sps:$4 sm:$0xff]  }
 0x8b0   : > { %v9462_v54 = vadd.f32 %v9461_v41, %v7784_v26  ;;  %v9504_v55 = vpop.f32.mrf.mxu1  ;;  %v20584_v2 = vadd.f32 %v9500_v23, %v9460_v60  ;;  %v16725_v21 = vld [vmem:[%s21659_s10 + $0x244] ss:$12 sps:$4 sm:$0xff]   ;;  %v16723_v26 = vld [vmem:[%s21659_s10 + $0x240] ss:$12 sps:$4 sm:$0xff]   ;;  %v9851_v29 = vmul.f32 %v9839_v18, %v20458_v46  ;;  %v16735_v46 = vld [vmem:[%s21659_s10 + $0x528] ss:$12 sps:$4 sm:$0xff]  }
 0x8b1   : > { %v9463_v27 = vpop.f32.mrf.mxu0  ;;  %11870 = vmatpush2.bf16.msra.mxu1 %v16687_v42  ;;  %v20555_v57 = vpack.c.bf16 %v9852_v25, %v9852_v25  ;;  %v16728_v23 = vld [vmem:[%s21659_s10 + $0x304] ss:$12 sps:$4 sm:$0xff]   ;;  %v16726_v42 = vld [vmem:[%s21659_s10 + $0x300] ss:$12 sps:$4 sm:$0xff]  }
 0x8b2   : > { %v20560_v58 = vadd.f32 %v9502_v33, %v9462_v54  ;;  %v9505_v59 = vpop.f32.mrf.mxu1  ;;  %11895 = vmatpush1.bf16.msra.mxu0 %v16690_v44  ;;  %11871 = vmatprep.subr.bf16.mxu1 %v16695_v32  ;;  %v9757_v28 = vmul.f32 %v20584_v2, %v20584_v2  ;;  %v16737_v20 = vld [vmem:[%s21659_s10 + $0x52c] ss:$12 sps:$4 sm:$0xff]   ;;  %v20646_v32 = vpack.c.bf16 %v9851_v29, %v9851_v29  ;;  %v16743_v41 = vld [vmem:[%s21659_s10 + $0x514] ss:$12 sps:$4 sm:$0xff]   ;;  %v16776_v18 = vld [vmem:[%s21659_s10 + $0x484] ss:$12 sps:$4 sm:$0xff]  }
 0x8b3   : > { %v9464_v61 = vpop.f32.mrf.mxu0  ;;  %11883 = vmatprep.mubr.bf16.mxu1 %v20555_v57  ;;  %11896 = vmatprep.subr.bf16.mxu0 %v16698_v51  ;;  %v16731_v44 = vld [vmem:[%s21659_s10 + $0x46c] ss:$12 sps:$4 sm:$0xff]   ;;  %v16734_v54 = vld [vmem:[%s21659_s10 + $0x454] ss:$12 sps:$4 sm:$0xff]   ;;  %v16732_v59 = vld [vmem:[%s21659_s10 + $0x450] ss:$12 sps:$4 sm:$0xff]  }
 0x8b4   : > { %v9758_v49 = vmul.f32 %v20560_v58, %v20560_v58  ;;  %v9769_v15 = vmul.f32 %v9757_v28, %v20584_v2  ;;  %v16740_v61 = vld [vmem:[%s21659_s10 + $0x43c] ss:$12 sps:$4 sm:$0xff]   ;;  %v16767_v28 = vld [vmem:[%s21659_s10 + $0x4b4] ss:$12 sps:$4 sm:$0xff]   ;;  %v16779_v29 = vld [vmem:[%s21659_s10 + $0x5ec] ss:$12 sps:$4 sm:$0xff]  }
 0x8b5   : > { %11872 = vmatpush2.bf16.msra.mxu1 %v16693_v13  ;;  %v16741_v13 = vld [vmem:[%s21659_s10 + $0x510] ss:$12 sps:$4 sm:$0xff]  }
 0x8b6   : > { %v9770_v43 = vmul.f32 %v9758_v49, %v20560_v58  ;;  %11897 = vmatpush1.bf16.msra.mxu0 %v16696_v3  ;;  %11873 = vmatprep.subr.bf16.mxu1 %v16701_v24  ;;  %v9781_v47 = vmul.f32 0.044715, %v9769_v15  ;;  %v16749_v24 = vld [vmem:[%s21659_s10 + $0x4fc] ss:$12 sps:$4 sm:$0xff]  }
 0x8b7   : > { %11898 = vmatprep.subr.bf16.mxu0 %v16704_v62  ;;  %v16764_v15 = vld [vmem:[%s21659_s10 + $0x3dc] ss:$12 sps:$4 sm:$0xff]  }
 0x8b8   : > { %v9782_v48 = vmul.f32 0.044715, %v9770_v43  ;;  %v9793_v33 = vadd.f32 %v9781_v47, %v20584_v2  ;;  %v7787_v47 = vsub.s32 6, %v19361_v45 }
 0x8b9   : > { %11874 = vmatpush2.bf16.msra.mxu1 %v16699_v53  ;;  %v16747_v53 = vld [vmem:[%s21659_s10 + $0x4f8] ss:$12 sps:$4 sm:$0xff]  }
 0x8ba   : > { %v9794_v5 = vadd.f32 %v9782_v48, %v20560_v58  ;;  %11899 = vmatpush1.bf16.msra.mxu0 %v16702_v63  ;;  %11875 = vmatprep.subr.bf16.mxu1 %v16707_v30  ;;  %v9805_v51 = vmul.f32 0.7978846, %v9793_v33  ;;  %v16738_v63 = vld [vmem:[%s21659_s10 + $0x438] ss:$12 sps:$4 sm:$0xff]   ;;  %v16753_v48 = vld [vmem:[%s21659_s10 + $0x4e0] ss:$12 sps:$4 sm:$0xff]  }
 0x8bb   : > { %11900 = vmatprep.subr.bf16.mxu0 %v16710_v4  ;;  %v16755_v30 = vld [vmem:[%s21659_s10 + $0x4e4] ss:$12 sps:$4 sm:$0xff]   ;;  %v16782_v33 = vld [vmem:[%s21659_s10 + $0x6ac] ss:$12 sps:$4 sm:$0xff]  }
 0x8bc   : > { %v9806_v10 = vmul.f32 0.7978846, %v9794_v5  ;;  %v16761_v5 = vld [vmem:[%s21659_s10 + $0x4cc] ss:$12 sps:$4 sm:$0xff]  }
 0x8bd   : > { %11876 = vmatpush2.bf16.msra.mxu1 %v16705_v17  ;;  %v16744_v17 = vld [vmem:[%s21659_s10 + $0x420] ss:$12 sps:$4 sm:$0xff]  }
 0x8be   : > { %11901 = vmatpush1.bf16.msra.mxu0 %v16708_v6  ;;  %11877 = vmatprep.subr.bf16.mxu1 %v16713_v7  ;;  %17075 = vtanh.f32 %v9806_v10  ;;  %v16752_v6 = vld [vmem:[%s21659_s10 + $0x40c] ss:$12 sps:$4 sm:$0xff]   ;;  %v16759_v7 = vld [vmem:[%s21659_s10 + $0x4c8] ss:$12 sps:$4 sm:$0xff]  }
 0x8bf   : > { %11902 = vmatprep.subr.bf16.mxu0 %v16716_v9  ;;  %17077 = vtanh.f32 %v9805_v51  ;;  %v16758_v9 = vld [vmem:[%s21659_s10 + $0x3f4] ss:$12 sps:$4 sm:$0xff]  }
 0x8c0   : > { %v16788_v51 = vld [vmem:[%s21659_s10 + $0x694] ss:$12 sps:$4 sm:$0xff]  }
 0x8c1   : > { %11878 = vmatpush2.bf16.msra.mxu1 %v16711_v11  ;;  %v16765_v11 = vld [vmem:[%s21659_s10 + $0x4b0] ss:$12 sps:$4 sm:$0xff]  }
 0x8c2   : > { %11903 = vmatpush1.bf16.msra.mxu0 %v16714_v14  ;;  %11879 = vmatprep.subr.bf16.mxu1 %v16719_v40  ;;  %v16773_v14 = vld [vmem:[%s21659_s10 + $0x49c] ss:$12 sps:$4 sm:$0xff]  }
 0x8c3   : > { %11904 = vmatprep.subr.bf16.mxu0 %v16722_v16  ;;  %v16771_v16 = vld [vmem:[%s21659_s10 + $0x498] ss:$12 sps:$4 sm:$0xff]  }
 0x8c5   : > { %11880 = vmatpush2.bf16.msra.mxu1 %v16717_v34  ;;  %v16762_v34 = vld [vmem:[%s21659_s10 + $0x3d8] ss:$12 sps:$4 sm:$0xff]  }
 0x8c6   : > { %11905 = vmatpush1.bf16.msra.mxu0 %v16720_v22  ;;  %11881 = vmatprep.subr.bf16.mxu1 %v16725_v21  ;;  %v16770_v21 = vld [vmem:[%s21659_s10 + $0x3c4] ss:$12 sps:$4 sm:$0xff]  }
 0x8c7   : > { %11906 = vmatprep.subr.bf16.mxu0 %v16728_v23  ;;  %v16774_v23 = vld [vmem:[%s21659_s10 + $0x480] ss:$12 sps:$4 sm:$0xff]  }
 0x8c9   : > { %11882 = vmatpush2.bf16.msra.mxu1 %v16723_v26  ;;  %v16768_v26 = vld [vmem:[%s21659_s10 + $0x3c0] ss:$12 sps:$4 sm:$0xff]  }
 0x8ca   : > { %11907 = vmatpush1.bf16.msra.mxu0 %v16726_v42  ;;  %11933 = vmatprep.subr.bf16.mxu1 %v16737_v20  ;;  %v7791_v20 = vsub.s32 7, %v19361_v45  ;;  %v16929_v45 = vld [vmem:[%s21659_s10 + $0x2f0] ss:$12 sps:$4 sm:$0xff]  }
 0x8cb   : > { %v17076_v25 = vpop.eup %17075  ;;  %11908 = vmatprep.subr.bf16.mxu0 %v16731_v44  ;;  %v7788_v44 = vrot.slane %v20182_v52, %v7787_v47  ;;  %v16815_v47 = vld [vmem:[%s21659_s10 + $0x55c] ss:$12 sps:$4 sm:$0xff]  }
 0x8cc   : > { %11884 = vmatmul.mubr.bf16.vlgmr.msra.gmra.mxu1 %v20646_v32  ;;  %v9830_v55 = vadd.f32 1.0, %v17076_v25  ;;  %v17078_v10 = vpop.eup %17077  ;;  %v7792_v25 = vrot.slane %v20182_v52, %v7791_v20  ;;  %v16786_v52 = vld [vmem:[%s21659_s10 + $0x690] ss:$12 sps:$4 sm:$0xff]  }
 0x8cd   : > { %v20658_v27 = vpop.f32.mrf.mxu0  ;;  %11934 = vmatpush1.bf16.msra.mxu1 %v16735_v46  ;;  %v9829_v40 = vadd.f32 1.0, %v17078_v10  ;;  %v16777_v46 = vld [vmem:[%s21659_s10 + $0x5e8] ss:$12 sps:$4 sm:$0xff]   ;;  %v16824_v20 = vld [vmem:[%s21659_s10 + $0x604] ss:$12 sps:$4 sm:$0xff]  }
 0x8ce   : > { %11909 = vmatpush2.bf16.msra.mxu0 %v16729_v35  ;;  %v9842_v3 = vmul.f32 0.5, %v9830_v55  ;;  %11935 = vmatprep.subr.bf16.mxu1 %v16743_v41  ;;  %v16785_v35 = vld [vmem:[%s21659_s10 + $0x5d4] ss:$12 sps:$4 sm:$0xff]  }
 0x8cf   : > { %v20669_v60 = vpop.f32.mrf.mxu0  ;;  %11910 = vmatprep.subr.bf16.mxu0 %v16734_v54  ;;  %v9841_v22 = vmul.f32 0.5, %v9829_v40  ;;  %v16801_v40 = vld [vmem:[%s21659_s10 + $0x588] ss:$12 sps:$4 sm:$0xff]  }
 0x8d0   : > { %v9854_v62 = vmul.f32 %v9842_v3, %v20560_v58  ;;  %v16746_v58 = vld [vmem:[%s21659_s10 + $0x424] ss:$12 sps:$4 sm:$0xff]   ;;  %v16791_v3 = vld [vmem:[%s21659_s10 + $0x5bc] ss:$12 sps:$4 sm:$0xff]  }
 0x8d1   : > { %v9586_v49 = vpop.f32.mrf.mxu0  ;;  %11936 = vmatpush1.bf16.msra.mxu1 %v16741_v13  ;;  %v9853_v42 = vmul.f32 %v9841_v22, %v20584_v2  ;;  %v16780_v2 = vld [vmem:[%s21659_s10 + $0x6a8] ss:$12 sps:$4 sm:$0xff]   ;;  %v16783_v13 = vld [vmem:[%s21659_s10 + $0x5d0] ss:$12 sps:$4 sm:$0xff]  }
 0x8d2   : > { %11911 = vmatpush2.bf16.msra.mxu0 %v16732_v59  ;;  %v20678_v43 = vpack.c.bf16 %v9854_v62, %v9854_v62  ;;  %11937 = vmatprep.subr.bf16.mxu1 %v16749_v24  ;;  %v16794_v62 = vld [vmem:[%s21659_s10 + $0x67c] ss:$12 sps:$4 sm:$0xff]  }
 0x8d3   : > { %v9587_v4 = vpop.f32.mrf.mxu0  ;;  %11912 = vmatprep.subr.bf16.mxu0 %v16740_v61  ;;  %v20763_v41 = vpack.c.bf16 %v9853_v42, %v9853_v42  ;;  %v16807_v22 = vld [vmem:[%s21659_s10 + $0x570] ss:$12 sps:$4 sm:$0xff]  }
 0x8d4   : > { %11924 = vmatprep.mubr.bf16.mxu0 %v20678_v43  ;;  %v16792_v4 = vld [vmem:[%s21659_s10 + $0x678] ss:$12 sps:$4 sm:$0xff]  }
 0x8d5   : > { %11938 = vmatpush1.bf16.msra.mxu1 %v16747_v53  ;;  %v16821_v42 = vld [vmem:[%s21659_s10 + $0x544] ss:$12 sps:$4 sm:$0xff]  }
 0x8d6   : > { %11913 = vmatpush2.bf16.msra.mxu0 %v16738_v63  ;;  %11939 = vmatprep.subr.bf16.mxu1 %v16755_v30  ;;  %v16789_v30 = vld [vmem:[%s21659_s10 + $0x5b8] ss:$12 sps:$4 sm:$0xff]  }
 0x8d7   : > { %11914 = vmatprep.subr.bf16.mxu0 %v16746_v58  ;;  %v16797_v58 = vld [vmem:[%s21659_s10 + $0x5a4] ss:$12 sps:$4 sm:$0xff]  }
 0x8d9   : > { %11940 = vmatpush1.bf16.msra.mxu1 %v16753_v48 }
 0x8da   : > { %11915 = vmatpush2.bf16.msra.mxu0 %v16744_v17  ;;  %11941 = vmatprep.subr.bf16.mxu1 %v16761_v5  ;;  %v16800_v17 = vld [vmem:[%s21659_s10 + $0x664] ss:$12 sps:$4 sm:$0xff]  }
 0x8db   : > { %11916 = vmatprep.subr.bf16.mxu0 %v16752_v6 }
 0x8dd   : > { %11942 = vmatpush1.bf16.msra.mxu1 %v16759_v7  ;;  %v16795_v7 = vld [vmem:[%s21659_s10 + $0x5a0] ss:$12 sps:$4 sm:$0xff]  }
 0x8de   : > { %11917 = vmatpush2.bf16.msra.mxu0 %v16750_v31  ;;  %11943 = vmatprep.subr.bf16.mxu1 %v16767_v28  ;;  %v16798_v31 = vld [vmem:[%s21659_s10 + $0x660] ss:$12 sps:$4 sm:$0xff]  }
 0x8df   : > { %11918 = vmatprep.subr.bf16.mxu0 %v16758_v9  ;;  %v16803_v28 = vld [vmem:[%s21659_s10 + $0x58c] ss:$12 sps:$4 sm:$0xff]  }
 0x8e1   : > { %11944 = vmatpush1.bf16.msra.mxu1 %v16765_v11  ;;  %v16806_v11 = vld [vmem:[%s21659_s10 + $0x64c] ss:$12 sps:$4 sm:$0xff]  }
 0x8e2   : > { %11919 = vmatpush2.bf16.msra.mxu0 %v16756_v12  ;;  %11945 = vmatprep.subr.bf16.mxu1 %v16773_v14 }
 0x8e3   : > { %11920 = vmatprep.subr.bf16.mxu0 %v16764_v15  ;;  %v16804_v15 = vld [vmem:[%s21659_s10 + $0x648] ss:$12 sps:$4 sm:$0xff]  }
 0x8e5   : > { %11946 = vmatpush1.bf16.msra.mxu1 %v16771_v16  ;;  %v16809_v16 = vld [vmem:[%s21659_s10 + $0x574] ss:$12 sps:$4 sm:$0xff]  }
 0x8e6   : > { %11921 = vmatpush2.bf16.msra.mxu0 %v16762_v34  ;;  %11947 = vmatprep.subr.bf16.mxu1 %v16776_v18  ;;  %v16812_v34 = vld [vmem:[%s21659_s10 + $0x634] ss:$12 sps:$4 sm:$0xff]  }
 0x8e7   : > { %11922 = vmatprep.subr.bf16.mxu0 %v16770_v21  ;;  %v16810_v21 = vld [vmem:[%s21659_s10 + $0x630] ss:$12 sps:$4 sm:$0xff]  }
 0x8e9   : > { %11948 = vmatpush1.bf16.msra.mxu1 %v16774_v23  ;;  %v16818_v23 = vld [vmem:[%s21659_s10 + $0x61c] ss:$12 sps:$4 sm:$0xff]  }
 0x8ea   : > { %11923 = vmatpush2.bf16.msra.mxu0 %v16768_v26  ;;  %11949 = vmatprep.subr.bf16.mxu1 %v16779_v29  ;;  %v16813_v26 = vld [vmem:[%s21659_s10 + $0x558] ss:$12 sps:$4 sm:$0xff]  }
 0x8eb   : > { %11974 = vmatprep.subr.bf16.mxu0 %v16782_v33  ;;  %v16816_v29 = vld [vmem:[%s21659_s10 + $0x618] ss:$12 sps:$4 sm:$0xff]   ;;  %v16819_v33 = vld [vmem:[%s21659_s10 + $0x540] ss:$12 sps:$4 sm:$0xff]  }
 0x8ec   : > { %v9541_v54 = vpop.f32.mrf.mxu1 }
 0x8ed   : > { %v9542_v55 = vadd.f32 %v9541_v54, %v7788_v44  ;;  %11925 = vmatmul.mubr.bf16.vlgmr.msra.gmra.mxu0 %v20763_v41  ;;  %11950 = vmatpush2.bf16.msra.mxu1 %v16777_v46  ;;  %v16822_v44 = vld [vmem:[%s21659_s10 + $0x600] ss:$12 sps:$4 sm:$0xff]  }
 0x8ee   : > { %v9543_v59 = vpop.f32.mrf.mxu1  ;;  %11975 = vmatpush1.bf16.msra.mxu0 %v16780_v2  ;;  %11951 = vmatprep.subr.bf16.mxu1 %v16785_v35  ;;  %v16851_v46 = vld [vmem:[%s21659_s10 + $0x82c] ss:$12 sps:$4 sm:$0xff]   ;;  %v20868_v2 = vld [vmem:[%s21658_s9 + $0x8] sm:$0xf] }
 0x8ef   : > { %v20780_v24 = vadd.f32 %v20658_v27, %v9542_v55  ;;  %v9544_v61 = vadd.f32 %v9543_v59, %v7792_v25  ;;  %11976 = vmatprep.subr.bf16.mxu0 %v16788_v51  ;;  %v16827_v35 = vld [vmem:[%s21659_s10 + $0x76c] ss:$12 sps:$4 sm:$0xff]   ;;  %v7796_v55 = vrot.slane %v20868_v2, %v19367_v56 }
 0x8f0   : > { %v9545_v49 = vpop.f32.mrf.mxu1 }
 0x8f1   : > { %v9759_v53 = vmul.f32 %v20780_v24, %v20780_v24  ;;  %v20788_v63 = vadd.f32 %v20669_v60, %v9544_v61  ;;  %11952 = vmatpush2.bf16.msra.mxu1 %v16783_v13  ;;  %v16825_v13 = vld [vmem:[%s21659_s10 + $0x768] ss:$12 sps:$4 sm:$0xff]  }
 0x8f2   : > { %v9546_v27 = vpop.f32.mrf.mxu1  ;;  %11977 = vmatpush1.bf16.msra.mxu0 %v16786_v52  ;;  %11953 = vmatprep.subr.bf16.mxu1 %v16791_v3  ;;  %v16830_v3 = vld [vmem:[%s21659_s10 + $0x754] ss:$12 sps:$4 sm:$0xff]  }
 0x8f3   : > { %v9771_v48 = vmul.f32 %v9759_v53, %v20780_v24  ;;  %v9760_v60 = vmul.f32 %v20788_v63, %v20788_v63  ;;  %11978 = vmatprep.subr.bf16.mxu0 %v16794_v62  ;;  %v7800_v62 = vrot.slane %v20868_v2, %v19364_v50 }
 0x8f5   : > { %v9783_v5 = vmul.f32 0.044715, %v9771_v48  ;;  %v9772_v6 = vmul.f32 %v9760_v60, %v20788_v63  ;;  %11954 = vmatpush2.bf16.msra.mxu1 %v16789_v30 }
 0x8f6   : > { %11979 = vmatpush1.bf16.msra.mxu0 %v16792_v4  ;;  %11955 = vmatprep.subr.bf16.mxu1 %v16797_v58  ;;  %v16828_v58 = vld [vmem:[%s21659_s10 + $0x750] ss:$12 sps:$4 sm:$0xff]  }
 0x8f7   : > { %v9795_v9 = vadd.f32 %v9783_v5, %v20780_v24  ;;  %v9784_v10 = vmul.f32 0.044715, %v9772_v6  ;;  %11980 = vmatprep.subr.bf16.mxu0 %v16800_v17  ;;  %v16833_v17 = vld [vmem:[%s21659_s10 + $0x73c] ss:$12 sps:$4 sm:$0xff]  }
 0x8f9   : > { %v9807_v12 = vmul.f32 0.7978846, %v9795_v9  ;;  %v9796_v14 = vadd.f32 %v9784_v10, %v20788_v63  ;;  %11956 = vmatpush2.bf16.msra.mxu1 %v16795_v7 }
 0x8fa   : > { %11981 = vmatpush1.bf16.msra.mxu0 %v16798_v31  ;;  %11957 = vmatprep.subr.bf16.mxu1 %v16803_v28  ;;  %v16849_v28 = vld [vmem:[%s21659_s10 + $0x828] ss:$12 sps:$4 sm:$0xff]  }
 0x8fb   : > { %17079 = vtanh.f32 %v9807_v12  ;;  %11982 = vmatprep.subr.bf16.mxu0 %v16806_v11  ;;  %v9808_v18 = vmul.f32 0.7978846, %v9796_v14  ;;  %v16831_v12 = vld [vmem:[%s21659_s10 + $0x738] ss:$12 sps:$4 sm:$0xff]   ;;  %v16856_v14 = vld [vmem:[%s21659_s10 + $0x814] ss:$12 sps:$4 sm:$0xff]  }
 0x8fd   : > { %11958 = vmatpush2.bf16.msra.mxu1 %v16801_v40  ;;  %17081 = vtanh.f32 %v9808_v18  ;;  %v16854_v18 = vld [vmem:[%s21659_s10 + $0x810] ss:$12 sps:$4 sm:$0xff]  }
 0x8fe   : > { %11983 = vmatpush1.bf16.msra.mxu0 %v16804_v15  ;;  %11959 = vmatprep.subr.bf16.mxu1 %v16809_v16  ;;  %v16836_v15 = vld [vmem:[%s21659_s10 + $0x724] ss:$12 sps:$4 sm:$0xff]  }
 0x8ff   : > { %11984 = vmatprep.subr.bf16.mxu0 %v16812_v34 }
 0x901   : > { %11960 = vmatpush2.bf16.msra.mxu1 %v16807_v22 }
 0x902   : > { %11985 = vmatpush1.bf16.msra.mxu0 %v16810_v21  ;;  %11961 = vmatprep.subr.bf16.mxu1 %v16815_v47  ;;  %v16834_v47 = vld [vmem:[%s21659_s10 + $0x720] ss:$12 sps:$4 sm:$0xff]  }
 0x903   : > { %11986 = vmatprep.subr.bf16.mxu0 %v16818_v23  ;;  %v16861_v23 = vld [vmem:[%s21659_s10 + $0x7fc] ss:$12 sps:$4 sm:$0xff]  }
 0x905   : > { %11962 = vmatpush2.bf16.msra.mxu1 %v16813_v26  ;;  %v16839_v26 = vld [vmem:[%s21659_s10 + $0x70c] ss:$12 sps:$4 sm:$0xff]  }
 0x906   : > { %11987 = vmatpush1.bf16.msra.mxu0 %v16816_v29  ;;  %11963 = vmatprep.subr.bf16.mxu1 %v16821_v42 }
 0x907   : > { %11988 = vmatprep.subr.bf16.mxu0 %v16824_v20  ;;  %v16859_v20 = vld [vmem:[%s21659_s10 + $0x7f8] ss:$12 sps:$4 sm:$0xff]  }
 0x908   : > { %v17080_v25 = vpop.eup %17079 }
 0x909   : > { %v9831_v51 = vadd.f32 1.0, %v17080_v25  ;;  %11964 = vmatpush2.bf16.msra.mxu1 %v16819_v33  ;;  %v16842_v25 = vld [vmem:[%s21659_s10 + $0x6f4] ss:$12 sps:$4 sm:$0xff]  }
 0x90a   : > { %v17082_v54 = vpop.eup %17081  ;;  %11989 = vmatpush1.bf16.msra.mxu0 %v16822_v44  ;;  %12015 = vmatprep.subr.bf16.mxu1 %v16851_v46  ;;  %v16837_v46 = vld [vmem:[%s21659_s10 + $0x708] ss:$12 sps:$4 sm:$0xff]  }
 0x90b   : > { %v9843_v59 = vmul.f32 0.5, %v9831_v51  ;;  %v9832_v52 = vadd.f32 1.0, %v17082_v54  ;;  %11990 = vmatprep.subr.bf16.mxu0 %v16827_v35  ;;  %v16866_v35 = vld [vmem:[%s21659_s10 + $0x7e4] ss:$12 sps:$4 sm:$0xff]   ;;  %v16864_v54 = vld [vmem:[%s21659_s10 + $0x7e0] ss:$12 sps:$4 sm:$0xff]  }
 0x90c   : > { %v9664_v61 = vpop.f32.mrf.mxu1 }
 0x90d   : > { %v9623_v49 = vpop.f32.mrf.mxu0  ;;  %v9844_v53 = vmul.f32 0.5, %v9832_v52  ;;  %v9855_v30 = vmul.f32 %v9843_v59, %v20780_v24  ;;  %v16845_v59 = vld [vmem:[%s21659_s10 + $0x6dc] ss:$12 sps:$4 sm:$0xff]  }
 0x90e   : > { %v9624_v27 = vadd.f32 %v9623_v49, %v7796_v55  ;;  %v9666_v4 = vpop.f32.mrf.mxu1  ;;  %11991 = vmatpush2.bf16.msra.mxu0 %v16825_v13  ;;  %v16840_v55 = vld [vmem:[%s21659_s10 + $0x6f0] ss:$12 sps:$4 sm:$0xff]   ;;  %v16871_v13 = vld [vmem:[%s21659_s10 + $0x7cc] ss:$12 sps:$4 sm:$0xff]   ;;  %v16869_v52 = vld [vmem:[%s21659_s10 + $0x7c8] ss:$12 sps:$4 sm:$0xff]  }
 0x90f   : > { %v9625_v48 = vpop.f32.mrf.mxu0  ;;  %v9856_v60 = vmul.f32 %v9844_v53, %v20788_v63  ;;  %11992 = vmatprep.subr.bf16.mxu0 %v16830_v3  ;;  %v20898_v9 = vpack.c.bf16 %v9855_v30, %v9855_v30  ;;  %v16843_v3 = vld [vmem:[%s21659_s10 + $0x6d8] ss:$12 sps:$4 sm:$0xff]   ;;  %v16874_v49 = vld [vmem:[%s21659_s10 + $0x7b0] ss:$12 sps:$4 sm:$0xff]   ;;  %v16846_v53 = vld [vmem:[%s21659_s10 + $0x6c0] ss:$12 sps:$4 sm:$0xff]  }
 0x910   : > { %v20891_v5 = vadd.f32 %v9664_v61, %v9624_v27  ;;  %v9626_v6 = vadd.f32 %v9625_v48, %v7800_v62  ;;  %v9668_v7 = vpop.f32.mrf.mxu1  ;;  %v16876_v61 = vld [vmem:[%s21659_s10 + $0x7b4] ss:$12 sps:$4 sm:$0xff]   ;;  %v16848_v62 = vld [vmem:[%s21659_s10 + $0x6c4] ss:$12 sps:$4 sm:$0xff]   ;;  %v16881_v30 = vld [vmem:[%s21659_s10 + $0x79c] ss:$12 sps:$4 sm:$0xff]  }
 0x911   : > { %v9627_v24 = vpop.f32.mrf.mxu0  ;;  %v20893_v31 = vpack.c.bf16 %v9856_v60, %v9856_v60  ;;  %v16852_v27 = vld [vmem:[%s21659_s10 + $0x170] ss:$12 sps:$4 sm:$0xff]  }
 0x912   : > { %v9761_v63 = vmul.f32 %v20891_v5, %v20891_v5  ;;  %v20902_v10 = vadd.f32 %v9666_v4, %v9626_v6  ;;  %v9669_v11 = vpop.f32.mrf.mxu1  ;;  %11993 = vmatpush2.bf16.msra.mxu0 %v16828_v58  ;;  %v16879_v58 = vld [vmem:[%s21659_s10 + $0x798] ss:$12 sps:$4 sm:$0xff]  }
 0x913   : > { %v9628_v40 = vpop.f32.mrf.mxu0  ;;  %11965 = vmatprep.mubr.bf16.mxu1 %v20893_v31  ;;  %11994 = vmatprep.subr.bf16.mxu0 %v16833_v17  ;;  %v16886_v60 = vld [vmem:[%s21659_s10 + $0x784] ss:$12 sps:$4 sm:$0xff]   ;;  %v16891_v11 = vld [vmem:[%s21659_s10 + $0x8ec] ss:$12 sps:$4 sm:$0xff]  }
 0x914   : > { %v9773_v16 = vmul.f32 %v9761_v63, %v20891_v5  ;;  %v9762_v34 = vmul.f32 %v20902_v10, %v20902_v10  ;;  %11966 = vmatmul.mubr.bf16.vlgmr.msra.gmra.mxu1 %v20898_v9 }
 0x915   : > { %12016 = vmatpush1.bf16.msra.mxu1 %v16849_v28  ;;  %v16884_v28 = vld [vmem:[%s21659_s10 + $0x780] ss:$12 sps:$4 sm:$0xff]  }
 0x916   : > { %v9785_v22 = vmul.f32 0.044715, %v9773_v16  ;;  %v9774_v21 = vmul.f32 %v9762_v34, %v20902_v10  ;;  %11995 = vmatpush2.bf16.msra.mxu0 %v16831_v12  ;;  %12017 = vmatprep.subr.bf16.mxu1 %v16856_v14  ;;  %v16889_v16 = vld [vmem:[%s21659_s10 + $0x8e8] ss:$12 sps:$4 sm:$0xff]  }
 0x917   : > { %11996 = vmatprep.subr.bf16.mxu0 %v16836_v15 }
 0x918   : > { %v9797_v29 = vadd.f32 %v9785_v22, %v20891_v5  ;;  %v9786_v42 = vmul.f32 0.044715, %v9774_v21  ;;  %v16896_v21 = vld [vmem:[%s21659_s10 + $0x8d4] ss:$12 sps:$4 sm:$0xff]  }
 0x919   : > { %12018 = vmatpush1.bf16.msra.mxu1 %v16854_v18  ;;  %v16853_v18 = vld [vmem:[%s21659_s10 + $0xb0] ss:$12 sps:$4 sm:$0xff]  }
 0x91a   : > { %v9809_v33 = vmul.f32 0.7978846, %v9797_v29  ;;  %v9798_v44 = vadd.f32 %v9786_v42, %v20902_v10  ;;  %11997 = vmatpush2.bf16.msra.mxu0 %v16834_v47  ;;  %12019 = vmatprep.subr.bf16.mxu1 %v16861_v23  ;;  %v16894_v47 = vld [vmem:[%s21659_s10 + $0x8d0] ss:$12 sps:$4 sm:$0xff]   ;;  %v16858_v23 = vld [vmem:[%s21659_s10 + $0x98] ss:$12 sps:$4 sm:$0xff]  }
 0x91b   : > { %11998 = vmatprep.subr.bf16.mxu0 %v16839_v26  ;;  %v16901_v26 = vld [vmem:[%s21659_s10 + $0x8bc] ss:$12 sps:$4 sm:$0xff]   ;;  %v16862_v29 = vld [vmem:[%s21659_s10 + $0x140] ss:$12 sps:$4 sm:$0xff]   ;;  %v16899_v42 = vld [vmem:[%s21659_s10 + $0x8b8] ss:$12 sps:$4 sm:$0xff]  }
 0x91c   : > { %17083 = vtanh.f32 %v9809_v33  ;;  %v9810_v51 = vmul.f32 0.7978846, %v9798_v44  ;;  %v16867_v33 = vld [vmem:[%s21659_s10 + $0x128] ss:$12 sps:$4 sm:$0xff]   ;;  %v16904_v44 = vld [vmem:[%s21659_s10 + $0x8a0] ss:$12 sps:$4 sm:$0xff]  }
 0x91d   : > { %12020 = vmatpush1.bf16.msra.mxu1 %v16859_v20  ;;  %v16906_v20 = vld [vmem:[%s21659_s10 + $0x8a4] ss:$12 sps:$4 sm:$0xff]  }
 0x91e   : > { %11999 = vmatpush2.bf16.msra.mxu0 %v16837_v46  ;;  %17085 = vtanh.f32 %v9810_v51  ;;  %12021 = vmatprep.subr.bf16.mxu1 %v16866_v35  ;;  %v16868_v46 = vld [vmem:[%s21659_s10 + $0x68] ss:$12 sps:$4 sm:$0xff]   ;;  %v16911_v35 = vld [vmem:[%s21659_s10 + $0x88c] ss:$12 sps:$4 sm:$0xff]  }
 0x91f   : > { %12000 = vmatprep.subr.bf16.mxu0 %v16842_v25  ;;  %v16872_v25 = vld [vmem:[%s21659_s10 + $0x110] ss:$12 sps:$4 sm:$0xff]   ;;  %v16909_v51 = vld [vmem:[%s21659_s10 + $0x888] ss:$12 sps:$4 sm:$0xff]  }
 0x921   : > { %12022 = vmatpush1.bf16.msra.mxu1 %v16864_v54  ;;  %v16873_v54 = vld [vmem:[%s21659_s10 + $0x50] ss:$12 sps:$4 sm:$0xff]  }
 0x922   : > { %12001 = vmatpush2.bf16.msra.mxu0 %v16840_v55  ;;  %12023 = vmatprep.subr.bf16.mxu1 %v16871_v13  ;;  %v16916_v55 = vld [vmem:[%s21659_s10 + $0x874] ss:$12 sps:$4 sm:$0xff]   ;;  %v16877_v13 = vld [vmem:[%s21659_s10 + $0xf8] ss:$12 sps:$4 sm:$0xff]  }
 0x923   : > { %12002 = vmatprep.subr.bf16.mxu0 %v16845_v59  ;;  %v16914_v59 = vld [vmem:[%s21659_s10 + $0x870] ss:$12 sps:$4 sm:$0xff]  }
 0x925   : > { %12024 = vmatpush1.bf16.msra.mxu1 %v16869_v52  ;;  %v16878_v52 = vld [vmem:[%s21659_s10 + $0x38] ss:$12 sps:$4 sm:$0xff]  }
 0x926   : > { %12003 = vmatpush2.bf16.msra.mxu0 %v16843_v3  ;;  %12025 = vmatprep.subr.bf16.mxu1 %v16876_v61  ;;  %v16921_v3 = vld [vmem:[%s21659_s10 + $0x85c] ss:$12 sps:$4 sm:$0xff]   ;;  %v16882_v61 = vld [vmem:[%s21659_s10 + $0xe0] ss:$12 sps:$4 sm:$0xff]  }
 0x927   : > { %12004 = vmatprep.subr.bf16.mxu0 %v16848_v62  ;;  %v7804_v62 = vrot.slane %v20868_v2, %v19375_v0 }
 0x929   : > { %v17084_v4 = vpop.eup %17083  ;;  %12026 = vmatpush1.bf16.msra.mxu1 %v16874_v49  ;;  %v16919_v49 = vld [vmem:[%s21659_s10 + $0x858] ss:$12 sps:$4 sm:$0xff]  }
 0x92a   : > { %v9833_v48 = vadd.f32 1.0, %v17084_v4  ;;  %12005 = vmatpush2.bf16.msra.mxu0 %v16846_v53  ;;  %12027 = vmatprep.subr.bf16.mxu1 %v16881_v30  ;;  %v16883_v53 = vld [vmem:[%s21659_s10 + $0x20] ss:$12 sps:$4 sm:$0xff]   ;;  %v16926_v30 = vld [vmem:[%s21659_s10 + $0x844] ss:$12 sps:$4 sm:$0xff]  }
 0x92b   : > { %v17086_v17 = vpop.eup %17085  ;;  %14832 = vmatprep.subr.bf16.mxu0 %v16852_v27  ;;  %v7808_v27 = vrot.slane %v20868_v2, %v7775_v8  ;;  %v16887_v4 = vld [vmem:[%s21659_s10 + $0xc8] ss:$12 sps:$4 sm:$0xff]  }
 0x92c   : > { %v9845_v6 = vmul.f32 0.5, %v9833_v48  ;;  %v9834_v7 = vadd.f32 1.0, %v17086_v17 }
 0x92d   : > { %v20987_v24 = vpop.f32.mrf.mxu0  ;;  %12028 = vmatpush1.bf16.msra.mxu1 %v16879_v58 }
 0x92e   : > { %v9846_v63 = vmul.f32 0.5, %v9834_v7  ;;  %12029 = vmatprep.subr.bf16.mxu1 %v16886_v60  ;;  %v9857_v12 = vmul.f32 %v9845_v6, %v20891_v5  ;;  %v16924_v60 = vld [vmem:[%s21659_s10 + $0x840] ss:$12 sps:$4 sm:$0xff]   ;;  %v16888_v6 = vld [vmem:[%s21659_s10 + $0x8] ss:$12 sps:$4 sm:$0xff]  }
 0x92f   : > { %v20996_v14 = vpop.f32.mrf.mxu0  ;;  %v16892_v7 = vld [vmem:[%s21659_s10 + $0x470] ss:$12 sps:$4 sm:$0xff]  }
 0x930   : > { %v9858_v40 = vmul.f32 %v9846_v63, %v20902_v10  ;;  %v21007_v22 = vpack.c.bf16 %v9857_v12, %v9857_v12  ;;  %v16857_v10 = vld [vmem:[%s21659_s10 + $0x158] ss:$12 sps:$4 sm:$0xff]  }
 0x931   : > { %v9750_v15 = vpop.f32.mrf.mxu0  ;;  %12030 = vmatpush1.bf16.msra.mxu1 %v16884_v28 }
 0x932   : > { %v21002_v34 = vpack.c.bf16 %v9858_v40, %v9858_v40  ;;  %12031 = vmatprep.subr.bf16.mxu1 %v16891_v11  ;;  %v16893_v40 = vld [vmem:[%s21659_s10 + $0x3b0] ss:$12 sps:$4 sm:$0xff]  }
 0x933   : > { %v9751_v5 = vpop.f32.mrf.mxu0 }
 0x934   : > { %12006 = vmatprep.mubr.bf16.mxu0 %v21002_v34 }
 0x935   : > { %12007 = vmatmul.mubr.bf16.vlgmr.msra.gmra.mxu0 %v21007_v22  ;;  %12032 = vmatpush2.bf16.msra.mxu1 %v16889_v16  ;;  %v16897_v16 = vld [vmem:[%s21659_s10 + $0x458] ss:$12 sps:$4 sm:$0xff]  }
 0x936   : > { %14833 = vmatpush3.bf16.msra.mxu0 %v16853_v18  ;;  %12088 = vmatprep.mubr.bf16.mxu0 %v20328_v36  ;;  %v16863_v36 = vld [vmem:[%s21659_s10 + $0x80] ss:$12 sps:$4 sm:$0xff]  }
 0x937   : > { %14834 = vmatprep.subr.bf16.mxu0 %v16857_v10  ;;  %12033 = vmatprep.subr.bf16.mxu1 %v16896_v21 }
 0x939   : > { %12034 = vmatpush2.bf16.msra.mxu1 %v16894_v47  ;;  %v16902_v47 = vld [vmem:[%s21659_s10 + $0x440] ss:$12 sps:$4 sm:$0xff]  }
 0x93a   : > { %14835 = vmatpush3.bf16.msra.mxu0 %v16858_v23  ;;  %12035 = vmatprep.subr.bf16.mxu1 %v16901_v26 }
 0x93b   : > { %14836 = vmatprep.subr.bf16.mxu0 %v16862_v29 }
 0x93d   : > { %12036 = vmatpush2.bf16.msra.mxu1 %v16899_v42  ;;  %v16908_v42 = vld [vmem:[%s21659_s10 + $0x368] ss:$12 sps:$4 sm:$0xff]  }
 0x93e   : > { %14837 = vmatpush3.bf16.msra.mxu0 %v16863_v36  ;;  %12037 = vmatprep.subr.bf16.mxu1 %v16906_v20  ;;  %v16912_v36 = vld [vmem:[%s21659_s10 + $0x410] ss:$12 sps:$4 sm:$0xff]  }
 0x93f   : > { %14838 = vmatprep.subr.bf16.mxu0 %v16867_v33  ;;  %v16913_v20 = vld [vmem:[%s21659_s10 + $0x350] ss:$12 sps:$4 sm:$0xff]   ;;  %v16917_v33 = vld [vmem:[%s21659_s10 + $0x3f8] ss:$12 sps:$4 sm:$0xff]  }
 0x941   : > { %12038 = vmatpush2.bf16.msra.mxu1 %v16904_v44  ;;  %v16918_v44 = vld [vmem:[%s21659_s10 + $0x338] ss:$12 sps:$4 sm:$0xff]  }
 0x942   : > { %14839 = vmatpush3.bf16.msra.mxu0 %v16868_v46  ;;  %12039 = vmatprep.subr.bf16.mxu1 %v16911_v35  ;;  %v16922_v46 = vld [vmem:[%s21659_s10 + $0x3e0] ss:$12 sps:$4 sm:$0xff]  }
 0x943   : > { %14840 = vmatprep.subr.bf16.mxu0 %v16872_v25 }
 0x945   : > { %12040 = vmatpush2.bf16.msra.mxu1 %v16909_v51 }
 0x946   : > { %14841 = vmatpush3.bf16.msra.mxu0 %v16873_v54  ;;  %12041 = vmatprep.subr.bf16.mxu1 %v16916_v55  ;;  %v16923_v54 = vld [vmem:[%s21659_s10 + $0x320] ss:$12 sps:$4 sm:$0xff]  }
 0x947   : > { %14842 = vmatprep.subr.bf16.mxu0 %v16877_v13  ;;  %v16927_v13 = vld [vmem:[%s21659_s10 + $0x3c8] ss:$12 sps:$4 sm:$0xff]  }
 0x949   : > { %12042 = vmatpush2.bf16.msra.mxu1 %v16914_v59 }
 0x94a   : > { %14843 = vmatpush3.bf16.msra.mxu0 %v16878_v52  ;;  %12043 = vmatprep.subr.bf16.mxu1 %v16921_v3 }
 0x94b   : > { %14844 = vmatprep.subr.bf16.mxu0 %v16882_v61 }
 0x94c   : > { %v9705_v58 = vpop.f32.mrf.mxu1 }
 0x94d   : > { %v9706_v48 = vadd.f32 %v9705_v58, %v7804_v62  ;;  %12044 = vmatpush2.bf16.msra.mxu1 %v16919_v49  ;;  %v16928_v62 = vld [vmem:[%s21659_s10 + $0x308] ss:$12 sps:$4 sm:$0xff]   ;;  %v16930_v58 = vld [vmem:[%s21659_s10 + $0x230] ss:$12 sps:$4 sm:$0xff]  }
 0x94e   : > { %14845 = vmatpush3.bf16.msra.mxu0 %v16883_v53  ;;  %v9707_v17 = vpop.f32.mrf.mxu1  ;;  %12045 = vmatprep.subr.bf16.mxu1 %v16926_v30  ;;  %v16931_v30 = vld [vmem:[%s21659_s10 + $0x770] ss:$12 sps:$4 sm:$0xff]  }
 0x94f   : > { %v9747_v8 = vadd.f32 %v20987_v24, %v9706_v48  ;;  %v9708_v2 = vadd.f32 %v9707_v17, %v7808_v27  ;;  %14846 = vmatprep.subr.bf16.mxu0 %v16887_v4 }
 0x950   : > { %v9709_v28 = vpop.f32.mrf.mxu1 }
 0x951   : > { %v9763_v63 = vmul.f32 %v9747_v8, %v9747_v8  ;;  %v9749_v11 = vadd.f32 %v20996_v14, %v9708_v2  ;;  %12046 = vmatpush2.bf16.msra.mxu1 %v16924_v60  ;;  %v16898_v14 = vld [vmem:[%s21659_s10 + $0x398] ss:$12 sps:$4 sm:$0xff]   ;;  %v16932_v60 = vld [vmem:[%s21659_s10 + $0x6b0] ss:$12 sps:$4 sm:$0xff]   ;;  %v16940_v28 = vld [vmem:[%s21659_s10 + $0x680] ss:$12 sps:$4 sm:$0xff]  }
 0x952   : > { %14847 = vmatpush3.bf16.msra.mxu0 %v16888_v6  ;;  %v9710_v12 = vpop.f32.mrf.mxu1  ;;  %14854 = vmatprep.subr.bf16.mxu1 %v16929_v45  ;;  %v16933_v6 = vld [vmem:[%s21659_s10 + $0x2d8] ss:$12 sps:$4 sm:$0xff]  }
 0x953   : > { %v9775_v15 = vmul.f32 %v9763_v63, %v9747_v8  ;;  %v9764_v24 = vmul.f32 %v9749_v11, %v9749_v11  ;;  %14876 = vmatprep.subr.bf16.mxu0 %v16892_v7  ;;  %v16935_v45 = vld [vmem:[%s21659_s10 + $0x758] ss:$12 sps:$4 sm:$0xff]   ;;  %v16937_v7 = vld [vmem:[%s21659_s10 + $0x2c0] ss:$12 sps:$4 sm:$0xff]   ;;  %v16943_v63 = vld [vmem:[%s21659_s10 + $0x728] ss:$12 sps:$4 sm:$0xff]  }
 0x954   : > { %v16936_v2 = vld [vmem:[%s21659_s10 + $0x698] ss:$12 sps:$4 sm:$0xff]   ;;  %v16944_v12 = vld [vmem:[%s21659_s10 + $0x668] ss:$12 sps:$4 sm:$0xff]  }
 0x955   : > { %v9787_v18 = vmul.f32 0.044715, %v9775_v15  ;;  %v9776_v5 = vmul.f32 %v9764_v24, %v9749_v11  ;;  %12089 = vmatmul.mubr.bf16.vlgmr.msra.gmra.mxu0 %v20533_v19  ;;  %v16903_v19 = vld [vmem:[%s21659_s10 + $0x380] ss:$12 sps:$4 sm:$0xff]   ;;  %v16947_v15 = vld [vmem:[%s21659_s10 + $0x710] ss:$12 sps:$4 sm:$0xff]  }
 0x956   : > { %14877 = vmatpush3.bf16.msra.mxu0 %v16893_v40  ;;  %12168 = vmatprep.mubr.bf16.mxu0 %v20678_v43  ;;  %v16907_v43 = vld [vmem:[%s21659_s10 + $0x428] ss:$12 sps:$4 sm:$0xff]   ;;  %v16945_v40 = vld [vmem:[%s21659_s10 + $0x290] ss:$12 sps:$4 sm:$0xff]  }
 0x957   : > { %v9799_v10 = vadd.f32 %v9787_v18, %v9747_v8  ;;  %v9788_v21 = vmul.f32 0.044715, %v9776_v5  ;;  %14878 = vmatprep.subr.bf16.mxu0 %v16897_v16  ;;  %v16946_v24 = vld [vmem:[%s21659_s10 + $0x1d0] ss:$12 sps:$4 sm:$0xff]   ;;  %v16949_v18 = vld [vmem:[%s21659_s10 + $0x278] ss:$12 sps:$4 sm:$0xff]  }
 0x958   : > { %v16948_v16 = vld [vmem:[%s21659_s10 + $0x650] ss:$12 sps:$4 sm:$0xff]   ;;  %v16951_v5 = vld [vmem:[%s21659_s10 + $0x6f8] ss:$12 sps:$4 sm:$0xff]  }
 0x959   : > { %v9811_v23 = vmul.f32 0.7978846, %v9799_v10  ;;  %v9800_v26 = vadd.f32 %v9788_v21, %v9749_v11  ;;  %v16950_v10 = vld [vmem:[%s21659_s10 + $0x1b8] ss:$12 sps:$4 sm:$0xff]  }
 0x95a   : > { %14879 = vmatpush3.bf16.msra.mxu0 %v16898_v14  ;;  %v21235_v14 = vld [vmem:[%s21660_s11] sm:$0x7]  ;;  %v16952_v21 = vld [vmem:[%s21659_s10 + $0x638] ss:$12 sps:$4 sm:$0xff]  }
 0x95b   : > { %17087 = vtanh.f32 %v9811_v23  ;;  %14880 = vmatprep.subr.bf16.mxu0 %v16902_v47  ;;  %v9812_v29 = vmul.f32 0.7978846, %v9800_v26  ;;  %v16953_v47 = vld [vmem:[%s21659_s10 + $0x260] ss:$12 sps:$4 sm:$0xff]   ;;  %v10262_v23 = vrot.slane %v21235_v14, %v19367_v56 }
 0x95c   : > { %v16955_v26 = vld [vmem:[%s21659_s10 + $0x6e0] ss:$12 sps:$4 sm:$0xff]  }
 0x95d   : > { %17089 = vtanh.f32 %v9812_v29  ;;  %v16956_v29 = vld [vmem:[%s21659_s10 + $0x620] ss:$12 sps:$4 sm:$0xff]  }
 0x95e   : > { %14881 = vmatpush3.bf16.msra.mxu0 %v16903_v19  ;;  %v10266_v19 = vrot.slane %v21235_v14, %v19364_v50 }
 0x95f   : > { %14882 = vmatprep.subr.bf16.mxu0 %v16907_v43  ;;  %v16954_v43 = vld [vmem:[%s21659_s10 + $0x1a0] ss:$12 sps:$4 sm:$0xff]  }
 0x962   : > { %14883 = vmatpush3.bf16.msra.mxu0 %v16908_v42  ;;  %v16957_v42 = vld [vmem:[%s21659_s10 + $0x248] ss:$12 sps:$4 sm:$0xff]  }
 0x963   : > { %14884 = vmatprep.subr.bf16.mxu0 %v16912_v36 }
 0x966   : > { %14885 = vmatpush3.bf16.msra.mxu0 %v16913_v20  ;;  %v16959_v20 = vld [vmem:[%s21659_s10 + $0x6c8] ss:$12 sps:$4 sm:$0xff]  }
 0x967   : > { %14886 = vmatprep.subr.bf16.mxu0 %v16917_v33 }
 0x968   : > { %v17088_v35 = vpop.eup %17087 }
 0x969   : > { %v9835_v25 = vadd.f32 1.0, %v17088_v35  ;;  %v16958_v35 = vld [vmem:[%s21659_s10 + $0x188] ss:$12 sps:$4 sm:$0xff]  }
 0x96a   : > { %v17090_v51 = vpop.eup %17089  ;;  %14887 = vmatpush3.bf16.msra.mxu0 %v16918_v44 }
 0x96b   : > { %v9847_v55 = vmul.f32 0.5, %v9835_v25  ;;  %14888 = vmatprep.subr.bf16.mxu0 %v16922_v46  ;;  %v9836_v59 = vadd.f32 1.0, %v17090_v51  ;;  %v16960_v51 = vld [vmem:[%s21659_s10 + $0x608] ss:$12 sps:$4 sm:$0xff]  }
 0x96d   : > { %v21153_v52 = vpop.f32.mrf.mxu0  ;;  %v9848_v3 = vmul.f32 0.5, %v9836_v59  ;;  %v9859_v61 = vmul.f32 %v9847_v55, %v9747_v8  ;;  %v16934_v8 = vld [vmem:[%s21659_s10 + $0x218] ss:$12 sps:$4 sm:$0xff]   ;;  %v16962_v59 = vld [vmem:[%s21659_s10 + $0x530] ss:$12 sps:$4 sm:$0xff]  }
 0x96e   : > { %14889 = vmatpush3.bf16.msra.mxu0 %v16923_v54  ;;  %v11845_v36 = vadd.f32 %v21153_v52, %v10262_v23  ;;  %v16961_v54 = vld [vmem:[%s21659_s10 + $0x5f0] ss:$12 sps:$4 sm:$0xff]  }
 0x96f   : > { %v21158_v49 = vpop.f32.mrf.mxu0  ;;  %14890 = vmatprep.subr.bf16.mxu0 %v16927_v13  ;;  %v9860_v53 = vmul.f32 %v9848_v3, %v9749_v11  ;;  %v21168_v48 = vpack.c.bf16 %v9859_v61, %v9859_v61  ;;  %v16942_v11 = vld [vmem:[%s21659_s10 + $0x1e8] ss:$12 sps:$4 sm:$0xff]   ;;  %v16963_v3 = vld [vmem:[%s21659_s10 + $0x5d8] ss:$12 sps:$4 sm:$0xff]  }
 0x970   : > { %v11847_v44 = vadd.f32 %v21158_v49, %v10266_v19  ;;  %v16964_v61 = vld [vmem:[%s21659_s10 + $0x518] ss:$12 sps:$4 sm:$0xff]   ;;  %v16966_v49 = vld [vmem:[%s21659_s10 + $0x500] ss:$12 sps:$4 sm:$0xff]  }
 0x971   : > { %v11848_v27 = vpop.f32.mrf.mxu0  ;;  %v21163_v4 = vpack.c.bf16 %v9860_v53, %v9860_v53  ;;  %v16970_v53 = vld [vmem:[%s21659_s10 + $0x4d0] ss:$12 sps:$4 sm:$0xff]  }
 0x972   : > { %14891 = vmatpush3.bf16.msra.mxu0 %v16928_v62  ;;  %v16965_v62 = vld [vmem:[%s21659_s10 + $0x5c0] ss:$12 sps:$4 sm:$0xff]   ;;  %v16972_v27 = vld [vmem:[%s21659_s10 + $0x4b8] ss:$12 sps:$4 sm:$0xff]  }
 0x973   : > { %v11849_v17 = vpop.f32.mrf.mxu0  ;;  %12047 = vmatprep.mubr.bf16.mxu1 %v21163_v4  ;;  %14920 = vmatprep.subr.bf16.mxu0 %v16931_v30  ;;  %v16971_v30 = vld [vmem:[%s21659_s10 + $0x578] ss:$12 sps:$4 sm:$0xff]  }
 0x974   : > { %12048 = vmatmul.mubr.bf16.vlgmr.msra.gmra.mxu1 %v21168_v48  ;;  %v16975_v17 = vld [vmem:[%s21659_s10 + $0x548] ss:$12 sps:$4 sm:$0xff]  }
 0x975   : > { %14855 = vmatpush3.bf16.msra.mxu1 %v16930_v58  ;;  %12169 = vmatmul.mubr.bf16.vlgmr.msra.gmra.mxu0 %v20763_v41  ;;  %v16939_v41 = vld [vmem:[%s21659_s10 + $0x740] ss:$12 sps:$4 sm:$0xff]  }
 0x976   : > { %12128 = vmatprep.mubr.bf16.mxu1 %v20555_v57  ;;  %14921 = vmatpush3.bf16.msra.mxu0 %v16932_v60  ;;  %v16938_v57 = vld [vmem:[%s21659_s10 + $0x200] ss:$12 sps:$4 sm:$0xff]  }
 0x977   : > { %12248 = vmatprep.mubr.bf16.mxu0 %v21002_v34  ;;  %14856 = vmatprep.subr.bf16.mxu1 %v16933_v6  ;;  %v16941_v34 = vld [vmem:[%s21659_s10 + $0x2a8] ss:$12 sps:$4 sm:$0xff]   ;;  %v16973_v58 = vld [vmem:[%s21659_s10 + $0x560] ss:$12 sps:$4 sm:$0xff]  }
 0x978   : > { %14922 = vmatprep.subr.bf16.mxu0 %v16935_v45  ;;  %v16974_v60 = vld [vmem:[%s21659_s10 + $0x4a0] ss:$12 sps:$4 sm:$0xff]   ;;  %v16976_v45 = vld [vmem:[%s21659_s10 + $0x488] ss:$12 sps:$4 sm:$0xff]  }
 0x979   : > { %14857 = vmatpush3.bf16.msra.mxu1 %v16934_v8 }
 0x97a   : > { %14923 = vmatpush3.bf16.msra.mxu0 %v16936_v2  ;;  %14858 = vmatprep.subr.bf16.mxu1 %v16937_v7  ;;  %v16977_v2 = vld [vmem:[%s21659_s10 + $0x8f0] ss:$12 sps:$4 sm:$0xff]  }
 0x97b   : > { %14924 = vmatprep.subr.bf16.mxu0 %v16939_v41 }
 0x97d   : > { %14859 = vmatpush3.bf16.msra.mxu1 %v16938_v57 }
 0x97e   : > { %14925 = vmatpush3.bf16.msra.mxu0 %v16940_v28  ;;  %14860 = vmatprep.subr.bf16.mxu1 %v16941_v34  ;;  %v16978_v28 = vld [vmem:[%s21659_s10 + $0x830] ss:$12 sps:$4 sm:$0xff]   ;;  %v16979_v34 = vld [vmem:[%s21659_s10 + $0x8d8] ss:$12 sps:$4 sm:$0xff]  }
 0x97f   : > { %14926 = vmatprep.subr.bf16.mxu0 %v16943_v63 }
 0x981   : > { %14861 = vmatpush3.bf16.msra.mxu1 %v16942_v11  ;;  %v16980_v11 = vld [vmem:[%s21659_s10 + $0x818] ss:$12 sps:$4 sm:$0xff]  }
 0x982   : > { %14927 = vmatpush3.bf16.msra.mxu0 %v16944_v12  ;;  %14862 = vmatprep.subr.bf16.mxu1 %v16945_v40  ;;  %v16981_v12 = vld [vmem:[%s21659_s10 + $0x8c0] ss:$12 sps:$4 sm:$0xff]  }
 0x983   : > { %14928 = vmatprep.subr.bf16.mxu0 %v16947_v15  ;;  %v16982_v40 = vld [vmem:[%s21659_s10 + $0x800] ss:$12 sps:$4 sm:$0xff]   ;;  %v16985_v15 = vld [vmem:[%s21659_s10 + $0x890] ss:$12 sps:$4 sm:$0xff]  }
 0x985   : > { %14863 = vmatpush3.bf16.msra.mxu1 %v16946_v24  ;;  %v16986_v24 = vld [vmem:[%s21659_s10 + $0x7d0] ss:$12 sps:$4 sm:$0xff]  }
 0x986   : > { %14929 = vmatpush3.bf16.msra.mxu0 %v16948_v16  ;;  %14864 = vmatprep.subr.bf16.mxu1 %v16949_v18  ;;  %v16987_v16 = vld [vmem:[%s21659_s10 + $0x878] ss:$12 sps:$4 sm:$0xff]  }
 0x987   : > { %14930 = vmatprep.subr.bf16.mxu0 %v16951_v5  ;;  %v16988_v18 = vld [vmem:[%s21659_s10 + $0x7b8] ss:$12 sps:$4 sm:$0xff]   ;;  %v16989_v5 = vld [vmem:[%s21659_s10 + $0x860] ss:$12 sps:$4 sm:$0xff]  }
 0x989   : > { %14865 = vmatpush3.bf16.msra.mxu1 %v16950_v10  ;;  %v16990_v10 = vld [vmem:[%s21659_s10 + $0x7a0] ss:$12 sps:$4 sm:$0xff]  }
 0x98a   : > { %14931 = vmatpush3.bf16.msra.mxu0 %v16952_v21  ;;  %14866 = vmatprep.subr.bf16.mxu1 %v16953_v47  ;;  %v16991_v21 = vld [vmem:[%s21659_s10 + $0x848] ss:$12 sps:$4 sm:$0xff]  }
 0x98b   : > { %14932 = vmatprep.subr.bf16.mxu0 %v16955_v26  ;;  %v16992_v47 = vld [vmem:[%s21659_s10 + $0x788] ss:$12 sps:$4 sm:$0xff]  }
 0x98c   : > { %v11885_v33 = vpop.f32.mrf.mxu1 }
 0x98d   : > { %v11886_v46 = vadd.f32 %v11885_v33, %v11845_v36  ;;  %14867 = vmatpush3.bf16.msra.mxu1 %v16954_v43 }
 0x98e   : > { %14933 = vmatpush3.bf16.msra.mxu0 %v16956_v29  ;;  %v11887_v25 = vpop.f32.mrf.mxu1  ;;  %14868 = vmatprep.subr.bf16.mxu1 %v16957_v42 }
 0x98f   : > { %v11888_v55 = vadd.f32 %v11887_v25, %v11847_v44  ;;  %14934 = vmatprep.subr.bf16.mxu0 %v16959_v20 }
 0x990   : > { %v11889_v13 = vpop.f32.mrf.mxu1 }
 0x991   : > { %14869 = vmatpush3.bf16.msra.mxu1 %v16958_v35 }
 0x992   : > { %14935 = vmatpush3.bf16.msra.mxu0 %v16960_v51  ;;  %v11890_v52 = vpop.f32.mrf.mxu1  ;;  %14898 = vmatprep.subr.bf16.mxu1 %v16961_v54 }
 0x994   : > { %12129 = vmatmul.mubr.bf16.vlgmr.msra.gmra.mxu1 %v20646_v32  ;;  %v16967_v32 = vld [vmem:[%s21659_s10 + $0x5a8] ss:$12 sps:$4 sm:$0xff]  }
 0x995   : > { %14899 = vmatpush3.bf16.msra.mxu1 %v16962_v59  ;;  %12208 = vmatprep.mubr.bf16.mxu1 %v20893_v31  ;;  %v16968_v31 = vld [vmem:[%s21659_s10 + $0x4e8] ss:$12 sps:$4 sm:$0xff]  }
 0x996   : > { %12249 = vmatmul.mubr.bf16.vlgmr.msra.gmra.mxu0 %v21007_v22  ;;  %14900 = vmatprep.subr.bf16.mxu1 %v16963_v3  ;;  %v16969_v22 = vld [vmem:[%s21659_s10 + $0x590] ss:$12 sps:$4 sm:$0xff]  }
 0x999   : > { %14901 = vmatpush3.bf16.msra.mxu1 %v16964_v61 }
 0x99a   : > { %14902 = vmatprep.subr.bf16.mxu1 %v16965_v62 }
 0x99d   : > { %14903 = vmatpush3.bf16.msra.mxu1 %v16966_v49 }
 0x99e   : > { %14904 = vmatprep.subr.bf16.mxu1 %v16967_v32 }
 0x9a1   : > { %14905 = vmatpush3.bf16.msra.mxu1 %v16968_v31 }
 0x9a2   : > { %14906 = vmatprep.subr.bf16.mxu1 %v16969_v22 }
 0x9a5   : > { %14907 = vmatpush3.bf16.msra.mxu1 %v16970_v53 }
 0x9a6   : > { %14908 = vmatprep.subr.bf16.mxu1 %v16971_v30  ;;  %v10270_v30 = vrot.slane %v21235_v14, %v19375_v0 }
 0x9a9   : > { %14909 = vmatpush3.bf16.msra.mxu1 %v16972_v27 }
 0x9aa   : > { %14910 = vmatprep.subr.bf16.mxu1 %v16973_v58 }
 0x9ad   : > { %14911 = vmatpush3.bf16.msra.mxu1 %v16974_v60  ;;  %v11926_v6 = vpop.f32.mrf.mxu0 }
 0x9ae   : > { %v11927_v8 = vadd.f32 %v11926_v6, %v11886_v46  ;;  %14912 = vmatprep.subr.bf16.mxu1 %v16975_v17 }
 0x9af   : > { %v11928_v7 = vpop.f32.mrf.mxu0 }
 0x9b0   : > { %v11929_v41 = vadd.f32 %v11928_v7, %v11888_v55 }
 0x9b1   : > { %14913 = vmatpush3.bf16.msra.mxu1 %v16976_v45  ;;  %v11930_v57 = vpop.f32.mrf.mxu0 }
 0x9b2   : > { %14942 = vmatprep.subr.bf16.mxu1 %v16977_v2 }
 0x9b3   : > { %v11931_v63 = vpop.f32.mrf.mxu0 }
 0x9b4   : > { %12209 = vmatmul.mubr.bf16.vlgmr.msra.gmra.mxu1 %v20898_v9  ;;  %v16983_v9 = vld [vmem:[%s21659_s10 + $0x8a8] ss:$12 sps:$4 sm:$0xff]  }
 0x9b5   : > { %14943 = vmatpush3.bf16.msra.mxu1 %v16978_v28  ;;  %12288 = vmatprep.mubr.bf16.mxu1 %v21163_v4  ;;  %v16984_v4 = vld [vmem:[%s21659_s10 + $0x7e8] ss:$12 sps:$4 sm:$0xff]  }
 0x9b6   : > { %14944 = vmatprep.subr.bf16.mxu1 %v16979_v34 }
 0x9b9   : > { %14945 = vmatpush3.bf16.msra.mxu1 %v16980_v11 }
 0x9ba   : > { %14946 = vmatprep.subr.bf16.mxu1 %v16981_v12 }
 0x9bd   : > { %14947 = vmatpush3.bf16.msra.mxu1 %v16982_v40 }
 0x9be   : > { %14948 = vmatprep.subr.bf16.mxu1 %v16983_v9 }
 0x9c1   : > { %14949 = vmatpush3.bf16.msra.mxu1 %v16984_v4 }
 0x9c2   : > { %14950 = vmatprep.subr.bf16.mxu1 %v16985_v15 }
 0x9c5   : > { %14951 = vmatpush3.bf16.msra.mxu1 %v16986_v24 }
 0x9c6   : > { %14952 = vmatprep.subr.bf16.mxu1 %v16987_v16 }
 0x9c9   : > { %14953 = vmatpush3.bf16.msra.mxu1 %v16988_v18 }
 0x9ca   : > { %14954 = vmatprep.subr.bf16.mxu1 %v16989_v5 }
 0x9cd   : > { %14955 = vmatpush3.bf16.msra.mxu1 %v16990_v10 }
 0x9ce   : > { %14956 = vmatprep.subr.bf16.mxu1 %v16991_v21 }
 0x9d1   : > { %14957 = vmatpush3.bf16.msra.mxu1 %v16992_v47 }
 0x9d2   : > { %15526 = vmatprep.subr.bf16.mxu1 %v17158_v1 }
 0x9d4   : > { %12289 = vmatmul.mubr.bf16.vlgmr.msra.gmra.mxu1 %v21168_v48  ;;  %v11967_v23 = vpop.f32.mrf.mxu1 }
 0x9d5   : > { %v11968_v26 = vadd.f32 %v11967_v23, %v11927_v8  ;;  %15542 = vmatprep.mubr.msk.bf16.mxu1 %vm17159_vm0, %v17158_v1 }
 0x9d6   : > { %v11969_v19 = vpop.f32.mrf.mxu1 }
 0x9d7   : > { %v11970_v43 = vadd.f32 %v11969_v19, %v11929_v41 }
 0x9d8   : > { %v11971_v29 = vpop.f32.mrf.mxu1 }
 0x9d9   : > { %v16995_v29 = vld [vmem:[%s21663_s14 + $0x38] sm:$0xff]  }
 0x9da   : > { %v11972_v42 = vpop.f32.mrf.mxu1 }
 0x9f5   : > { %v12008_v36 = vpop.f32.mrf.mxu0 }
 0x9f6   : > { %v12009_v20 = vadd.f32 %v12008_v36, %v11968_v26 }
 0x9f7   : > { %v12010_v33 = vpop.f32.mrf.mxu0 }
 0x9f8   : > { %v12011_v44 = vadd.f32 %v12010_v33, %v11970_v43  ;;  %v16993_v43 = vld [vmem:[%s21663_s14 + $0x78] sm:$0xff]  }
 0x9f9   : > { %v12012_v46 = vpop.f32.mrf.mxu0  ;;  %14964 = vmatprep.subr.bf16.mxu0 %v16993_v43  ;;  %v17022_v43 = vld [vmem:[%s21665_s16 + $0x10] sm:$0xff]  }
 0x9fa   : > { %14965 = vmatpush3.bf16.msra.mxu0 %v16995_v29  ;;  %v17024_v29 = vld [vmem:[%s21665_s16] sm:$0xff]  }
 0x9fb   : > { %v12013_v35 = vpop.f32.mrf.mxu0 }
 0xa15   : > { %v14848_v25 = vpop.f32.mrf.mxu0 }
 0xa17   : > { %v14849_v51 = vpop.f32.mrf.mxu0 }
 0xa18   : > { %v14850_v54 = vadd.f32 %v14849_v51, %v14848_v25 }
 0xa19   : > { %v14851_v55 = vpop.f32.mrf.mxu0 }
 0xa1a   : > { %v12091_v17 = vadd.f32 %v14850_v54, %v10270_v30  ;;  %v16998_v55 = vld [vmem:[%s21663_s14 + $0x30] sm:$0xff]   ;;  %v17011_v30 = vld [vmem:[%s21663_s14 + $0x48] sm:$0xff]  }
 0xa1b   : > { %v14852_v48 = vpop.f32.mrf.mxu0 }
 0xa1c   : > { %v16999_v48 = vld [vmem:[%s21663_s14 + $0x68] sm:$0xff]  }
 0xa34   : > { %v12049_v13 = vpop.f32.mrf.mxu1 }
 0xa35   : > { %v12050_v59 = vadd.f32 %v12049_v13, %v12009_v20  ;;  %v14892_v52 = vpop.f32.mrf.mxu0  ;;  %v17000_v13 = vld [vmem:[%s21663_s14 + $0xa8] sm:$0xff]  }
 0xa36   : > { %v12051_v3 = vpop.f32.mrf.mxu1 }
 0xa37   : > { %v12052_v61 = vadd.f32 %v12051_v3, %v12011_v44  ;;  %v14893_v62 = vpop.f32.mrf.mxu0  ;;  %v12296_v10 = vadd.f32 %v12050_v59, %v19566_v39  ;;  %v16996_v39 = vld [vmem:[%s21663_s14 + $0x70] sm:$0xff]   ;;  %v17001_v59 = vld [vmem:[%s21663_s14 + $0x28] sm:$0xff]   ;;  %v17003_v3 = vld [vmem:[%s21663_s14 + $0xa0] sm:$0xff]  }
 0xa38   : > { %v14894_v49 = vadd.f32 %v14893_v62, %v14892_v52  ;;  %v12053_v32 = vpop.f32.mrf.mxu1  ;;  %14966 = vmatprep.subr.bf16.mxu0 %v16996_v39  ;;  %v17002_v52 = vld [vmem:[%s21663_s14 + $0x60] sm:$0xff]   ;;  %v17005_v62 = vld [vmem:[%s21663_s14 + $0x58] sm:$0xff]  }
 0xa39   : > { %v14895_v31 = vpop.f32.mrf.mxu0  ;;  %v12297_v24 = vadd.f32 %v12052_v61, %v19562_v37  ;;  %v16994_v37 = vld [vmem:[%s21663_s14 + $0xb8] sm:$0xff]   ;;  %14967 = vmatpush3.bf16.msra.mxu0 %v16998_v55  ;;  %v17004_v61 = vld [vmem:[%s21663_s14 + $0x20] sm:$0xff]  }
 0xa3a   : > { %v12054_v22 = vpop.f32.mrf.mxu1  ;;  %15527 = vmatpush3.bf16.msra.mxu1 %v16994_v37  ;;  %14968 = vmatprep.subr.bf16.mxu0 %v16999_v48  ;;  %v17007_v32 = vld [vmem:[%s21663_s14 + $0x18] sm:$0xff]   ;;  %v17008_v31 = vld [vmem:[%s21663_s14 + $0x50] sm:$0xff]   ;;  %v17023_v37 = vld [vmem:[%s21665_s16 + $0x8] sm:$0xff]  }
 0xa3b   : > { %v14896_v53 = vpop.f32.mrf.mxu0  ;;  %v12299_v26 = vadd.f32 %v12297_v24, %v12296_v10  ;;  %15528 = vmatprep.subr.bf16.mxu1 %v17158_v1  ;;  %v17009_v22 = vld [vmem:[%s21663_s14 + $0x90] sm:$0xff]   ;;  %v17025_v39 = vld [vmem:[%s21667_s18 + $0x38] sm:$0xff]  }
 0xa3c   : > { %v17010_v53 = vld [vmem:[%s21663_s14 + $0x10] sm:$0xff]  }
 0xa3d   : > { %14969 = vmatpush3.bf16.msra.mxu0 %v17001_v59 }
 0xa3e   : > { %14970 = vmatprep.subr.bf16.mxu0 %v17002_v52 }
 0xa41   : > { %14971 = vmatpush3.bf16.msra.mxu0 %v17004_v61 }
 0xa42   : > { %14972 = vmatprep.subr.bf16.mxu0 %v17005_v62 }
 0xa45   : > { %14973 = vmatpush3.bf16.msra.mxu0 %v17007_v32  ;;  %v17031_v32 = vld [vmem:[%s21667_s18 + $0x8] sm:$0xff]  }
 0xa46   : > { %14974 = vmatprep.subr.bf16.mxu0 %v17008_v31  ;;  %v17032_v31 = vld [vmem:[%s21667_s18] sm:$0xff]  }
 0xa49   : > { %14975 = vmatpush3.bf16.msra.mxu0 %v17010_v53  ;;  %v17034_v53 = vld [vmem:[%s21669_s20 + $0x30] sm:$0xff]  }
 0xa4a   : > { %14976 = vmatprep.subr.bf16.mxu0 %v17011_v30  ;;  %v17035_v30 = vld [vmem:[%s21669_s20 + $0x28] sm:$0xff]  }
 0xa54   : > { %v14870_v27 = vpop.f32.mrf.mxu1 }
 0xa56   : > { %v14936_v58 = vpop.f32.mrf.mxu0  ;;  %v14871_v60 = vpop.f32.mrf.mxu1 }
 0xa57   : > { %v14872_v6 = vadd.f32 %v14871_v60, %v14870_v27  ;;  %v17012_v27 = vld [vmem:[%s21663_s14 + $0x88] sm:$0xff]   ;;  %v17014_v60 = vld [vmem:[%s21663_s14 + $0x40] sm:$0xff]  }
 0xa58   : > { %v14937_v45 = vpop.f32.mrf.mxu0  ;;  %v14873_v8 = vpop.f32.mrf.mxu1 }
 0xa59   : > { %v12131_v2 = vadd.f32 %v14872_v6, %v12091_v17  ;;  %v14938_v14 = vadd.f32 %v14937_v45, %v14936_v58  ;;  %v17013_v58 = vld [vmem:[%s21663_s14 + $0x8] sm:$0xff]   ;;  %v17015_v17 = vld [vmem:[%s21663_s14 + $0x80] sm:$0xff]  }
 0xa5a   : > { %v14939_v7 = vpop.f32.mrf.mxu0  ;;  %v14874_v41 = vpop.f32.mrf.mxu1  ;;  %14977 = vmatpush3.bf16.msra.mxu0 %v17013_v58  ;;  %v17016_v6 = vld [vmem:[%s21663_s14] sm:$0xff]   ;;  %v17037_v58 = vld [vmem:[%s21669_s20 + $0x18] sm:$0xff]  }
 0xa5b   : > { %v12171_v57 = vadd.f32 %v14894_v49, %v12131_v2  ;;  %v17006_v49 = vld [vmem:[%s21663_s14 + $0x98] sm:$0xff]   ;;  %14978 = vmatprep.subr.bf16.mxu0 %v17014_v60  ;;  %v12320_v7 = vld [vmem:[%s21661_s12] sm:$0x7]  ;;  %v17038_v60 = vld [vmem:[%s21669_s20 + $0x10] sm:$0xff]  }
 0xa5c   : > { %v14940_v28 = vpop.f32.mrf.mxu0  ;;  %v12340_v41 = vld [vmem:[%s21662_s13] sm:$0x7] }
 0xa5d   : > { %v12329_v28 = vrot.slane %v12320_v7, %v19364_v50 }
 0xa5e   : > { %14979 = vmatpush3.bf16.msra.mxu0 %v17016_v6 }
 0xa5f   : > { %15546 = vmatprep.subr.bf16.mxu0 %v17158_v1 }
 0xa74   : > { %v14914_v34 = vpop.f32.mrf.mxu1 }
 0xa76   : > { %v14915_v63 = vpop.f32.mrf.mxu1 }
 0xa77   : > { %v14916_v40 = vadd.f32 %v14915_v63, %v14914_v34  ;;  %v12333_v34 = vrot.slane %v12320_v7, %v19375_v0 }
 0xa78   : > { %v14917_v11 = vpop.f32.mrf.mxu1 }
 0xa79   : > { %v12211_v9 = vadd.f32 %v14916_v40, %v12171_v57  ;;  %v12325_v57 = vrot.slane %v12320_v7, %v19367_v56  ;;  %v12345_v11 = vrot.slane %v12340_v41, %v19367_v56  ;;  %v17018_v56 = vld [vmem:[%s21665_s16 + $0x30] sm:$0xff]  }
 0xa7a   : > { %v14918_v12 = vpop.f32.mrf.mxu1 }
 0xa7b   : > { %v12251_v16 = vadd.f32 %v14938_v14, %v12211_v9  ;;  %v12349_v12 = vrot.slane %v12340_v41, %v19364_v50  ;;  %v12353_v9 = vrot.slane %v12340_v41, %v19375_v0  ;;  %v17017_v50 = vld [vmem:[%s21665_s16 + $0x38] sm:$0xff]   ;;  %v17019_v0 = vld [vmem:[%s21665_s16 + $0x28] sm:$0xff]  }
 0xa94   : > { %v14958_v4 = vpop.f32.mrf.mxu1 }
 0xa96   : > { %v14959_v15 = vpop.f32.mrf.mxu1 }
 0xa97   : > { %v14960_v18 = vadd.f32 %v14959_v15, %v14958_v4 }
 0xa98   : > { %v14961_v5 = vpop.f32.mrf.mxu1 }
 0xa99   : > { %v12291_v21 = vadd.f32 %v14960_v18, %v12251_v16 }
 0xa9a   : > { %v14962_v47 = vpop.f32.mrf.mxu1 }
 0xa9b   : > { %v12298_v23 = vadd.f32 %v12291_v21, %v19564_v38  ;;  %v16997_v38 = vld [vmem:[%s21663_s14 + $0xb0] sm:$0xff]  }
 0xa9c   : > { %15529 = vmatpush3.bf16.msra.mxu1 %v16997_v38  ;;  %v17026_v38 = vld [vmem:[%s21667_s18 + $0x30] sm:$0xff]  }
 0xa9d   : > { %v12300_v19 = vadd.f32 %v12299_v26, %v12298_v23  ;;  %15530 = vmatprep.subr.bf16.mxu1 %v17158_v1  ;;  %v17020_v26 = vld [vmem:[%s21665_s16 + $0x20] sm:$0xff]  }
 0xa9f   : > { %12301 = vadd.xlane.f32.xlu0 %v12300_v19  ;;  %v17021_v19 = vld [vmem:[%s21665_s16 + $0x18] sm:$0xff]  }
 0xaa0   : > { %15531 = vmatpush3.bf16.msra.mxu1 %v17000_v13 }
 0xaa1   : > { %15532 = vmatprep.subr.bf16.mxu1 %v17158_v1 }
 0xaa4   : > { %15533 = vmatpush3.bf16.msra.mxu1 %v17003_v3 }
 0xaa5   : > { %15534 = vmatprep.subr.bf16.mxu1 %v17158_v1 }
 0xaa8   : > { %15535 = vmatpush3.bf16.msra.mxu1 %v17006_v49 }
 0xaa9   : > { %15536 = vmatprep.subr.bf16.mxu1 %v17158_v1 }
 0xaac   : > { %15537 = vmatpush3.bf16.msra.mxu1 %v17009_v22  ;;  %v17033_v22 = vld [vmem:[%s21669_s20 + $0x38] sm:$0xff]  }
 0xaad   : > { %15538 = vmatprep.subr.bf16.mxu1 %v17158_v1 }
 0xab0   : > { %15539 = vmatpush3.bf16.msra.mxu1 %v17012_v27  ;;  %v17036_v27 = vld [vmem:[%s21669_s20 + $0x20] sm:$0xff]  }
 0xab1   : > { %15540 = vmatprep.subr.bf16.mxu1 %v17158_v1 }
 0xab4   : > { %15541 = vmatpush3.bf16.msra.mxu1 %v17015_v17  ;;  %v12656_v17 = vld [vmem:[%s21666_s17] sm:$0x1] }
 0xab5   : > { %15566 = vmatprep.subr.bf16.mxu1 %v17158_v1 }
 0xb28   : > { %v12302_v42 = vpop.xlane.xlu0 %12301 }
 0xb29   : > { %v12303_v36 = vmul.f32 0.0026041667, %v12302_v42  ;;  %v17027_v42 = vld [vmem:[%s21667_s18 + $0x28] sm:$0xff]  }
 0xb2b   : > { %v21400_v20 = vsub.f32 %v12296_v10, %v12303_v36  ;;  %v21402_v33 = vsub.f32 %v12297_v24, %v12303_v36  ;;  %v21404_v44 = vsub.f32 %v12298_v23, %v12303_v36  ;;  %v17028_v36 = vld [vmem:[%s21667_s18 + $0x20] sm:$0xff]  }
 0xb2d   : > { %v12307_v46 = vmul.f32 %v21400_v20, %v21400_v20  ;;  %v12308_v35 = vmul.f32 %v21402_v33, %v21402_v33  ;;  %v12309_v25 = vmul.f32 %v21404_v44, %v21404_v44 }
 0xb2f   : > { %v12310_v51 = vadd.f32 %v12308_v35, %v12307_v46 }
 0xb31   : > { %v12311_v54 = vadd.f32 %v12310_v51, %v12309_v25  ;;  %v12411_v25 = vld [vmem:[%s21664_s15] sm:$0x1] }
 0xb33   : > { %12312 = vadd.xlane.f32.xlu1 %v12311_v54 }
 0xbbc   : > { %v12313_v45 = vpop.xlane.xlu1 %12312 }
 0xbbd   : > { %v12314_v8 = vmul.f32 0.0026041667, %v12313_v45 }
 0xbbf   : > { %v12315_v2 = vadd.f32 1e-12, %v12314_v8 }
 0xbc1   : > { %17091 = vrsqrt.f32 %v12315_v2 }
 0xbce   : > { %v17092_v63 = vpop.eup %17091 }
 0xbcf   : > { %v12318_v40 = vmul.f32 %v17092_v63, %v21402_v33  ;;  %v12319_v4 = vmul.f32 %v17092_v63, %v21404_v44  ;;  %v12317_v14 = vmul.f32 %v17092_v63, %v21400_v20  ;;  %v17029_v20 = vld [vmem:[%s21667_s18 + $0x18] sm:$0xff]   ;;  %v17030_v33 = vld [vmem:[%s21667_s18 + $0x10] sm:$0xff]   ;;  %v17040_v63 = vld [vmem:[%s21669_s20] sm:$0xff]  }
 0xbd1   : > { %v12338_v15 = vmul.f32 %v12329_v28, %v12318_v40  ;;  %v12339_v24 = vmul.f32 %v12333_v34, %v12319_v4  ;;  %v12337_v16 = vmul.f32 %v12325_v57, %v12317_v14  ;;  %v17039_v34 = vld [vmem:[%s21669_s20 + $0x8] sm:$0xff]  }
 0xbd3   : > { %v12358_v18 = vadd.f32 %v12349_v12, %v12338_v15  ;;  %v12359_v5 = vadd.f32 %v12353_v9, %v12339_v24  ;;  %v12357_v10 = vadd.f32 %v12345_v11, %v12337_v16  ;;  %v12765_v11 = vld [vmem:[%s21668_s19] sm:$0x1] }
 0xbd5   : > { %v12361_v21 = vpack.c.bf16 %v12358_v18, %v12358_v18  ;;  %v12362_v47 = vpack.c.bf16 %v12359_v5, %v12359_v5  ;;  %v12360_v23 = vpack.c.bf16 %v12357_v10, %v12357_v10 }
 0xbd7   : > { %12588 = vmatprep.mubr.bf16.mxu0 %v12361_v21  ;;  %15543 = vmatmul.mubr.bf16.vlgmr.msra.gmra.mxu1 %v12362_v47 }
 0xbd8   : > { %12589 = vmatmul.mubr.bf16.vlgmr.msra.gmra.mxu0 %v12360_v23  ;;  %15582 = vmatprep.mubr.msk.bf16.mxu1 %vm17159_vm0, %v17158_v1 }
 0xbd9   : > { %15547 = vmatpush3.bf16.msra.mxu0 %v17017_v50  ;;  %15562 = vmatprep.mubr.msk.bf16.mxu0 %vm17159_vm0, %v17158_v1 }
 0xbda   : > { %15548 = vmatprep.subr.bf16.mxu0 %v17158_v1  ;;  %15567 = vmatpush3.bf16.msra.mxu1 %v17025_v39 }
 0xbdb   : > { %15568 = vmatprep.subr.bf16.mxu1 %v17158_v1 }
 0xbdd   : > { %15549 = vmatpush3.bf16.msra.mxu0 %v17018_v56 }
 0xbde   : > { %15550 = vmatprep.subr.bf16.mxu0 %v17158_v1  ;;  %15569 = vmatpush3.bf16.msra.mxu1 %v17026_v38 }
 0xbdf   : > { %15570 = vmatprep.subr.bf16.mxu1 %v17158_v1 }
 0xbe1   : > { %15551 = vmatpush3.bf16.msra.mxu0 %v17019_v0 }
 0xbe2   : > { %15552 = vmatprep.subr.bf16.mxu0 %v17158_v1  ;;  %15571 = vmatpush3.bf16.msra.mxu1 %v17027_v42 }
 0xbe3   : > { %15572 = vmatprep.subr.bf16.mxu1 %v17158_v1 }
 0xbe5   : > { %15553 = vmatpush3.bf16.msra.mxu0 %v17020_v26 }
 0xbe6   : > { %15554 = vmatprep.subr.bf16.mxu0 %v17158_v1  ;;  %15573 = vmatpush3.bf16.msra.mxu1 %v17028_v36 }
 0xbe7   : > { %15574 = vmatprep.subr.bf16.mxu1 %v17158_v1 }
 0xbe9   : > { %15555 = vmatpush3.bf16.msra.mxu0 %v17021_v19 }
 0xbea   : > { %15556 = vmatprep.subr.bf16.mxu0 %v17158_v1  ;;  %15575 = vmatpush3.bf16.msra.mxu1 %v17029_v20 }
 0xbeb   : > { %15576 = vmatprep.subr.bf16.mxu1 %v17158_v1 }
 0xbed   : > { %15557 = vmatpush3.bf16.msra.mxu0 %v17022_v43 }
 0xbee   : > { %15558 = vmatprep.subr.bf16.mxu0 %v17158_v1  ;;  %15577 = vmatpush3.bf16.msra.mxu1 %v17030_v33 }
 0xbef   : > { %15578 = vmatprep.subr.bf16.mxu1 %v17158_v1 }
 0xbf1   : > { %15559 = vmatpush3.bf16.msra.mxu0 %v17023_v37 }
 0xbf2   : > { %15560 = vmatprep.subr.bf16.mxu0 %v17158_v1  ;;  %15579 = vmatpush3.bf16.msra.mxu1 %v17031_v32 }
 0xbf3   : > { %15580 = vmatprep.subr.bf16.mxu1 %v17158_v1 }
 0xbf5   : > { %15561 = vmatpush3.bf16.msra.mxu0 %v17024_v29 }
 0xbf6   : > { %15586 = vmatprep.subr.bf16.mxu0 %v17158_v1  ;;  %15581 = vmatpush3.bf16.msra.mxu1 %v17032_v31 }
 0xc97   : > { %v12630_v44 = vpop.f32.mrf.mxu1 }
 0xc98   : > { %v14980_v46 = vpop.f32.mrf.mxu0 }
 0xc99   : > { %v15544_v35 = vpop.f32.mrf.mxu1 }
 0xc9a   : > { %v14981_v51 = vpop.f32.mrf.mxu0 }
 0xc9b   : > { %v14982_v54 = vadd.f32 %v14981_v51, %v14980_v46  ;;  %v12633_v55 = vpop.f32.mrf.mxu1 }
 0xc9c   : > { %v14983_v48 = vpop.f32.mrf.mxu0 }
 0xc9d   : > { %v12591_v13 = vadd.f32 %v14982_v54, %v12411_v25  ;;  %v15545_v59 = vpop.f32.mrf.mxu1 }
 0xc9e   : > { %v14984_v52 = vpop.f32.mrf.mxu0 }
 0xc9f   : > { %v12631_v3 = vadd.f32 %v12630_v44, %v12591_v13 }
 0xca1   : > { %vm12636_vm4 = vcmp.ge.f32.partialorder %v12631_v3, 0.0  ;;  %v12637_v61 = vmul.f32 0.01, %v12631_v3 }
 0xca3   : > { %v12638_v62 = vsel %vm12636_vm4, %v12631_v3, %v12637_v61 }
 0xca4   : > { %v12639_v49 = vpack.c.bf16 %v12638_v62, %v12638_v62 }
 0xca6   : > { %15563 = vmatmul.mubr.bf16.vlgmr.msra.gmra.mxu0 %v12639_v49 }
 0xca7   : > { %15602 = vmatprep.mubr.msk.bf16.mxu0 %vm17159_vm0, %v17158_v1  ;;  %15587 = vmatpush3.bf16.msra.mxu0 %v17033_v22 }
 0xca8   : > { %15588 = vmatprep.subr.bf16.mxu0 %v17158_v1 }
 0xcab   : > { %15589 = vmatpush3.bf16.msra.mxu0 %v17034_v53 }
 0xcac   : > { %15590 = vmatprep.subr.bf16.mxu0 %v17158_v1 }
 0xcaf   : > { %15591 = vmatpush3.bf16.msra.mxu0 %v17035_v30 }
 0xcb0   : > { %15592 = vmatprep.subr.bf16.mxu0 %v17158_v1 }
 0xcb3   : > { %15593 = vmatpush3.bf16.msra.mxu0 %v17036_v27 }
 0xcb4   : > { %15594 = vmatprep.subr.bf16.mxu0 %v17158_v1 }
 0xcb7   : > { %15595 = vmatpush3.bf16.msra.mxu0 %v17037_v58 }
 0xcb8   : > { %15596 = vmatprep.subr.bf16.mxu0 %v17158_v1 }
 0xcbb   : > { %15597 = vmatpush3.bf16.msra.mxu0 %v17038_v60 }
 0xcbc   : > { %15598 = vmatprep.subr.bf16.mxu0 %v17158_v1 }
 0xcbf   : > { %15599 = vmatpush3.bf16.msra.mxu0 %v17039_v34 }
 0xcc0   : > { %15600 = vmatprep.subr.bf16.mxu0 %v17158_v1  ;;  %v12874_v1 = vld [vmem:[%s21670_s21] sm:$0x1] }
 0xcc3   : > { %15601 = vmatpush3.bf16.msra.mxu0 %v17040_v63 }
 0xd66   : > { %v12739_v6 = vpop.f32.mrf.mxu0 }
 0xd67   : > { %v12740_v45 = vadd.f32 %v12739_v6, %v12656_v17 }
 0xd68   : > { %v15564_v8 = vpop.f32.mrf.mxu0 }
 0xd69   : > { %vm12745_vm5 = vcmp.ge.f32.partialorder %v12740_v45, 0.0  ;;  %v12746_v2 = vmul.f32 0.01, %v12740_v45 }
 0xd6a   : > { %v12742_v7 = vpop.f32.mrf.mxu0 }
 0xd6b   : > { %v12747_v41 = vsel %vm12745_vm5, %v12740_v45, %v12746_v2 }
 0xd6c   : > { %v12748_v57 = vpack.c.bf16 %v12747_v41, %v12747_v41  ;;  %v15565_v28 = vpop.f32.mrf.mxu0 }
 0xd6e   : > { %15583 = vmatmul.mubr.bf16.vlgmr.msra.gmra.mxu1 %v12748_v57 }
 0xe2e   : > { %v12848_v12 = vpop.f32.mrf.mxu1 }
 0xe2f   : > { %v12849_v40 = vadd.f32 %v12848_v12, %v12765_v11 }
 0xe30   : > { %v15584_v9 = vpop.f32.mrf.mxu1 }
 0xe31   : > { %vm12854_vm6 = vcmp.ge.f32.partialorder %v12849_v40, 0.0  ;;  %v12855_v4 = vmul.f32 0.01, %v12849_v40 }
 0xe32   : > { %v12851_v14 = vpop.f32.mrf.mxu1 }
 0xe33   : > { %v12856_v15 = vsel %vm12854_vm6, %v12849_v40, %v12855_v4 }
 0xe34   : > { %v12857_v24 = vpack.c.bf16 %v12856_v15, %v12856_v15  ;;  %v15585_v16 = vpop.f32.mrf.mxu1 }
 0xe36   : > { %15603 = vmatmul.mubr.bf16.vlgmr.msra.gmra.mxu0 %v12857_v24 }
 0xef6   : > { %v12957_v18 = vpop.f32.mrf.mxu0 }
 0xef7   : > { %v12958_v5 = vadd.f32 %v12957_v18, %v12874_v1 }
 0xef8   : > { %v15604_v10 = vpop.f32.mrf.mxu0 }
 0xef9   : > { %12963 = vst [vmem:[%s686_s29] sm:$0x1] %v12958_v5 }
 0xefa   : > { %v12960_v21 = vpop.f32.mrf.mxu0 }
 0xefb   : > { %17109 = shalt.err (!%p17106_p3)
}
 0xefc   : > { %s17110_s1 = scalar_lea.hbm %s21608_s23, 16  ;;  %s17114_s22 = scalar_lea.hbm %s21708_s24, 32 }
 0xefd   : > { %p17111_p4 = scmp.ne.s32.totalorder %s21608_s23, %s17110_s1  ;;  %p17115_p9 = scmp.lt.s32.totalorder %s21608_s23, %s21708_s24 }
 0xefe   : > { %p17116_p10 = scmp.lt.s32.totalorder %s17114_s22, %s17110_s1 }
 0xeff   : > { %p17112_p7 = pnand %p17111_p4, %p17315_p5 }
 0xf00   : > { %p17117_p11 = por %p17116_p10, %p17115_p9 }
 0xf01   : > { %p17113_p8 = pneg %p17112_p7 }
 0xf03   : > { %p17118_p12 = pnand %p17117_p11, %p17113_p8 }
 0xf05   : > { %17121 = shalt.err (!%p17118_p12)
}
 0xf06   : > { %15607 = dma.vmem_to_hbm [thread:$0]  (%p17315_p5), %s21610_s30, 16, %s21608_s23, %s12965_s2   ;;  %v15605_v47 = vpop.f32.mrf.mxu0 }
 0xf07 PF: > { %s21709_s5 = sld [smem:[#allocation7_spill]] }
 0xf08   : > { %s21710_s0 = sld [smem:[#allocation5_spill]] }
 0xf0d   : > { %p15613_p13 = scmp.ge.s32.totalorder %s21709_s5, 2 }
 0xf0e   : > { %s12989_s3 = sand.u32 1, %s21710_s0  }
 0xf0f   : > { %p15610_p0 = pnand %p15613_p13, %p17319_p6  ;;  %s12990_s7 = scalar_lea.sflag [#allocation3], %s12989_s3 }
 0xf11   : > { %p15611_p1 = pneg %p15610_p0 }
 0xf13   : > { %17139 = dma.done.wait (%p15611_p1), %s12990_s7, 16  }
 0xf14   : > { %17141 = vsyncadd (%p15611_p1), %s12990_s7, 4294967280  ;;  %s21712_s30 = sld [smem:[#allocation8_spill]]  ;;  %s21715_s3 = smov %s17148_s28 }
 0xf15   : > { %s21713_s1 = sld [smem:[#allocation6_spill]] }
 0xf16   : > { %s21714_s29 = sld [smem:[#allocation9_spill]] }
 0xf1a   : > { %p32_p2 = scmp.ge.s32.totalorder %s21712_s30, 4  }
 0xf1b   : > { %s21716_s28 = smov %s21713_s1 }
 0xf1c   :  { %34 = sbr.rel (!%p32_p2) target bundleno = 13 (0xd), region = 146 }
 0xf21   :  { %12994 = vsyncpa [#allocation3], 1 }
 0xf22   :  { %12996 = vsyncpa [#allocation3 + $0x1], 1 }

</bundles_post_ra>
